<compile_context>
chip_gen: v7x
topology: tpu7x:2x2x1
jax: 0.10.0
libtpu: 0.0.40
codegen_flags: <defaults>
</compile_context>

<pallas_src>
import functools

import jax
import jax.numpy as jnp
import numpy as np
from jax.experimental import pallas as pl
from jax.experimental.pallas import tpu as pltpu

VMEM_LIMIT = 32 * 1024 * 1024   # explicit scoped-VMEM budget (>= v5e default, <= v7x phys)


# ------------------------------ in-kernel helpers ----------------------------


def _mish(y):
    # Mish(x) = x * tanh(softplus(x)), softplus threshold 20 (PyTorch).
    # tanh(log(1+e)) == ((1+e)^2 - 1) / ((1+e)^2 + 1) == e*(e+2) / (e*(e+2) + 2)
    # -> a single exp per element (EUP), no log / tanh.
    e = jnp.exp(jnp.minimum(y, 20.0))
    n = e * (e + 2.0)
    return jnp.where(y > 20.0, y, y * (n / (n + 2.0)))


def _store_lane_dense(o_ref, y, rows, w, c):
    """Store y (rows*w, c) into o_ref block (1, rows, w*c) lane-densely.

    The sublane->lane merge is done with a lane-dim concatenate (well supported
    lowering) instead of a generic reshape.  w is a compile-time constant and is
    small at these shapes; a production kernel would additionally tile W.
    """
    y3 = y.reshape(rows, w, c)
    dense = jnp.concatenate([y3[:, i, :] for i in range(w)], axis=-1)
    o_ref[0] = dense.astype(o_ref.dtype)


# ------------------------------- Pallas kernels ------------------------------


def _conv3x3_kernel(x_ref, w_ref, b_ref, o_ref, *, s, TH, Wo, Cin, Cout):
    """3x3 conv (stride s, pad already applied) + folded-BN shift + Mish.

    x_ref : (1, s*s, Hph, Wph, Cin)  phase view of the padded input (whole image,
            resident across H tiles; s=1 -> single phase)
    w_ref : (9*Cin, Cout)            BN scale already folded in
    b_ref : (1, Cout)                BN shift
    o_ref : (1, TH, Wo*Cout)         lane-dense output tile
    """
    t = pl.program_id(1)
    h0 = pl.multiple_of(t * TH, TH)
    taps = []
    for i in range(3):
        for j in range(3):
            p = (i % s) * s + (j % s)          # phase index
            r0, c0 = i // s, j // s            # offsets inside the phase
            taps.append(x_ref[0, p, pl.ds(h0 + r0, TH), c0:c0 + Wo, :])  # (TH, Wo, Cin)
    # single im2col slab -> one MXU matmul with K = 9*Cin
    slab = jnp.concatenate(taps, axis=-1).reshape(TH * Wo, 9 * Cin)
    acc = jnp.dot(slab, w_ref[...], preferred_element_type=jnp.float32)
    y = _mish(acc + b_ref[...])
    _store_lane_dense(o_ref, y, TH, Wo, Cout)


def _branch_kernel(x_ref, w1_ref, b1_ref, w2_ref, b2_ref, w5_ref, b5_ref,
                   l_ref, r1_ref, t_ref, *, TH, W, C2, Cp):
    """Fused part_one (1x1), part_two (1x1) and conv5 (1x1) on a shared input tile."""
    xv = x_ref[0, :, :, :].reshape(TH * W, C2)
    l = _mish(jnp.dot(xv, w1_ref[...], preferred_element_type=jnp.float32) + b1_ref[...])
    r1 = _mish(jnp.dot(xv, w2_ref[...], preferred_element_type=jnp.float32) + b2_ref[...])
    t5 = _mish(jnp.dot(r1, w5_ref[...], preferred_element_type=jnp.float32) + b5_ref[...])
    _store_lane_dense(l_ref, l, TH, W, C2)
    _store_lane_dense(r1_ref, r1, TH, W, C2)
    _store_lane_dense(t_ref, t5, TH, W, Cp)


def _tail_kernel(l_ref, r1_ref, r2_ref, wb_ref, bb_ref, wl_ref, wr_ref, bt_ref,
                 o_ref, *, TH, W, C2):
    """Fused: residual add + bottle_neck (1x1) + channel concat + transition (1x1)."""
    lv = l_ref[0, :, :, :].reshape(TH * W, C2)
    r1v = r1_ref[0, :, :, :].reshape(TH * W, C2)
    r2v = r2_ref[0, :, :, :].reshape(TH * W, C2)
    r = _mish(jnp.dot(r1v + r2v, wb_ref[...], preferred_element_type=jnp.float32)
              + bb_ref[...])
    # cat([l, r], channel) @ Wt  ==  l @ Wt_l + r @ Wt_r   (no concat materialized)
    y = (jnp.dot(lv, wl_ref[...], preferred_element_type=jnp.float32)
         + jnp.dot(r, wr_ref[...], preferred_element_type=jnp.float32))
    y = _mish(y + bt_ref[...])
    _store_lane_dense(o_ref, y, TH, W, C2)


# -------------------------------- JAX wrappers --------------------------------


def _fold_bn(p):
    """Fold BN scale into the conv weight; return (K, Cout) weight + (1, Cout) shift."""
    w = p["w"]
    kh, kw, cin, cout = w.shape
    w2d = (w.reshape(kh * kw * cin, cout) * p["scale"][None, :]).astype(jnp.float32)
    shift = p["shift"].reshape(1, cout).astype(jnp.float32)
    return w2d, shift


def _pick_row_tile(h, target):
    # output-block sublane dim must be a multiple of 8 (or the full extent) and divide H
    if h <= target:
        return h
    th = (target // 8) * 8
    while th >= 8:
        if h % th == 0:
            return th
        th -= 8
    return h


def conv3x3_bn_mish(x, params, *, stride=1, row_tile=8):
    """x: (N, H, W, Cin) NHWC; 3x3 conv with pad=1; returns (N, Ho, Wo, Cout)."""
    n, h, w, cin = x.shape
    w2d, shift = _fold_bn(params)
    cout = w2d.shape[1]
    s = stride

    # zero-pad and build the s*s phase view in one fused XLA producer (for s=1 this is
    # just the padded tensor with a unit phase axis).
    xp = jnp.pad(x, ((0, 0), (1, 1), (1, 1), (0, 0)))
    hp, wp = h + 2, w + 2
    ho, wo = (hp - 3) // s + 1, (wp - 3) // s + 1
    hq, wq = -(-hp // s) * s, -(-wp // s) * s
    if (hq, wq) != (hp, wp):
        xp = jnp.pad(xp, ((0, 0), (0, hq - hp), (0, wq - wp), (0, 0)))
    phases = jnp.stack([xp[:, a::s, b::s, :] for a in range(s) for b in range(s)],
                       axis=1)                                  # (N, s*s, Hph, Wph, Cin)
    hph, wph = hq // s, wq // s

    th = _pick_row_tile(ho, row_tile)
    kern = functools.partial(_conv3x3_kernel, s=s, TH=th, Wo=wo, Cin=cin, Cout=cout)
    out = pl.pallas_call(
        kern,
        out_shape=jax.ShapeDtypeStruct((n, ho, wo * cout), jnp.float32),
        grid=(n, ho // th),
        in_specs=[
            pl.BlockSpec((1, s * s, hph, wph, cin), lambda b, t: (b, 0, 0, 0, 0)),
            pl.BlockSpec((9 * cin, cout), lambda b, t: (0, 0)),
            pl.BlockSpec((1, cout), lambda b, t: (0, 0)),
        ],
        out_specs=pl.BlockSpec((1, th, wo * cout), lambda b, t: (b, t, 0)),
        compiler_params=pltpu.CompilerParams(
            dimension_semantics=("parallel", "parallel"),
            vmem_limit_bytes=VMEM_LIMIT),
    )(phases, w2d, shift)
    return out.reshape(n, ho, wo, cout)          # free contiguous reshape


def branch_1x1(x, p_one, p_two, p_five, *, row_tile=8):
    """Fused part_one / part_two / conv5.  x: (N, H, W, C2) -> (l, r1, t)."""
    n, h, w, c2 = x.shape
    w1, b1 = _fold_bn(p_one)
    w2, b2 = _fold_bn(p_two)
    w5, b5 = _fold_bn(p_five)
    cp = w5.shape[1]
    th = _pick_row_tile(h, row_tile)
    kern = functools.partial(_branch_kernel, TH=th, W=w, C2=c2, Cp=cp)
    l, r1, t5 = pl.pallas_call(
        kern,
        out_shape=(jax.ShapeDtypeStruct((n, h, w * c2), jnp.float32),
                   jax.ShapeDtypeStruct((n, h, w * c2), jnp.float32),
                   jax.ShapeDtypeStruct((n, h, w * cp), jnp.float32)),
        grid=(n, h // th),
        in_specs=[
            pl.BlockSpec((1, th, w, c2), lambda b, t: (b, t, 0, 0)),
            pl.BlockSpec((c2, c2), lambda b, t: (0, 0)),
            pl.BlockSpec((1, c2), lambda b, t: (0, 0)),
            pl.BlockSpec((c2, c2), lambda b, t: (0, 0)),
            pl.BlockSpec((1, c2), lambda b, t: (0, 0)),
            pl.BlockSpec((c2, cp), lambda b, t: (0, 0)),
            pl.BlockSpec((1, cp), lambda b, t: (0, 0)),
        ],
        out_specs=(pl.BlockSpec((1, th, w * c2), lambda b, t: (b, t, 0)),
                   pl.BlockSpec((1, th, w * c2), lambda b, t: (b, t, 0)),
                   pl.BlockSpec((1, th, w * cp), lambda b, t: (b, t, 0))),
        compiler_params=pltpu.CompilerParams(
            dimension_semantics=("parallel", "parallel"),
            vmem_limit_bytes=VMEM_LIMIT),
    )(x, w1, b1, w2, b2, w5, b5)
    return (l.reshape(n, h, w, c2), r1.reshape(n, h, w, c2), t5.reshape(n, h, w, cp))


def tail_1x1(l, r1, r2, p_bottle, p_trans, *, row_tile=8):
    """Fused residual add + bottle_neck + concat + transition."""
    n, h, w, c2 = l.shape
    wb, bb = _fold_bn(p_bottle)
    wt, bt = _fold_bn(p_trans)                 # (2*c2, c2)
    wl_, wr_ = wt[:c2], wt[c2:]
    th = _pick_row_tile(h, row_tile)
    kern = functools.partial(_tail_kernel, TH=th, W=w, C2=c2)
    out = pl.pallas_call(
        kern,
        out_shape=jax.ShapeDtypeStruct((n, h, w * c2), jnp.float32),
        grid=(n, h // th),
        in_specs=[
            pl.BlockSpec((1, th, w, c2), lambda b, t: (b, t, 0, 0)),
            pl.BlockSpec((1, th, w, c2), lambda b, t: (b, t, 0, 0)),
            pl.BlockSpec((1, th, w, c2), lambda b, t: (b, t, 0, 0)),
            pl.BlockSpec((c2, c2), lambda b, t: (0, 0)),
            pl.BlockSpec((1, c2), lambda b, t: (0, 0)),
            pl.BlockSpec((c2, c2), lambda b, t: (0, 0)),
            pl.BlockSpec((c2, c2), lambda b, t: (0, 0)),
            pl.BlockSpec((1, c2), lambda b, t: (0, 0)),
        ],
        out_specs=pl.BlockSpec((1, th, w * c2), lambda b, t: (b, t, 0)),
        compiler_params=pltpu.CompilerParams(
            dimension_semantics=("parallel", "parallel"),
            vmem_limit_bytes=VMEM_LIMIT),
    )(l, r1, r2, wb, bb, wl_, wr_, bt)
    return out.reshape(n, h, w, c2)


# ----------------------------- parameters / module ----------------------------


def init_conv_module(key, kh, kw, cin, cout):
    k1, k2, k3, k4, k5 = jax.random.split(key, 5)
    w = jax.random.normal(k1, (kh, kw, cin, cout), jnp.float32) / np.sqrt(kh * kw * cin)
    gamma = 1.0 + 0.1 * jax.random.normal(k2, (cout,), jnp.float32)
    beta = 0.1 * jax.random.normal(k3, (cout,), jnp.float32)
    running_mean = 0.1 * jax.random.normal(k4, (cout,), jnp.float32)
    running_var = 1.0 + 0.1 * jax.random.uniform(k5, (cout,), jnp.float32)
    eps = 1e-5  # PyTorch BatchNorm2d default
    bn_scale = gamma / jnp.sqrt(running_var + eps)
    bn_shift = beta - running_mean * bn_scale
    return dict(w=w, scale=bn_scale, shift=bn_shift)


def init_stem_params(key, planes):
    specs = [
        ("conv1", 3, 3, planes),
        ("conv2", 3, planes, planes * 2),
        ("part_one", 1, planes * 2, planes * 2),
        ("part_two", 1, planes * 2, planes * 2),
        ("conv5", 1, planes * 2, planes),
        ("conv6", 3, planes, planes * 2),
        ("bottle_neck", 1, planes * 2, planes * 2),
        ("transition", 1, planes * 4, planes * 2),
    ]
    keys = jax.random.split(key, len(specs))
    return {name: init_conv_module(k, ksz, ksz, cin, cout)
            for k, (name, ksz, cin, cout) in zip(keys, specs)}


def stem_forward(x_nchw, params, *, row_tile=8):
    # row_tile=8 is deliberately small so the multi-tile grid path is exercised at these
    # toy shapes; production would pick the H tile from Wo*Cout and the VMEM budget.
    p = params
    x = jnp.transpose(x_nchw, (0, 2, 3, 1))                              # NHWC
    x = conv3x3_bn_mish(x, p["conv1"], stride=1, row_tile=row_tile)
    x = conv3x3_bn_mish(x, p["conv2"], stride=2, row_tile=row_tile)
    l, r1, t = branch_1x1(x, p["part_one"], p["part_two"], p["conv5"], row_tile=row_tile)
    r2 = conv3x3_bn_mish(t, p["conv6"], stride=1, row_tile=row_tile)
    out = tail_1x1(l, r1, r2, p["bottle_neck"], p["transition"], row_tile=row_tile)
    return jnp.transpose(out, (0, 3, 1, 2))                              # NCHW


# ------------------------------ pure-JAX reference -----------------------------


def _ref_mish(y):
    sp = jnp.where(y > 20.0, y, jnp.log1p(jnp.exp(jnp.minimum(y, 20.0))))
    return y * jnp.tanh(sp)


def _ref_conv(x, p, *, stride=1, padding=0):
    y = jax.lax.conv_general_dilated(
        x, p["w"], window_strides=(stride, stride),
        padding=[(padding, padding), (padding, padding)],
        dimension_numbers=("NHWC", "HWIO", "NHWC"))
    return _ref_mish(y * p["scale"] + p["shift"])


def _ref_stem(x_nchw, params):
    p = params
    x = jnp.transpose(x_nchw, (0, 2, 3, 1))
    x = _ref_conv(x, p["conv1"], stride=1, padding=1)
    x = _ref_conv(x, p["conv2"], stride=2, padding=1)
    l = _ref_conv(x, p["part_one"])
    r1 = _ref_conv(x, p["part_two"])
    r2 = _ref_conv(r1, p["conv5"])
    r2 = _ref_conv(r2, p["conv6"], padding=1)
    r = _ref_conv(r1 + r2, p["bottle_neck"])
    xc = jnp.concatenate([l, r], axis=-1)
    out = _ref_conv(xc, p["transition"])
    return jnp.transpose(out, (0, 3, 1, 2))


# ------------------------------------ main --------------------------------------

if __name__ == "__main__":
    planes = 4
    key = jax.random.PRNGKey(0)
    kx, kp = jax.random.split(key)
    # StemLayer's first conv expects 3 input channels (RGB).
    x = jax.random.normal(kx, (2, 3, 16, 16), jnp.float32)
    params = init_stem_params(kp, planes)

    fwd = jax.jit(functools.partial(stem_forward, row_tile=8))
    out = jax.block_until_ready(fwd(x, params))

    ref = _ref_stem(x, params)
    np.testing.assert_allclose(np.asarray(out), np.asarray(ref), rtol=2e-4, atol=2e-4)
    assert out.shape == (2, planes * 2, 8, 8)
    print("KERNEL_OK")
</pallas_src>

<mosaic_0001>
module attributes {stable_mosaic.version = 11 : i64} {
  func.func @_conv3x3_kernel(%arg0: i32, %arg1: i32, %arg2: memref<1x1x18x18x3xf32, #tpu.memory_space<vmem>>, %arg3: memref<27x4xf32, #tpu.memory_space<vmem>>, %arg4: memref<1x4xf32, #tpu.memory_space<vmem>>, %arg5: memref<1x8x64xf32, #tpu.memory_space<vmem>>) attributes {dimension_semantics = [#tpu.dimension_semantics<parallel>, #tpu.dimension_semantics<parallel>], iteration_bounds = array<i64: 2, 2>, scalar_prefetch = 0 : i64, scratch_operands = 0 : i64, tpu.core_type = #tpu.core_type<tc>, window_params = [{transform_indices = @transform_0, window_bounds = array<i64: 1, 1, 18, 18, 3>}, {pipeline_mode = #tpu.pipeline_mode<synchronous>, transform_indices = @transform_1, window_bounds = array<i64: 27, 4>}, {pipeline_mode = #tpu.pipeline_mode<synchronous>, transform_indices = @transform_2, window_bounds = array<i64: 1, 4>}, {transform_indices = @transform_3, window_bounds = array<i64: 1, 8, 64>}]} {
    %c8_i32 = arith.constant 8 : i32
    %0 = arith.muli %arg1, %c8_i32 : i32
    %1 = tpu.assume_multiple %0, 8 : i32
    %c0_i32 = arith.constant 0 : i32
    %2 = arith.addi %1, %c0_i32 : i32
    %c0 = arith.constant 0 : index
    %c0_0 = arith.constant 0 : index
    %3 = arith.index_cast %2 : i32 to index
    %c0_1 = arith.constant 0 : index
    %c0_2 = arith.constant 0 : index
    %4 = vector.load %arg2[%c0, %c0_0, %3, %c0_1, %c0_2] : memref<1x1x18x18x3xf32, #tpu.memory_space<vmem>>, vector<1x1x8x16x3xf32>
    %5 = vector.shape_cast %4 : vector<1x1x8x16x3xf32> to vector<8x16x3xf32>
    %c0_i32_3 = arith.constant 0 : i32
    %6 = arith.addi %1, %c0_i32_3 : i32
    %c0_4 = arith.constant 0 : index
    %c0_5 = arith.constant 0 : index
    %7 = arith.index_cast %6 : i32 to index
    %c1 = arith.constant 1 : index
    %c0_6 = arith.constant 0 : index
    %8 = vector.load %arg2[%c0_4, %c0_5, %7, %c1, %c0_6] : memref<1x1x18x18x3xf32, #tpu.memory_space<vmem>>, vector<1x1x8x16x3xf32>
    %9 = vector.shape_cast %8 : vector<1x1x8x16x3xf32> to vector<8x16x3xf32>
    %c0_i32_7 = arith.constant 0 : i32
    %10 = arith.addi %1, %c0_i32_7 : i32
    %c0_8 = arith.constant 0 : index
    %c0_9 = arith.constant 0 : index
    %11 = arith.index_cast %10 : i32 to index
    %c2 = arith.constant 2 : index
    %c0_10 = arith.constant 0 : index
    %12 = vector.load %arg2[%c0_8, %c0_9, %11, %c2, %c0_10] : memref<1x1x18x18x3xf32, #tpu.memory_space<vmem>>, vector<1x1x8x16x3xf32>
    %13 = vector.shape_cast %12 : vector<1x1x8x16x3xf32> to vector<8x16x3xf32>
    %c1_i32 = arith.constant 1 : i32
    %14 = arith.addi %1, %c1_i32 : i32
    %c0_11 = arith.constant 0 : index
    %c0_12 = arith.constant 0 : index
    %15 = arith.index_cast %14 : i32 to index
    %c0_13 = arith.constant 0 : index
    %c0_14 = arith.constant 0 : index
    %16 = vector.load %arg2[%c0_11, %c0_12, %15, %c0_13, %c0_14] : memref<1x1x18x18x3xf32, #tpu.memory_space<vmem>>, vector<1x1x8x16x3xf32>
    %17 = vector.shape_cast %16 : vector<1x1x8x16x3xf32> to vector<8x16x3xf32>
    %c1_i32_15 = arith.constant 1 : i32
    %18 = arith.addi %1, %c1_i32_15 : i32
    %c0_16 = arith.constant 0 : index
    %c0_17 = arith.constant 0 : index
    %19 = arith.index_cast %18 : i32 to index
    %c1_18 = arith.constant 1 : index
    %c0_19 = arith.constant 0 : index
    %20 = vector.load %arg2[%c0_16, %c0_17, %19, %c1_18, %c0_19] : memref<1x1x18x18x3xf32, #tpu.memory_space<vmem>>, vector<1x1x8x16x3xf32>
    %21 = vector.shape_cast %20 : vector<1x1x8x16x3xf32> to vector<8x16x3xf32>
    %c1_i32_20 = arith.constant 1 : i32
    %22 = arith.addi %1, %c1_i32_20 : i32
    %c0_21 = arith.constant 0 : index
    %c0_22 = arith.constant 0 : index
    %23 = arith.index_cast %22 : i32 to index
    %c2_23 = arith.constant 2 : index
    %c0_24 = arith.constant 0 : index
    %24 = vector.load %arg2[%c0_21, %c0_22, %23, %c2_23, %c0_24] : memref<1x1x18x18x3xf32, #tpu.memory_space<vmem>>, vector<1x1x8x16x3xf32>
    %25 = vector.shape_cast %24 : vector<1x1x8x16x3xf32> to vector<8x16x3xf32>
    %c2_i32 = arith.constant 2 : i32
    %26 = arith.addi %1, %c2_i32 : i32
    %c0_25 = arith.constant 0 : index
    %c0_26 = arith.constant 0 : index
    %27 = arith.index_cast %26 : i32 to index
    %c0_27 = arith.constant 0 : index
    %c0_28 = arith.constant 0 : index
    %28 = vector.load %arg2[%c0_25, %c0_26, %27, %c0_27, %c0_28] : memref<1x1x18x18x3xf32, #tpu.memory_space<vmem>>, vector<1x1x8x16x3xf32>
    %29 = vector.shape_cast %28 : vector<1x1x8x16x3xf32> to vector<8x16x3xf32>
    %c2_i32_29 = arith.constant 2 : i32
    %30 = arith.addi %1, %c2_i32_29 : i32
    %c0_30 = arith.constant 0 : index
    %c0_31 = arith.constant 0 : index
    %31 = arith.index_cast %30 : i32 to index
    %c1_32 = arith.constant 1 : index
    %c0_33 = arith.constant 0 : index
    %32 = vector.load %arg2[%c0_30, %c0_31, %31, %c1_32, %c0_33] : memref<1x1x18x18x3xf32, #tpu.memory_space<vmem>>, vector<1x1x8x16x3xf32>
    %33 = vector.shape_cast %32 : vector<1x1x8x16x3xf32> to vector<8x16x3xf32>
    %c2_i32_34 = arith.constant 2 : i32
    %34 = arith.addi %1, %c2_i32_34 : i32
    %c0_35 = arith.constant 0 : index
    %c0_36 = arith.constant 0 : index
    %35 = arith.index_cast %34 : i32 to index
    %c2_37 = arith.constant 2 : index
    %c0_38 = arith.constant 0 : index
    %36 = vector.load %arg2[%c0_35, %c0_36, %35, %c2_37, %c0_38] : memref<1x1x18x18x3xf32, #tpu.memory_space<vmem>>, vector<1x1x8x16x3xf32>
    %37 = vector.shape_cast %36 : vector<1x1x8x16x3xf32> to vector<8x16x3xf32>
    %38 = tpu.concatenate %5, %9, %13, %17, %21, %25, %29, %33, %37 in 2 : vector<8x16x3xf32>, vector<8x16x3xf32>, vector<8x16x3xf32>, vector<8x16x3xf32>, vector<8x16x3xf32>, vector<8x16x3xf32>, vector<8x16x3xf32>, vector<8x16x3xf32>, vector<8x16x3xf32> -> vector<8x16x27xf32>
    %39 = vector.shape_cast %38 : vector<8x16x27xf32> to vector<128x27xf32>
    %c0_39 = arith.constant 0 : index
    %c0_40 = arith.constant 0 : index
    %40 = vector.load %arg3[%c0_39, %c0_40] : memref<27x4xf32, #tpu.memory_space<vmem>>, vector<27x4xf32>
    %cst = arith.constant dense<0.000000e+00> : vector<128x4xf32>
    %41 = tpu.matmul %39, %40, %cst {dimension_numbers = #tpu.dot_dimension_numbers<[1], [0], [0], [1], [0, 0, 1, 1], [], []>} : vector<128x27xf32>, vector<27x4xf32>, vector<128x4xf32> -> vector<128x4xf32>
    %c0_41 = arith.constant 0 : index
    %c0_42 = arith.constant 0 : index
    %42 = vector.load %arg4[%c0_41, %c0_42] : memref<1x4xf32, #tpu.memory_space<vmem>>, vector<1x4xf32>
    %43 = vector.broadcast %42 : vector<1x4xf32> to vector<128x4xf32>
    %44 = arith.addf %41, %43 : vector<128x4xf32>
    %cst_43 = arith.constant 2.000000e+01 : f32
    %45 = vector.broadcast %cst_43 : f32 to vector<128x4xf32>
    %46 = arith.minimumf %44, %45 : vector<128x4xf32>
    %47 = math.exp %46 : vector<128x4xf32>
    %cst_44 = arith.constant 2.000000e+00 : f32
    %48 = vector.broadcast %cst_44 : f32 to vector<128x4xf32>
    %49 = arith.addf %47, %48 : vector<128x4xf32>
    %50 = arith.mulf %47, %49 : vector<128x4xf32>
    %cst_45 = arith.constant 2.000000e+01 : f32
    %51 = vector.broadcast %cst_45 : f32 to vector<128x4xf32>
    %52 = arith.cmpf ogt, %44, %51 : vector<128x4xf32>
    %cst_46 = arith.constant 2.000000e+00 : f32
    %53 = vector.broadcast %cst_46 : f32 to vector<128x4xf32>
    %54 = arith.addf %50, %53 : vector<128x4xf32>
    %55 = arith.divf %50, %54 : vector<128x4xf32>
    %56 = arith.mulf %44, %55 : vector<128x4xf32>
    %57 = arith.select %52, %44, %56 : vector<128x4xi1>, vector<128x4xf32>
    %58 = vector.shape_cast %57 : vector<128x4xf32> to vector<8x16x4xf32>
    %59 = vector.extract_strided_slice %58 {offsets = [0, 0, 0], sizes = [8, 1, 4], strides = [1, 1, 1]} : vector<8x16x4xf32> to vector<8x1x4xf32>
    %60 = vector.shape_cast %59 : vector<8x1x4xf32> to vector<8x4xf32>
    %61 = vector.extract_strided_slice %58 {offsets = [0, 1, 0], sizes = [8, 1, 4], strides = [1, 1, 1]} : vector<8x16x4xf32> to vector<8x1x4xf32>
    %62 = vector.shape_cast %61 : vector<8x1x4xf32> to vector<8x4xf32>
    %63 = vector.extract_strided_slice %58 {offsets = [0, 2, 0], sizes = [8, 1, 4], strides = [1, 1, 1]} : vector<8x16x4xf32> to vector<8x1x4xf32>
    %64 = vector.shape_cast %63 : vector<8x1x4xf32> to vector<8x4xf32>
    %65 = vector.extract_strided_slice %58 {offsets = [0, 3, 0], sizes = [8, 1, 4], strides = [1, 1, 1]} : vector<8x16x4xf32> to vector<8x1x4xf32>
    %66 = vector.shape_cast %65 : vector<8x1x4xf32> to vector<8x4xf32>
    %67 = vector.extract_strided_slice %58 {offsets = [0, 4, 0], sizes = [8, 1, 4], strides = [1, 1, 1]} : vector<8x16x4xf32> to vector<8x1x4xf32>
    %68 = vector.shape_cast %67 : vector<8x1x4xf32> to vector<8x4xf32>
    %69 = vector.extract_strided_slice %58 {offsets = [0, 5, 0], sizes = [8, 1, 4], strides = [1, 1, 1]} : vector<8x16x4xf32> to vector<8x1x4xf32>
    %70 = vector.shape_cast %69 : vector<8x1x4xf32> to vector<8x4xf32>
    %71 = vector.extract_strided_slice %58 {offsets = [0, 6, 0], sizes = [8, 1, 4], strides = [1, 1, 1]} : vector<8x16x4xf32> to vector<8x1x4xf32>
    %72 = vector.shape_cast %71 : vector<8x1x4xf32> to vector<8x4xf32>
    %73 = vector.extract_strided_slice %58 {offsets = [0, 7, 0], sizes = [8, 1, 4], strides = [1, 1, 1]} : vector<8x16x4xf32> to vector<8x1x4xf32>
    %74 = vector.shape_cast %73 : vector<8x1x4xf32> to vector<8x4xf32>
    %75 = vector.extract_strided_slice %58 {offsets = [0, 8, 0], sizes = [8, 1, 4], strides = [1, 1, 1]} : vector<8x16x4xf32> to vector<8x1x4xf32>
    %76 = vector.shape_cast %75 : vector<8x1x4xf32> to vector<8x4xf32>
    %77 = vector.extract_strided_slice %58 {offsets = [0, 9, 0], sizes = [8, 1, 4], strides = [1, 1, 1]} : vector<8x16x4xf32> to vector<8x1x4xf32>
    %78 = vector.shape_cast %77 : vector<8x1x4xf32> to vector<8x4xf32>
    %79 = vector.extract_strided_slice %58 {offsets = [0, 10, 0], sizes = [8, 1, 4], strides = [1, 1, 1]} : vector<8x16x4xf32> to vector<8x1x4xf32>
    %80 = vector.shape_cast %79 : vector<8x1x4xf32> to vector<8x4xf32>
    %81 = vector.extract_strided_slice %58 {offsets = [0, 11, 0], sizes = [8, 1, 4], strides = [1, 1, 1]} : vector<8x16x4xf32> to vector<8x1x4xf32>
    %82 = vector.shape_cast %81 : vector<8x1x4xf32> to vector<8x4xf32>
    %83 = vector.extract_strided_slice %58 {offsets = [0, 12, 0], sizes = [8, 1, 4], strides = [1, 1, 1]} : vector<8x16x4xf32> to vector<8x1x4xf32>
    %84 = vector.shape_cast %83 : vector<8x1x4xf32> to vector<8x4xf32>
    %85 = vector.extract_strided_slice %58 {offsets = [0, 13, 0], sizes = [8, 1, 4], strides = [1, 1, 1]} : vector<8x16x4xf32> to vector<8x1x4xf32>
    %86 = vector.shape_cast %85 : vector<8x1x4xf32> to vector<8x4xf32>
    %87 = vector.extract_strided_slice %58 {offsets = [0, 14, 0], sizes = [8, 1, 4], strides = [1, 1, 1]} : vector<8x16x4xf32> to vector<8x1x4xf32>
    %88 = vector.shape_cast %87 : vector<8x1x4xf32> to vector<8x4xf32>
    %89 = vector.extract_strided_slice %58 {offsets = [0, 15, 0], sizes = [8, 1, 4], strides = [1, 1, 1]} : vector<8x16x4xf32> to vector<8x1x4xf32>
    %90 = vector.shape_cast %89 : vector<8x1x4xf32> to vector<8x4xf32>
    %91 = tpu.concatenate %60, %62, %64, %66, %68, %70, %72, %74, %76, %78, %80, %82, %84, %86, %88, %90 in 1 : vector<8x4xf32>, vector<8x4xf32>, vector<8x4xf32>, vector<8x4xf32>, vector<8x4xf32>, vector<8x4xf32>, vector<8x4xf32>, vector<8x4xf32>, vector<8x4xf32>, vector<8x4xf32>, vector<8x4xf32>, vector<8x4xf32>, vector<8x4xf32>, vector<8x4xf32>, vector<8x4xf32>, vector<8x4xf32> -> vector<8x64xf32>
    %c0_47 = arith.constant 0 : index
    %c0_48 = arith.constant 0 : index
    %c0_49 = arith.constant 0 : index
    %92 = vector.load %arg5[%c0_47, %c0_48, %c0_49] : memref<1x8x64xf32, #tpu.memory_space<vmem>>, vector<1x8x64xf32>
    %93 = vector.shape_cast %92 : vector<1x8x64xf32> to vector<8x64xf32>
    %94 = vector.shape_cast %91 : vector<8x64xf32> to vector<1x8x64xf32>
    tpu.vector_store %arg5[%c0_47, %c0_48, %c0_49], %94 {strides = array<i32>} : memref<1x8x64xf32, #tpu.memory_space<vmem>>, vector<1x8x64xf32>,
    return
  }
  func.func @transform_0(%arg0: i32, %arg1: i32) -> (i32, i32, i32, i32, i32) {
    %c0_i32 = arith.constant 0 : i32
    %c0_i32_0 = arith.constant 0 : i32
    %c0_i32_1 = arith.constant 0 : i32
    %c0_i32_2 = arith.constant 0 : i32
    %c0_i32_3 = arith.constant 0 : i32
    return %arg0, %c0_i32, %c0_i32_0, %c0_i32_1, %c0_i32_2 : i32, i32, i32, i32, i32
  }
  func.func @transform_1(%arg0: i32, %arg1: i32) -> (i32, i32) {
    %c0_i32 = arith.constant 0 : i32
    %c0_i32_0 = arith.constant 0 : i32
    %c0_i32_1 = arith.constant 0 : i32
    return %c0_i32, %c0_i32_0 : i32, i32
  }
  func.func @transform_2(%arg0: i32, %arg1: i32) -> (i32, i32) {
    %c0_i32 = arith.constant 0 : i32
    %c0_i32_0 = arith.constant 0 : i32
    %c0_i32_1 = arith.constant 0 : i32
    return %c0_i32, %c0_i32_0 : i32, i32
  }
  func.func @transform_3(%arg0: i32, %arg1: i32) -> (i32, i32, i32) {
    %c0_i32 = arith.constant 0 : i32
    %c0_i32_0 = arith.constant 0 : i32
    return %arg0, %arg1, %c0_i32 : i32, i32, i32
  }
}

module attributes {stable_mosaic.version = 11 : i64} {
  func.func @_conv3x3_kernel(%arg0: i32, %arg1: i32, %arg2: memref<1x4x9x9x4xf32, #tpu.memory_space<vmem>>, %arg3: memref<36x8xf32, #tpu.memory_space<vmem>>, %arg4: memref<1x8xf32, #tpu.memory_space<vmem>>, %arg5: memref<1x8x64xf32, #tpu.memory_space<vmem>>) attributes {dimension_semantics = [#tpu.dimension_semantics<parallel>, #tpu.dimension_semantics<parallel>], iteration_bounds = array<i64: 2, 1>, scalar_prefetch = 0 : i64, scratch_operands = 0 : i64, tpu.core_type = #tpu.core_type<tc>, window_params = [{transform_indices = @transform_0, window_bounds = array<i64: 1, 4, 9, 9, 4>}, {pipeline_mode = #tpu.pipeline_mode<synchronous>, transform_indices = @transform_1, window_bounds = array<i64: 36, 8>}, {pipeline_mode = #tpu.pipeline_mode<synchronous>, transform_indices = @transform_2, window_bounds = array<i64: 1, 8>}, {transform_indices = @transform_3, window_bounds = array<i64: 1, 8, 64>}]} {
    %c8_i32 = arith.constant 8 : i32
    %0 = arith.muli %arg1, %c8_i32 : i32
    %1 = tpu.assume_multiple %0, 8 : i32
    %c0_i32 = arith.constant 0 : i32
    %2 = arith.addi %1, %c0_i32 : i32
    %c0 = arith.constant 0 : index
    %c0_0 = arith.constant 0 : index
    %3 = arith.index_cast %2 : i32 to index
    %c0_1 = arith.constant 0 : index
    %c0_2 = arith.constant 0 : index
    %4 = vector.load %arg2[%c0, %c0_0, %3, %c0_1, %c0_2] : memref<1x4x9x9x4xf32, #tpu.memory_space<vmem>>, vector<1x1x8x8x4xf32>
    %5 = vector.shape_cast %4 : vector<1x1x8x8x4xf32> to vector<8x8x4xf32>
    %c0_i32_3 = arith.constant 0 : i32
    %6 = arith.addi %1, %c0_i32_3 : i32
    %c0_4 = arith.constant 0 : index
    %c1 = arith.constant 1 : index
    %7 = arith.index_cast %6 : i32 to index
    %c0_5 = arith.constant 0 : index
    %c0_6 = arith.constant 0 : index
    %8 = vector.load %arg2[%c0_4, %c1, %7, %c0_5, %c0_6] : memref<1x4x9x9x4xf32, #tpu.memory_space<vmem>>, vector<1x1x8x8x4xf32>
    %9 = vector.shape_cast %8 : vector<1x1x8x8x4xf32> to vector<8x8x4xf32>
    %c0_i32_7 = arith.constant 0 : i32
    %10 = arith.addi %1, %c0_i32_7 : i32
    %c0_8 = arith.constant 0 : index
    %c0_9 = arith.constant 0 : index
    %11 = arith.index_cast %10 : i32 to index
    %c1_10 = arith.constant 1 : index
    %c0_11 = arith.constant 0 : index
    %12 = vector.load %arg2[%c0_8, %c0_9, %11, %c1_10, %c0_11] : memref<1x4x9x9x4xf32, #tpu.memory_space<vmem>>, vector<1x1x8x8x4xf32>
    %13 = vector.shape_cast %12 : vector<1x1x8x8x4xf32> to vector<8x8x4xf32>
    %c0_i32_12 = arith.constant 0 : i32
    %14 = arith.addi %1, %c0_i32_12 : i32
    %c0_13 = arith.constant 0 : index
    %c2 = arith.constant 2 : index
    %15 = arith.index_cast %14 : i32 to index
    %c0_14 = arith.constant 0 : index
    %c0_15 = arith.constant 0 : index
    %16 = vector.load %arg2[%c0_13, %c2, %15, %c0_14, %c0_15] : memref<1x4x9x9x4xf32, #tpu.memory_space<vmem>>, vector<1x1x8x8x4xf32>
    %17 = vector.shape_cast %16 : vector<1x1x8x8x4xf32> to vector<8x8x4xf32>
    %c0_i32_16 = arith.constant 0 : i32
    %18 = arith.addi %1, %c0_i32_16 : i32
    %c0_17 = arith.constant 0 : index
    %c3 = arith.constant 3 : index
    %19 = arith.index_cast %18 : i32 to index
    %c0_18 = arith.constant 0 : index
    %c0_19 = arith.constant 0 : index
    %20 = vector.load %arg2[%c0_17, %c3, %19, %c0_18, %c0_19] : memref<1x4x9x9x4xf32, #tpu.memory_space<vmem>>, vector<1x1x8x8x4xf32>
    %21 = vector.shape_cast %20 : vector<1x1x8x8x4xf32> to vector<8x8x4xf32>
    %c0_i32_20 = arith.constant 0 : i32
    %22 = arith.addi %1, %c0_i32_20 : i32
    %c0_21 = arith.constant 0 : index
    %c2_22 = arith.constant 2 : index
    %23 = arith.index_cast %22 : i32 to index
    %c1_23 = arith.constant 1 : index
    %c0_24 = arith.constant 0 : index
    %24 = vector.load %arg2[%c0_21, %c2_22, %23, %c1_23, %c0_24] : memref<1x4x9x9x4xf32, #tpu.memory_space<vmem>>, vector<1x1x8x8x4xf32>
    %25 = vector.shape_cast %24 : vector<1x1x8x8x4xf32> to vector<8x8x4xf32>
    %c1_i32 = arith.constant 1 : i32
    %26 = arith.addi %1, %c1_i32 : i32
    %c0_25 = arith.constant 0 : index
    %c0_26 = arith.constant 0 : index
    %27 = arith.index_cast %26 : i32 to index
    %c0_27 = arith.constant 0 : index
    %c0_28 = arith.constant 0 : index
    %28 = vector.load %arg2[%c0_25, %c0_26, %27, %c0_27, %c0_28] : memref<1x4x9x9x4xf32, #tpu.memory_space<vmem>>, vector<1x1x8x8x4xf32>
    %29 = vector.shape_cast %28 : vector<1x1x8x8x4xf32> to vector<8x8x4xf32>
    %c1_i32_29 = arith.constant 1 : i32
    %30 = arith.addi %1, %c1_i32_29 : i32
    %c0_30 = arith.constant 0 : index
    %c1_31 = arith.constant 1 : index
    %31 = arith.index_cast %30 : i32 to index
    %c0_32 = arith.constant 0 : index
    %c0_33 = arith.constant 0 : index
    %32 = vector.load %arg2[%c0_30, %c1_31, %31, %c0_32, %c0_33] : memref<1x4x9x9x4xf32, #tpu.memory_space<vmem>>, vector<1x1x8x8x4xf32>
    %33 = vector.shape_cast %32 : vector<1x1x8x8x4xf32> to vector<8x8x4xf32>
    %c1_i32_34 = arith.constant 1 : i32
    %34 = arith.addi %1, %c1_i32_34 : i32
    %c0_35 = arith.constant 0 : index
    %c0_36 = arith.constant 0 : index
    %35 = arith.index_cast %34 : i32 to index
    %c1_37 = arith.constant 1 : index
    %c0_38 = arith.constant 0 : index
    %36 = vector.load %arg2[%c0_35, %c0_36, %35, %c1_37, %c0_38] : memref<1x4x9x9x4xf32, #tpu.memory_space<vmem>>, vector<1x1x8x8x4xf32>
    %37 = vector.shape_cast %36 : vector<1x1x8x8x4xf32> to vector<8x8x4xf32>
    %38 = tpu.concatenate %5, %9, %13, %17, %21, %25, %29, %33, %37 in 2 : vector<8x8x4xf32>, vector<8x8x4xf32>, vector<8x8x4xf32>, vector<8x8x4xf32>, vector<8x8x4xf32>, vector<8x8x4xf32>, vector<8x8x4xf32>, vector<8x8x4xf32>, vector<8x8x4xf32> -> vector<8x8x36xf32>
    %39 = vector.shape_cast %38 : vector<8x8x36xf32> to vector<64x36xf32>
    %c0_39 = arith.constant 0 : index
    %c0_40 = arith.constant 0 : index
    %40 = vector.load %arg3[%c0_39, %c0_40] : memref<36x8xf32, #tpu.memory_space<vmem>>, vector<36x8xf32>
    %cst = arith.constant dense<0.000000e+00> : vector<64x8xf32>
    %41 = tpu.matmul %39, %40, %cst {dimension_numbers = #tpu.dot_dimension_numbers<[1], [0], [0], [1], [0, 0, 1, 1], [], []>} : vector<64x36xf32>, vector<36x8xf32>, vector<64x8xf32> -> vector<64x8xf32>
    %c0_41 = arith.constant 0 : index
    %c0_42 = arith.constant 0 : index
    %42 = vector.load %arg4[%c0_41, %c0_42] : memref<1x8xf32, #tpu.memory_space<vmem>>, vector<1x8xf32>
    %43 = vector.broadcast %42 : vector<1x8xf32> to vector<64x8xf32>
    %44 = arith.addf %41, %43 : vector<64x8xf32>
    %cst_43 = arith.constant 2.000000e+01 : f32
    %45 = vector.broadcast %cst_43 : f32 to vector<64x8xf32>
    %46 = arith.minimumf %44, %45 : vector<64x8xf32>
    %47 = math.exp %46 : vector<64x8xf32>
    %cst_44 = arith.constant 2.000000e+00 : f32
    %48 = vector.broadcast %cst_44 : f32 to vector<64x8xf32>
    %49 = arith.addf %47, %48 : vector<64x8xf32>
    %50 = arith.mulf %47, %49 : vector<64x8xf32>
    %cst_45 = arith.constant 2.000000e+01 : f32
    %51 = vector.broadcast %cst_45 : f32 to vector<64x8xf32>
    %52 = arith.cmpf ogt, %44, %51 : vector<64x8xf32>
    %cst_46 = arith.constant 2.000000e+00 : f32
    %53 = vector.broadcast %cst_46 : f32 to vector<64x8xf32>
    %54 = arith.addf %50, %53 : vector<64x8xf32>
    %55 = arith.divf %50, %54 : vector<64x8xf32>
    %56 = arith.mulf %44, %55 : vector<64x8xf32>
    %57 = arith.select %52, %44, %56 : vector<64x8xi1>, vector<64x8xf32>
    %58 = vector.shape_cast %57 : vector<64x8xf32> to vector<8x8x8xf32>
    %59 = vector.extract_strided_slice %58 {offsets = [0, 0, 0], sizes = [8, 1, 8], strides = [1, 1, 1]} : vector<8x8x8xf32> to vector<8x1x8xf32>
    %60 = vector.shape_cast %59 : vector<8x1x8xf32> to vector<8x8xf32>
    %61 = vector.extract_strided_slice %58 {offsets = [0, 1, 0], sizes = [8, 1, 8], strides = [1, 1, 1]} : vector<8x8x8xf32> to vector<8x1x8xf32>
    %62 = vector.shape_cast %61 : vector<8x1x8xf32> to vector<8x8xf32>
    %63 = vector.extract_strided_slice %58 {offsets = [0, 2, 0], sizes = [8, 1, 8], strides = [1, 1, 1]} : vector<8x8x8xf32> to vector<8x1x8xf32>
    %64 = vector.shape_cast %63 : vector<8x1x8xf32> to vector<8x8xf32>
    %65 = vector.extract_strided_slice %58 {offsets = [0, 3, 0], sizes = [8, 1, 8], strides = [1, 1, 1]} : vector<8x8x8xf32> to vector<8x1x8xf32>
    %66 = vector.shape_cast %65 : vector<8x1x8xf32> to vector<8x8xf32>
    %67 = vector.extract_strided_slice %58 {offsets = [0, 4, 0], sizes = [8, 1, 8], strides = [1, 1, 1]} : vector<8x8x8xf32> to vector<8x1x8xf32>
    %68 = vector.shape_cast %67 : vector<8x1x8xf32> to vector<8x8xf32>
    %69 = vector.extract_strided_slice %58 {offsets = [0, 5, 0], sizes = [8, 1, 8], strides = [1, 1, 1]} : vector<8x8x8xf32> to vector<8x1x8xf32>
    %70 = vector.shape_cast %69 : vector<8x1x8xf32> to vector<8x8xf32>
    %71 = vector.extract_strided_slice %58 {offsets = [0, 6, 0], sizes = [8, 1, 8], strides = [1, 1, 1]} : vector<8x8x8xf32> to vector<8x1x8xf32>
    %72 = vector.shape_cast %71 : vector<8x1x8xf32> to vector<8x8xf32>
    %73 = vector.extract_strided_slice %58 {offsets = [0, 7, 0], sizes = [8, 1, 8], strides = [1, 1, 1]} : vector<8x8x8xf32> to vector<8x1x8xf32>
    %74 = vector.shape_cast %73 : vector<8x1x8xf32> to vector<8x8xf32>
    %75 = tpu.concatenate %60, %62, %64, %66, %68, %70, %72, %74 in 1 : vector<8x8xf32>, vector<8x8xf32>, vector<8x8xf32>, vector<8x8xf32>, vector<8x8xf32>, vector<8x8xf32>, vector<8x8xf32>, vector<8x8xf32> -> vector<8x64xf32>
    %c0_47 = arith.constant 0 : index
    %c0_48 = arith.constant 0 : index
    %c0_49 = arith.constant 0 : index
    %76 = vector.load %arg5[%c0_47, %c0_48, %c0_49] : memref<1x8x64xf32, #tpu.memory_space<vmem>>, vector<1x8x64xf32>
    %77 = vector.shape_cast %76 : vector<1x8x64xf32> to vector<8x64xf32>
    %78 = vector.shape_cast %75 : vector<8x64xf32> to vector<1x8x64xf32>
    tpu.vector_store %arg5[%c0_47, %c0_48, %c0_49], %78 {strides = array<i32>} : memref<1x8x64xf32, #tpu.memory_space<vmem>>, vector<1x8x64xf32>,
    return
  }
  func.func @transform_0(%arg0: i32, %arg1: i32) -> (i32, i32, i32, i32, i32) {
    %c0_i32 = arith.constant 0 : i32
    %c0_i32_0 = arith.constant 0 : i32
    %c0_i32_1 = arith.constant 0 : i32
    %c0_i32_2 = arith.constant 0 : i32
    %c0_i32_3 = arith.constant 0 : i32
    return %arg0, %c0_i32, %c0_i32_0, %c0_i32_1, %c0_i32_2 : i32, i32, i32, i32, i32
  }
  func.func @transform_1(%arg0: i32, %arg1: i32) -> (i32, i32) {
    %c0_i32 = arith.constant 0 : i32
    %c0_i32_0 = arith.constant 0 : i32
    %c0_i32_1 = arith.constant 0 : i32
    return %c0_i32, %c0_i32_0 : i32, i32
  }
  func.func @transform_2(%arg0: i32, %arg1: i32) -> (i32, i32) {
    %c0_i32 = arith.constant 0 : i32
    %c0_i32_0 = arith.constant 0 : i32
    %c0_i32_1 = arith.constant 0 : i32
    return %c0_i32, %c0_i32_0 : i32, i32
  }
  func.func @transform_3(%arg0: i32, %arg1: i32) -> (i32, i32, i32) {
    %c0_i32 = arith.constant 0 : i32
    %c0_i32_0 = arith.constant 0 : i32
    return %arg0, %arg1, %c0_i32 : i32, i32, i32
  }
}

module attributes {stable_mosaic.version = 11 : i64} {
  func.func @_branch_kernel(%arg0: i32, %arg1: i32, %arg2: memref<1x8x8x8xf32, #tpu.memory_space<vmem>>, %arg3: memref<8x8xf32, #tpu.memory_space<vmem>>, %arg4: memref<1x8xf32, #tpu.memory_space<vmem>>, %arg5: memref<8x8xf32, #tpu.memory_space<vmem>>, %arg6: memref<1x8xf32, #tpu.memory_space<vmem>>, %arg7: memref<8x4xf32, #tpu.memory_space<vmem>>, %arg8: memref<1x4xf32, #tpu.memory_space<vmem>>, %arg9: memref<1x8x64xf32, #tpu.memory_space<vmem>>, %arg10: memref<1x8x64xf32, #tpu.memory_space<vmem>>, %arg11: memref<1x8x32xf32, #tpu.memory_space<vmem>>) attributes {dimension_semantics = [#tpu.dimension_semantics<parallel>, #tpu.dimension_semantics<parallel>], iteration_bounds = array<i64: 2, 1>, scalar_prefetch = 0 : i64, scratch_operands = 0 : i64, tpu.core_type = #tpu.core_type<tc>, window_params = [{transform_indices = @transform_0, window_bounds = array<i64: 1, 8, 8, 8>}, {pipeline_mode = #tpu.pipeline_mode<synchronous>, transform_indices = @transform_1, window_bounds = array<i64: 8, 8>}, {pipeline_mode = #tpu.pipeline_mode<synchronous>, transform_indices = @transform_2, window_bounds = array<i64: 1, 8>}, {pipeline_mode = #tpu.pipeline_mode<synchronous>, transform_indices = @transform_3, window_bounds = array<i64: 8, 8>}, {pipeline_mode = #tpu.pipeline_mode<synchronous>, transform_indices = @transform_4, window_bounds = array<i64: 1, 8>}, {pipeline_mode = #tpu.pipeline_mode<synchronous>, transform_indices = @transform_5, window_bounds = array<i64: 8, 4>}, {pipeline_mode = #tpu.pipeline_mode<synchronous>, transform_indices = @transform_6, window_bounds = array<i64: 1, 4>}, {transform_indices = @transform_7, window_bounds = array<i64: 1, 8, 64>}, {transform_indices = @transform_8, window_bounds = array<i64: 1, 8, 64>}, {transform_indices = @transform_9, window_bounds = array<i64: 1, 8, 32>}]} {
    %c0 = arith.constant 0 : index
    %c0_0 = arith.constant 0 : index
    %c0_1 = arith.constant 0 : index
    %c0_2 = arith.constant 0 : index
    %0 = vector.load %arg2[%c0, %c0_0, %c0_1, %c0_2] : memref<1x8x8x8xf32, #tpu.memory_space<vmem>>, vector<1x8x8x8xf32>
    %1 = vector.shape_cast %0 : vector<1x8x8x8xf32> to vector<8x8x8xf32>
    %2 = vector.shape_cast %1 : vector<8x8x8xf32> to vector<64x8xf32>
    %c0_3 = arith.constant 0 : index
    %c0_4 = arith.constant 0 : index
    %3 = vector.load %arg3[%c0_3, %c0_4] : memref<8x8xf32, #tpu.memory_space<vmem>>, vector<8x8xf32>
    %cst = arith.constant dense<0.000000e+00> : vector<64x8xf32>
    %4 = tpu.matmul %2, %3, %cst {dimension_numbers = #tpu.dot_dimension_numbers<[1], [0], [0], [1], [0, 0, 1, 1], [], []>} : vector<64x8xf32>, vector<8x8xf32>, vector<64x8xf32> -> vector<64x8xf32>
    %c0_5 = arith.constant 0 : index
    %c0_6 = arith.constant 0 : index
    %5 = vector.load %arg4[%c0_5, %c0_6] : memref<1x8xf32, #tpu.memory_space<vmem>>, vector<1x8xf32>
    %6 = vector.broadcast %5 : vector<1x8xf32> to vector<64x8xf32>
    %7 = arith.addf %4, %6 : vector<64x8xf32>
    %cst_7 = arith.constant 2.000000e+01 : f32
    %8 = vector.broadcast %cst_7 : f32 to vector<64x8xf32>
    %9 = arith.minimumf %7, %8 : vector<64x8xf32>
    %10 = math.exp %9 : vector<64x8xf32>
    %cst_8 = arith.constant 2.000000e+00 : f32
    %11 = vector.broadcast %cst_8 : f32 to vector<64x8xf32>
    %12 = arith.addf %10, %11 : vector<64x8xf32>
    %13 = arith.mulf %10, %12 : vector<64x8xf32>
    %cst_9 = arith.constant 2.000000e+01 : f32
    %14 = vector.broadcast %cst_9 : f32 to vector<64x8xf32>
    %15 = arith.cmpf ogt, %7, %14 : vector<64x8xf32>
    %cst_10 = arith.constant 2.000000e+00 : f32
    %16 = vector.broadcast %cst_10 : f32 to vector<64x8xf32>
    %17 = arith.addf %13, %16 : vector<64x8xf32>
    %18 = arith.divf %13, %17 : vector<64x8xf32>
    %19 = arith.mulf %7, %18 : vector<64x8xf32>
    %20 = arith.select %15, %7, %19 : vector<64x8xi1>, vector<64x8xf32>
    %c0_11 = arith.constant 0 : index
    %c0_12 = arith.constant 0 : index
    %21 = vector.load %arg5[%c0_11, %c0_12] : memref<8x8xf32, #tpu.memory_space<vmem>>, vector<8x8xf32>
    %cst_13 = arith.constant dense<0.000000e+00> : vector<64x8xf32>
    %22 = tpu.matmul %2, %21, %cst_13 {dimension_numbers = #tpu.dot_dimension_numbers<[1], [0], [0], [1], [0, 0, 1, 1], [], []>} : vector<64x8xf32>, vector<8x8xf32>, vector<64x8xf32> -> vector<64x8xf32>
    %c0_14 = arith.constant 0 : index
    %c0_15 = arith.constant 0 : index
    %23 = vector.load %arg6[%c0_14, %c0_15] : memref<1x8xf32, #tpu.memory_space<vmem>>, vector<1x8xf32>
    %24 = vector.broadcast %23 : vector<1x8xf32> to vector<64x8xf32>
    %25 = arith.addf %22, %24 : vector<64x8xf32>
    %cst_16 = arith.constant 2.000000e+01 : f32
    %26 = vector.broadcast %cst_16 : f32 to vector<64x8xf32>
    %27 = arith.minimumf %25, %26 : vector<64x8xf32>
    %28 = math.exp %27 : vector<64x8xf32>
    %cst_17 = arith.constant 2.000000e+00 : f32
    %29 = vector.broadcast %cst_17 : f32 to vector<64x8xf32>
    %30 = arith.addf %28, %29 : vector<64x8xf32>
    %31 = arith.mulf %28, %30 : vector<64x8xf32>
    %cst_18 = arith.constant 2.000000e+01 : f32
    %32 = vector.broadcast %cst_18 : f32 to vector<64x8xf32>
    %33 = arith.cmpf ogt, %25, %32 : vector<64x8xf32>
    %cst_19 = arith.constant 2.000000e+00 : f32
    %34 = vector.broadcast %cst_19 : f32 to vector<64x8xf32>
    %35 = arith.addf %31, %34 : vector<64x8xf32>
    %36 = arith.divf %31, %35 : vector<64x8xf32>
    %37 = arith.mulf %25, %36 : vector<64x8xf32>
    %38 = arith.select %33, %25, %37 : vector<64x8xi1>, vector<64x8xf32>
    %c0_20 = arith.constant 0 : index
    %c0_21 = arith.constant 0 : index
    %39 = vector.load %arg7[%c0_20, %c0_21] : memref<8x4xf32, #tpu.memory_space<vmem>>, vector<8x4xf32>
    %cst_22 = arith.constant dense<0.000000e+00> : vector<64x4xf32>
    %40 = tpu.matmul %38, %39, %cst_22 {dimension_numbers = #tpu.dot_dimension_numbers<[1], [0], [0], [1], [0, 0, 1, 1], [], []>} : vector<64x8xf32>, vector<8x4xf32>, vector<64x4xf32> -> vector<64x4xf32>
    %c0_23 = arith.constant 0 : index
    %c0_24 = arith.constant 0 : index
    %41 = vector.load %arg8[%c0_23, %c0_24] : memref<1x4xf32, #tpu.memory_space<vmem>>, vector<1x4xf32>
    %42 = vector.broadcast %41 : vector<1x4xf32> to vector<64x4xf32>
    %43 = arith.addf %40, %42 : vector<64x4xf32>
    %cst_25 = arith.constant 2.000000e+01 : f32
    %44 = vector.broadcast %cst_25 : f32 to vector<64x4xf32>
    %45 = arith.minimumf %43, %44 : vector<64x4xf32>
    %46 = math.exp %45 : vector<64x4xf32>
    %cst_26 = arith.constant 2.000000e+00 : f32
    %47 = vector.broadcast %cst_26 : f32 to vector<64x4xf32>
    %48 = arith.addf %46, %47 : vector<64x4xf32>
    %49 = arith.mulf %46, %48 : vector<64x4xf32>
    %cst_27 = arith.constant 2.000000e+01 : f32
    %50 = vector.broadcast %cst_27 : f32 to vector<64x4xf32>
    %51 = arith.cmpf ogt, %43, %50 : vector<64x4xf32>
    %cst_28 = arith.constant 2.000000e+00 : f32
    %52 = vector.broadcast %cst_28 : f32 to vector<64x4xf32>
    %53 = arith.addf %49, %52 : vector<64x4xf32>
    %54 = arith.divf %49, %53 : vector<64x4xf32>
    %55 = arith.mulf %43, %54 : vector<64x4xf32>
    %56 = arith.select %51, %43, %55 : vector<64x4xi1>, vector<64x4xf32>
    %57 = vector.shape_cast %20 : vector<64x8xf32> to vector<8x8x8xf32>
    %58 = vector.extract_strided_slice %57 {offsets = [0, 0, 0], sizes = [8, 1, 8], strides = [1, 1, 1]} : vector<8x8x8xf32> to vector<8x1x8xf32>
    %59 = vector.shape_cast %58 : vector<8x1x8xf32> to vector<8x8xf32>
    %60 = vector.extract_strided_slice %57 {offsets = [0, 1, 0], sizes = [8, 1, 8], strides = [1, 1, 1]} : vector<8x8x8xf32> to vector<8x1x8xf32>
    %61 = vector.shape_cast %60 : vector<8x1x8xf32> to vector<8x8xf32>
    %62 = vector.extract_strided_slice %57 {offsets = [0, 2, 0], sizes = [8, 1, 8], strides = [1, 1, 1]} : vector<8x8x8xf32> to vector<8x1x8xf32>
    %63 = vector.shape_cast %62 : vector<8x1x8xf32> to vector<8x8xf32>
    %64 = vector.extract_strided_slice %57 {offsets = [0, 3, 0], sizes = [8, 1, 8], strides = [1, 1, 1]} : vector<8x8x8xf32> to vector<8x1x8xf32>
    %65 = vector.shape_cast %64 : vector<8x1x8xf32> to vector<8x8xf32>
    %66 = vector.extract_strided_slice %57 {offsets = [0, 4, 0], sizes = [8, 1, 8], strides = [1, 1, 1]} : vector<8x8x8xf32> to vector<8x1x8xf32>
    %67 = vector.shape_cast %66 : vector<8x1x8xf32> to vector<8x8xf32>
    %68 = vector.extract_strided_slice %57 {offsets = [0, 5, 0], sizes = [8, 1, 8], strides = [1, 1, 1]} : vector<8x8x8xf32> to vector<8x1x8xf32>
    %69 = vector.shape_cast %68 : vector<8x1x8xf32> to vector<8x8xf32>
    %70 = vector.extract_strided_slice %57 {offsets = [0, 6, 0], sizes = [8, 1, 8], strides = [1, 1, 1]} : vector<8x8x8xf32> to vector<8x1x8xf32>
    %71 = vector.shape_cast %70 : vector<8x1x8xf32> to vector<8x8xf32>
    %72 = vector.extract_strided_slice %57 {offsets = [0, 7, 0], sizes = [8, 1, 8], strides = [1, 1, 1]} : vector<8x8x8xf32> to vector<8x1x8xf32>
    %73 = vector.shape_cast %72 : vector<8x1x8xf32> to vector<8x8xf32>
    %74 = tpu.concatenate %59, %61, %63, %65, %67, %69, %71, %73 in 1 : vector<8x8xf32>, vector<8x8xf32>, vector<8x8xf32>, vector<8x8xf32>, vector<8x8xf32>, vector<8x8xf32>, vector<8x8xf32>, vector<8x8xf32> -> vector<8x64xf32>
    %c0_29 = arith.constant 0 : index
    %c0_30 = arith.constant 0 : index
    %c0_31 = arith.constant 0 : index
    %75 = vector.load %arg9[%c0_29, %c0_30, %c0_31] : memref<1x8x64xf32, #tpu.memory_space<vmem>>, vector<1x8x64xf32>
    %76 = vector.shape_cast %75 : vector<1x8x64xf32> to vector<8x64xf32>
    %77 = vector.shape_cast %74 : vector<8x64xf32> to vector<1x8x64xf32>
    tpu.vector_store %arg9[%c0_29, %c0_30, %c0_31], %77 {strides = array<i32>} : memref<1x8x64xf32, #tpu.memory_space<vmem>>, vector<1x8x64xf32>,
    %78 = vector.shape_cast %38 : vector<64x8xf32> to vector<8x8x8xf32>
    %79 = vector.extract_strided_slice %78 {offsets = [0, 0, 0], sizes = [8, 1, 8], strides = [1, 1, 1]} : vector<8x8x8xf32> to vector<8x1x8xf32>
    %80 = vector.shape_cast %79 : vector<8x1x8xf32> to vector<8x8xf32>
    %81 = vector.extract_strided_slice %78 {offsets = [0, 1, 0], sizes = [8, 1, 8], strides = [1, 1, 1]} : vector<8x8x8xf32> to vector<8x1x8xf32>
    %82 = vector.shape_cast %81 : vector<8x1x8xf32> to vector<8x8xf32>
    %83 = vector.extract_strided_slice %78 {offsets = [0, 2, 0], sizes = [8, 1, 8], strides = [1, 1, 1]} : vector<8x8x8xf32> to vector<8x1x8xf32>
    %84 = vector.shape_cast %83 : vector<8x1x8xf32> to vector<8x8xf32>
    %85 = vector.extract_strided_slice %78 {offsets = [0, 3, 0], sizes = [8, 1, 8], strides = [1, 1, 1]} : vector<8x8x8xf32> to vector<8x1x8xf32>
    %86 = vector.shape_cast %85 : vector<8x1x8xf32> to vector<8x8xf32>
    %87 = vector.extract_strided_slice %78 {offsets = [0, 4, 0], sizes = [8, 1, 8], strides = [1, 1, 1]} : vector<8x8x8xf32> to vector<8x1x8xf32>
    %88 = vector.shape_cast %87 : vector<8x1x8xf32> to vector<8x8xf32>
    %89 = vector.extract_strided_slice %78 {offsets = [0, 5, 0], sizes = [8, 1, 8], strides = [1, 1, 1]} : vector<8x8x8xf32> to vector<8x1x8xf32>
    %90 = vector.shape_cast %89 : vector<8x1x8xf32> to vector<8x8xf32>
    %91 = vector.extract_strided_slice %78 {offsets = [0, 6, 0], sizes = [8, 1, 8], strides = [1, 1, 1]} : vector<8x8x8xf32> to vector<8x1x8xf32>
    %92 = vector.shape_cast %91 : vector<8x1x8xf32> to vector<8x8xf32>
    %93 = vector.extract_strided_slice %78 {offsets = [0, 7, 0], sizes = [8, 1, 8], strides = [1, 1, 1]} : vector<8x8x8xf32> to vector<8x1x8xf32>
    %94 = vector.shape_cast %93 : vector<8x1x8xf32> to vector<8x8xf32>
    %95 = tpu.concatenate %80, %82, %84, %86, %88, %90, %92, %94 in 1 : vector<8x8xf32>, vector<8x8xf32>, vector<8x8xf32>, vector<8x8xf32>, vector<8x8xf32>, vector<8x8xf32>, vector<8x8xf32>, vector<8x8xf32> -> vector<8x64xf32>
    %c0_32 = arith.constant 0 : index
    %c0_33 = arith.constant 0 : index
    %c0_34 = arith.constant 0 : index
    %96 = vector.load %arg10[%c0_32, %c0_33, %c0_34] : memref<1x8x64xf32, #tpu.memory_space<vmem>>, vector<1x8x64xf32>
    %97 = vector.shape_cast %96 : vector<1x8x64xf32> to vector<8x64xf32>
    %98 = vector.shape_cast %95 : vector<8x64xf32> to vector<1x8x64xf32>
    tpu.vector_store %arg10[%c0_32, %c0_33, %c0_34], %98 {strides = array<i32>} : memref<1x8x64xf32, #tpu.memory_space<vmem>>, vector<1x8x64xf32>,
    %99 = vector.shape_cast %56 : vector<64x4xf32> to vector<8x8x4xf32>
    %100 = vector.extract_strided_slice %99 {offsets = [0, 0, 0], sizes = [8, 1, 4], strides = [1, 1, 1]} : vector<8x8x4xf32> to vector<8x1x4xf32>
    %101 = vector.shape_cast %100 : vector<8x1x4xf32> to vector<8x4xf32>
    %102 = vector.extract_strided_slice %99 {offsets = [0, 1, 0], sizes = [8, 1, 4], strides = [1, 1, 1]} : vector<8x8x4xf32> to vector<8x1x4xf32>
    %103 = vector.shape_cast %102 : vector<8x1x4xf32> to vector<8x4xf32>
    %104 = vector.extract_strided_slice %99 {offsets = [0, 2, 0], sizes = [8, 1, 4], strides = [1, 1, 1]} : vector<8x8x4xf32> to vector<8x1x4xf32>
    %105 = vector.shape_cast %104 : vector<8x1x4xf32> to vector<8x4xf32>
    %106 = vector.extract_strided_slice %99 {offsets = [0, 3, 0], sizes = [8, 1, 4], strides = [1, 1, 1]} : vector<8x8x4xf32> to vector<8x1x4xf32>
    %107 = vector.shape_cast %106 : vector<8x1x4xf32> to vector<8x4xf32>
    %108 = vector.extract_strided_slice %99 {offsets = [0, 4, 0], sizes = [8, 1, 4], strides = [1, 1, 1]} : vector<8x8x4xf32> to vector<8x1x4xf32>
    %109 = vector.shape_cast %108 : vector<8x1x4xf32> to vector<8x4xf32>
    %110 = vector.extract_strided_slice %99 {offsets = [0, 5, 0], sizes = [8, 1, 4], strides = [1, 1, 1]} : vector<8x8x4xf32> to vector<8x1x4xf32>
    %111 = vector.shape_cast %110 : vector<8x1x4xf32> to vector<8x4xf32>
    %112 = vector.extract_strided_slice %99 {offsets = [0, 6, 0], sizes = [8, 1, 4], strides = [1, 1, 1]} : vector<8x8x4xf32> to vector<8x1x4xf32>
    %113 = vector.shape_cast %112 : vector<8x1x4xf32> to vector<8x4xf32>
    %114 = vector.extract_strided_slice %99 {offsets = [0, 7, 0], sizes = [8, 1, 4], strides = [1, 1, 1]} : vector<8x8x4xf32> to vector<8x1x4xf32>
    %115 = vector.shape_cast %114 : vector<8x1x4xf32> to vector<8x4xf32>
    %116 = tpu.concatenate %101, %103, %105, %107, %109, %111, %113, %115 in 1 : vector<8x4xf32>, vector<8x4xf32>, vector<8x4xf32>, vector<8x4xf32>, vector<8x4xf32>, vector<8x4xf32>, vector<8x4xf32>, vector<8x4xf32> -> vector<8x32xf32>
    %c0_35 = arith.constant 0 : index
    %c0_36 = arith.constant 0 : index
    %c0_37 = arith.constant 0 : index
    %117 = vector.load %arg11[%c0_35, %c0_36, %c0_37] : memref<1x8x32xf32, #tpu.memory_space<vmem>>, vector<1x8x32xf32>
    %118 = vector.shape_cast %117 : vector<1x8x32xf32> to vector<8x32xf32>
    %119 = vector.shape_cast %116 : vector<8x32xf32> to vector<1x8x32xf32>
    tpu.vector_store %arg11[%c0_35, %c0_36, %c0_37], %119 {strides = array<i32>} : memref<1x8x32xf32, #tpu.memory_space<vmem>>, vector<1x8x32xf32>,
    return
  }
  func.func @transform_0(%arg0: i32, %arg1: i32) -> (i32, i32, i32, i32) {
    %c0_i32 = arith.constant 0 : i32
    %c0_i32_0 = arith.constant 0 : i32
    %c0_i32_1 = arith.constant 0 : i32
    return %arg0, %arg1, %c0_i32, %c0_i32_0 : i32, i32, i32, i32
  }
  func.func @transform_1(%arg0: i32, %arg1: i32) -> (i32, i32) {
    %c0_i32 = arith.constant 0 : i32
    %c0_i32_0 = arith.constant 0 : i32
    %c0_i32_1 = arith.constant 0 : i32
    return %c0_i32, %c0_i32_0 : i32, i32
  }
  func.func @transform_2(%arg0: i32, %arg1: i32) -> (i32, i32) {
    %c0_i32 = arith.constant 0 : i32
    %c0_i32_0 = arith.constant 0 : i32
    %c0_i32_1 = arith.constant 0 : i32
    return %c0_i32, %c0_i32_0 : i32, i32
  }
  func.func @transform_3(%arg0: i32, %arg1: i32) -> (i32, i32) {
    %c0_i32 = arith.constant 0 : i32
    %c0_i32_0 = arith.constant 0 : i32
    %c0_i32_1 = arith.constant 0 : i32
    return %c0_i32, %c0_i32_0 : i32, i32
  }
  func.func @transform_4(%arg0: i32, %arg1: i32) -> (i32, i32) {
    %c0_i32 = arith.constant 0 : i32
    %c0_i32_0 = arith.constant 0 : i32
    %c0_i32_1 = arith.constant 0 : i32
    return %c0_i32, %c0_i32_0 : i32, i32
  }
  func.func @transform_5(%arg0: i32, %arg1: i32) -> (i32, i32) {
    %c0_i32 = arith.constant 0 : i32
    %c0_i32_0 = arith.constant 0 : i32
    %c0_i32_1 = arith.constant 0 : i32
    return %c0_i32, %c0_i32_0 : i32, i32
  }
  func.func @transform_6(%arg0: i32, %arg1: i32) -> (i32, i32) {
    %c0_i32 = arith.constant 0 : i32
    %c0_i32_0 = arith.constant 0 : i32
    %c0_i32_1 = arith.constant 0 : i32
    return %c0_i32, %c0_i32_0 : i32, i32
  }
  func.func @transform_7(%arg0: i32, %arg1: i32) -> (i32, i32, i32) {
    %c0_i32 = arith.constant 0 : i32
    %c0_i32_0 = arith.constant 0 : i32
    return %arg0, %arg1, %c0_i32 : i32, i32, i32
  }
  func.func @transform_8(%arg0: i32, %arg1: i32) -> (i32, i32, i32) {
    %c0_i32 = arith.constant 0 : i32
    %c0_i32_0 = arith.constant 0 : i32
    return %arg0, %arg1, %c0_i32 : i32, i32, i32
  }
  func.func @transform_9(%arg0: i32, %arg1: i32) -> (i32, i32, i32) {
    %c0_i32 = arith.constant 0 : i32
    %c0_i32_0 = arith.constant 0 : i32
    return %arg0, %arg1, %c0_i32 : i32, i32, i32
  }
}

module attributes {stable_mosaic.version = 11 : i64} {
  func.func @_conv3x3_kernel(%arg0: i32, %arg1: i32, %arg2: memref<1x1x10x10x4xf32, #tpu.memory_space<vmem>>, %arg3: memref<36x8xf32, #tpu.memory_space<vmem>>, %arg4: memref<1x8xf32, #tpu.memory_space<vmem>>, %arg5: memref<1x8x64xf32, #tpu.memory_space<vmem>>) attributes {dimension_semantics = [#tpu.dimension_semantics<parallel>, #tpu.dimension_semantics<parallel>], iteration_bounds = array<i64: 2, 1>, scalar_prefetch = 0 : i64, scratch_operands = 0 : i64, tpu.core_type = #tpu.core_type<tc>, window_params = [{transform_indices = @transform_0, window_bounds = array<i64: 1, 1, 10, 10, 4>}, {pipeline_mode = #tpu.pipeline_mode<synchronous>, transform_indices = @transform_1, window_bounds = array<i64: 36, 8>}, {pipeline_mode = #tpu.pipeline_mode<synchronous>, transform_indices = @transform_2, window_bounds = array<i64: 1, 8>}, {transform_indices = @transform_3, window_bounds = array<i64: 1, 8, 64>}]} {
    %c8_i32 = arith.constant 8 : i32
    %0 = arith.muli %arg1, %c8_i32 : i32
    %1 = tpu.assume_multiple %0, 8 : i32
    %c0_i32 = arith.constant 0 : i32
    %2 = arith.addi %1, %c0_i32 : i32
    %c0 = arith.constant 0 : index
    %c0_0 = arith.constant 0 : index
    %3 = arith.index_cast %2 : i32 to index
    %c0_1 = arith.constant 0 : index
    %c0_2 = arith.constant 0 : index
    %4 = vector.load %arg2[%c0, %c0_0, %3, %c0_1, %c0_2] : memref<1x1x10x10x4xf32, #tpu.memory_space<vmem>>, vector<1x1x8x8x4xf32>
    %5 = vector.shape_cast %4 : vector<1x1x8x8x4xf32> to vector<8x8x4xf32>
    %c0_i32_3 = arith.constant 0 : i32
    %6 = arith.addi %1, %c0_i32_3 : i32
    %c0_4 = arith.constant 0 : index
    %c0_5 = arith.constant 0 : index
    %7 = arith.index_cast %6 : i32 to index
    %c1 = arith.constant 1 : index
    %c0_6 = arith.constant 0 : index
    %8 = vector.load %arg2[%c0_4, %c0_5, %7, %c1, %c0_6] : memref<1x1x10x10x4xf32, #tpu.memory_space<vmem>>, vector<1x1x8x8x4xf32>
    %9 = vector.shape_cast %8 : vector<1x1x8x8x4xf32> to vector<8x8x4xf32>
    %c0_i32_7 = arith.constant 0 : i32
    %10 = arith.addi %1, %c0_i32_7 : i32
    %c0_8 = arith.constant 0 : index
    %c0_9 = arith.constant 0 : index
    %11 = arith.index_cast %10 : i32 to index
    %c2 = arith.constant 2 : index
    %c0_10 = arith.constant 0 : index
    %12 = vector.load %arg2[%c0_8, %c0_9, %11, %c2, %c0_10] : memref<1x1x10x10x4xf32, #tpu.memory_space<vmem>>, vector<1x1x8x8x4xf32>
    %13 = vector.shape_cast %12 : vector<1x1x8x8x4xf32> to vector<8x8x4xf32>
    %c1_i32 = arith.constant 1 : i32
    %14 = arith.addi %1, %c1_i32 : i32
    %c0_11 = arith.constant 0 : index
    %c0_12 = arith.constant 0 : index
    %15 = arith.index_cast %14 : i32 to index
    %c0_13 = arith.constant 0 : index
    %c0_14 = arith.constant 0 : index
    %16 = vector.load %arg2[%c0_11, %c0_12, %15, %c0_13, %c0_14] : memref<1x1x10x10x4xf32, #tpu.memory_space<vmem>>, vector<1x1x8x8x4xf32>
    %17 = vector.shape_cast %16 : vector<1x1x8x8x4xf32> to vector<8x8x4xf32>
    %c1_i32_15 = arith.constant 1 : i32
    %18 = arith.addi %1, %c1_i32_15 : i32
    %c0_16 = arith.constant 0 : index
    %c0_17 = arith.constant 0 : index
    %19 = arith.index_cast %18 : i32 to index
    %c1_18 = arith.constant 1 : index
    %c0_19 = arith.constant 0 : index
    %20 = vector.load %arg2[%c0_16, %c0_17, %19, %c1_18, %c0_19] : memref<1x1x10x10x4xf32, #tpu.memory_space<vmem>>, vector<1x1x8x8x4xf32>
    %21 = vector.shape_cast %20 : vector<1x1x8x8x4xf32> to vector<8x8x4xf32>
    %c1_i32_20 = arith.constant 1 : i32
    %22 = arith.addi %1, %c1_i32_20 : i32
    %c0_21 = arith.constant 0 : index
    %c0_22 = arith.constant 0 : index
    %23 = arith.index_cast %22 : i32 to index
    %c2_23 = arith.constant 2 : index
    %c0_24 = arith.constant 0 : index
    %24 = vector.load %arg2[%c0_21, %c0_22, %23, %c2_23, %c0_24] : memref<1x1x10x10x4xf32, #tpu.memory_space<vmem>>, vector<1x1x8x8x4xf32>
    %25 = vector.shape_cast %24 : vector<1x1x8x8x4xf32> to vector<8x8x4xf32>
    %c2_i32 = arith.constant 2 : i32
    %26 = arith.addi %1, %c2_i32 : i32
    %c0_25 = arith.constant 0 : index
    %c0_26 = arith.constant 0 : index
    %27 = arith.index_cast %26 : i32 to index
    %c0_27 = arith.constant 0 : index
    %c0_28 = arith.constant 0 : index
    %28 = vector.load %arg2[%c0_25, %c0_26, %27, %c0_27, %c0_28] : memref<1x1x10x10x4xf32, #tpu.memory_space<vmem>>, vector<1x1x8x8x4xf32>
    %29 = vector.shape_cast %28 : vector<1x1x8x8x4xf32> to vector<8x8x4xf32>
    %c2_i32_29 = arith.constant 2 : i32
    %30 = arith.addi %1, %c2_i32_29 : i32
    %c0_30 = arith.constant 0 : index
    %c0_31 = arith.constant 0 : index
    %31 = arith.index_cast %30 : i32 to index
    %c1_32 = arith.constant 1 : index
    %c0_33 = arith.constant 0 : index
    %32 = vector.load %arg2[%c0_30, %c0_31, %31, %c1_32, %c0_33] : memref<1x1x10x10x4xf32, #tpu.memory_space<vmem>>, vector<1x1x8x8x4xf32>
    %33 = vector.shape_cast %32 : vector<1x1x8x8x4xf32> to vector<8x8x4xf32>
    %c2_i32_34 = arith.constant 2 : i32
    %34 = arith.addi %1, %c2_i32_34 : i32
    %c0_35 = arith.constant 0 : index
    %c0_36 = arith.constant 0 : index
    %35 = arith.index_cast %34 : i32 to index
    %c2_37 = arith.constant 2 : index
    %c0_38 = arith.constant 0 : index
    %36 = vector.load %arg2[%c0_35, %c0_36, %35, %c2_37, %c0_38] : memref<1x1x10x10x4xf32, #tpu.memory_space<vmem>>, vector<1x1x8x8x4xf32>
    %37 = vector.shape_cast %36 : vector<1x1x8x8x4xf32> to vector<8x8x4xf32>
    %38 = tpu.concatenate %5, %9, %13, %17, %21, %25, %29, %33, %37 in 2 : vector<8x8x4xf32>, vector<8x8x4xf32>, vector<8x8x4xf32>, vector<8x8x4xf32>, vector<8x8x4xf32>, vector<8x8x4xf32>, vector<8x8x4xf32>, vector<8x8x4xf32>, vector<8x8x4xf32> -> vector<8x8x36xf32>
    %39 = vector.shape_cast %38 : vector<8x8x36xf32> to vector<64x36xf32>
    %c0_39 = arith.constant 0 : index
    %c0_40 = arith.constant 0 : index
    %40 = vector.load %arg3[%c0_39, %c0_40] : memref<36x8xf32, #tpu.memory_space<vmem>>, vector<36x8xf32>
    %cst = arith.constant dense<0.000000e+00> : vector<64x8xf32>
    %41 = tpu.matmul %39, %40, %cst {dimension_numbers = #tpu.dot_dimension_numbers<[1], [0], [0], [1], [0, 0, 1, 1], [], []>} : vector<64x36xf32>, vector<36x8xf32>, vector<64x8xf32> -> vector<64x8xf32>
    %c0_41 = arith.constant 0 : index
    %c0_42 = arith.constant 0 : index
    %42 = vector.load %arg4[%c0_41, %c0_42] : memref<1x8xf32, #tpu.memory_space<vmem>>, vector<1x8xf32>
    %43 = vector.broadcast %42 : vector<1x8xf32> to vector<64x8xf32>
    %44 = arith.addf %41, %43 : vector<64x8xf32>
    %cst_43 = arith.constant 2.000000e+01 : f32
    %45 = vector.broadcast %cst_43 : f32 to vector<64x8xf32>
    %46 = arith.minimumf %44, %45 : vector<64x8xf32>
    %47 = math.exp %46 : vector<64x8xf32>
    %cst_44 = arith.constant 2.000000e+00 : f32
    %48 = vector.broadcast %cst_44 : f32 to vector<64x8xf32>
    %49 = arith.addf %47, %48 : vector<64x8xf32>
    %50 = arith.mulf %47, %49 : vector<64x8xf32>
    %cst_45 = arith.constant 2.000000e+01 : f32
    %51 = vector.broadcast %cst_45 : f32 to vector<64x8xf32>
    %52 = arith.cmpf ogt, %44, %51 : vector<64x8xf32>
    %cst_46 = arith.constant 2.000000e+00 : f32
    %53 = vector.broadcast %cst_46 : f32 to vector<64x8xf32>
    %54 = arith.addf %50, %53 : vector<64x8xf32>
    %55 = arith.divf %50, %54 : vector<64x8xf32>
    %56 = arith.mulf %44, %55 : vector<64x8xf32>
    %57 = arith.select %52, %44, %56 : vector<64x8xi1>, vector<64x8xf32>
    %58 = vector.shape_cast %57 : vector<64x8xf32> to vector<8x8x8xf32>
    %59 = vector.extract_strided_slice %58 {offsets = [0, 0, 0], sizes = [8, 1, 8], strides = [1, 1, 1]} : vector<8x8x8xf32> to vector<8x1x8xf32>
    %60 = vector.shape_cast %59 : vector<8x1x8xf32> to vector<8x8xf32>
    %61 = vector.extract_strided_slice %58 {offsets = [0, 1, 0], sizes = [8, 1, 8], strides = [1, 1, 1]} : vector<8x8x8xf32> to vector<8x1x8xf32>
    %62 = vector.shape_cast %61 : vector<8x1x8xf32> to vector<8x8xf32>
    %63 = vector.extract_strided_slice %58 {offsets = [0, 2, 0], sizes = [8, 1, 8], strides = [1, 1, 1]} : vector<8x8x8xf32> to vector<8x1x8xf32>
    %64 = vector.shape_cast %63 : vector<8x1x8xf32> to vector<8x8xf32>
    %65 = vector.extract_strided_slice %58 {offsets = [0, 3, 0], sizes = [8, 1, 8], strides = [1, 1, 1]} : vector<8x8x8xf32> to vector<8x1x8xf32>
    %66 = vector.shape_cast %65 : vector<8x1x8xf32> to vector<8x8xf32>
    %67 = vector.extract_strided_slice %58 {offsets = [0, 4, 0], sizes = [8, 1, 8], strides = [1, 1, 1]} : vector<8x8x8xf32> to vector<8x1x8xf32>
    %68 = vector.shape_cast %67 : vector<8x1x8xf32> to vector<8x8xf32>
    %69 = vector.extract_strided_slice %58 {offsets = [0, 5, 0], sizes = [8, 1, 8], strides = [1, 1, 1]} : vector<8x8x8xf32> to vector<8x1x8xf32>
    %70 = vector.shape_cast %69 : vector<8x1x8xf32> to vector<8x8xf32>
    %71 = vector.extract_strided_slice %58 {offsets = [0, 6, 0], sizes = [8, 1, 8], strides = [1, 1, 1]} : vector<8x8x8xf32> to vector<8x1x8xf32>
    %72 = vector.shape_cast %71 : vector<8x1x8xf32> to vector<8x8xf32>
    %73 = vector.extract_strided_slice %58 {offsets = [0, 7, 0], sizes = [8, 1, 8], strides = [1, 1, 1]} : vector<8x8x8xf32> to vector<8x1x8xf32>
    %74 = vector.shape_cast %73 : vector<8x1x8xf32> to vector<8x8xf32>
    %75 = tpu.concatenate %60, %62, %64, %66, %68, %70, %72, %74 in 1 : vector<8x8xf32>, vector<8x8xf32>, vector<8x8xf32>, vector<8x8xf32>, vector<8x8xf32>, vector<8x8xf32>, vector<8x8xf32>, vector<8x8xf32> -> vector<8x64xf32>
    %c0_47 = arith.constant 0 : index
    %c0_48 = arith.constant 0 : index
    %c0_49 = arith.constant 0 : index
    %76 = vector.load %arg5[%c0_47, %c0_48, %c0_49] : memref<1x8x64xf32, #tpu.memory_space<vmem>>, vector<1x8x64xf32>
    %77 = vector.shape_cast %76 : vector<1x8x64xf32> to vector<8x64xf32>
    %78 = vector.shape_cast %75 : vector<8x64xf32> to vector<1x8x64xf32>
    tpu.vector_store %arg5[%c0_47, %c0_48, %c0_49], %78 {strides = array<i32>} : memref<1x8x64xf32, #tpu.memory_space<vmem>>, vector<1x8x64xf32>,
    return
  }
  func.func @transform_0(%arg0: i32, %arg1: i32) -> (i32, i32, i32, i32, i32) {
    %c0_i32 = arith.constant 0 : i32
    %c0_i32_0 = arith.constant 0 : i32
    %c0_i32_1 = arith.constant 0 : i32
    %c0_i32_2 = arith.constant 0 : i32
    %c0_i32_3 = arith.constant 0 : i32
    return %arg0, %c0_i32, %c0_i32_0, %c0_i32_1, %c0_i32_2 : i32, i32, i32, i32, i32
  }
  func.func @transform_1(%arg0: i32, %arg1: i32) -> (i32, i32) {
    %c0_i32 = arith.constant 0 : i32
    %c0_i32_0 = arith.constant 0 : i32
    %c0_i32_1 = arith.constant 0 : i32
    return %c0_i32, %c0_i32_0 : i32, i32
  }
  func.func @transform_2(%arg0: i32, %arg1: i32) -> (i32, i32) {
    %c0_i32 = arith.constant 0 : i32
    %c0_i32_0 = arith.constant 0 : i32
    %c0_i32_1 = arith.constant 0 : i32
    return %c0_i32, %c0_i32_0 : i32, i32
  }
  func.func @transform_3(%arg0: i32, %arg1: i32) -> (i32, i32, i32) {
    %c0_i32 = arith.constant 0 : i32
    %c0_i32_0 = arith.constant 0 : i32
    return %arg0, %arg1, %c0_i32 : i32, i32, i32
  }
}

module attributes {stable_mosaic.version = 11 : i64} {
  func.func @_tail_kernel(%arg0: i32, %arg1: i32, %arg2: memref<1x8x8x8xf32, #tpu.memory_space<vmem>>, %arg3: memref<1x8x8x8xf32, #tpu.memory_space<vmem>>, %arg4: memref<1x8x8x8xf32, #tpu.memory_space<vmem>>, %arg5: memref<8x8xf32, #tpu.memory_space<vmem>>, %arg6: memref<1x8xf32, #tpu.memory_space<vmem>>, %arg7: memref<8x8xf32, #tpu.memory_space<vmem>>, %arg8: memref<8x8xf32, #tpu.memory_space<vmem>>, %arg9: memref<1x8xf32, #tpu.memory_space<vmem>>, %arg10: memref<1x8x64xf32, #tpu.memory_space<vmem>>) attributes {dimension_semantics = [#tpu.dimension_semantics<parallel>, #tpu.dimension_semantics<parallel>], iteration_bounds = array<i64: 2, 1>, scalar_prefetch = 0 : i64, scratch_operands = 0 : i64, tpu.core_type = #tpu.core_type<tc>, window_params = [{transform_indices = @transform_0, window_bounds = array<i64: 1, 8, 8, 8>}, {transform_indices = @transform_1, window_bounds = array<i64: 1, 8, 8, 8>}, {transform_indices = @transform_2, window_bounds = array<i64: 1, 8, 8, 8>}, {pipeline_mode = #tpu.pipeline_mode<synchronous>, transform_indices = @transform_3, window_bounds = array<i64: 8, 8>}, {pipeline_mode = #tpu.pipeline_mode<synchronous>, transform_indices = @transform_4, window_bounds = array<i64: 1, 8>}, {pipeline_mode = #tpu.pipeline_mode<synchronous>, transform_indices = @transform_5, window_bounds = array<i64: 8, 8>}, {pipeline_mode = #tpu.pipeline_mode<synchronous>, transform_indices = @transform_6, window_bounds = array<i64: 8, 8>}, {pipeline_mode = #tpu.pipeline_mode<synchronous>, transform_indices = @transform_7, window_bounds = array<i64: 1, 8>}, {transform_indices = @transform_8, window_bounds = array<i64: 1, 8, 64>}]} {
    %c0 = arith.constant 0 : index
    %c0_0 = arith.constant 0 : index
    %c0_1 = arith.constant 0 : index
    %c0_2 = arith.constant 0 : index
    %0 = vector.load %arg2[%c0, %c0_0, %c0_1, %c0_2] : memref<1x8x8x8xf32, #tpu.memory_space<vmem>>, vector<1x8x8x8xf32>
    %1 = vector.shape_cast %0 : vector<1x8x8x8xf32> to vector<8x8x8xf32>
    %2 = vector.shape_cast %1 : vector<8x8x8xf32> to vector<64x8xf32>
    %c0_3 = arith.constant 0 : index
    %c0_4 = arith.constant 0 : index
    %c0_5 = arith.constant 0 : index
    %c0_6 = arith.constant 0 : index
    %3 = vector.load %arg3[%c0_3, %c0_4, %c0_5, %c0_6] : memref<1x8x8x8xf32, #tpu.memory_space<vmem>>, vector<1x8x8x8xf32>
    %4 = vector.shape_cast %3 : vector<1x8x8x8xf32> to vector<8x8x8xf32>
    %5 = vector.shape_cast %4 : vector<8x8x8xf32> to vector<64x8xf32>
    %c0_7 = arith.constant 0 : index
    %c0_8 = arith.constant 0 : index
    %c0_9 = arith.constant 0 : index
    %c0_10 = arith.constant 0 : index
    %6 = vector.load %arg4[%c0_7, %c0_8, %c0_9, %c0_10] : memref<1x8x8x8xf32, #tpu.memory_space<vmem>>, vector<1x8x8x8xf32>
    %7 = vector.shape_cast %6 : vector<1x8x8x8xf32> to vector<8x8x8xf32>
    %8 = vector.shape_cast %7 : vector<8x8x8xf32> to vector<64x8xf32>
    %9 = arith.addf %5, %8 : vector<64x8xf32>
    %c0_11 = arith.constant 0 : index
    %c0_12 = arith.constant 0 : index
    %10 = vector.load %arg5[%c0_11, %c0_12] : memref<8x8xf32, #tpu.memory_space<vmem>>, vector<8x8xf32>
    %cst = arith.constant dense<0.000000e+00> : vector<64x8xf32>
    %11 = tpu.matmul %9, %10, %cst {dimension_numbers = #tpu.dot_dimension_numbers<[1], [0], [0], [1], [0, 0, 1, 1], [], []>} : vector<64x8xf32>, vector<8x8xf32>, vector<64x8xf32> -> vector<64x8xf32>
    %c0_13 = arith.constant 0 : index
    %c0_14 = arith.constant 0 : index
    %12 = vector.load %arg6[%c0_13, %c0_14] : memref<1x8xf32, #tpu.memory_space<vmem>>, vector<1x8xf32>
    %13 = vector.broadcast %12 : vector<1x8xf32> to vector<64x8xf32>
    %14 = arith.addf %11, %13 : vector<64x8xf32>
    %cst_15 = arith.constant 2.000000e+01 : f32
    %15 = vector.broadcast %cst_15 : f32 to vector<64x8xf32>
    %16 = arith.minimumf %14, %15 : vector<64x8xf32>
    %17 = math.exp %16 : vector<64x8xf32>
    %cst_16 = arith.constant 2.000000e+00 : f32
    %18 = vector.broadcast %cst_16 : f32 to vector<64x8xf32>
    %19 = arith.addf %17, %18 : vector<64x8xf32>
    %20 = arith.mulf %17, %19 : vector<64x8xf32>
    %cst_17 = arith.constant 2.000000e+01 : f32
    %21 = vector.broadcast %cst_17 : f32 to vector<64x8xf32>
    %22 = arith.cmpf ogt, %14, %21 : vector<64x8xf32>
    %cst_18 = arith.constant 2.000000e+00 : f32
    %23 = vector.broadcast %cst_18 : f32 to vector<64x8xf32>
    %24 = arith.addf %20, %23 : vector<64x8xf32>
    %25 = arith.divf %20, %24 : vector<64x8xf32>
    %26 = arith.mulf %14, %25 : vector<64x8xf32>
    %27 = arith.select %22, %14, %26 : vector<64x8xi1>, vector<64x8xf32>
    %c0_19 = arith.constant 0 : index
    %c0_20 = arith.constant 0 : index
    %28 = vector.load %arg7[%c0_19, %c0_20] : memref<8x8xf32, #tpu.memory_space<vmem>>, vector<8x8xf32>
    %cst_21 = arith.constant dense<0.000000e+00> : vector<64x8xf32>
    %29 = tpu.matmul %2, %28, %cst_21 {dimension_numbers = #tpu.dot_dimension_numbers<[1], [0], [0], [1], [0, 0, 1, 1], [], []>} : vector<64x8xf32>, vector<8x8xf32>, vector<64x8xf32> -> vector<64x8xf32>
    %c0_22 = arith.constant 0 : index
    %c0_23 = arith.constant 0 : index
    %30 = vector.load %arg8[%c0_22, %c0_23] : memref<8x8xf32, #tpu.memory_space<vmem>>, vector<8x8xf32>
    %cst_24 = arith.constant dense<0.000000e+00> : vector<64x8xf32>
    %31 = tpu.matmul %27, %30, %cst_24 {dimension_numbers = #tpu.dot_dimension_numbers<[1], [0], [0], [1], [0, 0, 1, 1], [], []>} : vector<64x8xf32>, vector<8x8xf32>, vector<64x8xf32> -> vector<64x8xf32>
    %32 = arith.addf %29, %31 : vector<64x8xf32>
    %c0_25 = arith.constant 0 : index
    %c0_26 = arith.constant 0 : index
    %33 = vector.load %arg9[%c0_25, %c0_26] : memref<1x8xf32, #tpu.memory_space<vmem>>, vector<1x8xf32>
    %34 = vector.broadcast %33 : vector<1x8xf32> to vector<64x8xf32>
    %35 = arith.addf %32, %34 : vector<64x8xf32>
    %cst_27 = arith.constant 2.000000e+01 : f32
    %36 = vector.broadcast %cst_27 : f32 to vector<64x8xf32>
    %37 = arith.minimumf %35, %36 : vector<64x8xf32>
    %38 = math.exp %37 : vector<64x8xf32>
    %cst_28 = arith.constant 2.000000e+00 : f32
    %39 = vector.broadcast %cst_28 : f32 to vector<64x8xf32>
    %40 = arith.addf %38, %39 : vector<64x8xf32>
    %41 = arith.mulf %38, %40 : vector<64x8xf32>
    %cst_29 = arith.constant 2.000000e+01 : f32
    %42 = vector.broadcast %cst_29 : f32 to vector<64x8xf32>
    %43 = arith.cmpf ogt, %35, %42 : vector<64x8xf32>
    %cst_30 = arith.constant 2.000000e+00 : f32
    %44 = vector.broadcast %cst_30 : f32 to vector<64x8xf32>
    %45 = arith.addf %41, %44 : vector<64x8xf32>
    %46 = arith.divf %41, %45 : vector<64x8xf32>
    %47 = arith.mulf %35, %46 : vector<64x8xf32>
    %48 = arith.select %43, %35, %47 : vector<64x8xi1>, vector<64x8xf32>
    %49 = vector.shape_cast %48 : vector<64x8xf32> to vector<8x8x8xf32>
    %50 = vector.extract_strided_slice %49 {offsets = [0, 0, 0], sizes = [8, 1, 8], strides = [1, 1, 1]} : vector<8x8x8xf32> to vector<8x1x8xf32>
    %51 = vector.shape_cast %50 : vector<8x1x8xf32> to vector<8x8xf32>
    %52 = vector.extract_strided_slice %49 {offsets = [0, 1, 0], sizes = [8, 1, 8], strides = [1, 1, 1]} : vector<8x8x8xf32> to vector<8x1x8xf32>
    %53 = vector.shape_cast %52 : vector<8x1x8xf32> to vector<8x8xf32>
    %54 = vector.extract_strided_slice %49 {offsets = [0, 2, 0], sizes = [8, 1, 8], strides = [1, 1, 1]} : vector<8x8x8xf32> to vector<8x1x8xf32>
    %55 = vector.shape_cast %54 : vector<8x1x8xf32> to vector<8x8xf32>
    %56 = vector.extract_strided_slice %49 {offsets = [0, 3, 0], sizes = [8, 1, 8], strides = [1, 1, 1]} : vector<8x8x8xf32> to vector<8x1x8xf32>
    %57 = vector.shape_cast %56 : vector<8x1x8xf32> to vector<8x8xf32>
    %58 = vector.extract_strided_slice %49 {offsets = [0, 4, 0], sizes = [8, 1, 8], strides = [1, 1, 1]} : vector<8x8x8xf32> to vector<8x1x8xf32>
    %59 = vector.shape_cast %58 : vector<8x1x8xf32> to vector<8x8xf32>
    %60 = vector.extract_strided_slice %49 {offsets = [0, 5, 0], sizes = [8, 1, 8], strides = [1, 1, 1]} : vector<8x8x8xf32> to vector<8x1x8xf32>
    %61 = vector.shape_cast %60 : vector<8x1x8xf32> to vector<8x8xf32>
    %62 = vector.extract_strided_slice %49 {offsets = [0, 6, 0], sizes = [8, 1, 8], strides = [1, 1, 1]} : vector<8x8x8xf32> to vector<8x1x8xf32>
    %63 = vector.shape_cast %62 : vector<8x1x8xf32> to vector<8x8xf32>
    %64 = vector.extract_strided_slice %49 {offsets = [0, 7, 0], sizes = [8, 1, 8], strides = [1, 1, 1]} : vector<8x8x8xf32> to vector<8x1x8xf32>
    %65 = vector.shape_cast %64 : vector<8x1x8xf32> to vector<8x8xf32>
    %66 = tpu.concatenate %51, %53, %55, %57, %59, %61, %63, %65 in 1 : vector<8x8xf32>, vector<8x8xf32>, vector<8x8xf32>, vector<8x8xf32>, vector<8x8xf32>, vector<8x8xf32>, vector<8x8xf32>, vector<8x8xf32> -> vector<8x64xf32>
    %c0_31 = arith.constant 0 : index
    %c0_32 = arith.constant 0 : index
    %c0_33 = arith.constant 0 : index
    %67 = vector.load %arg10[%c0_31, %c0_32, %c0_33] : memref<1x8x64xf32, #tpu.memory_space<vmem>>, vector<1x8x64xf32>
    %68 = vector.shape_cast %67 : vector<1x8x64xf32> to vector<8x64xf32>
    %69 = vector.shape_cast %66 : vector<8x64xf32> to vector<1x8x64xf32>
    tpu.vector_store %arg10[%c0_31, %c0_32, %c0_33], %69 {strides = array<i32>} : memref<1x8x64xf32, #tpu.memory_space<vmem>>, vector<1x8x64xf32>,
    return
  }
  func.func @transform_0(%arg0: i32, %arg1: i32) -> (i32, i32, i32, i32) {
    %c0_i32 = arith.constant 0 : i32
    %c0_i32_0 = arith.constant 0 : i32
    %c0_i32_1 = arith.constant 0 : i32
    return %arg0, %arg1, %c0_i32, %c0_i32_0 : i32, i32, i32, i32
  }
  func.func @transform_1(%arg0: i32, %arg1: i32) -> (i32, i32, i32, i32) {
    %c0_i32 = arith.constant 0 : i32
    %c0_i32_0 = arith.constant 0 : i32
    %c0_i32_1 = arith.constant 0 : i32
    return %arg0, %arg1, %c0_i32, %c0_i32_0 : i32, i32, i32, i32
  }
  func.func @transform_2(%arg0: i32, %arg1: i32) -> (i32, i32, i32, i32) {
    %c0_i32 = arith.constant 0 : i32
    %c0_i32_0 = arith.constant 0 : i32
    %c0_i32_1 = arith.constant 0 : i32
    return %arg0, %arg1, %c0_i32, %c0_i32_0 : i32, i32, i32, i32
  }
  func.func @transform_3(%arg0: i32, %arg1: i32) -> (i32, i32) {
    %c0_i32 = arith.constant 0 : i32
    %c0_i32_0 = arith.constant 0 : i32
    %c0_i32_1 = arith.constant 0 : i32
    return %c0_i32, %c0_i32_0 : i32, i32
  }
  func.func @transform_4(%arg0: i32, %arg1: i32) -> (i32, i32) {
    %c0_i32 = arith.constant 0 : i32
    %c0_i32_0 = arith.constant 0 : i32
    %c0_i32_1 = arith.constant 0 : i32
    return %c0_i32, %c0_i32_0 : i32, i32
  }
  func.func @transform_5(%arg0: i32, %arg1: i32) -> (i32, i32) {
    %c0_i32 = arith.constant 0 : i32
    %c0_i32_0 = arith.constant 0 : i32
    %c0_i32_1 = arith.constant 0 : i32
    return %c0_i32, %c0_i32_0 : i32, i32
  }
  func.func @transform_6(%arg0: i32, %arg1: i32) -> (i32, i32) {
    %c0_i32 = arith.constant 0 : i32
    %c0_i32_0 = arith.constant 0 : i32
    %c0_i32_1 = arith.constant 0 : i32
    return %c0_i32, %c0_i32_0 : i32, i32
  }
  func.func @transform_7(%arg0: i32, %arg1: i32) -> (i32, i32) {
    %c0_i32 = arith.constant 0 : i32
    %c0_i32_0 = arith.constant 0 : i32
    %c0_i32_1 = arith.constant 0 : i32
    return %c0_i32, %c0_i32_0 : i32, i32
  }
  func.func @transform_8(%arg0: i32, %arg1: i32) -> (i32, i32, i32) {
    %c0_i32 = arith.constant 0 : i32
    %c0_i32_0 = arith.constant 0 : i32
    return %arg0, %arg1, %c0_i32 : i32, i32, i32
  }
}

</mosaic_0001>

<bundles_post_ra>
// kernel: stem_forward.5
= control target key start
LH: loop header
LB: loop body
LE: loop exit
PB: predicated region body
PF: predicated region fallthrough
CT: control target
= control target key end

     0   :  { %s2195_s12 = smov 0   ;;  %s2197_s13 = smov 0   ;;  %s3358_s0 = inlined_call_operand.vmem [shape: f32[2,1,18,18,3], index: 0, kind: input, shape index: {}]   ;;  %s3359_s1 = inlined_call_operand.vmem [shape: f32[27,4], index: 1, kind: input, shape index: {}]   ;;  %s3360_s2 = inlined_call_operand.vmem [shape: f32[1,4], index: 2, kind: input, shape index: {}]   ;;  %s3361_s3 = inlined_call_operand.vmem [shape: f32[2,16,64], index: 3, kind: output, shape index: {}]  }
   0x1   :  { %s2199_s14 = smov 0   ;;  %s2201_s15 = smov 0  }
   0x2   :  { %s2203_s16 = smov 0  }
   0x3 LB: > { %s22_s17 = sadd.s32 1, %s2143_s14  ;;  %s25_s18 = sadd.s32 1, %s2147_s15  ;;  %s2151_s16 = sphi %s2203_s16, %s13_s16   ;;  %s2147_s15 = sphi %s2201_s15, %s3368_s15   ;;  %s2143_s14 = sphi %s2199_s14, %s3367_s14   ;;  %s2139_s13 = sphi %s2197_s13, %s3366_s13   ;;  %s2135_s12 = sphi %s2195_s12, %s3365_s12  }
   0x4   : > { %p23_p0 = scmp.ge.s32.totalorder %s22_s17, 2  ;;  %p1794_p1 = scmp.ge.s32.totalorder %s2151_s16, 1 }
   0x5   : > { %p151_p2 = scmp.lt.s32.totalorder %s2151_s16, 5 }
   0x6   : > { %s3370_s17 = smov (%p23_p0, %s22_s17), 0  ;;  %s3372_s18 = smov (!%p23_p0, %s25_s18), %s2147_s15 }
   0x7   : > { %p152_p3 = pnand %p1794_p1, %p151_p2  ;;  %p27_p4 = scmp.ge.s32.totalorder %s3372_s18, 2 }
   0x8   : > { %p178_p5 = scmp.lt.s32.totalorder (!%p152_p3), %s2139_s13, 1  ;;  %s1799_s19 = smul.u32 (!%p152_p3), 192, %s2135_s12  ;;  %v992_v19 = vld [vmem:[%s3359_s1] sm:$0xff] (!%p152_p3)  ;;  %v993_v20 = vld [vmem:[%s3359_s1 + $0x8] sm:$0xff] (!%p152_p3)  ;;  %v994_v24 = vld [vmem:[%s3359_s1 + $0x10] sm:$0xff] (!%p152_p3)  ;;  %vm1052_vm0 = vcmask (!%p152_p3), 1042432  }
   0x9   : > { %s3374_s18 = smov (%p27_p4, %s3372_s18), 0  ;;  %155 = sbr.rel (%p152_p3) target bundleno = 792 (0x318), region = 32 }
   0xa   : > { %s2153_s25 = smov (!%p152_p3), 6   ;;  %s2154_s26 = smov (!%p152_p3), 3   ;;  %v1972_v21 = vpack.c.bf16 (!%p152_p3), %v993_v20, %v992_v19  ;;  %v995_v25 = vld [vmem:[%s3359_s1 + $0x18] sm:$0x7] (!%p152_p3)  ;;  %vm2160_vm1 = vmmov (!%p152_p3), 1   ;;  %vm856_vm3 = vcmask (!%p152_p3), 23552  }
   0xb   : > { %s2155_s27 = smov (!%p152_p3), 9   ;;  %s2156_s28 = smov (!%p152_p3), 12   ;;  %v1976_v26 = vpack.c.bf16 (!%p152_p3), %v995_v25, %v994_v24  ;;  %vm1977_vm2 = vmpackc.low (!%p152_p3), %vm1052_vm0, %vm2160_vm1  ;;  %vm873_vm4 = vcmask (!%p152_p3), 48128   ;;  %vm890_vm5 = vcmask (!%p152_p3), 72704   ;;  %vm907_vm6 = vcmask (!%p152_p3), 97280  }
   0xc   : > { %s2157_s29 = smov (!%p152_p3), 15   ;;  %s2158_s30 = smov (!%p152_p3), 18   ;;  %1973 = vmatprep.subr.bf16.mxu0 (!%p152_p3), %v1972_v21  ;;  %1982 = vmatprep.subr.bf16.mxu1 (!%p152_p3), %v1972_v21  ;;  %vm924_vm7 = vcmask (!%p152_p3), 121856   ;;  %vm941_vm8 = vcmask (!%p152_p3), 146432   ;;  %vm958_vm9 = vcmask (!%p152_p3), 171008   ;;  %vm975_vm10 = vcmask (!%p152_p3), 195584  }
   0xd   : > { %s2159_s4 = smov (!%p152_p3), 21   ;;  %1975 = vmatpush3.bf16.msra.mxu0 (!%p152_p3), %v1972_v21  ;;  %1984 = vmatpush3.bf16.msra.mxu1 (!%p152_p3), %v1972_v21  ;;  %vm1003_vm11 = vcmask (!%p152_p3), 220160   ;;  %vm1386_vm14 = vcmask (!%p152_p3), 1041409   ;;  %vm1389_vm1 = vcmask (!%p152_p3), 1042434   ;;  %s2171_s5 = smov (!%p152_p3), 28  }
   0xe   : > { %1978 = vmatprep.subr.msk.bf16.mxu0 (!%p152_p3), %vm1977_vm2, %v1976_v26  ;;  %1983 = vmatprep.subr.msk.bf16.mxu1 (!%p152_p3), %vm1977_vm2, %v1976_v26  ;;  %s2172_s6 = smov (!%p152_p3), 56   ;;  %s2173_s7 = smov (!%p152_p3), 52  }
   0xf   : > { %s2174_s8 = smov (!%p152_p3), 60   ;;  %p185_p6 = scmp.lt.s32.totalorder (!%p152_p3), %s2135_s12, 1 }
  0x10   : > { %s3376_s13 = smov (!%p178_p5, %s2139_s13), 1 }
  0x11   : > { %s1986_s20 = smul.u32 432, %s3376_s13  ;;  %1981 = vmatpush3.bf16.msk.msra.mxu0 %vm1977_vm2, %v1976_v26  ;;  %1985 = vmatpush3.bf16.msk.msra.mxu1 %vm1977_vm2, %v1976_v26  ;;  %s3378_s12 = smov (!%p185_p6, %s2135_s12), 1 }
  0x12   : > { %s1796_s9 = sshll.u32 %s3376_s13, 1 }
  0x13   : > { %s182_s23 = scalar_lea.vmem %s3358_s0, %s1986_s20  ;;  %s2161_s20 = smov 24  }
  0x14   : > { %s2234_s24 = scalar_lea.vmem %s182_s23, %s1799_s19  ;;  %s2162_s23 = smov 44  }
  0x15   : > { %v226_v0 = vld [vmem:[%s2234_s24 + $0x2] sm:$0xff]  ;;  %v227_v2 = vld [vmem:[%s2234_s24 + $0xa] sm:$0xff]  ;;  %v2248_v5 = vld [vmem:[%s2234_s24 + $0x18] sm:$0xff]  ;;  %s188_s10 = sadd.s32 %s1796_s9, %s3378_s12 }
  0x16   : > { %v210_v1 = vld [vmem:[%s2234_s24 + $0x1] sm:$0xff]  ;;  %424 = vrot.lane.b32.xlu1 %v226_v0, %s2153_s25  ;;  %v211_v3 = vld [vmem:[%s2234_s24 + $0x9] sm:$0xff]  ;;  %v212_v6 = vld [vmem:[%s2234_s24 + $0x19] sm:$0xff]  ;;  %s1797_s11 = sshll.u32 %s188_s10, 3 }
  0x17   : > { %360 = vrot.lane.b32.xlu0 %v210_v1, %s2154_s26  ;;  %v2245_v4 = vld [vmem:[%s2234_s24 + $0x20] sm:$0xff]  ;;  %v2268_v10 = vld [vmem:[%s2234_s24 + $0x69] sm:$0xff]  ;;  %v2294_v15 = vld [vmem:[%s2234_s24 + $0x38] sm:$0xff] }
  0x18   : > { %v1819_v7 = vld [vmem:[%s2234_s24 + $0x21] sm:$0xff]  ;;  %v2281_v13 = vld [vmem:[%s2234_s24 + $0x30] sm:$0xff]  ;;  %v2297_v16 = vld [vmem:[%s2234_s24 + $0x78] sm:$0xff] }
  0x19   : > { %v2259_v8 = vld [vmem:[%s2234_s24 + $0x61] sm:$0xff]  ;;  %v2287_v14 = vld [vmem:[%s2234_s24 + $0x6a] sm:$0xff]  ;;  %v1869_v22 = vld [vmem:[%s2234_s24 + $0x39] sm:$0xff] }
  0x1a   : > { %426 = vrot.lane.b32.xlu1 %v227_v2, %s2153_s25  ;;  %v1834_v9 = vld [vmem:[%s2234_s24 + $0x1a] sm:$0xff]  ;;  %v1835_v11 = vld [vmem:[%s2234_s24 + $0x22] sm:$0xff]  ;;  %v1868_v17 = vld [vmem:[%s2234_s24 + $0x31] sm:$0xff] }
  0x1b   : > { %362 = vrot.lane.b32.xlu0 %v211_v3, %s2154_s26  ;;  %v2275_v12 = vld [vmem:[%s2234_s24 + $0x62] sm:$0xff]  ;;  %v2321_v23 = vld [vmem:[%s2234_s24 + $0x79] sm:$0xff]  ;;  %v2364_v32 = vld [vmem:[%s2234_s24 + $0x90] sm:$0xff] }
  0x1c   : > { %v2308_v18 = vld [vmem:[%s2234_s24 + $0x80] sm:$0xff]  ;;  %v1884_v27 = vld [vmem:[%s2234_s24 + $0x32] sm:$0xff]  ;;  %v2367_v33 = vld [vmem:[%s2234_s24 + $0x48] sm:$0xff] }
  0x1d   : > { %v2339_v28 = vld [vmem:[%s2234_s24 + $0x81] sm:$0xff]  ;;  %v2381_v34 = vld [vmem:[%s2234_s24 + $0x98] sm:$0xff]  ;;  %v2384_v35 = vld [vmem:[%s2234_s24 + $0x50] sm:$0xff] }
  0x1e   : > { %490 = vrot.lane.b32.xlu1 %v2245_v4, %s2155_s27  ;;  %v1885_v29 = vld [vmem:[%s2234_s24 + $0x3a] sm:$0xff]  ;;  %v2358_v31 = vld [vmem:[%s2234_s24 + $0x82] sm:$0xff]  ;;  %v1876_v36 = vld [vmem:[%s2234_s24 + $0x91] sm:$0xff] }
  0x1f   : > { %488 = vrot.lane.b32.xlu0 %v2248_v5, %s2155_s27  ;;  %v2346_v30 = vld [vmem:[%s2234_s24 + $0x7a] sm:$0xff]  ;;  %v1870_v37 = vld [vmem:[%s2234_s24 + $0x49] sm:$0xff]  ;;  %v1871_v39 = vld [vmem:[%s2234_s24 + $0x51] sm:$0xff] }
  0x20   : > { %v1877_v38 = vld [vmem:[%s2234_s24 + $0x99] sm:$0xff]  ;;  %v1886_v41 = vld [vmem:[%s2234_s24 + $0x4a] sm:$0xff] }
  0x21   : > { %v1892_v40 = vld [vmem:[%s2234_s24 + $0x92] sm:$0xff]  ;;  %v1893_v50 = vld [vmem:[%s2234_s24 + $0x9a] sm:$0xff]  ;;  %v2449_v60 = vld [vmem:[%s2234_s24 + $0xa8] sm:$0xff] }
  0x22   : > { %364 = vrot.lane.b32.xlu1 %v212_v6, %s2154_s26  ;;  %v1887_v51 = vld [vmem:[%s2234_s24 + $0x52] sm:$0xff]  ;;  %v2454_v63 = vld [vmem:[%s2234_s24 + $0x60] sm:$0xff]  ;;  %v1878_v19 = vld [vmem:[%s2234_s24 + $0xa9] sm:$0xff] }
  0x23   : > { %552 = vrot.lane.b32.xlu0 %v212_v6, %s2156_s28  ;;  %v2473_v6 = vld [vmem:[%s2234_s24 + $0xb0] sm:$0xff] }
  0x26   : > { %554 = vrot.lane.b32.xlu1 %v1819_v7, %s2156_s28 }
  0x27   : > { %376 = vrot.lane.b32.xlu0 %v2259_v8, %s2154_s26 }
  0x2a   : > { %366 = vrot.lane.b32.xlu1 %v1819_v7, %s2154_s26 }
  0x2b   : > { %616 = vrot.lane.b32.xlu0 %v1834_v9, %s2157_s29 }
  0x2e   : > { %428 = vrot.lane.b32.xlu1 %v1834_v9, %s2153_s25 }
  0x2f   : > { %378 = vrot.lane.b32.xlu0 %v2268_v10, %s2154_s26 }
  0x32   : > { %618 = vrot.lane.b32.xlu1 %v1835_v11, %s2157_s29 }
  0x33   : > { %440 = vrot.lane.b32.xlu0 %v2275_v12, %s2153_s25 }
  0x36   : > { %430 = vrot.lane.b32.xlu1 %v1835_v11, %s2153_s25  ;;  %v194_v11 = vld [vmem:[%s2234_s24] sm:$0xff] }
  0x37   : > { %680 = vrot.lane.b32.xlu0 %v2281_v13, %s2158_s30 }
  0x3a   : > { %492 = vrot.lane.b32.xlu1 %v2281_v13, %s2155_s27 }
  0x3b   : > { %442 = vrot.lane.b32.xlu0 %v2287_v14, %s2153_s25 }
  0x3e   : > { %682 = vrot.lane.b32.xlu1 %v2294_v15, %s2158_s30 }
  0x3f   : > { %504 = vrot.lane.b32.xlu0 %v2297_v16, %s2155_s27 }
  0x42   : > { %494 = vrot.lane.b32.xlu1 %v2294_v15, %s2155_s27 }
  0x43   : > { %744 = vrot.lane.b32.xlu0 %v1868_v17, %s2159_s4 }
  0x46   : > { %556 = vrot.lane.b32.xlu1 %v1868_v17, %s2156_s28 }
  0x47   : > { %506 = vrot.lane.b32.xlu0 %v2308_v18, %s2155_s27 }
  0x4a   : > { %746 = vrot.lane.b32.xlu1 %v1869_v22, %s2159_s4 }
  0x4b   : > { %568 = vrot.lane.b32.xlu0 %v2321_v23, %s2156_s28 }
  0x4e   : > { %368 = vrot.lane.b32.xlu1 %v1868_v17, %s2154_s26  ;;  %v2479_v17 = vld [vmem:[%s2234_s24 + $0x68] sm:$0xff] }
  0x4f   : > { %808 = vrot.lane.b32.xlu0 %v1884_v27, %s2161_s20 }
  0x52   : > { %558 = vrot.lane.b32.xlu1 %v1869_v22, %s2156_s28 }
  0x53   : > { %380 = vrot.lane.b32.xlu0 %v2321_v23, %s2154_s26 }
  0x56   : > { %620 = vrot.lane.b32.xlu1 %v1884_v27, %s2157_s29 }
  0x57   : > { %570 = vrot.lane.b32.xlu0 %v2339_v28, %s2156_s28 }
  0x5a   : > { %810 = vrot.lane.b32.xlu1 %v1885_v29, %s2161_s20 }
  0x5b   : > { %632 = vrot.lane.b32.xlu0 %v2346_v30, %s2157_s29 }
  0x5e   : > { %382 = vrot.lane.b32.xlu1 %v2339_v28, %s2154_s26 }
  0x5f   : > { %370 = vrot.lane.b32.xlu0 %v1869_v22, %s2154_s26 }
  0x62   : > { %444 = vrot.lane.b32.xlu1 %v2346_v30, %s2153_s25 }
  0x63   : > { %432 = vrot.lane.b32.xlu0 %v1884_v27, %s2153_s25 }
  0x66   : > { %634 = vrot.lane.b32.xlu1 %v2358_v31, %s2157_s29 }
  0x67   : > { %622 = vrot.lane.b32.xlu0 %v1885_v29, %s2157_s29 }
  0x6a   : > { %696 = vrot.lane.b32.xlu1 %v2364_v32, %s2158_s30 }
  0x6b   : > { %684 = vrot.lane.b32.xlu0 %v2367_v33, %s2158_s30 }
  0x6e   : > { %446 = vrot.lane.b32.xlu1 %v2358_v31, %s2153_s25 }
  0x6f   : > { %434 = vrot.lane.b32.xlu0 %v1885_v29, %s2153_s25 }
  0x72   : > { %508 = vrot.lane.b32.xlu1 %v2364_v32, %s2155_s27 }
  0x73   : > { %496 = vrot.lane.b32.xlu0 %v2367_v33, %s2155_s27 }
  0x76   : > { %698 = vrot.lane.b32.xlu1 %v2381_v34, %s2158_s30 }
  0x77   : > { %686 = vrot.lane.b32.xlu0 %v2384_v35, %s2158_s30 }
  0x7a   : > { %760 = vrot.lane.b32.xlu1 %v1876_v36, %s2159_s4 }
  0x7b   : > { %748 = vrot.lane.b32.xlu0 %v1870_v37, %s2159_s4 }
  0x7e   : > { %510 = vrot.lane.b32.xlu1 %v2381_v34, %s2155_s27 }
  0x7f   : > { %498 = vrot.lane.b32.xlu0 %v2384_v35, %s2155_s27 }
  0x82   : > { %572 = vrot.lane.b32.xlu1 %v1876_v36, %s2156_s28 }
  0x83   : > { %560 = vrot.lane.b32.xlu0 %v1870_v37, %s2156_s28 }
  0x86   : > { %762 = vrot.lane.b32.xlu1 %v1877_v38, %s2159_s4 }
  0x87   : > { %750 = vrot.lane.b32.xlu0 %v1871_v39, %s2159_s4 }
  0x88   : > { %v2406_v42 = vpop.permute.xlu1 %424 }
  0x89   : > { %v361_v43 = vpop.permute.xlu0 %360 }
  0x8a   : > { %824 = vrot.lane.b32.xlu1 %v1892_v40, %s2161_s20  ;;  %v857_v20 = vsel %vm856_vm3, %v194_v11, %v361_v43  ;;  %v1879_v43 = vld [vmem:[%s2234_s24 + $0xb1] sm:$0xff] }
  0x8b   : > { %812 = vrot.lane.b32.xlu0 %v1886_v41, %s2161_s20  ;;  %v874_v24 = vsel %vm873_vm4, %v857_v20, %v2406_v42 }
  0x8c   : > { %v2410_v44 = vpop.permute.xlu1 %426 }
  0x8d   : > { %v2412_v45 = vpop.permute.xlu0 %362 }
  0x8e   : > { %384 = vrot.lane.b32.xlu1 %v1876_v36, %s2154_s26 }
  0x8f   : > { %372 = vrot.lane.b32.xlu0 %v1870_v37, %s2154_s26 }
  0x90   : > { %v2416_v46 = vpop.permute.xlu1 %490 }
  0x91   : > { %v489_v47 = vpop.permute.xlu0 %488 }
  0x92   : > { %574 = vrot.lane.b32.xlu1 %v1877_v38, %s2156_s28  ;;  %v891_v25 = vsel %vm890_vm5, %v874_v24, %v489_v47 }
  0x93   : > { %562 = vrot.lane.b32.xlu0 %v1871_v39, %s2156_s28 }
  0x94   : > { %v2420_v48 = vpop.permute.xlu1 %364 }
  0x95   : > { %v553_v49 = vpop.permute.xlu0 %552 }
  0x96   : > { %636 = vrot.lane.b32.xlu1 %v1892_v40, %s2157_s29  ;;  %v908_v29 = vsel %vm907_vm6, %v891_v25, %v553_v49 }
  0x97   : > { %624 = vrot.lane.b32.xlu0 %v1886_v41, %s2157_s29 }
  0x98   : > { %v2426_v52 = vpop.permute.xlu1 %554 }
  0x99   : > { %v2428_v53 = vpop.permute.xlu0 %376 }
  0x9a   : > { %826 = vrot.lane.b32.xlu1 %v1893_v50, %s2161_s20 }
  0x9b   : > { %814 = vrot.lane.b32.xlu0 %v1887_v51, %s2161_s20 }
  0x9c   : > { %v2432_v54 = vpop.permute.xlu1 %366 }
  0x9d   : > { %v617_v55 = vpop.permute.xlu0 %616 }
  0x9e   : > { %386 = vrot.lane.b32.xlu1 %v1877_v38, %s2154_s26  ;;  %v925_v36 = vsel %vm924_vm7, %v908_v29, %v617_v55  ;;  %v1894_v55 = vld [vmem:[%s2234_s24 + $0xaa] sm:$0xff] }
  0x9f   : > { %374 = vrot.lane.b32.xlu0 %v1871_v39, %s2154_s26 }
  0xa0   : > { %v2436_v56 = vpop.permute.xlu1 %428 }
  0xa1   : > { %v2438_v57 = vpop.permute.xlu0 %378 }
  0xa2   : > { %448 = vrot.lane.b32.xlu1 %v1892_v40, %s2153_s25 }
  0xa3   : > { %436 = vrot.lane.b32.xlu0 %v1886_v41, %s2153_s25  ;;  %v195_v41 = vld [vmem:[%s2234_s24 + $0x8] sm:$0xff] }
  0xa4   : > { %v2442_v58 = vpop.permute.xlu1 %618  ;;  %v858_v47 = vsel %vm856_vm3, %v195_v41, %v2412_v45 }
  0xa5   : > { %v2444_v59 = vpop.permute.xlu0 %440 }
  0xa6   : > { %638 = vrot.lane.b32.xlu1 %v1893_v50, %s2157_s29 }
  0xa7   : > { %626 = vrot.lane.b32.xlu0 %v1887_v51, %s2157_s29 }
  0xa8   : > { %v2451_v61 = vpop.permute.xlu1 %430 }
  0xa9   : > { %v681_v62 = vpop.permute.xlu0 %680 }
  0xaa   : > { %700 = vrot.lane.b32.xlu1 %v2449_v60, %s2158_s30  ;;  %v942_v37 = vsel %vm941_vm8, %v925_v36, %v681_v62 }
  0xab   : > { %688 = vrot.lane.b32.xlu0 %v2454_v63, %s2158_s30 }
  0xac   : > { %v2460_v0 = vpop.permute.xlu1 %492 }
  0xad   : > { %v2462_v1 = vpop.permute.xlu0 %442 }
  0xae   : > { %450 = vrot.lane.b32.xlu1 %v1893_v50, %s2153_s25 }
  0xaf   : > { %438 = vrot.lane.b32.xlu0 %v1887_v51, %s2153_s25  ;;  %v875_v51 = vsel %vm873_vm4, %v858_v47, %v2410_v44  ;;  %v1865_v47 = vld [vmem:[%s2234_s24 + $0xc8] sm:$0xff] }
  0xb0   : > { %v683_v2 = vpop.permute.xlu1 %682 }
  0xb1   : > { %v2466_v3 = vpop.permute.xlu0 %504 }
  0xb2   : > { %512 = vrot.lane.b32.xlu1 %v2449_v60, %s2155_s27 }
  0xb3   : > { %500 = vrot.lane.b32.xlu0 %v2454_v63, %s2155_s27 }
  0xb4   : > { %v2475_v7 = vpop.permute.xlu1 %494 }
  0xb5   : > { %v745_v9 = vpop.permute.xlu0 %744 }
  0xb6   : > { %702 = vrot.lane.b32.xlu1 %v2473_v6, %s2158_s30  ;;  %v959_v38 = vsel %vm958_vm9, %v942_v37, %v745_v9 }
  0xb7   : > { %690 = vrot.lane.b32.xlu0 %v2479_v17, %s2158_s30 }
  0xb8   : > { %v2487_v21 = vpop.permute.xlu1 %556 }
  0xb9   : > { %v2489_v22 = vpop.permute.xlu0 %506 }
  0xba   : > { %764 = vrot.lane.b32.xlu1 %v1878_v19, %s2159_s4 }
  0xbb   : > { %752 = vrot.lane.b32.xlu0 %v2259_v8, %s2159_s4 }
  0xbc   : > { %v747_v26 = vpop.permute.xlu1 %746 }
  0xbd   : > { %v2497_v27 = vpop.permute.xlu0 %568 }
  0xbe   : > { %514 = vrot.lane.b32.xlu1 %v2473_v6, %s2155_s27 }
  0xbf   : > { %502 = vrot.lane.b32.xlu0 %v2479_v17, %s2155_s27 }
  0xc0   : > { %v2507_v39 = vpop.permute.xlu1 %368 }
  0xc1   : > { %v809_v40 = vpop.permute.xlu0 %808 }
  0xc2   : > { %v976_v42 = vsel %vm975_vm10, %v959_v38, %v809_v40  ;;  %576 = vrot.lane.b32.xlu1 %v1878_v19, %s2156_s28  ;;  %v1864_v40 = vld [vmem:[%s2234_s24 + $0xc0] sm:$0xff] }
  0xc3   : > { %564 = vrot.lane.b32.xlu0 %v2259_v8, %s2156_s28  ;;  %1948 = vmatprep.mubr.msk.f32.mxu0 %vm1003_vm11, %v976_v42  ;;  %v892_v8 = vsel %vm890_vm5, %v875_v51, %v2416_v46 }
  0xc4   : > { %v2518_v49 = vpop.permute.xlu1 %558  ;;  %v909_v45 = vsel %vm907_vm6, %v892_v8, %v2426_v52 }
  0xc5   : > { %v2520_v50 = vpop.permute.xlu0 %380  ;;  %v926_v11 = vsel %vm924_vm7, %v909_v45, %v2442_v58  ;;  %v1880_v45 = vld [vmem:[%s2234_s24 + $0xc1] sm:$0xff] }
  0xc6   : > { %766 = vrot.lane.b32.xlu1 %v1879_v43, %s2159_s4  ;;  %v943_v44 = vsel %vm941_vm8, %v926_v11, %v683_v2 }
  0xc7   : > { %754 = vrot.lane.b32.xlu0 %v2268_v10, %s2159_s4  ;;  %v960_v46 = vsel %vm958_vm9, %v943_v44, %v747_v26 }
  0xc8   : > { %v2530_v62 = vpop.permute.xlu1 %620 }
  0xc9   : > { %v2532_v9 = vpop.permute.xlu0 %570 }
  0xca   : > { %828 = vrot.lane.b32.xlu1 %v1894_v55, %s2161_s20 }
  0xcb   : > { %816 = vrot.lane.b32.xlu0 %v2275_v12, %s2161_s20 }
  0xcc   : > { %v811_v20 = vpop.permute.xlu1 %810 }
  0xcd   : > { %v2543_v24 = vpop.permute.xlu0 %632  ;;  %v977_v25 = vsel %vm975_vm10, %v960_v46, %v811_v20 }
  0xce   : > { %566 = vrot.lane.b32.xlu1 %v2268_v10, %s2156_s28  ;;  %1949 = vmatmul.mubr.msk.f32.vlgmr.msra.gmra.mrb[0].mxu0 %vm1003_vm11, %v977_v25  ;;  %v1895_v10 = vld [vmem:[%s2234_s24 + $0xb2] sm:$0xff]  ;;  %v861_v25 = vsel %vm856_vm3, %v2281_v13, %v2507_v39  ;;  %v859_v39 = vsel %vm856_vm3, %v2248_v5, %v2420_v48 }
  0xcf   : > { %388 = vrot.lane.b32.xlu0 %v1878_v19, %s2154_s26 }
  0xd0   : > { %v383_v52 = vpop.permute.xlu1 %382 }
  0xd1   : > { %v2550_v58 = vpop.permute.xlu0 %370  ;;  %v868_v8 = vsel %vm856_vm3, %v2308_v18, %v383_v52 }
  0xd2   : > { %628 = vrot.lane.b32.xlu1 %v2275_v12, %s2157_s29 }
  0xd3   : > { %578 = vrot.lane.b32.xlu0 %v1879_v43, %s2156_s28 }
  0xd4   : > { %v445_v2 = vpop.permute.xlu1 %444 }
  0xd5   : > { %v433_v26 = vpop.permute.xlu0 %432 }
  0xd6   : > { %818 = vrot.lane.b32.xlu1 %v2287_v14, %s2161_s20  ;;  %v878_v52 = vsel %vm873_vm4, %v861_v25, %v433_v26 }
  0xd7   : > { %640 = vrot.lane.b32.xlu0 %v1894_v55, %s2157_s29 }
  0xd8   : > { %v2559_v19 = vpop.permute.xlu1 %634 }
  0xd9   : > { %v2561_v29 = vpop.permute.xlu0 %622 }
  0xda   : > { %390 = vrot.lane.b32.xlu1 %v1879_v43, %s2154_s26  ;;  %s2165_s26 = smov 36  }
  0xdb   : > { %830 = vrot.lane.b32.xlu0 %v1895_v10, %s2161_s20 }
  0xdc   : > { %v697_v12 = vpop.permute.xlu1 %696 }
  0xdd   : > { %v685_v36 = vpop.permute.xlu0 %684 }
  0xde   : > { %630 = vrot.lane.b32.xlu1 %v2287_v14, %s2157_s29 }
  0xdf   : > { %452 = vrot.lane.b32.xlu0 %v1894_v55, %s2153_s25 }
  0xe0   : > { %v447_v37 = vpop.permute.xlu1 %446 }
  0xe1   : > { %v2568_v38 = vpop.permute.xlu0 %434  ;;  %v885_v11 = vsel %vm873_vm4, %v868_v8, %v447_v37 }
  0xe2   : > { %692 = vrot.lane.b32.xlu1 %v2297_v16, %s2158_s30 }
  0xe3   : > { %642 = vrot.lane.b32.xlu0 %v1895_v10, %s2157_s29 }
  0xe4   : > { %v509_v41 = vpop.permute.xlu1 %508 }
  0xe5   : > { %v497_v42 = vpop.permute.xlu0 %496 }
  0xe6   : > { %454 = vrot.lane.b32.xlu1 %v1895_v10, %s2153_s25  ;;  %v895_v37 = vsel %vm890_vm5, %v878_v52, %v497_v42  ;;  %v1866_v52 = vld [vmem:[%s2234_s24 + $0xd8] sm:$0xff]  ;;  %s2164_s25 = smov 40  }
  0xe7   : > { %704 = vrot.lane.b32.xlu0 %v1864_v40, %s2158_s30 }
  0xe8   : > { %v2576_v43 = vpop.permute.xlu1 %698 }
  0xe9   : > { %v2578_v14 = vpop.permute.xlu0 %686 }
  0xea   : > { %694 = vrot.lane.b32.xlu1 %v2308_v18, %s2158_s30 }
  0xeb   : > { %516 = vrot.lane.b32.xlu0 %v1864_v40, %s2155_s27 }
  0xec   : > { %v761_v51 = vpop.permute.xlu1 %760 }
  0xed   : > { %v749_v55 = vpop.permute.xlu0 %748 }
  0xee   : > { %756 = vrot.lane.b32.xlu1 %v2321_v23, %s2159_s4  ;;  %v867_v23 = vsel %vm856_vm3, %v2297_v16, %v2520_v50  ;;  %v865_v50 = vsel %vm856_vm3, %v2454_v63, %v2428_v53 }
  0xef   : > { %706 = vrot.lane.b32.xlu0 %v1865_v47, %s2158_s30  ;;  %v884_v18 = vsel %vm873_vm4, %v867_v23, %v445_v2  ;;  %v876_v2 = vsel %vm873_vm4, %v859_v39, %v2436_v56  ;;  %v882_v26 = vsel %vm873_vm4, %v865_v50, %v2444_v59 }
  0xf0   : > { %v511_v44 = vpop.permute.xlu1 %510  ;;  %v901_v10 = vsel %vm890_vm5, %v884_v18, %v509_v41  ;;  %v1881_v41 = vld [vmem:[%s2234_s24 + $0xc9] sm:$0xff]  ;;  %v893_v5 = vsel %vm890_vm5, %v876_v2, %v2460_v0  ;;  %v899_v48 = vsel %vm890_vm5, %v882_v26, %v2466_v3 }
  0xf1   : > { %v499_v46 = vpop.permute.xlu0 %498  ;;  %v902_v20 = vsel %vm890_vm5, %v885_v11, %v511_v44  ;;  %v916_v42 = vsel %vm907_vm6, %v899_v48, %v2497_v27 }
  0xf2   : > { %518 = vrot.lane.b32.xlu1 %v1865_v47, %s2155_s27  ;;  %v933_v59 = vsel %vm924_vm7, %v916_v42, %v2543_v24  ;;  %v1896_v47 = vld [vmem:[%s2234_s24 + $0xc2] sm:$0xff]  ;;  %s2166_s27 = smov 8  }
  0xf3   : > { %768 = vrot.lane.b32.xlu0 %v1880_v45, %s2159_s4  ;;  %v950_v0 = vsel %vm941_vm8, %v933_v59, %v697_v12 }
  0xf4   : > { %v573_v40 = vpop.permute.xlu1 %572 }
  0xf5   : > { %v561_v8 = vpop.permute.xlu0 %560  ;;  %v2605_v13 = vsel %vm907_vm6, %v901_v10, %v573_v40 }
  0xf6   : > { %v2608_v16 = vsel %vm907_vm6, %v895_v37, %v561_v8  ;;  %758 = vrot.lane.b32.xlu1 %v2339_v28, %s2159_s4  ;;  %v910_v28 = vsel %vm907_vm6, %v893_v5, %v2487_v21  ;;  %v967_v21 = vsel %vm958_vm9, %v950_v0, %v761_v51 }
  0xf7   : > { %580 = vrot.lane.b32.xlu0 %v1880_v45, %s2156_s28  ;;  %v927_v56 = vsel %vm924_vm7, %v910_v28, %v2530_v62 }
  0xf8   : > { %v763_v53 = vpop.permute.xlu1 %762  ;;  %v944_v3 = vsel %vm941_vm8, %v927_v56, %v685_v36  ;;  %v862_v36 = vsel %vm856_vm3, %v2294_v15, %v2550_v58  ;;  %v866_v58 = vsel %vm856_vm3, %v2479_v17, %v2438_v57 }
  0xf9   : > { %v751_v63 = vpop.permute.xlu0 %750  ;;  %v961_v27 = vsel %vm958_vm9, %v944_v3, %v749_v55  ;;  %v879_v51 = vsel %vm873_vm4, %v862_v36, %v2568_v38  ;;  %v1849_v55 = vld [vmem:[%s2234_s24 + $0xca] sm:$0xff] }
  0xfa   : > { %820 = vrot.lane.b32.xlu1 %v2346_v30, %s2161_s20  ;;  %v896_v44 = vsel %vm890_vm5, %v879_v51, %v499_v46  ;;  %v883_v46 = vsel %vm873_vm4, %v866_v58, %v2462_v1 }
  0xfb   : > { %770 = vrot.lane.b32.xlu0 %v1881_v41, %s2159_s4 }
  0xfc   : > { %v825_v45 = vpop.permute.xlu1 %824 }
  0xfd   : > { %v813_v62 = vpop.permute.xlu0 %812  ;;  %v984_v24 = vsel %vm975_vm10, %v967_v21, %v825_v45 }
  0xfe   : > { %v978_v11 = vsel %vm975_vm10, %v961_v27, %v813_v62  ;;  %582 = vrot.lane.b32.xlu1 %v1881_v41, %s2156_s28  ;;  %1960 = vmatprep.mubr.msk.f32.mxu1 %vm1003_vm11, %v984_v24 }
  0xff   : > { %832 = vrot.lane.b32.xlu0 %v1896_v47, %s2161_s20  ;;  %1951 = vmatprep.mubr.msk.f32.mxu0 %vm1003_vm11, %v978_v11 }
 0x100   : > { %v385_v30 = vpop.permute.xlu1 %384 }
 0x101   : > { %v373_v12 = vpop.permute.xlu0 %372  ;;  %v869_v41 = vsel %vm856_vm3, %v2364_v32, %v385_v30 }
 0x102   : > { %822 = vrot.lane.b32.xlu1 %v2358_v31, %s2161_s20  ;;  %v860_v31 = vsel %vm856_vm3, %v2245_v4, %v2432_v54  ;;  %v900_v54 = vsel %vm890_vm5, %v883_v46, %v2489_v22  ;;  %v863_v5 = vsel %vm856_vm3, %v2367_v33, %v373_v12 }
 0x103   : > { %644 = vrot.lane.b32.xlu0 %v1896_v47, %s2157_s29  ;;  %v877_v38 = vsel %vm873_vm4, %v860_v31, %v2451_v61  ;;  %v917_v61 = vsel %vm907_vm6, %v900_v54, %v2532_v9  ;;  %v1882_v9 = vld [vmem:[%s2234_s24 + $0xd9] sm:$0xff] }
 0x104   : > { %v575_v25 = vpop.permute.xlu1 %574  ;;  %v894_v4 = vsel %vm890_vm5, %v877_v38, %v2475_v7  ;;  %v934_v1 = vsel %vm924_vm7, %v917_v61, %v2559_v19 }
 0x105   : > { %v563_v23 = vpop.permute.xlu0 %562  ;;  %v2661_v18 = vsel %vm907_vm6, %v902_v20, %v575_v25  ;;  %v1867_v20 = vld [vmem:[%s2234_s24 + $0xe0] sm:$0xff]  ;;  %v911_v10 = vsel %vm907_vm6, %v894_v4, %v2518_v49  ;;  %v951_v7 = vsel %vm941_vm8, %v934_v1, %v2576_v43 }
 0x106   : > { %v2664_v15 = vsel %vm907_vm6, %v896_v44, %v563_v23  ;;  %646 = vrot.lane.b32.xlu1 %v1849_v55, %s2157_s29  ;;  %v928_v37 = vsel %vm924_vm7, %v911_v10, %v2561_v29  ;;  %v1883_v49 = vld [vmem:[%s2234_s24 + $0xe1] sm:$0xff]  ;;  %v968_v40 = vsel %vm958_vm9, %v951_v7, %v763_v53  ;;  %s2168_s29 = smov 4  }
 0x107   : > { %834 = vrot.lane.b32.xlu0 %v1849_v55, %s2161_s20  ;;  %v945_v22 = vsel %vm941_vm8, %v928_v37, %v2578_v14  ;;  %v1899_v43 = vld [vmem:[%s2234_s24 + $0xe2] sm:$0xff]  ;;  %v1898_v14 = vld [vmem:[%s2234_s24 + $0xda] sm:$0xff]  ;;  %s2163_s24 = smov 32  }
 0x108   : > { %v637_v57 = vpop.permute.xlu1 %636  ;;  %v962_v19 = vsel %vm958_vm9, %v945_v22, %v751_v63 }
 0x109   : > { %v625_v17 = vpop.permute.xlu0 %624  ;;  %v935_v58 = vsel %vm924_vm7, %v2605_v13, %v637_v57 }
 0x10a   : > { %710 = vrot.lane.b32.xlu1 %v1867_v20, %s2158_s30  ;;  %v929_v38 = vsel %vm924_vm7, %v2608_v16, %v625_v17 }
 0x10b   : > { %708 = vrot.lane.b32.xlu0 %v1866_v52, %s2158_s30  ;;  %s2169_s30 = smov 20  }
 0x10c   : > { %v827_v8 = vpop.permute.xlu1 %826 }
 0x10d   : > { %v815_v29 = vpop.permute.xlu0 %814  ;;  %v985_v39 = vsel %vm975_vm10, %v968_v40, %v827_v8 }
 0x10e   : > { %v979_v50 = vsel %vm975_vm10, %v962_v19, %v815_v29  ;;  %774 = vrot.lane.b32.xlu1 %v1883_v49, %s2159_s4  ;;  %1961 = vmatmul.mubr.msk.f32.vlgmr.msra.gmra.mrb[0].mxu1 %vm1003_vm11, %v985_v39 }
 0x10f   : > { %772 = vrot.lane.b32.xlu0 %v1882_v9, %s2159_s4  ;;  %1952 = vmatmul.mubr.msk.f32.gmra.mrb[2].mxu0 %vm1003_vm11, %v979_v50  ;;  %s2170_s4 = smov 48  }
 0x110   : > { %v387_v2 = vpop.permute.xlu1 %386 }
 0x111   : > { %v375_v26 = vpop.permute.xlu0 %374  ;;  %v870_v3 = vsel %vm856_vm3, %v2381_v34, %v387_v2 }
 0x112   : > { %838 = vrot.lane.b32.xlu1 %v1899_v43, %s2161_s20  ;;  %v864_v47 = vsel %vm856_vm3, %v2384_v35, %v375_v26 }
 0x113   : > { %836 = vrot.lane.b32.xlu0 %v1898_v14, %s2161_s20 }
 0x114   : > { %v449_v48 = vpop.permute.xlu1 %448 }
 0x115   : > { %v437_v53 = vpop.permute.xlu0 %436  ;;  %v886_v63 = vsel %vm873_vm4, %v869_v41, %v449_v48 }
 0x116   : > { %v880_v28 = vsel %vm873_vm4, %v863_v5, %v437_v53 }
 0x118   : > { %v639_v42 = vpop.permute.xlu1 %638 }
 0x119   : > { %v627_v56 = vpop.permute.xlu0 %626  ;;  %v936_v19 = vsel %vm924_vm7, %v2661_v18, %v639_v42 }
 0x11a   : > { %v930_v37 = vsel %vm924_vm7, %v2664_v15, %v627_v56 }
 0x11c   : > { %v701_v59 = vpop.permute.xlu1 %700 }
 0x11d   : > { %v689_v0 = vpop.permute.xlu0 %688  ;;  %v952_v46 = vsel %vm941_vm8, %v935_v58, %v701_v59 }
 0x11e   : > { %v946_v20 = vsel %vm941_vm8, %v929_v38, %v689_v0 }
 0x120   : > { %v451_v32 = vpop.permute.xlu1 %450 }
 0x121   : > { %v439_v21 = vpop.permute.xlu0 %438  ;;  %v887_v33 = vsel %vm873_vm4, %v870_v3, %v451_v32 }
 0x122   : > { %v2724_v27 = vsel %vm873_vm4, %v864_v47, %v439_v21 }
 0x124   : > { %v513_v45 = vpop.permute.xlu1 %512 }
 0x125   : > { %v501_v62 = vpop.permute.xlu0 %500  ;;  %v2727_v11 = vsel %vm890_vm5, %v886_v63, %v513_v45 }
 0x126   : > { %v897_v24 = vsel %vm890_vm5, %v880_v28, %v501_v62 }
 0x128   : > { %v703_v30 = vpop.permute.xlu1 %702 }
 0x129   : > { %v691_v12 = vpop.permute.xlu0 %690  ;;  %v953_v8 = vsel %vm941_vm8, %v936_v19, %v703_v30 }
 0x12a   : > { %v947_v7 = vsel %vm941_vm8, %v930_v37, %v691_v12 }
 0x12c   : > { %v765_v34 = vpop.permute.xlu1 %764 }
 0x12d   : > { %v753_v36 = vpop.permute.xlu0 %752  ;;  %v969_v52 = vsel %vm958_vm9, %v952_v46, %v765_v34 }
 0x12e   : > { %v963_v4 = vsel %vm958_vm9, %v946_v20, %v753_v36 }
 0x130   : > { %v515_v51 = vpop.permute.xlu1 %514 }
 0x131   : > { %v503_v35 = vpop.permute.xlu0 %502  ;;  %v2731_v55 = vsel %vm890_vm5, %v887_v33, %v515_v51 }
 0x134   : > { %v577_v44 = vpop.permute.xlu1 %576 }
 0x135   : > { %v565_v25 = vpop.permute.xlu0 %564  ;;  %v920_v45 = vsel %vm907_vm6, %v2727_v11, %v577_v44 }
 0x136   : > { %v914_v0 = vsel %vm907_vm6, %v897_v24, %v565_v25  ;;  %v898_v24 = vsel %vm890_vm5, %v2724_v27, %v503_v35 }
 0x138   : > { %v767_v23 = vpop.permute.xlu1 %766 }
 0x139   : > { %v755_v31 = vpop.permute.xlu0 %754  ;;  %v970_v29 = vsel %vm958_vm9, %v953_v8, %v767_v23 }
 0x13a   : > { %v964_v22 = vsel %vm958_vm9, %v947_v7, %v755_v31 }
 0x13c   : > { %v829_v54 = vpop.permute.xlu1 %828 }
 0x13d   : > { %v817_v10 = vpop.permute.xlu0 %816  ;;  %v986_v61 = vsel %vm975_vm10, %v969_v52, %v829_v54 }
 0x13e   : > { %v980_v1 = vsel %vm975_vm10, %v963_v4, %v817_v10  ;;  %1963 = vmatprep.mubr.msk.f32.mxu1 %vm1003_vm11, %v986_v61 }
 0x13f   : > { %1954 = vmatprep.mubr.msk.f32.mxu0 %vm1003_vm11, %v980_v1 }
 0x140   : > { %v567_v13 = vpop.permute.xlu1 %566 }
 0x141   : > { %v2745_v16 = vpop.permute.xlu0 %388  ;;  %v915_v25 = vsel %vm907_vm6, %v898_v24, %v567_v13 }
 0x144   : > { %v629_v57 = vpop.permute.xlu1 %628 }
 0x145   : > { %v579_v17 = vpop.permute.xlu0 %578  ;;  %v931_v3 = vsel %vm924_vm7, %v914_v0, %v629_v57 }
 0x146   : > { %v921_v27 = vsel %vm907_vm6, %v2731_v55, %v579_v17  ;;  %v871_v55 = vsel %vm856_vm3, %v2449_v60, %v2745_v16 }
 0x148   : > { %v819_v49 = vpop.permute.xlu1 %818 }
 0x149   : > { %v641_v9 = vpop.permute.xlu0 %640  ;;  %v981_v40 = vsel %vm975_vm10, %v964_v22, %v819_v49 }
 0x14a   : > { %1955 = vmatmul.mubr.msk.f32.gmra.mrb[4].mxu0 %vm1003_vm11, %v981_v40  ;;  %v937_v30 = vsel %vm924_vm7, %v920_v45, %v641_v9 }
 0x14c   : > { %v391_v39 = vpop.permute.xlu1 %390 }
 0x14d   : > { %v831_v50 = vpop.permute.xlu0 %830  ;;  %v872_v13 = vsel %vm856_vm3, %v2473_v6, %v391_v39 }
 0x14e   : > { %v987_v15 = vsel %vm975_vm10, %v970_v29, %v831_v50 }
 0x14f   : > { %1964 = vmatmul.mubr.msk.f32.gmra.mrb[2].mxu1 %vm1003_vm11, %v987_v15 }
 0x150   : > { %v631_v43 = vpop.permute.xlu1 %630 }
 0x151   : > { %v453_v14 = vpop.permute.xlu0 %452  ;;  %v932_v11 = vsel %vm924_vm7, %v915_v25, %v631_v43 }
 0x152   : > { %v888_v57 = vsel %vm873_vm4, %v871_v55, %v453_v14 }
 0x154   : > { %v693_v2 = vpop.permute.xlu1 %692 }
 0x155   : > { %v643_v26 = vpop.permute.xlu0 %642  ;;  %v948_v47 = vsel %vm941_vm8, %v931_v3, %v693_v2 }
 0x156   : > { %v938_v46 = vsel %vm924_vm7, %v921_v27, %v643_v26  ;;  %v2811_v26 = vld [vmem:[%s3360_s2] ss:$0 sm:$0xff] }
 0x158   : > { %v455_v41 = vpop.permute.xlu1 %454 }
 0x159   : > { %v705_v5 = vpop.permute.xlu0 %704  ;;  %v889_v17 = vsel %vm873_vm4, %v872_v13, %v455_v41 }
 0x15a   : > { %v954_v12 = vsel %vm941_vm8, %v937_v30, %v705_v5 }
 0x15c   : > { %v695_v48 = vpop.permute.xlu1 %694 }
 0x15d   : > { %v517_v18 = vpop.permute.xlu0 %516  ;;  %v949_v44 = vsel %vm941_vm8, %v932_v11, %v695_v48 }
 0x15e   : > { %v905_v37 = vsel %vm890_vm5, %v888_v57, %v517_v18 }
 0x160   : > { %v757_v53 = vpop.permute.xlu1 %756 }
 0x161   : > { %v707_v63 = vpop.permute.xlu0 %706  ;;  %v965_v32 = vsel %vm958_vm9, %v948_v47, %v757_v53 }
 0x162   : > { %v955_v20 = vsel %vm941_vm8, %v938_v46, %v707_v63 }
 0x164   : > { %v519_v28 = vpop.permute.xlu1 %518 }
 0x165   : > { %v769_v42 = vpop.permute.xlu0 %768  ;;  %v906_v7 = vsel %vm890_vm5, %v889_v17, %v519_v28 }
 0x166   : > { %v971_v34 = vsel %vm958_vm9, %v954_v12, %v769_v42 }
 0x168   : > { %v759_v56 = vpop.permute.xlu1 %758 }
 0x169   : > { %v581_v59 = vpop.permute.xlu0 %580  ;;  %v966_v31 = vsel %vm958_vm9, %v949_v44, %v759_v56 }
 0x16a   : > { %v922_v9 = vsel %vm907_vm6, %v905_v37, %v581_v59 }
 0x16c   : > { %v821_v21 = vpop.permute.xlu1 %820 }
 0x16d   : > { %v771_v33 = vpop.permute.xlu0 %770  ;;  %v982_v62 = vsel %vm975_vm10, %v965_v32, %v821_v21 }
 0x16e   : > { %1957 = vmatprep.mubr.msk.f32.mxu0 %vm1003_vm11, %v982_v62  ;;  %v972_v52 = vsel %vm958_vm9, %v955_v20, %v771_v33 }
 0x170   : > { %v583_v36 = vpop.permute.xlu1 %582 }
 0x171   : > { %v833_v51 = vpop.permute.xlu0 %832  ;;  %v923_v40 = vsel %vm907_vm6, %v906_v7, %v583_v36 }
 0x172   : > { %v988_v23 = vsel %vm975_vm10, %v971_v34, %v833_v51 }
 0x173   : > { %1966 = vmatprep.mubr.msk.f32.mxu1 %vm1003_vm11, %v988_v23 }
 0x174   : > { %v823_v58 = vpop.permute.xlu1 %822 }
 0x175   : > { %v645_v38 = vpop.permute.xlu0 %644  ;;  %v983_v35 = vsel %vm975_vm10, %v966_v31, %v823_v58 }
 0x176   : > { %1958 = vmatmul.mubr.msk.f32.gmra.mrb[6].mxu0 %vm1003_vm11, %v983_v35  ;;  %v939_v19 = vsel %vm924_vm7, %v922_v9, %v645_v38 }
 0x178   : > { %v647_v4 = vpop.permute.xlu1 %646 }
 0x179   : > { %v835_v54 = vpop.permute.xlu0 %834  ;;  %v940_v60 = vsel %vm924_vm7, %v923_v40, %v647_v4 }
 0x17a   : > { %v989_v10 = vsel %vm975_vm10, %v972_v52, %v835_v54 }
 0x17b   : > { %1967 = vmatmul.mubr.msk.f32.gmra.mrb[4].mxu1 %vm1003_vm11, %v989_v10 }
 0x17c   : > { %v711_v61 = vpop.permute.xlu1 %710 }
 0x17d   : > { %v709_v1 = vpop.permute.xlu0 %708  ;;  %v957_v6 = vsel %vm941_vm8, %v940_v60, %v711_v61 }
 0x17e   : > { %v956_v16 = vsel %vm941_vm8, %v939_v19, %v709_v1  ;;  %vm1392_vm8 = vcmask 1043459  }
 0x180   : > { %v775_v22 = vpop.permute.xlu1 %774 }
 0x181   : > { %v773_v49 = vpop.permute.xlu0 %772  ;;  %v974_v8 = vsel %vm958_vm9, %v957_v6, %v775_v22 }
 0x182   : > { %v973_v29 = vsel %vm958_vm9, %v956_v16, %v773_v49 }
 0x184   : > { %v839_v39 = vpop.permute.xlu1 %838 }
 0x185   : > { %v837_v50 = vpop.permute.xlu0 %836  ;;  %v991_v15 = vsel %vm975_vm10, %v974_v8, %v839_v39 }
 0x186   : > { %v990_v43 = vsel %vm975_vm10, %v973_v29, %v837_v50 }
 0x187   : > { %1969 = vmatprep.mubr.msk.f32.mxu1 %vm1003_vm11, %v990_v43 }
 0x188   : > { %1970 = vmatmul.mubr.msk.f32.gmra.mrb[6].mxu1 %vm1003_vm11, %v991_v15  ;;  %vm1395_vm11 = vcmask 1044484  }
 0x1a1   : > { %v1950_v14 = vpop.f32.mrb[0].mxu0 }
 0x1a2   : > { %v1122_v2 = vpop.f32.mrb[1].mxu0  ;;  %v1128_v41 = vadd.f32 %v1950_v14, %v2811_v26 }
 0x1a3   : > { %v2815_v18 = vadd.f32 %v2811_v26, %v1122_v2 }
 0x1a4   : > { %v1202_v5 = vmin.f32 %v1128_v41, 20.0  ;;  %vm1282_vm12 = vcmp.gt.f32.partialorder %v1128_v41, 20.0 }
 0x1a5   : > { %v1201_v53 = vmin.f32 %v2815_v18, 20.0  ;;  %vm1281_vm0 = vcmp.gt.f32.partialorder %v2815_v18, 20.0 }
 0x1a6   : > { %v1219_v48 = vmul.f32 1.442695, %v1202_v5 }
 0x1a7   : > { %v1217_v56 = vmul.f32 1.442695, %v1201_v53 }
 0x1a8   : > { %2049 = vpow2.f32 %v1219_v48 }
 0x1a9   : > { %2051 = vpow2.f32 %v1217_v56 }
 0x1b2   : > { %v2050_v42 = vpop.eup %2049 }
 0x1b3   : > { %v1250_v21 = vadd.f32 2.0, %v2050_v42  ;;  %v2052_v24 = vpop.eup %2051 }
 0x1b4   : > { %v1249_v36 = vadd.f32 2.0, %v2052_v24 }
 0x1b5   : > { %v1266_v30 = vmul.f32 %v2050_v42, %v1250_v21 }
 0x1b6   : > { %v1265_v44 = vmul.f32 %v2052_v24, %v1249_v36 }
 0x1b7   : > { %v1298_v12 = vadd.f32 2.0, %v1266_v30 }
 0x1b8   : > { %v1297_v35 = vadd.f32 2.0, %v1265_v44 }
 0x1e1   : > { %v2818_v28 = vpop.f32.mrb[0].mxu1 }
 0x1e2   : > { %v1953_v63 = vpop.f32.mrb[2].mxu0  ;;  %v2821_v3 = vpop.f32.mrb[1].mxu1 }
 0x1e3   : > { %v1138_v59 = vadd.f32 %v1953_v63, %v2811_v26  ;;  %v1132_v0 = vpop.f32.mrb[3].mxu0 }
 0x1e4   : > { %v1133_v47 = vadd.f32 %v2811_v26, %v1132_v0 }
 0x1e5   : > { %v1204_v32 = vmin.f32 %v1138_v59, 20.0  ;;  %vm1284_vm13 = vcmp.gt.f32.partialorder %v1138_v59, 20.0 }
 0x1e6   : > { %v1203_v33 = vmin.f32 %v1133_v47, 20.0  ;;  %vm1283_vm15 = vcmp.gt.f32.partialorder %v1133_v47, 20.0 }
 0x1e7   : > { %v1223_v45 = vmul.f32 1.442695, %v1204_v32 }
 0x1e8   : > { %v1221_v62 = vmul.f32 1.442695, %v1203_v33 }
 0x1e9   : > { %2053 = vpow2.f32 %v1223_v45  ;;  %v2869_v45 = vadd.f32 %v2818_v28, %v2811_v26 }
 0x1ea   : > { %2055 = vpow2.f32 %v1221_v62 }
 0x1eb   : > { %2057 = vrcp.f32 %v1298_v12  ;;  %v2874_v12 = vadd.f32 %v2811_v26, %v2821_v3  ;;  %vm1290_vm4 = vcmp.gt.f32.partialorder %v2869_v45, 20.0 }
 0x1ed   : > { %vm1289_vm5 = vcmp.gt.f32.partialorder %v2874_v12, 20.0 }
 0x1f3   : > { %v2054_v34 = vpop.eup %2053 }
 0x1f4   : > { %v1252_v51 = vadd.f32 2.0, %v2054_v34  ;;  %v2056_v25 = vpop.eup %2055 }
 0x1f5   : > { %v1251_v11 = vadd.f32 2.0, %v2056_v25  ;;  %v2058_v27 = vpop.eup %2057 }
 0x1f6   : > { %v1268_v23 = vmul.f32 %v2054_v34, %v1252_v51  ;;  %v1316_v46 = vmul.f32 %v2058_v27, %v1266_v30  ;;  %v1210_v51 = vmin.f32 %v2869_v45, 20.0 }
 0x1f7   : > { %v1267_v58 = vmul.f32 %v2056_v25, %v1251_v11  ;;  %v1209_v25 = vmin.f32 %v2874_v12, 20.0 }
 0x1f8   : > { %v1300_v31 = vadd.f32 2.0, %v1268_v23  ;;  %v1346_v20 = vmul.f32 %v1316_v46, %v1128_v41 }
 0x1f9   : > { %v1299_v38 = vadd.f32 2.0, %v1267_v58  ;;  %v1233_v11 = vmul.f32 1.442695, %v1209_v25 }
 0x1fa   : > { %2059 = vrcp.f32 %v1300_v31  ;;  %v1362_v10 = vsel %vm1282_vm12, %v1128_v41, %v1346_v20  ;;  %vm1398_vm12 = vcmask 1045509  }
 0x1fb   : > { %2061 = vrcp.f32 %v1299_v38  ;;  %v1585_v57 = vrot.slane %v1362_v10, 3  ;;  %v1568_v7 = vrot.slane %v1362_v10, 2  ;;  %v1551_v49 = vrot.slane %v1362_v10, 1 }
 0x1fc   : > { %2063 = vrcp.f32 %v1297_v35  ;;  %v1602_v39 = vrot.slane %v1362_v10, 4  ;;  %v1636_v15 = vrot.slane %v1362_v10, 6  ;;  %v1619_v2 = vrot.slane %v1362_v10, 5 }
 0x1fd   : > { %v1653_v48 = vrot.slane %v1362_v10, 7 }
 0x204   : > { %v2060_v52 = vpop.eup %2059 }
 0x205   : > { %v1320_v4 = vmul.f32 %v2060_v52, %v1268_v23  ;;  %v2062_v54 = vpop.eup %2061  ;;  %v1235_v23 = vmul.f32 1.442695, %v1210_v51 }
 0x206   : > { %v1318_v55 = vmul.f32 %v2062_v54, %v1267_v58  ;;  %v2064_v13 = vpop.eup %2063 }
 0x207   : > { %v1348_v61 = vmul.f32 %v1320_v4, %v1138_v59  ;;  %v1314_v19 = vmul.f32 %v2064_v13, %v1265_v44 }
 0x208   : > { %v1347_v60 = vmul.f32 %v1318_v55, %v1133_v47 }
 0x209   : > { %v1364_v1 = vsel %vm1284_vm13, %v1138_v59, %v1348_v61  ;;  %v1345_v8 = vmul.f32 %v1314_v19, %v2815_v18 }
 0x20a   : > { %v1586_v17 = vrot.slane %v1364_v1, 2  ;;  %v1534_v37 = vrot.slane %v1364_v1, 7  ;;  %v1569_v22 = vrot.slane %v1364_v1, 1  ;;  %v2834_v16 = vsel %vm1386_vm14, %v1364_v1, %v1551_v49 }
 0x20b   : > { %v2837_v29 = vsel %vm1283_vm15, %v1133_v47, %v1347_v60  ;;  %v1603_v50 = vrot.slane %v1364_v1, 3  ;;  %v1637_v43 = vrot.slane %v1364_v1, 5  ;;  %v1620_v41 = vrot.slane %v1364_v1, 4 }
 0x20c   : > { %v2825_v9 = vsel %vm1386_vm14, %v1586_v17, %v1585_v57  ;;  %v2828_v40 = vsel %vm1386_vm14, %v1534_v37, %v1362_v10  ;;  %v2831_v6 = vsel %vm1386_vm14, %v1569_v22, %v1568_v7  ;;  %v1654_v53 = vrot.slane %v1364_v1, 6 }
 0x20d   : > { %v2841_v14 = vsel %vm1386_vm14, %v1603_v50, %v1602_v39  ;;  %v2844_v5 = vsel %vm1386_vm14, %v1637_v43, %v1636_v15  ;;  %v1385_v63 = vrot.slane %v2837_v29, 7  ;;  %v2848_v42 = vsel %vm1281_vm0, %v2815_v18, %v1345_v8 }
 0x20e   : > { %v2851_v56 = vsel %vm1386_vm14, %v1620_v41, %v1619_v2  ;;  %v2854_v59 = vsel %vm1386_vm14, %v1654_v53, %v1653_v48  ;;  %v1441_v49 = vrot.slane %v2848_v42, 3  ;;  %v1442_v19 = vrot.slane %v2837_v29, 2 }
 0x20f   : > { %v2858_v0 = vsel %vm1386_vm14, %v1385_v63, %v2848_v42  ;;  %v1424_v8 = vrot.slane %v2848_v42, 2  ;;  %v1458_v39 = vrot.slane %v2848_v42, 4  ;;  %v1407_v50 = vrot.slane %v2848_v42, 1 }
 0x210   : > { %v1425_v2 = vrot.slane %v2837_v29, 1  ;;  %v1492_v41 = vrot.slane %v2848_v42, 6  ;;  %v1475_v48 = vrot.slane %v2848_v42, 5 }
 0x21d   : > { %v1956_v47 = vpop.f32.mrb[4].mxu0 }
 0x21e   : > { %v2861_v32 = vadd.f32 %v1956_v47, %v2811_v26  ;;  %v1142_v21 = vpop.f32.mrb[5].mxu0 }
 0x21f   : > { %v2864_v33 = vadd.f32 %v2811_v26, %v1142_v21 }
 0x220   : > { %v1206_v18 = vmin.f32 %v2861_v32, 20.0  ;;  %vm1286_vm2 = vcmp.gt.f32.partialorder %v2861_v32, 20.0 }
 0x221   : > { %v1205_v62 = vmin.f32 %v2864_v33, 20.0  ;;  %vm1285_vm3 = vcmp.gt.f32.partialorder %v2864_v33, 20.0 }
 0x222   : > { %v1965_v30 = vpop.f32.mrb[2].mxu1  ;;  %v1227_v24 = vmul.f32 1.442695, %v1206_v18 }
 0x223   : > { %v1172_v34 = vpop.f32.mrb[3].mxu1  ;;  %v1225_v36 = vmul.f32 1.442695, %v1205_v62  ;;  %v2879_v28 = vadd.f32 %v1965_v30, %v2811_v26  ;;  %v1443_v62 = vsel %vm1386_vm14, %v1442_v19, %v1441_v49  ;;  %v1459_v30 = vrot.slane %v2837_v29, 3 }
 0x224   : > { %2065 = vpow2.f32 %v1227_v24  ;;  %v2882_v3 = vadd.f32 %v2811_v26, %v1172_v34 }
 0x225   : > { %2067 = vpow2.f32 %v1225_v36  ;;  %v1212_v27 = vmin.f32 %v2879_v28, 20.0  ;;  %vm1292_vm7 = vcmp.gt.f32.partialorder %v2879_v28, 20.0 }
 0x226   : > { %2069 = vpow2.f32 %v1235_v23  ;;  %v1211_v20 = vmin.f32 %v2882_v3, 20.0  ;;  %vm1291_vm9 = vcmp.gt.f32.partialorder %v2882_v3, 20.0 }
 0x227   : > { %2071 = vpow2.f32 %v1233_v11  ;;  %v1239_v54 = vmul.f32 1.442695, %v1212_v27  ;;  %v1426_v11 = vsel %vm1386_vm14, %v1425_v2, %v1424_v8 }
 0x228   : > { %v1237_v10 = vmul.f32 1.442695, %v1211_v20  ;;  %v1509_v20 = vrot.slane %v2848_v42, 7 }
 0x22e   : > { %v2066_v44 = vpop.eup %2065 }
 0x22f   : > { %v2068_v31 = vpop.eup %2067  ;;  %v1254_v58 = vadd.f32 2.0, %v2066_v44 }
 0x230   : > { %v1253_v38 = vadd.f32 2.0, %v2068_v31  ;;  %v2070_v61 = vpop.eup %2069 }
 0x231   : > { %v1270_v35 = vmul.f32 %v2066_v44, %v1254_v58  ;;  %v2072_v1 = vpop.eup %2071  ;;  %v1258_v55 = vadd.f32 2.0, %v2070_v61 }
 0x232   : > { %v1269_v46 = vmul.f32 %v2068_v31, %v1253_v38  ;;  %v1257_v13 = vadd.f32 2.0, %v2072_v1 }
 0x233   : > { %v1302_v52 = vadd.f32 2.0, %v1270_v35  ;;  %v2886_v17 = vmul.f32 %v2070_v61, %v1258_v55 }
 0x234   : > { %v1301_v4 = vadd.f32 2.0, %v1269_v46  ;;  %v2888_v37 = vmul.f32 %v2072_v1, %v1257_v13 }
 0x235   : > { %2073 = vrcp.f32 %v1302_v52  ;;  %v1306_v53 = vadd.f32 2.0, %v2886_v17 }
 0x236   : > { %2075 = vrcp.f32 %v1301_v4  ;;  %v1305_v63 = vadd.f32 2.0, %v2888_v37 }
 0x237   : > { %2077 = vpow2.f32 %v1239_v54  ;;  %v1408_v54 = vsel %vm1386_vm14, %v2837_v29, %v1407_v50 }
 0x238   : > { %2079 = vpow2.f32 %v1237_v10 }
 0x239   : > { %2081 = vrcp.f32 %v1306_v53 }
 0x23a   : > { %2083 = vrcp.f32 %v1305_v63 }
 0x23f   : > { %v2074_v57 = vpop.eup %2073 }
 0x240   : > { %v2076_v7 = vpop.eup %2075  ;;  %v1324_v22 = vmul.f32 %v2074_v57, %v1270_v35 }
 0x241   : > { %v1322_v60 = vmul.f32 %v2076_v7, %v1269_v46  ;;  %v2078_v15 = vpop.eup %2077  ;;  %v1476_v46 = vrot.slane %v2837_v29, 4  ;;  %v1510_v7 = vrot.slane %v2837_v29, 6 }
 0x242   : > { %v1350_v43 = vmul.f32 %v1324_v22, %v2861_v32  ;;  %v2080_v21 = vpop.eup %2079  ;;  %v1260_v34 = vadd.f32 2.0, %v2078_v15 }
 0x243   : > { %v1349_v47 = vmul.f32 %v1322_v60, %v2864_v33  ;;  %v1259_v44 = vadd.f32 2.0, %v2080_v21  ;;  %v1477_v8 = vsel %vm1386_vm14, %v1476_v46, %v1475_v48 }
 0x244   : > { %v2904_v18 = vsel %vm1286_vm2, %v2861_v32, %v1350_v43  ;;  %v2943_v35 = vmul.f32 %v2078_v15, %v1260_v34 }
 0x245   : > { %v2910_v24 = vsel %vm1285_vm3, %v2864_v33, %v1349_v47  ;;  %v1588_v36 = vrot.slane %v2904_v18, 1  ;;  %v1536_v51 = vrot.slane %v2904_v18, 6  ;;  %v2917_v25 = vsel %vm1389_vm1, %v2904_v18, %v2831_v6 }
 0x246   : > { %v1444_v32 = vrot.slane %v2910_v24, 1  ;;  %v1553_v23 = vrot.slane %v2904_v18, 7  ;;  %v2932_v58 = vsel %vm1389_vm1, %v2910_v24, %v1426_v11  ;;  %v1461_v27 = vrot.slane %v2910_v24, 2 }
 0x247   : > { %v2924_v33 = vsel %vm1389_vm1, %v1588_v36, %v2825_v9  ;;  %v2928_v31 = vsel %vm1389_vm1, %v1536_v51, %v2828_v40  ;;  %v1493_v9 = vrot.slane %v2837_v29, 5  ;;  %v2953_v10 = vmul.f32 %v2080_v21, %v1259_v44 }
 0x248   : > { %v2935_v6 = vsel %vm1389_vm1, %v1444_v32, %v1443_v62  ;;  %v2939_v38 = vsel %vm1389_vm1, %v1553_v23, %v2834_v16  ;;  %v1460_v16 = vsel %vm1386_vm14, %v1459_v30, %v1458_v39  ;;  %v1409_v42 = vrot.slane %v2910_v24, 7  ;;  %v2082_v32 = vpop.eup %2081 }
 0x249   : > { %v1959_v40 = vpop.f32.mrb[6].mxu0  ;;  %v2959_v1 = vsel %vm1389_vm1, %v1461_v27, %v1460_v16  ;;  %v1494_v13 = vsel %vm1386_vm14, %v1493_v9, %v1492_v41  ;;  %v1495_v57 = vrot.slane %v2910_v24, 4  ;;  %v1308_v22 = vadd.f32 2.0, %v2943_v35  ;;  %v2084_v27 = vpop.eup %2083 }
 0x24a   : > { %v2948_v52 = vadd.f32 %v1959_v40, %v2811_v26  ;;  %v1152_v4 = vpop.f32.mrb[7].mxu0  ;;  %v2969_v60 = vsel %vm1389_vm1, %v1409_v42, %v1408_v54  ;;  %v1478_v29 = vrot.slane %v2910_v24, 3  ;;  %v1307_v2 = vadd.f32 2.0, %v2953_v10 }
 0x24b   : > { %v2956_v61 = vadd.f32 %v2811_v26, %v1152_v4  ;;  %v2976_v43 = vsel %vm1389_vm1, %v1495_v57, %v1494_v13  ;;  %v1605_v63 = vrot.slane %v2904_v18, 2  ;;  %v1511_v30 = vsel %vm1386_vm14, %v1510_v7, %v1509_v20 }
 0x24c   : > { %v1208_v55 = vmin.f32 %v2948_v52, 20.0  ;;  %v2986_v47 = vsel %vm1389_vm1, %v1478_v29, %v1477_v8  ;;  %v1512_v36 = vrot.slane %v2910_v24, 5  ;;  %v1639_v51 = vrot.slane %v2904_v18, 4 }
 0x24d   : > { %v1207_v49 = vmin.f32 %v2956_v61, 20.0  ;;  %v2991_v62 = vsel %vm1389_vm1, %v1605_v63, %v2841_v14  ;;  %v1622_v11 = vrot.slane %v2904_v18, 3  ;;  %v1656_v44 = vrot.slane %v2904_v18, 5 }
 0x24e   : > { %v1968_v19 = vpop.f32.mrb[4].mxu1  ;;  %v1231_v39 = vmul.f32 1.442695, %v1208_v55  ;;  %v2999_v14 = vsel %vm1389_vm1, %v1512_v36, %v1511_v30  ;;  %v3003_v9 = vsel %vm1389_vm1, %v1639_v51, %v2844_v5  ;;  %v1388_v18 = vrot.slane %v2910_v24, 6 }
 0x24f   : > { %v2973_v50 = vadd.f32 %v1968_v19, %v2811_v26  ;;  %v1182_v15 = vpop.f32.mrb[5].mxu1  ;;  %v1229_v41 = vmul.f32 1.442695, %v1207_v49  ;;  %v3007_v40 = vsel %vm1389_vm1, %v1622_v11, %v2851_v56  ;;  %v3011_v46 = vsel %vm1389_vm1, %v1656_v44, %v2854_v59 }
 0x250   : > { %v2981_v53 = vadd.f32 %v2811_v26, %v1182_v15  ;;  %2085 = vpow2.f32 %v1231_v39  ;;  %v3016_v20 = vsel %vm1389_vm1, %v1388_v18, %v2858_v0  ;;  %v1332_v16 = vmul.f32 %v2082_v32, %v2886_v17 }
 0x251   : > { %v1214_v48 = vmin.f32 %v2973_v50, 20.0  ;;  %2087 = vpow2.f32 %v1229_v41  ;;  %v1330_v7 = vmul.f32 %v2084_v27, %v2888_v37  ;;  %vm1288_vm13 = vcmp.gt.f32.partialorder %v2948_v52, 20.0 }
 0x252   : > { %v1213_v21 = vmin.f32 %v2981_v53, 20.0  ;;  %2089 = vrcp.f32 %v1308_v22  ;;  %v1354_v17 = vmul.f32 %v1332_v16, %v2869_v45  ;;  %vm1401_vm14 = vcmask 1046534  }
 0x253   : > { %v1243_v34 = vmul.f32 1.442695, %v1214_v48  ;;  %2091 = vrcp.f32 %v1307_v2  ;;  %vm1287_vm15 = vcmp.gt.f32.partialorder %v2956_v61, 20.0  ;;  %vm1294_vm0 = vcmp.gt.f32.partialorder %v2973_v50, 20.0 }
 0x254   : > { %v1241_v23 = vmul.f32 1.442695, %v1213_v21  ;;  %v1353_v21 = vmul.f32 %v1330_v7, %v2874_v12  ;;  %vm1293_vm1 = vcmp.gt.f32.partialorder %v2981_v53, 20.0 }
 0x255   : > { %2093 = vpow2.f32 %v1243_v34 }
 0x256   : > { %2095 = vpow2.f32 %v1241_v23  ;;  %v3046_v23 = vsel %vm1289_vm5, %v2874_v12, %v1353_v21  ;;  %vm1670_vm5 = vcmask 31744  }
 0x257   : > { %v1447_v18 = vrot.slane %v3046_v23, 7  ;;  %v1430_v16 = vrot.slane %v3046_v23, 6 }
 0x25a   : > { %v2086_v4 = vpop.eup %2085 }
 0x25b   : > { %v1971_v5 = vpop.f32.mrb[6].mxu1  ;;  %v2088_v54 = vpop.eup %2087  ;;  %v1256_v42 = vadd.f32 2.0, %v2086_v4 }
 0x25c   : > { %v3020_v55 = vadd.f32 %v1971_v5, %v2811_v26  ;;  %v1192_v56 = vpop.f32.mrb[7].mxu1  ;;  %v2090_v13 = vpop.eup %2089  ;;  %v1255_v57 = vadd.f32 2.0, %v2088_v54  ;;  %v1499_v5 = vrot.slane %v3046_v23, 2 }
 0x25d   : > { %v3023_v59 = vadd.f32 %v2811_v26, %v1192_v56  ;;  %v2092_v24 = vpop.eup %2091  ;;  %v1272_v0 = vmul.f32 %v2086_v4, %v1256_v42  ;;  %v1336_v15 = vmul.f32 %v2090_v13, %v2943_v35  ;;  %v3038_v35 = vsel %vm1290_vm4, %v2869_v45, %v1354_v17 }
 0x25e   : > { %v1216_v22 = vmin.f32 %v3020_v55, 20.0  ;;  %v1271_v19 = vmul.f32 %v2088_v54, %v1255_v57  ;;  %v1334_v26 = vmul.f32 %v2092_v24, %v2953_v10  ;;  %v1591_v45 = vrot.slane %v3038_v35, 7 }
 0x25f   : > { %v2094_v49 = vpop.eup %2093  ;;  %v1215_v8 = vmin.f32 %v3023_v59, 20.0  ;;  %v1304_v29 = vadd.f32 2.0, %v1272_v0  ;;  %v1356_v36 = vmul.f32 %v1336_v15, %v2879_v28  ;;  %v1540_v44 = vrot.slane %v3038_v35, 4 }
 0x260   : > { %v2096_v39 = vpop.eup %2095  ;;  %v1262_v2 = vadd.f32 2.0, %v2094_v49  ;;  %v1247_v41 = vmul.f32 1.442695, %v1216_v22  ;;  %v1303_v63 = vadd.f32 2.0, %v1271_v19  ;;  %v1355_v51 = vmul.f32 %v1334_v26, %v2882_v3 }
 0x261   : > { %v1261_v48 = vadd.f32 2.0, %v2096_v39  ;;  %v1245_v37 = vmul.f32 1.442695, %v1215_v8  ;;  %2097 = vrcp.f32 %v1304_v29  ;;  %v3051_v11 = vsel %vm1292_vm7, %v2879_v28, %v1356_v36 }
 0x262   : > { %v3032_v30 = vmul.f32 %v2094_v49, %v1262_v2  ;;  %2099 = vrcp.f32 %v1303_v63  ;;  %v1574_v27 = vrot.slane %v3038_v35, 6  ;;  %v3057_v12 = vsel %vm1291_vm9, %v2882_v3, %v1355_v51 }
 0x263   : > { %v3035_v34 = vmul.f32 %v2096_v39, %v1261_v48  ;;  %2101 = vpow2.f32 %v1247_v41  ;;  %v1557_v4 = vrot.slane %v3038_v35, 5  ;;  %v1413_v28 = vrot.slane %v3046_v23, 5 }
 0x264   : > { %v1310_v10 = vadd.f32 2.0, %v3032_v30  ;;  %2103 = vpow2.f32 %v1245_v37  ;;  %v1482_v54 = vrot.slane %v3046_v23, 1  ;;  %v1516_v42 = vrot.slane %v3046_v23, 3 }
 0x265   : > { %v1309_v32 = vadd.f32 2.0, %v3035_v34  ;;  %v1593_v56 = vrot.slane %v3051_v11, 6  ;;  %v1542_v7 = vrot.slane %v3051_v11, 3  ;;  %v1576_v22 = vrot.slane %v3051_v11, 5 }
 0x266   : > { %2105 = vrcp.f32 %v1310_v10  ;;  %v1449_v49 = vrot.slane %v3057_v12, 6  ;;  %v1559_v17 = vrot.slane %v3051_v11, 4  ;;  %v1432_v15 = vrot.slane %v3057_v12, 5 }
 0x267   : > { %2107 = vrcp.f32 %v1309_v32  ;;  %v1466_v29 = vrot.slane %v3057_v12, 7  ;;  %v1415_v26 = vrot.slane %v3057_v12, 4  ;;  %v1501_v63 = vrot.slane %v3057_v12, 1 }
 0x268   : > { %v1645_v57 = vrot.slane %v3051_v11, 1  ;;  %vm1296_vm2 = vcmp.gt.f32.partialorder %v3020_v55, 20.0  ;;  %vm1295_vm3 = vcmp.gt.f32.partialorder %v3023_v59, 20.0  ;;  %vm1404_vm4 = vcmask 1047559  }
 0x269   : > { %vm1672_vm7 = vcmask 64512   ;;  %vm1677_vm9 = vcmask 162816  }
 0x26b   : > { %v2098_v24 = vpop.eup %2097 }
 0x26c   : > { %v2100_v8 = vpop.eup %2099  ;;  %v1328_v39 = vmul.f32 %v2098_v24, %v1272_v0  ;;  %v1610_v0 = vrot.slane %v3051_v11, 7 }
 0x26d   : > { %v2102_v2 = vpop.eup %2101  ;;  %v1326_v41 = vmul.f32 %v2100_v8, %v1271_v19  ;;  %v1518_v19 = vrot.slane %v3057_v12, 2 }
 0x26e   : > { %v2104_v48 = vpop.eup %2103  ;;  %v1352_v37 = vmul.f32 %v1328_v39, %v2948_v52  ;;  %v1264_v21 = vadd.f32 2.0, %v2102_v2 }
 0x26f   : > { %v1351_v10 = vmul.f32 %v1326_v41, %v2956_v61  ;;  %v1263_v51 = vadd.f32 2.0, %v2104_v48 }
 0x270   : > { %v2106_v36 = vpop.eup %2105  ;;  %v3089_v24 = vsel %vm1288_vm13, %v2948_v52, %v1352_v37  ;;  %v3092_v39 = vmul.f32 %v2102_v2, %v1264_v21  ;;  %vm1684_vm13 = vcmask 293888  }
 0x271   : > { %v2108_v32 = vpop.eup %2107  ;;  %v1340_v8 = vmul.f32 %v2106_v36, %v3032_v30  ;;  %v3098_v41 = vsel %vm1287_vm15, %v2956_v61, %v1351_v10  ;;  %v3101_v3 = vmul.f32 %v2104_v48, %v1263_v51  ;;  %v1590_v52 = vsel %vm1392_vm8, %v3089_v24, %v2924_v33 }
 0x272   : > { %v1338_v13 = vmul.f32 %v2108_v32, %v3035_v34  ;;  %v1312_v30 = vadd.f32 2.0, %v3092_v39  ;;  %v1592_v2 = vsel %vm1395_vm11, %v1591_v45, %v1590_v52  ;;  %v1538_v21 = vrot.slane %v3089_v24, 5 }
 0x273   : > { %v1358_v37 = vmul.f32 %v1340_v8, %v2973_v50  ;;  %v1311_v61 = vadd.f32 2.0, %v3101_v3  ;;  %v1594_v34 = vsel %vm1398_vm12, %v1593_v56, %v1592_v2  ;;  %v1572_v48 = vrot.slane %v3089_v24, 7 }
 0x274   : > { %v1357_v36 = vmul.f32 %v1338_v13, %v2981_v53  ;;  %2109 = vrcp.f32 %v1312_v30  ;;  %v1539_v10 = vsel %vm1392_vm8, %v1538_v21, %v2928_v31  ;;  %v1446_v45 = vsel %vm1392_vm8, %v3098_v41, %v2935_v6 }
 0x275   : > { %v3117_v33 = vsel %vm1294_vm0, %v2973_v50, %v1358_v37  ;;  %2111 = vrcp.f32 %v1311_v61  ;;  %v1541_v50 = vsel %vm1395_vm11, %v1540_v44, %v1539_v10  ;;  %v1573_v32 = vsel %vm1392_vm8, %v1572_v48, %v2917_v25 }
 0x276   : > { %v3127_v13 = vsel %vm1293_vm1, %v2981_v53, %v1357_v36  ;;  %v1595_v56 = vrot.slane %v3117_v33, 5  ;;  %v1543_v51 = vsel %vm1398_vm12, %v1542_v7, %v1541_v50  ;;  %v1544_v31 = vrot.slane %v3117_v33, 2 }
 0x277   : > { %v1578_v6 = vrot.slane %v3117_v33, 4  ;;  %v1575_v53 = vsel %vm1395_vm11, %v1574_v27, %v1573_v32  ;;  %v1448_v44 = vsel %vm1395_vm11, %v1447_v18, %v1446_v45  ;;  %v1451_v7 = vrot.slane %v3127_v13, 5 }
 0x278   : > { %v3139_v8 = vsel %vm1401_vm14, %v1595_v56, %v1594_v34  ;;  %v3149_v52 = vsel %vm1401_vm14, %v1544_v31, %v1543_v51  ;;  %v1577_v25 = vsel %vm1398_vm12, %v1576_v22, %v1575_v53  ;;  %v1450_v37 = vsel %vm1398_vm12, %v1449_v49, %v1448_v44 }
 0x279   : > { %v1555_v30 = vrot.slane %v3089_v24, 6  ;;  %v1579_v2 = vsel %vm1401_vm14, %v1578_v6, %v1577_v25  ;;  %v3156_v21 = vsel %vm1401_vm14, %v1451_v7, %v1450_v37  ;;  %v1561_v27 = vrot.slane %v3117_v33, 3 }
 0x27a   : > { %v1428_v18 = vrot.slane %v3098_v41, 7  ;;  %v1434_v22 = vrot.slane %v3127_v13, 4  ;;  %v1463_v49 = vrot.slane %v3098_v41, 1  ;;  %v1468_v61 = vrot.slane %v3127_v13, 6 }
 0x27b   : > { %v1556_v36 = vsel %vm1392_vm8, %v1555_v30, %v2939_v38  ;;  %v1411_v10 = vrot.slane %v3098_v41, 6  ;;  %v1417_v45 = vrot.slane %v3127_v13, 3  ;;  %vm1688_vm15 = vcmask 359424  }
 0x27c   : > { %v1558_v34 = vsel %vm1395_vm11, %v1557_v4, %v1556_v36  ;;  %v1429_v48 = vsel %vm1392_vm8, %v1428_v18, %v2932_v58  ;;  %v1464_v50 = vsel %vm1392_vm8, %v1463_v49, %v2959_v1  ;;  %v1497_v4 = vrot.slane %v3098_v41, 3 }
 0x27d   : > { %v1560_v38 = vsel %vm1398_vm12, %v1559_v17, %v1558_v34  ;;  %v1431_v56 = vsel %vm1395_vm11, %v1430_v16, %v1429_v48  ;;  %v1465_v31 = vsel %vm1395_vm11, %v3046_v23, %v1464_v50  ;;  %v1412_v17 = vsel %vm1392_vm8, %v1411_v10, %v2969_v60 }
 0x27e   : > { %v1562_v58 = vsel %vm1401_vm14, %v1561_v27, %v1560_v38  ;;  %v1433_v51 = vsel %vm1398_vm12, %v1432_v15, %v1431_v56  ;;  %v2110_v32 = vpop.eup %2109  ;;  %v1467_v1 = vsel %vm1398_vm12, %v1466_v29, %v1465_v31  ;;  %v1414_v6 = vsel %vm1395_vm11, %v1413_v28, %v1412_v17 }
 0x27f   : > { %v1435_v16 = vsel %vm1401_vm14, %v1434_v22, %v1433_v51  ;;  %v1498_v15 = vsel %vm1392_vm8, %v1497_v4, %v2976_v43  ;;  %v2112_v53 = vpop.eup %2111  ;;  %v1344_v44 = vmul.f32 %v2110_v32, %v3092_v39  ;;  %v1469_v7 = vsel %vm1401_vm14, %v1468_v61, %v1467_v1 }
 0x280   : > { %v1416_v60 = vsel %vm1398_vm12, %v1415_v26, %v1414_v6  ;;  %v1500_v29 = vsel %vm1395_vm11, %v1499_v5, %v1498_v15  ;;  %v1342_v25 = vmul.f32 %v2112_v53, %v3101_v3  ;;  %v1480_v39 = vrot.slane %v3098_v41, 2 }
 0x281   : > { %v1418_v28 = vsel %vm1401_vm14, %v1417_v45, %v1416_v60  ;;  %v1502_v43 = vsel %vm1398_vm12, %v1501_v63, %v1500_v29  ;;  %v1360_v37 = vmul.f32 %v1344_v44, %v3020_v55  ;;  %v1485_v26 = vrot.slane %v3127_v13, 7 }
 0x282   : > { %v1503_v30 = vsel %vm1401_vm14, %v3127_v13, %v1502_v43  ;;  %v1607_v27 = vrot.slane %v3089_v24, 1  ;;  %v1359_v5 = vmul.f32 %v1342_v25, %v3023_v59  ;;  %v1481_v3 = vsel %vm1392_vm8, %v1480_v39, %v2986_v47 }
 0x283   : > { %v1612_v18 = vrot.slane %v3117_v33, 6  ;;  %v1514_v63 = vrot.slane %v3098_v41, 4  ;;  %v3227_v36 = vsel %vm1296_vm2, %v3020_v55, %v1360_v37  ;;  %v1483_v22 = vsel %vm1395_vm11, %v1482_v54, %v1481_v3 }
 0x284   : > { %v1608_v49 = vsel %vm1392_vm8, %v1607_v27, %v2991_v62  ;;  %v1520_v61 = vrot.slane %v3127_v13, 1  ;;  %v3238_v47 = vsel %vm1295_vm3, %v3023_v59, %v1359_v5  ;;  %v1597_v34 = vrot.slane %v3227_v36, 4 }
 0x285   : > { %v1546_v48 = vrot.slane %v3227_v36, 1  ;;  %v1580_v55 = vrot.slane %v3227_v36, 3  ;;  %v1453_v10 = vrot.slane %v3238_v47, 4  ;;  %v1563_v54 = vrot.slane %v3227_v36, 2 }
 0x286   : > { %v1436_v45 = vrot.slane %v3238_v47, 3  ;;  %v1470_v62 = vrot.slane %v3238_v47, 5  ;;  %v1598_v38 = vsel %vm1404_vm4, %v1597_v34, %v3139_v8  ;;  %v1419_v50 = vrot.slane %v3238_v47, 2 }
 0x287   : > { %v1547_v59 = vsel %vm1404_vm4, %v1546_v48, %v3149_v52  ;;  %v1581_v56 = vsel %vm1404_vm4, %v1580_v55, %v1579_v2  ;;  %1599 = vrot.lane.b32.xlu0 %v1598_v38, %s2162_s23  ;;  %v1454_v4 = vsel %vm1404_vm4, %v1453_v10, %v3156_v21  ;;  %v1564_v51 = vsel %vm1404_vm4, %v1563_v54, %v1562_v58 }
 0x288   : > { %1548 = vrot.lane.b32.xlu1 %v1547_v59, %s2163_s24  ;;  %v1437_v31 = vsel %vm1404_vm4, %v1436_v45, %v1435_v16  ;;  %v1504_v8 = vrot.slane %v3238_v47, 7  ;;  %v1471_v17 = vsel %vm1404_vm4, %v1470_v62, %v1469_v7  ;;  %v1420_v52 = vsel %vm1404_vm4, %v1419_v50, %v1418_v28 }
 0x289   : > { %v1484_v2 = vsel %vm1398_vm12, %v3057_v12, %v1483_v22  ;;  %v1487_v32 = vrot.slane %v3238_v47, 6  ;;  %v1609_v21 = vsel %vm1395_vm11, %v3038_v35, %v1608_v49  ;;  %v1614_v58 = vrot.slane %v3227_v36, 5 }
 0x28a   : > { %v1505_v1 = vsel %vm1404_vm4, %v1504_v8, %v1503_v30  ;;  %v1486_v6 = vsel %vm1401_vm14, %v1485_v26, %v1484_v2  ;;  %v1611_v15 = vsel %vm1398_vm12, %v1610_v0, %v1609_v21  ;;  %v1515_v53 = vsel %vm1392_vm8, %v1514_v63, %v2999_v14 }
 0x28b   : > { %v1488_v16 = vsel %vm1404_vm4, %v1487_v32, %v1486_v6  ;;  %v1641_v44 = vrot.slane %v3089_v24, 3  ;;  %1455 = vrot.lane.b32.xlu0 %v1454_v4, %s2156_s28  ;;  %v1613_v7 = vsel %vm1401_vm14, %v1612_v18, %v1611_v15  ;;  %v1517_v60 = vsel %vm1395_vm11, %v1516_v42, %v1515_v53  ;;  %s2167_s28 = smov 16  }
 0x28c   : > { %1582 = vrot.lane.b32.xlu1 %v1581_v56, %s2164_s25  ;;  %v1648_v29 = vrot.slane %v3227_v36, 7  ;;  %v1624_v25 = vrot.slane %v3089_v24, 2  ;;  %v1615_v0 = vsel %vm1404_vm4, %v1614_v58, %v1613_v7  ;;  %v1519_v14 = vsel %vm1398_vm12, %v1518_v19, %v1517_v60 }
 0x28d   : > { %v1642_v28 = vsel %vm1392_vm8, %v1641_v44, %v3003_v9  ;;  %v1629_v43 = vrot.slane %v3117_v33, 7  ;;  %v1521_v39 = vsel %vm1401_vm14, %v1520_v61, %v1519_v14  ;;  %v3362_v37 = vrot.slane %v3038_v35, 2 }
 0x28e   : > { %v1625_v30 = vsel %vm1392_vm8, %v1624_v25, %v3007_v40  ;;  %v1631_v26 = vrot.slane %v3227_v36, 6  ;;  %v1522_v27 = vsel %vm1404_vm4, %v3238_v47, %v1521_v39  ;;  %v3363_v19 = vrot.slane %v3038_v35, 1 }
 0x28f   : > { %v1644_v42 = vsel %vm1395_vm11, %v3362_v37, %v1642_v28  ;;  %v1658_v3 = vrot.slane %v3089_v24, 4  ;;  %1565 = vrot.lane.b32.xlu0 %v1564_v51, %s2165_s26  ;;  %v1664_v63 = vrot.slane %v3117_v33, 1  ;;  %v1662_v61 = vrot.slane %v3051_v11, 2 }
 0x290   : > { %v1646_v9 = vsel %vm1398_vm12, %v1645_v57, %v1644_v42  ;;  %v1627_v5 = vsel %vm1395_vm11, %v3363_v19, %v1625_v30  ;;  %1438 = vrot.lane.b32.xlu1 %v1437_v31, %s2166_s27  ;;  %v1391_v57 = vrot.slane %v3098_v41, 5  ;;  %v3364_v48 = vrot.slane %v3038_v35, 3 }
 0x291   : > { %v1647_v40 = vsel %vm1401_vm14, %v3117_v33, %v1646_v9  ;;  %v1628_v18 = vsel %vm1398_vm12, %v3051_v11, %v1627_v5  ;;  %v1659_v24 = vsel %vm1392_vm8, %v1658_v3, %v3011_v46  ;;  %v1394_v10 = vrot.slane %v3046_v23, 4 }
 0x292   : > { %v1649_v22 = vsel %vm1404_vm4, %v1648_v29, %v1647_v40  ;;  %v1630_v49 = vsel %vm1401_vm14, %v1629_v43, %v1628_v18  ;;  %v1661_v55 = vsel %vm1395_vm11, %v3364_v48, %v1659_v24  ;;  %v1400_v33 = vrot.slane %v3127_v13, 2 }
 0x293   : > { %v1632_v34 = vsel %vm1404_vm4, %v1631_v26, %v1630_v49  ;;  %v1663_v41 = vsel %vm1398_vm12, %v1662_v61, %v1661_v55  ;;  %v1397_v54 = vrot.slane %v3057_v12, 3  ;;  %v1403_v45 = vrot.slane %v3238_v47, 1  ;;  %1421 = vrot.lane.b32.xlu0 %v1420_v52, %s2168_s29 }
 0x294   : > { %v1393_v46 = vsel %vm1392_vm8, %v1391_v57, %v3016_v20  ;;  %1472 = vrot.lane.b32.xlu1 %v1471_v17, %s2167_s28  ;;  %v1665_v35 = vsel %vm1401_vm14, %v1664_v63, %v1663_v41  ;;  %vm1675_vm8 = vcmask 130048   ;;  %vm1692_vm0 = vcmask 424960  }
 0x295   : > { %v1396_v11 = vsel %vm1395_vm11, %v1394_v10, %v1393_v46  ;;  %v1666_v23 = vsel %vm1404_vm4, %v3227_v36, %v1665_v35  ;;  %vm1680_vm11 = vcmask 228352   ;;  %vm1694_vm1 = vcmask 457728  }
 0x296   : > { %v1399_v13 = vsel %vm1398_vm12, %v1397_v54, %v1396_v11  ;;  %vm1682_vm12 = vcmask 261120   ;;  %vm1696_vm2 = vcmask 490496  }
 0x297   : > { %v1402_v12 = vsel %vm1401_vm14, %v1400_v33, %v1399_v13  ;;  %1489 = vrot.lane.b32.xlu0 %v1488_v16, %s2169_s30  ;;  %vm1686_vm14 = vcmask 326656  }
 0x298   : > { %v1405_v47 = vsel %vm1404_vm4, %v1403_v45, %v1402_v12  ;;  %1506 = vrot.lane.b32.xlu1 %v1505_v1, %s2161_s20  ;;  %s190_s20 = scalar_lea.vmem %s3361_s3, %s1797_s11 }
 0x29b   : > { %1523 = vrot.lane.b32.xlu0 %v1522_v27, %s2171_s5 }
 0x29c   : > { %1616 = vrot.lane.b32.xlu1 %v1615_v0, %s2170_s4 }
 0x29f   : > { %1633 = vrot.lane.b32.xlu0 %v1632_v34, %s2173_s7 }
 0x2a0   : > { %1650 = vrot.lane.b32.xlu1 %v1649_v22, %s2172_s6 }
 0x2a3   : > { %1667 = vrot.lane.b32.xlu0 %v1666_v23, %s2174_s8 }
 0x2f9   : > { %v1600_v20 = vpop.permute.xlu0 %1599 }
 0x2fa   : > { %v1549_v36 = vpop.permute.xlu1 %1548 }
 0x2fd   : > { %v1456_v38 = vpop.permute.xlu0 %1455 }
 0x2fe   : > { %v1583_v62 = vpop.permute.xlu1 %1582 }
 0x301   : > { %v1566_v59 = vpop.permute.xlu0 %1565 }
 0x302   : > { %v1439_v56 = vpop.permute.xlu1 %1438 }
 0x305   : > { %v1422_v4 = vpop.permute.xlu0 %1421 }
 0x306   : > { %v1473_v50 = vpop.permute.xlu1 %1472  ;;  %v1671_v51 = vsel %vm1670_vm5, %v1405_v47, %v1422_v4 }
 0x307   : > { %v1673_v31 = vsel %vm1672_vm7, %v1671_v51, %v1439_v56 }
 0x308   : > { %v1674_v8 = vsel %vm907_vm6, %v1673_v31, %v1456_v38  ;;  %vm1690_vm6 = vcmask 392192  }
 0x309   : > { %v1490_v52 = vpop.permute.xlu0 %1489  ;;  %v1676_v2 = vsel %vm1675_vm8, %v1674_v8, %v1473_v50 }
 0x30a   : > { %v1507_v17 = vpop.permute.xlu1 %1506  ;;  %v1678_v32 = vsel %vm1677_vm9, %v1676_v2, %v1490_v52 }
 0x30b   : > { %v1679_v6 = vsel %vm975_vm10, %v1678_v32, %v1507_v17  ;;  %vm1698_vm10 = vcmask 523264  }
 0x30d   : > { %v1524_v1 = vpop.permute.xlu0 %1523 }
 0x30e   : > { %v1617_v21 = vpop.permute.xlu1 %1616  ;;  %v1681_v58 = vsel %vm1680_vm11, %v1679_v6, %v1524_v1 }
 0x30f   : > { %v1683_v16 = vsel %vm1682_vm12, %v1681_v58, %v1549_v36 }
 0x310   : > { %v1685_v15 = vsel %vm1684_vm13, %v1683_v16, %v1566_v59 }
 0x311   : > { %v1634_v53 = vpop.permute.xlu0 %1633  ;;  %v1687_v44 = vsel %vm1686_vm14, %v1685_v15, %v1583_v62 }
 0x312   : > { %v1689_v7 = vsel %vm1688_vm15, %v1687_v44, %v1600_v20  ;;  %v1651_v29 = vpop.permute.xlu1 %1650 }
 0x313   : > { %v1691_v60 = vsel %vm1690_vm6, %v1689_v7, %v1617_v21 }
 0x314   : > { %v1693_v25 = vsel %vm1692_vm0, %v1691_v60, %v1634_v53 }
 0x315   : > { %v1668_v0 = vpop.permute.xlu0 %1667  ;;  %v1695_v14 = vsel %vm1694_vm1, %v1693_v25, %v1651_v29 }
 0x316   : > { %v1697_v28 = vsel %vm1696_vm2, %v1695_v14, %v1668_v0 }
 0x317   : > { %1699 = vst.msk [vmem:[%s190_s20] sm:$0xff] %vm1698_vm10, %v1697_v28 }
 0x318 PF: > { %s13_s16 = sadd.s32 1, %s2151_s16   ;;  %s3365_s12 = smov %s2143_s14 }
 0x319   : > { %p10_p7 = scmp.ge.s32.totalorder %s13_s16, 6   ;;  %s3366_s13 = smov %s2147_s15 }
 0x31a   : > { %s3367_s14 = smov %s3370_s17  ;;  %s3368_s15 = smov %s3374_s18 }
 0x31b   :  { %12 = sbr.rel (!%p10_p7) target bundleno = 3 (0x3), region = 65 }

// kernel: stem_forward.6
= control target key start
LH: loop header
LB: loop body
LE: loop exit
PB: predicated region body
PF: predicated region fallthrough
CT: control target
= control target key end

     0   :  { %s1335_s12 = smov 0   ;;  %s1337_s13 = smov 0   ;;  %s1831_s0 = inlined_call_operand.vmem [shape: f32[2,4,9,9,4], index: 0, kind: input, shape index: {}]   ;;  %s1832_s1 = inlined_call_operand.vmem [shape: f32[36,8], index: 1, kind: input, shape index: {}]   ;;  %s1833_s2 = inlined_call_operand.vmem [shape: f32[1,8], index: 2, kind: input, shape index: {}]   ;;  %s1834_s3 = inlined_call_operand.vmem [shape: f32[2,8,64], index: 3, kind: output, shape index: {}]  }
   0x1   :  { %s1339_s14 = smov 0  }
   0x2 LB: > { %s25_s15 = sadd.s32 1, %s1298_s13  ;;  %p1092_p0 = scmp.ge.s32.totalorder %s1302_s14, 1  ;;  %s1302_s14 = sphi %s1339_s14, %s13_s14   ;;  %s1298_s13 = sphi %s1337_s13, %s1836_s13   ;;  %s1294_s12 = sphi %s1335_s12, %s1835_s12  }
   0x3   : > { %p27_p1 = scmp.ge.s32.totalorder %s25_s15, 2  ;;  %p151_p2 = scmp.lt.s32.totalorder %s1302_s14, 3 }
   0x5   : > { %s1838_s15 = smov (%p27_p1, %s25_s15), 0  ;;  %p152_p3 = pnand %p1092_p0, %p151_p2 }
   0x6   : > { %p177_p4 = scmp.lt.s32.totalorder (!%p152_p3), %s1294_s12, 1  ;;  %s1304_s20 = smov (!%p152_p3), 8   ;;  %v603_v23 = vld [vmem:[%s1832_s1] sm:$0xff] (!%p152_p3)  ;;  %v604_v24 = vld [vmem:[%s1832_s1 + $0x8] sm:$0xff] (!%p152_p3)  ;;  %v605_v28 = vld [vmem:[%s1832_s1 + $0x10] sm:$0xff] (!%p152_p3)  ;;  %vm640_vm0 = vcmask (!%p152_p3), 1043456  }
   0x7   : > { %155 = sbr.rel (%p152_p3) target bundleno = 647 (0x287), region = 32  ;;  %s1305_s21 = smov (!%p152_p3), 4   ;;  %v1198_v25 = vpack.c.bf16 (!%p152_p3), %v604_v24, %v603_v23  ;;  %v606_v29 = vld [vmem:[%s1832_s1 + $0x18] sm:$0xff] (!%p152_p3)  ;;  %v607_v32 = vld [vmem:[%s1832_s1 + $0x20] sm:$0xf] (!%p152_p3)  ;;  %vm531_vm1 = vcmask (!%p152_p3), 31744  }
   0x8   : > { %s1306_s22 = smov (!%p152_p3), 12   ;;  %s1307_s23 = smov (!%p152_p3), 16   ;;  %v1202_v30 = vpack.c.bf16 (!%p152_p3), %v606_v29, %v605_v28  ;;  %vm540_vm2 = vcmask (!%p152_p3), 64512   ;;  %vm549_vm3 = vcmask (!%p152_p3), 97280   ;;  %vm558_vm4 = vcmask (!%p152_p3), 130048  }
   0x9   : > { %s1308_s24 = smov (!%p152_p3), 20   ;;  %s1309_s25 = smov (!%p152_p3), 24   ;;  %1199 = vmatprep.subr.bf16.mxu0 (!%p152_p3), %v1198_v25  ;;  %1206 = vmatprep.subr.bf16.mxu1 (!%p152_p3), %v1198_v25  ;;  %vm567_vm5 = vcmask (!%p152_p3), 162816   ;;  %vm576_vm6 = vcmask (!%p152_p3), 195584   ;;  %vm585_vm7 = vcmask (!%p152_p3), 228352   ;;  %vm594_vm8 = vcmask (!%p152_p3), 261120  }
   0xa   : > { %s1310_s30 = smov (!%p152_p3), 28   ;;  %1201 = vmatpush3.bf16.msra.mxu0 (!%p152_p3), %v1198_v25  ;;  %1209 = vmatpush3.bf16.msra.mxu1 (!%p152_p3), %v1198_v25  ;;  %s1311_s10 = smov (!%p152_p3), 32   ;;  %vm615_vm9 = vcmask (!%p152_p3), 293888   ;;  %vm846_vm12 = vcmask (!%p152_p3), 1041409   ;;  %vm849_vm13 = vcmask (!%p152_p3), 1042434   ;;  %vm852_vm15 = vcmask (!%p152_p3), 1043459  }
   0xb   : > { %1203 = vmatprep.subr.bf16.mxu0 (!%p152_p3), %v1202_v30  ;;  %1207 = vmatprep.subr.bf16.mxu1 (!%p152_p3), %v1202_v30  ;;  %s1312_s17 = smov (!%p152_p3), 48   ;;  %s1313_s18 = smov (!%p152_p3), 40  }
   0xe   : > { %s1840_s12 = smov (!%p177_p4, %s1294_s12), 1  ;;  %1205 = vmatpush3.bf16.msra.mxu0 %v1202_v30  ;;  %1210 = vmatpush3.bf16.msra.mxu1 %v1202_v30 }
   0xf   : > { %s1212_s16 = smul.u32 576, %s1840_s12  ;;  %1184 = vmatprep.subr.msk.mxu0 %vm640_vm0, %v607_v32  ;;  %1208 = vmatprep.subr.msk.mxu1 %vm640_vm0, %v607_v32 }
  0x11   : > { %s1359_s19 = scalar_lea.vmem %s1831_s0, %s1212_s16 }
  0x12   : > { %v210_v0 = vld [vmem:[%s1359_s19 + $0x1] sm:$0xff]  ;;  %v1095_v1 = vld [vmem:[%s1359_s19 + $0x90] sm:$0xff]  ;;  %1185 = vmatpush3.msk.msra.mxu0 %vm640_vm0, %v607_v32  ;;  %1211 = vmatpush3.msk.msra.mxu1 %vm640_vm0, %v607_v32 }
  0x13   : > { %315 = vrot.lane.b32.xlu1 %v210_v0, %s1304_s20  ;;  %283 = vrot.lane.b32.xlu0 %v1095_v1, %s1305_s21  ;;  %v1366_v2 = vld [vmem:[%s1359_s19 + $0x11] sm:$0xff]  ;;  %v1096_v3 = vld [vmem:[%s1359_s19 + $0xa0] sm:$0xff] }
  0x14   : > { %v1104_v4 = vld [vmem:[%s1359_s19 + $0x130] sm:$0xff]  ;;  %v1103_v5 = vld [vmem:[%s1359_s19 + $0x120] sm:$0xff] }
  0x15   : > { %v1097_v6 = vld [vmem:[%s1359_s19 + $0xb0] sm:$0xff]  ;;  %v1112_v8 = vld [vmem:[%s1359_s19 + $0x1c0] sm:$0xff] }
  0x16   : > { %v1111_v7 = vld [vmem:[%s1359_s19 + $0x1b0] sm:$0xff]  ;;  %v1388_v10 = vld [vmem:[%s1359_s19 + $0xc0] sm:$0xff] }
  0x17   : > { %317 = vrot.lane.b32.xlu1 %v1366_v2, %s1304_s20  ;;  %285 = vrot.lane.b32.xlu0 %v1096_v3, %s1305_s21  ;;  %v1382_v9 = vld [vmem:[%s1359_s19 + $0xd0] sm:$0xff]  ;;  %v1119_v11 = vld [vmem:[%s1359_s19 + $0x121] sm:$0xff] }
  0x18   : > { %v1395_v12 = vld [vmem:[%s1359_s19 + $0x21] sm:$0xff]  ;;  %v1120_v14 = vld [vmem:[%s1359_s19 + $0x131] sm:$0xff] }
  0x19   : > { %v1398_v13 = vld [vmem:[%s1359_s19 + $0xe0] sm:$0xff]  ;;  %v1412_v16 = vld [vmem:[%s1359_s19 + $0x31] sm:$0xff] }
  0x1a   : > { %v1406_v15 = vld [vmem:[%s1359_s19 + $0x41] sm:$0xff]  ;;  %v1415_v17 = vld [vmem:[%s1359_s19 + $0x10] sm:$0xff] }
  0x1b   : > { %349 = vrot.lane.b32.xlu1 %v1104_v4, %s1306_s22  ;;  %347 = vrot.lane.b32.xlu0 %v1103_v5, %s1306_s22  ;;  %v1105_v18 = vld [vmem:[%s1359_s19 + $0x140] sm:$0xff]  ;;  %v1423_v19 = vld [vmem:[%s1359_s19 + $0x51] sm:$0xff] }
  0x1c   : > { %v1429_v20 = vld [vmem:[%s1359_s19 + $0x20] sm:$0xff]  ;;  %v1106_v22 = vld [vmem:[%s1359_s19 + $0x150] sm:$0xff] }
  0x1d   : > { %v1107_v21 = vld [vmem:[%s1359_s19 + $0x160] sm:$0xff]  ;;  %v1113_v26 = vld [vmem:[%s1359_s19 + $0x1d0] sm:$0xff] }
  0x1e   : > { %v1108_v27 = vld [vmem:[%s1359_s19 + $0x170] sm:$0xff]  ;;  %v1116_v34 = vld [vmem:[%s1359_s19 + $0x200] sm:$0xff] }
  0x1f   : > { %287 = vrot.lane.b32.xlu1 %v1097_v6, %s1305_s21  ;;  %379 = vrot.lane.b32.xlu0 %v1111_v7, %s1307_s23  ;;  %v1115_v31 = vld [vmem:[%s1359_s19 + $0x1f0] sm:$0xff]  ;;  %v1114_v35 = vld [vmem:[%s1359_s19 + $0x1e0] sm:$0xff] }
  0x20   : > { %v1101_v33 = vld [vmem:[%s1359_s19 + $0xf0] sm:$0xff]  ;;  %v1123_v36 = vld [vmem:[%s1359_s19 + $0x161] sm:$0xff] }
  0x21   : > { %v1121_v37 = vld [vmem:[%s1359_s19 + $0x141] sm:$0xff]  ;;  %v1122_v39 = vld [vmem:[%s1359_s19 + $0x151] sm:$0xff] }
  0x22   : > { %v1102_v38 = vld [vmem:[%s1359_s19 + $0x100] sm:$0xff]  ;;  %v1129_v41 = vld [vmem:[%s1359_s19 + $0x30] sm:$0xff] }
  0x23   : > { %381 = vrot.lane.b32.xlu1 %v1112_v8, %s1307_s23  ;;  %291 = vrot.lane.b32.xlu0 %v1382_v9, %s1305_s21  ;;  %v216_v40 = vld [vmem:[%s1359_s19 + $0x61] sm:$0xff]  ;;  %v1124_v42 = vld [vmem:[%s1359_s19 + $0x171] sm:$0xff] }
  0x24   : > { %v217_v43 = vld [vmem:[%s1359_s19 + $0x71] sm:$0xff]  ;;  %v1130_v45 = vld [vmem:[%s1359_s19 + $0x40] sm:$0xff] }
  0x25   : > { %v1131_v44 = vld [vmem:[%s1359_s19 + $0x50] sm:$0xff]  ;;  %v1109_v46 = vld [vmem:[%s1359_s19 + $0x180] sm:$0xff] }
  0x26   : > { %v1493_v47 = vld [vmem:[%s1359_s19 + $0x60] sm:$0xff]  ;;  %v1110_v48 = vld [vmem:[%s1359_s19 + $0x190] sm:$0xff] }
  0x27   : > { %289 = vrot.lane.b32.xlu1 %v1388_v10, %s1305_s21  ;;  %411 = vrot.lane.b32.xlu0 %v1119_v11, %s1308_s24  ;;  %v1117_v49 = vld [vmem:[%s1359_s19 + $0x210] sm:$0xff]  ;;  %v1118_v50 = vld [vmem:[%s1359_s19 + $0x220] sm:$0xff] }
  0x28   : > { %v1125_v51 = vld [vmem:[%s1359_s19 + $0x181] sm:$0xff]  ;;  %v1126_v52 = vld [vmem:[%s1359_s19 + $0x191] sm:$0xff] }
  0x29   : > { %v1134_v53 = vld [vmem:[%s1359_s19 + $0x80] sm:$0xff]  ;;  %v1523_v54 = vld [vmem:[%s1359_s19 + $0x70] sm:$0xff] }
  0x2a   : > { %v1142_v57 = vld [vmem:[%s1359_s19 + $0x110] sm:$0xff]  ;;  %v1150_v60 = vld [vmem:[%s1359_s19 + $0x81] sm:$0xff] }
  0x2b   : > { %319 = vrot.lane.b32.xlu1 %v1395_v12, %s1304_s20  ;;  %293 = vrot.lane.b32.xlu0 %v1398_v13, %s1305_s21 }
  0x2f   : > { %413 = vrot.lane.b32.xlu1 %v1120_v14, %s1308_s24  ;;  %323 = vrot.lane.b32.xlu0 %v1406_v15, %s1304_s20 }
  0x33   : > { %321 = vrot.lane.b32.xlu1 %v1412_v16, %s1304_s20  ;;  %443 = vrot.lane.b32.xlu0 %v1415_v17, %s1309_s25 }
  0x37   : > { %351 = vrot.lane.b32.xlu1 %v1105_v18, %s1306_s22  ;;  %325 = vrot.lane.b32.xlu0 %v1423_v19, %s1304_s20 }
  0x3b   : > { %445 = vrot.lane.b32.xlu1 %v1429_v20, %s1309_s25  ;;  %355 = vrot.lane.b32.xlu0 %v1107_v21, %s1306_s22 }
  0x3f   : > { %353 = vrot.lane.b32.xlu1 %v1106_v22, %s1306_s22  ;;  %475 = vrot.lane.b32.xlu0 %v1096_v3, %s1310_s30 }
  0x43   : > { %383 = vrot.lane.b32.xlu1 %v1113_v26, %s1307_s23  ;;  %357 = vrot.lane.b32.xlu0 %v1108_v27, %s1306_s22  ;;  %v192_v26 = vld [vmem:[%s1359_s19] sm:$0xff]  ;;  %s1314_s19 = smov 56  }
  0x47   : > { %477 = vrot.lane.b32.xlu1 %v1097_v6, %s1310_s30  ;;  %387 = vrot.lane.b32.xlu0 %v1115_v31, %s1307_s23 }
  0x4b   : > { %295 = vrot.lane.b32.xlu1 %v1101_v33, %s1305_s21  ;;  %507 = vrot.lane.b32.xlu0 %v1366_v2, %s1311_s10 }
  0x4f   : > { %389 = vrot.lane.b32.xlu1 %v1116_v34, %s1307_s23  ;;  %385 = vrot.lane.b32.xlu0 %v1114_v35, %s1307_s23 }
  0x53   : > { %419 = vrot.lane.b32.xlu1 %v1123_v36, %s1308_s24  ;;  %415 = vrot.lane.b32.xlu0 %v1121_v37, %s1308_s24 }
  0x57   : > { %297 = vrot.lane.b32.xlu1 %v1102_v38, %s1305_s21  ;;  %509 = vrot.lane.b32.xlu0 %v1395_v12, %s1311_s10 }
  0x5b   : > { %417 = vrot.lane.b32.xlu1 %v1122_v39, %s1308_s24  ;;  %327 = vrot.lane.b32.xlu0 %v216_v40, %s1304_s20 }
  0x5f   : > { %447 = vrot.lane.b32.xlu1 %v1129_v41, %s1309_s25  ;;  %421 = vrot.lane.b32.xlu0 %v1124_v42, %s1308_s24 }
  0x63   : > { %329 = vrot.lane.b32.xlu1 %v217_v43, %s1304_s20  ;;  %451 = vrot.lane.b32.xlu0 %v1131_v44, %s1309_s25 }
  0x67   : > { %449 = vrot.lane.b32.xlu1 %v1130_v45, %s1309_s25  ;;  %359 = vrot.lane.b32.xlu0 %v1109_v46, %s1306_s22 }
  0x6b   : > { %479 = vrot.lane.b32.xlu1 %v1388_v10, %s1310_s30  ;;  %453 = vrot.lane.b32.xlu0 %v1493_v47, %s1309_s25 }
  0x6f   : > { %361 = vrot.lane.b32.xlu1 %v1110_v48, %s1306_s22  ;;  %483 = vrot.lane.b32.xlu0 %v1398_v13, %s1310_s30 }
  0x73   : > { %481 = vrot.lane.b32.xlu1 %v1382_v9, %s1310_s30  ;;  %391 = vrot.lane.b32.xlu0 %v1117_v49, %s1307_s23 }
  0x77   : > { %511 = vrot.lane.b32.xlu1 %v1412_v16, %s1311_s10  ;;  %485 = vrot.lane.b32.xlu0 %v1101_v33, %s1310_s30 }
  0x7b   : > { %393 = vrot.lane.b32.xlu1 %v1118_v50, %s1307_s23  ;;  %515 = vrot.lane.b32.xlu0 %v1423_v19, %s1311_s10 }
  0x7f   : > { %513 = vrot.lane.b32.xlu1 %v1406_v15, %s1311_s10  ;;  %423 = vrot.lane.b32.xlu0 %v1125_v51, %s1308_s24 }
  0x83   : > { %425 = vrot.lane.b32.xlu1 %v1126_v52, %s1308_s24  ;;  %517 = vrot.lane.b32.xlu0 %v216_v40, %s1311_s10 }
  0x85   : > { %v316_v55 = vpop.permute.xlu1 %315  ;;  %v284_v56 = vpop.permute.xlu0 %283 }
  0x86   : > { %v532_v27 = vsel %vm531_vm1, %v192_v26, %v284_v56 }
  0x87   : > { %457 = vrot.lane.b32.xlu1 %v1134_v53, %s1309_s25  ;;  %455 = vrot.lane.b32.xlu0 %v1523_v54, %s1309_s25  ;;  %v541_v30 = vsel %vm540_vm2, %v532_v27, %v316_v55 }
  0x89   : > { %v1529_v58 = vpop.permute.xlu1 %317  ;;  %v286_v59 = vpop.permute.xlu0 %285 }
  0x8b   : > { %489 = vrot.lane.b32.xlu1 %v1142_v57, %s1310_s30  ;;  %487 = vrot.lane.b32.xlu0 %v1102_v38, %s1310_s30 }
  0x8d   : > { %v350_v61 = vpop.permute.xlu1 %349  ;;  %v348_v62 = vpop.permute.xlu0 %347 }
  0x8e   : > { %v550_v31 = vsel %vm549_vm3, %v541_v30, %v348_v62 }
  0x8f   : > { %521 = vrot.lane.b32.xlu1 %v1150_v60, %s1311_s10  ;;  %519 = vrot.lane.b32.xlu0 %v217_v43, %s1311_s10 }
  0x91   : > { %v288_v63 = vpop.permute.xlu1 %287  ;;  %v380_v0 = vpop.permute.xlu0 %379 }
  0x92   : > { %v534_v7 = vsel %vm531_vm1, %v1429_v20, %v288_v63  ;;  %v559_v34 = vsel %vm558_vm4, %v550_v31, %v380_v0 }
  0x95   : > { %v382_v1 = vpop.permute.xlu1 %381  ;;  %v292_v2 = vpop.permute.xlu0 %291 }
  0x96   : > { %v536_v3 = vsel %vm531_vm1, %v1130_v45, %v292_v2 }
  0x99   : > { %v290_v4 = vpop.permute.xlu1 %289  ;;  %v412_v5 = vpop.permute.xlu0 %411 }
  0x9a   : > { %v535_v6 = vsel %vm531_vm1, %v1129_v41, %v290_v4  ;;  %v568_v35 = vsel %vm567_vm5, %v559_v34, %v412_v5  ;;  %v533_v41 = vsel %vm531_vm1, %v1415_v17, %v286_v59 }
  0x9d   : > { %v320_v8 = vpop.permute.xlu1 %319  ;;  %v294_v9 = vpop.permute.xlu0 %293 }
  0x9e   : > { %v1541_v10 = vsel %vm540_vm2, %v534_v7, %v320_v8  ;;  %v537_v11 = vsel %vm531_vm1, %v1131_v44, %v294_v9  ;;  %v542_v44 = vsel %vm540_vm2, %v533_v41, %v1529_v58 }
  0x9f   : > { %v551_v45 = vsel %vm549_vm3, %v542_v44, %v350_v61 }
  0xa0   : > { %v560_v49 = vsel %vm558_vm4, %v551_v45, %v382_v1 }
  0xa1   : > { %v414_v12 = vpop.permute.xlu1 %413  ;;  %v324_v13 = vpop.permute.xlu0 %323 }
  0xa2   : > { %v1545_v14 = vsel %vm540_vm2, %v536_v3, %v324_v13  ;;  %v569_v50 = vsel %vm567_vm5, %v560_v49, %v414_v12 }
  0xa5   : > { %v322_v15 = vpop.permute.xlu1 %321  ;;  %v444_v16 = vpop.permute.xlu0 %443 }
  0xa6   : > { %v1548_v18 = vsel %vm540_vm2, %v535_v6, %v322_v15  ;;  %v577_v36 = vsel %vm576_vm6, %v568_v35, %v444_v16 }
  0xa9   : > { %v352_v19 = vpop.permute.xlu1 %351  ;;  %v326_v20 = vpop.permute.xlu0 %325 }
  0xaa   : > { %v1551_v21 = vsel %vm540_vm2, %v537_v11, %v326_v20  ;;  %v552_v4 = vsel %vm549_vm3, %v1541_v10, %v352_v19 }
  0xad   : > { %v446_v22 = vpop.permute.xlu1 %445  ;;  %v356_v23 = vpop.permute.xlu0 %355 }
  0xae   : > { %v578_v51 = vsel %vm576_vm6, %v569_v50, %v446_v22  ;;  %v554_v11 = vsel %vm549_vm3, %v1545_v14, %v356_v23 }
  0xb1   : > { %v1553_v24 = vpop.permute.xlu1 %353  ;;  %v476_v25 = vpop.permute.xlu0 %475 }
  0xb2   : > { %v586_v37 = vsel %vm585_vm7, %v577_v36, %v476_v25  ;;  %v553_v22 = vsel %vm549_vm3, %v1548_v18, %v1553_v24 }
  0xb5   : > { %v384_v28 = vpop.permute.xlu1 %383  ;;  %v1557_v29 = vpop.permute.xlu0 %357 }
  0xb6   : > { %v561_v7 = vsel %vm558_vm4, %v552_v4, %v384_v28  ;;  %v555_v31 = vsel %vm549_vm3, %v1551_v21, %v1557_v29 }
  0xb9   : > { %v478_v32 = vpop.permute.xlu1 %477  ;;  %v388_v33 = vpop.permute.xlu0 %387 }
  0xba   : > { %v587_v52 = vsel %vm585_vm7, %v578_v51, %v478_v32  ;;  %v563_v16 = vsel %vm558_vm4, %v554_v11, %v388_v33 }
  0xbd   : > { %v1565_v38 = vpop.permute.xlu1 %295  ;;  %v508_v39 = vpop.permute.xlu0 %507 }
  0xbe   : > { %v595_v40 = vsel %vm594_vm8, %v586_v37, %v508_v39 }
  0xbf   : > { %1186 = vmatprep.mubr.msk.f32.mxu0 %vm615_vm9, %v595_v40 }
  0xc1   : > { %v390_v42 = vpop.permute.xlu1 %389  ;;  %v386_v43 = vpop.permute.xlu0 %385 }
  0xc2   : > { %v562_v26 = vsel %vm558_vm4, %v553_v22, %v386_v43  ;;  %v564_v33 = vsel %vm558_vm4, %v555_v31, %v390_v42  ;;  %v538_v42 = vsel %vm531_vm1, %v1493_v47, %v1565_v38 }
  0xc5   : > { %v420_v46 = vpop.permute.xlu1 %419  ;;  %v416_v48 = vpop.permute.xlu0 %415 }
  0xc6   : > { %v570_v8 = vsel %vm567_vm5, %v561_v7, %v416_v48  ;;  %v572_v10 = vsel %vm567_vm5, %v563_v16, %v420_v46 }
  0xc9   : > { %v298_v53 = vpop.permute.xlu1 %297  ;;  %v510_v55 = vpop.permute.xlu0 %509 }
  0xca   : > { %v596_v17 = vsel %vm594_vm8, %v587_v52, %v510_v55  ;;  %v539_v43 = vsel %vm531_vm1, %v1523_v54, %v298_v53 }
  0xcb   : > { %1187 = vmatmul.mubr.msk.f32.vlgmr.msra.gmra.mrb[0].mxu0 %vm615_vm9, %v596_v17 }
  0xcd   : > { %v418_v56 = vpop.permute.xlu1 %417  ;;  %v328_v57 = vpop.permute.xlu0 %327 }
  0xce   : > { %v571_v28 = vsel %vm567_vm5, %v562_v26, %v418_v56  ;;  %v547_v44 = vsel %vm540_vm2, %v538_v42, %v328_v57 }
  0xd1   : > { %v448_v58 = vpop.permute.xlu1 %447  ;;  %v422_v59 = vpop.permute.xlu0 %421 }
  0xd2   : > { %v579_v9 = vsel %vm576_vm6, %v570_v8, %v448_v58  ;;  %v573_v35 = vsel %vm567_vm5, %v564_v33, %v422_v59 }
  0xd5   : > { %v330_v60 = vpop.permute.xlu1 %329  ;;  %v452_v61 = vpop.permute.xlu0 %451 }
  0xd6   : > { %v581_v19 = vsel %vm576_vm6, %v572_v10, %v452_v61  ;;  %v548_v45 = vsel %vm540_vm2, %v539_v43, %v330_v60  ;;  %v1638_v60 = vld [vmem:[%s1833_s2] ss:$0 sm:$0xff] }
  0xd9   : > { %v450_v62 = vpop.permute.xlu1 %449  ;;  %v360_v63 = vpop.permute.xlu0 %359 }
  0xda   : > { %v580_v30 = vsel %vm576_vm6, %v571_v28, %v450_v62  ;;  %v556_v46 = vsel %vm549_vm3, %v547_v44, %v360_v63 }
  0xdd   : > { %v480_v0 = vpop.permute.xlu1 %479  ;;  %v454_v1 = vpop.permute.xlu0 %453 }
  0xde   : > { %v588_v12 = vsel %vm585_vm7, %v579_v9, %v480_v0  ;;  %v582_v36 = vsel %vm576_vm6, %v573_v35, %v454_v1 }
  0xe1   : > { %v362_v2 = vpop.permute.xlu1 %361  ;;  %v484_v3 = vpop.permute.xlu0 %483 }
  0xe2   : > { %v590_v14 = vsel %vm585_vm7, %v581_v19, %v484_v3  ;;  %v557_v48 = vsel %vm549_vm3, %v548_v45, %v362_v2  ;;  %vm855_vm3 = vcmask 1044484  }
  0xe5   : > { %v482_v5 = vpop.permute.xlu1 %481  ;;  %v392_v6 = vpop.permute.xlu0 %391 }
  0xe6   : > { %v589_v18 = vsel %vm585_vm7, %v580_v30, %v482_v5  ;;  %v565_v51 = vsel %vm558_vm4, %v556_v46, %v392_v6 }
  0xe9   : > { %v512_v13 = vpop.permute.xlu1 %511  ;;  %v486_v15 = vpop.permute.xlu0 %485 }
  0xea   : > { %v597_v20 = vsel %vm594_vm8, %v588_v12, %v512_v13  ;;  %v591_v37 = vsel %vm585_vm7, %v582_v36, %v486_v15 }
  0xeb   : > { %1189 = vmatprep.mubr.msk.f32.mxu0 %vm615_vm9, %v597_v20 }
  0xed   : > { %v394_v23 = vpop.permute.xlu1 %393  ;;  %v516_v25 = vpop.permute.xlu0 %515 }
  0xee   : > { %v599_v27 = vsel %vm594_vm8, %v590_v14, %v516_v25  ;;  %v566_v52 = vsel %vm558_vm4, %v557_v48, %v394_v23 }
  0xef   : > { %1192 = vmatprep.mubr.msk.f32.mxu1 %vm615_vm9, %v599_v27 }
  0xf1   : > { %v514_v24 = vpop.permute.xlu1 %513  ;;  %v424_v32 = vpop.permute.xlu0 %423 }
  0xf2   : > { %v598_v34 = vsel %vm594_vm8, %v589_v18, %v514_v24  ;;  %v574_v55 = vsel %vm567_vm5, %v565_v51, %v424_v32 }
  0xf3   : > { %1190 = vmatmul.mubr.msk.f32.gmra.mrb[2].mxu0 %vm615_vm9, %v598_v34 }
  0xf5   : > { %v426_v39 = vpop.permute.xlu1 %425  ;;  %v518_v40 = vpop.permute.xlu0 %517 }
  0xf6   : > { %v600_v21 = vsel %vm594_vm8, %v591_v37, %v518_v40  ;;  %v575_v47 = vsel %vm567_vm5, %v566_v52, %v426_v39 }
  0xf7   : > { %1193 = vmatmul.mubr.msk.f32.vlgmr.msra.gmra.mrb[0].mxu1 %vm615_vm9, %v600_v21 }
  0xf9   : > { %v458_v29 = vpop.permute.xlu1 %457  ;;  %v456_v41 = vpop.permute.xlu0 %455 }
  0xfa   : > { %v584_v54 = vsel %vm576_vm6, %v575_v47, %v458_v29  ;;  %v583_v38 = vsel %vm576_vm6, %v574_v55, %v456_v41 }
  0xfd   : > { %v490_v49 = vpop.permute.xlu1 %489  ;;  %v488_v50 = vpop.permute.xlu0 %487 }
  0xfe   : > { %v593_v53 = vsel %vm585_vm7, %v584_v54, %v490_v49  ;;  %v592_v17 = vsel %vm585_vm7, %v583_v38, %v488_v50  ;;  %vm858_vm7 = vcmask 1045509  }
 0x101   : > { %v522_v56 = vpop.permute.xlu1 %521  ;;  %v520_v57 = vpop.permute.xlu0 %519 }
 0x102   : > { %v602_v58 = vsel %vm594_vm8, %v593_v53, %v522_v56  ;;  %v601_v59 = vsel %vm594_vm8, %v592_v17, %v520_v57 }
 0x103   : > { %1195 = vmatprep.mubr.msk.f32.mxu1 %vm615_vm9, %v601_v59 }
 0x104   : > { %1196 = vmatmul.mubr.msk.f32.gmra.mrb[2].mxu1 %vm615_vm9, %v602_v58 }
 0x19e   : > { %v1188_v61 = vpop.f32.mrb[0].mxu0 }
 0x19f   : > { %v716_v62 = vadd.f32 %v1188_v61, %v1638_v60  ;;  %v710_v63 = vpop.f32.mrb[1].mxu0 }
 0x1a0   : > { %v711_v0 = vadd.f32 %v1638_v60, %v710_v63 }
 0x1a1   : > { %v750_v1 = vmin.f32 %v716_v62, 20.0  ;;  %vm790_vm10 = vcmp.gt.f32.partialorder %v716_v62, 20.0 }
 0x1a2   : > { %v749_v2 = vmin.f32 %v711_v0, 20.0  ;;  %vm789_vm11 = vcmp.gt.f32.partialorder %v711_v0, 20.0 }
 0x1a3   : > { %v759_v3 = vmul.f32 1.442695, %v750_v1 }
 0x1a4   : > { %v757_v4 = vmul.f32 1.442695, %v749_v2 }
 0x1a5   : > { %1248 = vpow2.f32 %v759_v3 }
 0x1a6   : > { %1250 = vpow2.f32 %v757_v4 }
 0x1af   : > { %v1249_v5 = vpop.eup %1248 }
 0x1b0   : > { %v1251_v6 = vpop.eup %1250  ;;  %v774_v7 = vadd.f32 2.0, %v1249_v5 }
 0x1b1   : > { %v773_v8 = vadd.f32 2.0, %v1251_v6 }
 0x1b2   : > { %v782_v9 = vmul.f32 %v1249_v5, %v774_v7 }
 0x1b3   : > { %v781_v11 = vmul.f32 %v1251_v6, %v773_v8 }
 0x1b4   : > { %v798_v12 = vadd.f32 2.0, %v782_v9 }
 0x1b5   : > { %v797_v13 = vadd.f32 2.0, %v781_v11 }
 0x1b6   : > { %1252 = vrcp.f32 %v798_v12 }
 0x1b7   : > { %1254 = vrcp.f32 %v797_v13 }
 0x1c0   : > { %v1253_v15 = vpop.eup %1252 }
 0x1c1   : > { %v1255_v16 = vpop.eup %1254  ;;  %v808_v20 = vmul.f32 %v1253_v15, %v782_v9 }
 0x1c2   : > { %v806_v10 = vmul.f32 %v1255_v16, %v781_v11 }
 0x1c3   : > { %v822_v19 = vmul.f32 %v808_v20, %v716_v62 }
 0x1c4   : > { %v821_v22 = vmul.f32 %v806_v10, %v711_v0 }
 0x1c5   : > { %v830_v14 = vsel %vm790_vm10, %v716_v62, %v822_v19  ;;  %vm861_vm10 = vcmask 1046534  }
 0x1c6   : > { %v829_v23 = vsel %vm789_vm11, %v711_v0, %v821_v22  ;;  %v1191_v25 = vpop.f32.mrb[2].mxu0  ;;  %v885_v26 = vrot.slane %v830_v14, 1  ;;  %v919_v27 = vrot.slane %v830_v14, 3  ;;  %v902_v28 = vrot.slane %v830_v14, 2 }
 0x1c7   : > { %v1643_v30 = vadd.f32 %v1191_v25, %v1638_v60  ;;  %v720_v31 = vpop.f32.mrb[3].mxu0  ;;  %v884_v18 = vrot.slane %v829_v23, 2  ;;  %v867_v24 = vrot.slane %v829_v23, 1  ;;  %v918_v32 = vrot.slane %v829_v23, 4 }
 0x1c8   : > { %v1646_v33 = vadd.f32 %v1638_v60, %v720_v31  ;;  %v901_v34 = vrot.slane %v829_v23, 3  ;;  %v952_v35 = vrot.slane %v829_v23, 6  ;;  %v953_v36 = vrot.slane %v830_v14, 5 }
 0x1c9   : > { %v752_v37 = vmin.f32 %v1643_v30, 20.0  ;;  %v1650_v39 = vsel %vm846_vm12, %v885_v26, %v884_v18  ;;  %v1653_v40 = vsel %vm846_vm12, %v830_v14, %v867_v24  ;;  %v1657_v41 = vsel %vm846_vm12, %v919_v27, %v918_v32 }
 0x1ca   : > { %v751_v21 = vmin.f32 %v1646_v33, 20.0  ;;  %v1194_v29 = vpop.f32.mrb[0].mxu1  ;;  %v1660_v42 = vsel %vm846_vm12, %v902_v28, %v901_v34  ;;  %v1666_v46 = vsel %vm846_vm12, %v953_v36, %v952_v35  ;;  %v935_v48 = vrot.slane %v829_v23, 5 }
 0x1cb   : > { %v763_v43 = vmul.f32 1.442695, %v752_v37  ;;  %v1663_v44 = vadd.f32 %v1194_v29, %v1638_v60  ;;  %v730_v45 = vpop.f32.mrb[1].mxu1  ;;  %v936_v51 = vrot.slane %v830_v14, 4  ;;  %v969_v52 = vrot.slane %v829_v23, 7 }
 0x1cc   : > { %v761_v49 = vmul.f32 1.442695, %v751_v21  ;;  %v1669_v50 = vadd.f32 %v1638_v60, %v730_v45  ;;  %v970_v47 = vrot.slane %v830_v14, 6  ;;  %v845_v56 = vrot.slane %v830_v14, 7 }
 0x1cd   : > { %1256 = vpow2.f32 %v763_v43  ;;  %v754_v55 = vmin.f32 %v1663_v44, 20.0  ;;  %v1674_v38 = vsel %vm846_vm12, %v936_v51, %v935_v48  ;;  %vm792_vm14 = vcmp.gt.f32.partialorder %v1643_v30, 20.0 }
 0x1ce   : > { %1258 = vpow2.f32 %v761_v49  ;;  %v753_v54 = vmin.f32 %v1669_v50, 20.0  ;;  %v1677_v17 = vsel %vm846_vm12, %v970_v47, %v969_v52  ;;  %v1680_v58 = vsel %vm846_vm12, %v845_v56, %v829_v23 }
 0x1cf   : > { %v767_v53 = vmul.f32 1.442695, %v754_v55  ;;  %vm791_vm0 = vcmp.gt.f32.partialorder %v1646_v33, 20.0  ;;  %vm794_vm1 = vcmp.gt.f32.partialorder %v1663_v44, 20.0  ;;  %vm793_vm5 = vcmp.gt.f32.partialorder %v1669_v50, 20.0 }
 0x1d0   : > { %v765_v57 = vmul.f32 1.442695, %v753_v54  ;;  %vm864_vm11 = vcmask 1047559  }
 0x1d1   : > { %1260 = vpow2.f32 %v767_v53 }
 0x1d2   : > { %1262 = vpow2.f32 %v765_v57 }
 0x1d7   : > { %v1257_v59 = vpop.eup %1256  ;;  %v1197_v61 = vpop.f32.mrb[2].mxu1 }
 0x1d8   : > { %v1259_v62 = vpop.eup %1258  ;;  %v776_v63 = vadd.f32 2.0, %v1257_v59  ;;  %v1683_v0 = vadd.f32 %v1197_v61, %v1638_v60  ;;  %v740_v1 = vpop.f32.mrb[3].mxu1 }
 0x1d9   : > { %v775_v2 = vadd.f32 2.0, %v1259_v62  ;;  %v1686_v3 = vadd.f32 %v1638_v60, %v740_v1 }
 0x1da   : > { %v784_v4 = vmul.f32 %v1257_v59, %v776_v63  ;;  %v756_v5 = vmin.f32 %v1683_v0, 20.0  ;;  %vm796_vm9 = vcmp.gt.f32.partialorder %v1683_v0, 20.0 }
 0x1db   : > { %v1261_v6 = vpop.eup %1260  ;;  %v783_v7 = vmul.f32 %v1259_v62, %v775_v2  ;;  %v755_v8 = vmin.f32 %v1686_v3, 20.0  ;;  %vm795_vm12 = vcmp.gt.f32.partialorder %v1686_v3, 20.0 }
 0x1dc   : > { %v1263_v9 = vpop.eup %1262  ;;  %v800_v11 = vadd.f32 2.0, %v784_v4  ;;  %v778_v12 = vadd.f32 2.0, %v1261_v6  ;;  %v771_v13 = vmul.f32 1.442695, %v756_v5 }
 0x1dd   : > { %v799_v15 = vadd.f32 2.0, %v783_v7  ;;  %v777_v16 = vadd.f32 2.0, %v1263_v9  ;;  %v769_v20 = vmul.f32 1.442695, %v755_v8 }
 0x1de   : > { %1264 = vrcp.f32 %v800_v11  ;;  %v786_v10 = vmul.f32 %v1261_v6, %v778_v12 }
 0x1df   : > { %1266 = vrcp.f32 %v799_v15  ;;  %v785_v19 = vmul.f32 %v1263_v9, %v777_v16 }
 0x1e0   : > { %v802_v60 = vadd.f32 2.0, %v786_v10  ;;  %1268 = vpow2.f32 %v771_v13 }
 0x1e1   : > { %v801_v22 = vadd.f32 2.0, %v785_v19  ;;  %1270 = vpow2.f32 %v769_v20 }
 0x1e2   : > { %1272 = vrcp.f32 %v802_v60 }
 0x1e3   : > { %1274 = vrcp.f32 %v801_v22 }
 0x1e8   : > { %v1265_v14 = vpop.eup %1264 }
 0x1e9   : > { %v1267_v23 = vpop.eup %1266  ;;  %v812_v25 = vmul.f32 %v1265_v14, %v784_v4 }
 0x1ea   : > { %v1269_v26 = vpop.eup %1268  ;;  %v810_v27 = vmul.f32 %v1267_v23, %v783_v7 }
 0x1eb   : > { %v1271_v28 = vpop.eup %1270  ;;  %v824_v31 = vmul.f32 %v812_v25, %v1643_v30  ;;  %v780_v18 = vadd.f32 2.0, %v1269_v26 }
 0x1ec   : > { %v1273_v24 = vpop.eup %1272  ;;  %v823_v32 = vmul.f32 %v810_v27, %v1646_v33  ;;  %v779_v34 = vadd.f32 2.0, %v1271_v28 }
 0x1ed   : > { %v1275_v35 = vpop.eup %1274  ;;  %v1696_v36 = vsel %vm792_vm14, %v1643_v30, %v824_v31  ;;  %v816_v37 = vmul.f32 %v1273_v24, %v786_v10  ;;  %v788_v21 = vmul.f32 %v1269_v26, %v780_v18  ;;  %vm992_vm14 = vcmask 392192  }
 0x1ee   : > { %v1700_v29 = vsel %vm791_vm0, %v1646_v33, %v823_v32  ;;  %v814_v43 = vmul.f32 %v1275_v35, %v785_v19  ;;  %v787_v45 = vmul.f32 %v1271_v28, %v779_v34  ;;  %v888_v48 = vrot.slane %v1696_v36, 7 }
 0x1ef   : > { %v826_v49 = vmul.f32 %v816_v37, %v1663_v44  ;;  %v804_v51 = vadd.f32 2.0, %v788_v21  ;;  %v887_v30 = vsel %vm849_vm13, %v1700_v29, %v1650_v39  ;;  %v869_v52 = vrot.slane %v1700_v29, 7 }
 0x1f0   : > { %v825_v55 = vmul.f32 %v814_v43, %v1669_v50  ;;  %v803_v47 = vadd.f32 2.0, %v787_v45  ;;  %v889_v54 = vsel %vm852_vm15, %v888_v48, %v887_v30  ;;  %v871_v33 = vrot.slane %v1696_v36, 6 }
 0x1f1   : > { %v1714_v53 = vsel %vm794_vm1, %v1663_v44, %v826_v49  ;;  %1276 = vrcp.f32 %v804_v51  ;;  %v870_v56 = vsel %vm849_vm13, %v869_v52, %v1653_v40  ;;  %v921_v39 = vrot.slane %v1700_v29, 2 }
 0x1f2   : > { %v1722_v57 = vsel %vm793_vm5, %v1669_v50, %v825_v55  ;;  %1278 = vrcp.f32 %v803_v47  ;;  %v892_v59 = vrot.slane %v1714_v53, 5  ;;  %v872_v61 = vsel %vm852_vm15, %v871_v33, %v870_v56 }
 0x1f3   : > { %v890_v62 = vrot.slane %v1722_v57, 6  ;;  %v873_v44 = vrot.slane %v1722_v57, 5  ;;  %v875_v63 = vrot.slane %v1714_v53, 4  ;;  %v922_v40 = vsel %vm849_vm13, %v921_v39, %v1657_v41 }
 0x1f4   : > { %v923_v1 = vrot.slane %v1696_v36, 1  ;;  %v926_v2 = vrot.slane %v1714_v53, 7  ;;  %v904_v50 = vrot.slane %v1700_v29, 1  ;;  %v907_v4 = vrot.slane %v1722_v57, 7 }
 0x1f5   : > { %v891_v5 = vsel %vm855_vm3, %v890_v62, %v889_v54  ;;  %v874_v6 = vsel %vm855_vm3, %v873_v44, %v872_v61  ;;  %v909_v7 = vrot.slane %v1714_v53, 6  ;;  %v955_v8 = vrot.slane %v1700_v29, 4 }
 0x1f6   : > { %v893_v9 = vsel %vm858_vm7, %v892_v59, %v891_v5  ;;  %v876_v41 = vsel %vm858_vm7, %v875_v63, %v874_v6  ;;  %v924_v11 = vsel %vm852_vm15, %v923_v1, %v922_v40  ;;  %v905_v12 = vsel %vm849_vm13, %v904_v50, %v1660_v42 }
 0x1f7   : > { %v925_v13 = vsel %vm855_vm3, %v1722_v57, %v924_v11  ;;  %v906_v15 = vsel %vm852_vm15, %v1696_v36, %v905_v12  ;;  %v956_v16 = vsel %vm849_vm13, %v955_v8, %v1666_v46  ;;  %v957_v20 = vrot.slane %v1696_v36, 3 }
 0x1f8   : > { %v927_v10 = vsel %vm858_vm7, %v926_v2, %v925_v13  ;;  %v908_v19 = vsel %vm855_vm3, %v907_v4, %v906_v15  ;;  %v959_v42 = vrot.slane %v1722_v57, 2  ;;  %v961_v14 = vrot.slane %v1714_v53, 1 }
 0x1f9   : > { %v910_v60 = vsel %vm858_vm7, %v909_v7, %v908_v19  ;;  %v958_v22 = vsel %vm852_vm15, %v957_v20, %v956_v16  ;;  %v938_v23 = vrot.slane %v1700_v29, 3  ;;  %v940_v25 = vrot.slane %v1696_v36, 2 }
 0x1fa   : > { %v960_v46 = vsel %vm855_vm3, %v959_v42, %v958_v22  ;;  %v942_v26 = vrot.slane %v1722_v57, 1  ;;  %v972_v27 = vrot.slane %v1700_v29, 5  ;;  %v974_v24 = vrot.slane %v1696_v36, 4 }
 0x1fb   : > { %v1277_v28 = vpop.eup %1276  ;;  %v962_v31 = vsel %vm858_vm7, %v961_v14, %v960_v46  ;;  %v939_v18 = vsel %vm849_vm13, %v938_v23, %v1674_v38  ;;  %v976_v32 = vrot.slane %v1722_v57, 3  ;;  %v848_v48 = vrot.slane %v1700_v29, 6 }
 0x1fc   : > { %v1279_v34 = vpop.eup %1278  ;;  %v820_v35 = vmul.f32 %v1277_v28, %v788_v21  ;;  %v941_v37 = vsel %vm852_vm15, %v940_v25, %v939_v18  ;;  %v973_v43 = vsel %vm849_vm13, %v972_v27, %v1677_v17  ;;  %v978_v38 = vrot.slane %v1714_v53, 2 }
 0x1fd   : > { %v818_v49 = vmul.f32 %v1279_v34, %v787_v45  ;;  %v943_v51 = vsel %vm855_vm3, %v942_v26, %v941_v37  ;;  %v975_v30 = vsel %vm852_vm15, %v974_v24, %v973_v43  ;;  %v851_v47 = vrot.slane %v1696_v36, 5 }
 0x1fe   : > { %v828_v52 = vmul.f32 %v820_v35, %v1683_v0  ;;  %v944_v55 = vsel %vm858_vm7, %v1714_v53, %v943_v51  ;;  %v977_v21 = vsel %vm855_vm3, %v976_v32, %v975_v30  ;;  %v850_v45 = vsel %vm849_vm13, %v848_v48, %v1680_v58 }
 0x1ff   : > { %v827_v17 = vmul.f32 %v818_v49, %v1686_v3  ;;  %v979_v29 = vsel %vm858_vm7, %v978_v38, %v977_v21  ;;  %v854_v33 = vrot.slane %v1722_v57, 4  ;;  %v857_v56 = vrot.slane %v1714_v53, 3 }
 0x200   : > { %v836_v54 = vsel %vm796_vm9, %v1683_v0, %v828_v52  ;;  %v853_v39 = vsel %vm852_vm15, %v851_v47, %v850_v45  ;;  %vm990_vm13 = vcmask 326656   ;;  %vm994_vm15 = vcmask 457728  }
 0x201   : > { %v835_v36 = vsel %vm795_vm12, %v1686_v3, %v827_v17  ;;  %v896_v59 = vrot.slane %v836_v54, 3  ;;  %v879_v61 = vrot.slane %v836_v54, 2  ;;  %v930_v62 = vrot.slane %v836_v54, 5 }
 0x202   : > { %v894_v44 = vrot.slane %v835_v36, 4  ;;  %v877_v63 = vrot.slane %v835_v36, 3  ;;  %v928_v40 = vrot.slane %v835_v36, 6  ;;  %v911_v1 = vrot.slane %v835_v36, 5 }
 0x203   : > { %v913_v58 = vrot.slane %v836_v54, 4  ;;  %v963_v2 = vsel %vm861_vm10, %v835_v36, %v962_v31  ;;  %v964_v50 = vrot.slane %v836_v54, 7  ;;  %v945_v0 = vrot.slane %v835_v36, 7 }
 0x204   : > { %v895_v57 = vsel %vm861_vm10, %v894_v44, %v893_v9  ;;  %v878_v53 = vsel %vm861_vm10, %v877_v63, %v876_v41  ;;  %v929_v4 = vsel %vm861_vm10, %v928_v40, %v927_v10  ;;  %v912_v3 = vsel %vm861_vm10, %v911_v1, %v910_v60 }
 0x205   : > { %v897_v5 = vsel %vm864_vm11, %v896_v59, %v895_v57  ;;  %v880_v6 = vsel %vm864_vm11, %v879_v61, %v878_v53  ;;  %v931_v7 = vsel %vm864_vm11, %v930_v62, %v929_v4  ;;  %v914_v8 = vsel %vm864_vm11, %v913_v58, %v912_v3 }
 0x206   : > { %898 = vrot.lane.b32.xlu1 %v897_v5, %s1307_s23  ;;  %881 = vrot.lane.b32.xlu0 %v880_v6, %s1304_s20  ;;  %v965_v9 = vsel %vm864_vm11, %v964_v50, %v963_v2  ;;  %v946_v41 = vsel %vm861_vm10, %v945_v0, %v944_v55  ;;  %v947_v11 = vrot.slane %v836_v54, 6  ;;  %v980_v12 = vrot.slane %v835_v36, 1  ;;  %s1094_s20 = sshll.u32 %s1840_s12, 3 }
 0x207   : > { %v860_v13 = vrot.slane %v835_v36, 2  ;;  %v856_v15 = vsel %vm855_vm3, %v854_v33, %v853_v39  ;;  %v863_v10 = vrot.slane %v836_v54, 1  ;;  %s188_s23 = scalar_lea.vmem %s1834_s3, %s1094_s20 }
 0x208   : > { %v948_v16 = vsel %vm864_vm11, %v947_v11, %v946_v41  ;;  %v981_v20 = vsel %vm861_vm10, %v980_v12, %v979_v29  ;;  %v859_v19 = vsel %vm858_vm7, %v857_v56, %v856_v15 }
 0x209   : > { %v982_v42 = vsel %vm864_vm11, %v836_v54, %v981_v20  ;;  %v862_v60 = vsel %vm861_vm10, %v860_v13, %v859_v19 }
 0x20a   : > { %932 = vrot.lane.b32.xlu1 %v931_v7, %s1311_s10  ;;  %915 = vrot.lane.b32.xlu0 %v914_v8, %s1309_s25  ;;  %v865_v22 = vsel %vm864_vm11, %v863_v10, %v862_v60 }
 0x20e   : > { %966 = vrot.lane.b32.xlu1 %v965_v9, %s1312_s17  ;;  %949 = vrot.lane.b32.xlu0 %v948_v16, %s1313_s18 }
 0x212   : > { %983 = vrot.lane.b32.xlu0 %v982_v42, %s1314_s19 }
 0x278   : > { %v899_v14 = vpop.permute.xlu1 %898  ;;  %v882_v23 = vpop.permute.xlu0 %881 }
 0x279   : > { %v986_v46 = vsel %vm540_vm2, %v865_v22, %v882_v23  ;;  %vm996_vm2 = vcmask 523264  }
 0x27a   : > { %v987_v27 = vsel %vm558_vm4, %v986_v46, %v899_v14 }
 0x27c   : > { %v933_v25 = vpop.permute.xlu1 %932  ;;  %v916_v26 = vpop.permute.xlu0 %915 }
 0x27d   : > { %v988_v28 = vsel %vm576_vm6, %v987_v27, %v916_v26 }
 0x27e   : > { %v989_v18 = vsel %vm594_vm8, %v988_v28, %v933_v25 }
 0x280   : > { %v950_v31 = vpop.permute.xlu0 %949  ;;  %v967_v24 = vpop.permute.xlu1 %966 }
 0x281   : > { %v991_v32 = vsel %vm990_vm13, %v989_v18, %v950_v31 }
 0x282   : > { %v993_v35 = vsel %vm992_vm14, %v991_v32, %v967_v24 }
 0x284   : > { %v984_v34 = vpop.permute.xlu0 %983 }
 0x285   : > { %v995_v37 = vsel %vm994_vm15, %v993_v35, %v984_v34 }
 0x286   : > { %997 = vst.msk [vmem:[%s188_s23] sm:$0xff] %vm996_vm2, %v995_v37 }
 0x287 PF: > { %s13_s14 = sadd.s32 1, %s1302_s14   ;;  %s1835_s12 = smov %s1298_s13 }
 0x288   : > { %p10_p5 = scmp.ge.s32.totalorder %s13_s14, 4   ;;  %s1836_s13 = smov %s1838_s15 }
 0x28a   :  { %12 = sbr.rel (!%p10_p5) target bundleno = 2 (0x2), region = 68 }

// kernel: stem_forward.7
= control target key start
LH: loop header
LB: loop body
LE: loop exit
PB: predicated region body
PF: predicated region fallthrough
CT: control target
= control target key end

     0   :  { %s2010_s30 = smov 0   ;;  %s2012_s10 = smov 0   ;;  %s2811_s0 = inlined_call_operand.vmem [shape: f32[2,8,8,8], index: 0, kind: input, shape index: {}]   ;;  %s2812_s1 = inlined_call_operand.vmem [shape: f32[8,8], index: 1, kind: input, shape index: {}]   ;;  %s2813_s2 = inlined_call_operand.vmem [shape: f32[1,8], index: 2, kind: input, shape index: {}]   ;;  %s2814_s3 = inlined_call_operand.vmem [shape: f32[8,8], index: 3, kind: input, shape index: {}]   ;;  %s2815_s4 = inlined_call_operand.vmem [shape: f32[1,8], index: 4, kind: input, shape index: {}]   ;;  %s2816_s5 = inlined_call_operand.vmem [shape: f32[8,4], index: 5, kind: input, shape index: {}]   ;;  %s2817_s6 = inlined_call_operand.vmem [shape: f32[1,4], index: 6, kind: input, shape index: {}]   ;;  %s2818_s7 = inlined_call_operand.vmem [shape: f32[2,8,64], index: 7, kind: output, shape index: {0}]   ;;  %s2819_s8 = inlined_call_operand.vmem [shape: f32[2,8,64], index: 8, kind: output, shape index: {1}]   ;;  %s2820_s9 = inlined_call_operand.vmem [shape: f32[2,8,32], index: 9, kind: output, shape index: {2}]  }
   0x1   :  { %s2014_s11 = smov 0  }
   0x2 LB: > { %s32_s12 = sadd.s32 1, %s1943_s10  ;;  %p1687_p0 = scmp.ge.s32.totalorder %s1947_s11, 1  ;;  %s1947_s11 = sphi %s2014_s11, %s20_s11   ;;  %s1943_s10 = sphi %s2012_s10, %s2824_s10   ;;  %s1939_s30 = sphi %s2010_s30, %s2823_s30  }
   0x3   : > { %p34_p1 = scmp.ge.s32.totalorder %s32_s12, 2  ;;  %p317_p2 = scmp.lt.s32.totalorder %s1947_s11, 3 }
   0x5   : > { %s2826_s12 = smov (%p34_p1, %s32_s12), 0  ;;  %p318_p3 = pnand %p1687_p0, %p317_p2 }
   0x6   : > { %v412_v0 = vld [vmem:[%s2812_s1] sm:$0xff] (!%p318_p3)  ;;  %p374_p4 = scmp.lt.s32.totalorder (!%p318_p3), %s1939_s30, 1  ;;  %vm420_vm0 = vcmask (!%p318_p3), 64512   ;;  %vm1073_vm6 = vcmask (!%p318_p3), 1041409   ;;  %vm1076_vm8 = vcmask (!%p318_p3), 1042434   ;;  %vm1079_vm10 = vcmask (!%p318_p3), 1043459  }
   0x7   : > { %321 = sbr.rel (%p318_p3) target bundleno = 694 (0x2b6), region = 48  ;;  %v638_v1 = vld [vmem:[%s2814_s3] sm:$0xff] (!%p318_p3)  ;;  %1792 = vmatprep.subr.mxu1 (!%p318_p3), %v412_v0  ;;  %1750 = vmatprep.subr.mxu0 (!%p318_p3), %v412_v0  ;;  %vm1082_vm12 = vcmask (!%p318_p3), 1044484   ;;  %vm1085_vm15 = vcmask (!%p318_p3), 1045509   ;;  %s1949_s27 = smov (!%p318_p3), 16  }
   0x8   : > { %1793 = vmatpush3.msra.mxu1 (!%p318_p3), %v412_v0  ;;  %1751 = vmatpush3.msra.mxu0 (!%p318_p3), %v412_v0  ;;  %v839_v10 = vld [vmem:[%s2816_s5] sm:$0xff] (!%p318_p3)  ;;  %s1950_s28 = smov (!%p318_p3), 8   ;;  %s1951_s29 = smov (!%p318_p3), 32  }
   0x9   : > { %1764 = vmatprep.subr.mxu1 (!%p318_p3), %v638_v1  ;;  %1778 = vmatprep.subr.mxu0 (!%p318_p3), %v839_v10  ;;  %v1693_v11 = vld [vmem:[%s2813_s2] ss:$0 sm:$0xff] (!%p318_p3)  ;;  %s1952_s13 = smov (!%p318_p3), 24   ;;  %s1953_s14 = smov (!%p318_p3), 48  }
   0xa   : > { %v2087_v38 = vld [vmem:[%s2815_s4] ss:$0 sm:$0xff] (!%p318_p3)  ;;  %s1954_s15 = smov (!%p318_p3), 40   ;;  %s1955_s16 = smov (!%p318_p3), 56  }
   0xb   : > { %s1956_s22 = smov (!%p318_p3), 12   ;;  %s1957_s23 = smov (!%p318_p3), 4  }
   0xc   : > { %s1958_s24 = smov (!%p318_p3), 20   ;;  %s1959_s25 = smov (!%p318_p3), 28  }
   0xe   : > { %s2828_s30 = smov (!%p374_p4, %s1939_s30), 1 }
   0xf   : > { %s1722_s17 = sshll.u32 %s2828_s30, 6 }
  0x10   : > { %s381_s20 = scalar_lea.vmem %s2811_s0, %s1722_s17  ;;  %s2573_s17 = sshll.u32 %s2828_s30, 3 }
  0x11   : > { %v404_v2 = vld [vmem:[%s381_s20] sm:$0xff]  ;;  %v405_v4 = vld [vmem:[%s381_s20 + $0x8] sm:$0xff]  ;;  %v406_v6 = vld [vmem:[%s381_s20 + $0x10] sm:$0xff] }
  0x12   : > { %v408_v3 = vld [vmem:[%s381_s20 + $0x20] sm:$0xff]  ;;  %1752 = vmatprep.mubr.msk.f32.mxu0 %vm420_vm0, %v404_v2  ;;  %v409_v5 = vld [vmem:[%s381_s20 + $0x28] sm:$0xff]  ;;  %v410_v7 = vld [vmem:[%s381_s20 + $0x30] sm:$0xff] }
  0x13   : > { %1758 = vmatprep.mubr.msk.f32.mxu1 %vm420_vm0, %v408_v3  ;;  %1753 = vmatmul.mubr.msk.f32.vlgmr.msra.gmra.mrb[0].mxu0 %vm420_vm0, %v405_v4  ;;  %v407_v8 = vld [vmem:[%s381_s20 + $0x18] sm:$0xff] }
  0x14   : > { %1759 = vmatmul.mubr.msk.f32.vlgmr.msra.gmra.mrb[0].mxu1 %vm420_vm0, %v409_v5  ;;  %1755 = vmatprep.mubr.msk.f32.mxu0 %vm420_vm0, %v406_v6  ;;  %v411_v9 = vld [vmem:[%s381_s20 + $0x38] sm:$0xff]  ;;  %s389_s20 = scalar_lea.vmem %s2818_s7, %s2573_s17 }
  0x15   : > { %1765 = vmatpush3.msra.mxu1 %v638_v1  ;;  %1761 = vmatprep.mubr.msk.f32.mxu1 %vm420_vm0, %v410_v7 }
  0x16   : > { %1779 = vmatpush3.msra.mxu0 %v839_v10 }
  0x17   : > { %1756 = vmatmul.mubr.msk.f32.gmra.mrb[2].mxu0 %vm420_vm0, %v407_v8 }
  0x18   : > { %1762 = vmatmul.mubr.msk.f32.gmra.mrb[2].mxu1 %vm420_vm0, %v411_v9 }
  0x19   : > { %1766 = vmatprep.mubr.msk.f32.mxu1 %vm420_vm0, %v404_v2 }
  0x1c   : > { %1767 = vmatmul.mubr.msk.f32.vlgmr.msra.gmra.mrb[4].mxu1 %vm420_vm0, %v405_v4 }
  0x1d   : > { %1769 = vmatprep.mubr.msk.f32.mxu1 %vm420_vm0, %v406_v6 }
  0x20   : > { %1770 = vmatmul.mubr.msk.f32.gmra.mrb[6].mxu1 %vm420_vm0, %v407_v8 }
  0x21   : > { %1772 = vmatprep.mubr.msk.f32.mxu1 %vm420_vm0, %v408_v3 }
  0x24   : > { %1773 = vmatmul.mubr.msk.f32.gmra.mrb[8].mxu1 %vm420_vm0, %v409_v5 }
  0x25   : > { %1775 = vmatprep.mubr.msk.f32.mxu1 %vm420_vm0, %v410_v7 }
  0x28   : > { %1776 = vmatmul.mubr.msk.f32.gmra.mrb[10].mxu1 %vm420_vm0, %v411_v9 }
  0xe6   : > { %v1754_v13 = vpop.f32.mrb[0].mxu0 }
  0xe7   : > { %v1760_v12 = vpop.f32.mrb[0].mxu1  ;;  %v2064_v15 = vadd.f32 %v1754_v13, %v1693_v11  ;;  %v511_v17 = vpop.f32.mrb[1].mxu0 }
  0xe8   : > { %v2062_v14 = vadd.f32 %v1760_v12, %v1693_v11  ;;  %v531_v16 = vpop.f32.mrb[1].mxu1  ;;  %v2068_v19 = vadd.f32 %v1693_v11, %v511_v17 }
  0xe9   : > { %v2066_v18 = vadd.f32 %v1693_v11, %v531_v16  ;;  %v551_v21 = vmin.f32 %v2064_v15, 20.0  ;;  %vm591_vm1 = vcmp.gt.f32.partialorder %v2064_v15, 20.0 }
  0xea   : > { %v555_v20 = vmin.f32 %v2062_v14, 20.0  ;;  %v550_v23 = vmin.f32 %v2068_v19, 20.0  ;;  %v1757_v24 = vpop.f32.mrb[2].mxu0  ;;  %vm595_vm2 = vcmp.gt.f32.partialorder %v2062_v14, 20.0  ;;  %vm590_vm4 = vcmp.gt.f32.partialorder %v2068_v19, 20.0 }
  0xeb   : > { %v554_v22 = vmin.f32 %v2066_v18, 20.0  ;;  %v1763_v25 = vpop.f32.mrb[2].mxu1  ;;  %v560_v27 = vmul.f32 1.442695, %v551_v21  ;;  %v2074_v28 = vadd.f32 %v1757_v24, %v1693_v11  ;;  %v521_v30 = vpop.f32.mrb[3].mxu0  ;;  %vm594_vm3 = vcmp.gt.f32.partialorder %v2066_v18, 20.0 }
  0xec   : > { %v568_v26 = vmul.f32 1.442695, %v555_v20  ;;  %v2076_v29 = vadd.f32 %v1763_v25, %v1693_v11  ;;  %v541_v31 = vpop.f32.mrb[3].mxu1  ;;  %v558_v33 = vmul.f32 1.442695, %v550_v23  ;;  %v2078_v34 = vadd.f32 %v1693_v11, %v521_v30 }
  0xed   : > { %v566_v32 = vmul.f32 1.442695, %v554_v22  ;;  %v2080_v35 = vadd.f32 %v1693_v11, %v541_v31  ;;  %v553_v36 = vmin.f32 %v2074_v28, 20.0  ;;  %vm593_vm5 = vcmp.gt.f32.partialorder %v2074_v28, 20.0 }
  0xee   : > { %1829 = vpow2.f32 %v568_v26  ;;  %v557_v37 = vmin.f32 %v2076_v29, 20.0  ;;  %v552_v39 = vmin.f32 %v2078_v34, 20.0  ;;  %vm597_vm7 = vcmp.gt.f32.partialorder %v2076_v29, 20.0 }
  0xef   : > { %1831 = vpow2.f32 %v560_v27  ;;  %v1768_v40 = vpop.f32.mrb[4].mxu1  ;;  %v564_v41 = vmul.f32 1.442695, %v553_v36  ;;  %v556_v43 = vmin.f32 %v2080_v35, 20.0  ;;  %vm592_vm9 = vcmp.gt.f32.partialorder %v2078_v34, 20.0 }
  0xf0   : > { %1833 = vpow2.f32 %v566_v32  ;;  %v572_v42 = vmul.f32 1.442695, %v557_v37  ;;  %v712_v44 = vpop.f32.mrb[5].mxu1  ;;  %v562_v45 = vmul.f32 1.442695, %v552_v39  ;;  %v2092_v46 = vadd.f32 %v1768_v40, %v2087_v38 }
  0xf1   : > { %1835 = vpow2.f32 %v558_v33  ;;  %v570_v47 = vmul.f32 1.442695, %v556_v43  ;;  %v2095_v48 = vadd.f32 %v2087_v38, %v712_v44  ;;  %vm596_vm11 = vcmp.gt.f32.partialorder %v2080_v35, 20.0 }
  0xf2   : > { %1837 = vpow2.f32 %v564_v41  ;;  %v752_v49 = vmin.f32 %v2092_v46, 20.0  ;;  %vm792_vm13 = vcmp.gt.f32.partialorder %v2092_v46, 20.0 }
  0xf3   : > { %1839 = vpow2.f32 %v572_v42  ;;  %v1771_v50 = vpop.f32.mrb[6].mxu1  ;;  %v751_v51 = vmin.f32 %v2095_v48, 20.0  ;;  %vm791_vm14 = vcmp.gt.f32.partialorder %v2095_v48, 20.0 }
  0xf4   : > { %1841 = vpow2.f32 %v562_v45  ;;  %v2100_v52 = vadd.f32 %v1771_v50, %v2087_v38  ;;  %v722_v53 = vpop.f32.mrb[7].mxu1  ;;  %v761_v54 = vmul.f32 1.442695, %v752_v49 }
  0xf5   : > { %1843 = vpow2.f32 %v570_v47  ;;  %v2103_v55 = vadd.f32 %v2087_v38, %v722_v53  ;;  %v759_v56 = vmul.f32 1.442695, %v751_v51 }
  0xf6   : > { %v754_v57 = vmin.f32 %v2100_v52, 20.0  ;;  %1845 = vpow2.f32 %v761_v54 }
  0xf7   : > { %v753_v58 = vmin.f32 %v2103_v55, 20.0  ;;  %v1774_v59 = vpop.f32.mrb[8].mxu1  ;;  %1847 = vpow2.f32 %v759_v56 }
  0xf8   : > { %v1830_v60 = vpop.eup %1829  ;;  %v765_v61 = vmul.f32 1.442695, %v754_v57  ;;  %v2108_v62 = vadd.f32 %v1774_v59, %v2087_v38  ;;  %v732_v63 = vpop.f32.mrb[9].mxu1 }
  0xf9   : > { %v1832_v0 = vpop.eup %1831  ;;  %v579_v1 = vadd.f32 2.0, %v1830_v60  ;;  %v763_v2 = vmul.f32 1.442695, %v753_v58  ;;  %v2111_v3 = vadd.f32 %v2087_v38, %v732_v63 }
  0xfa   : > { %v1834_v4 = vpop.eup %1833  ;;  %v575_v5 = vadd.f32 2.0, %v1832_v0  ;;  %1849 = vpow2.f32 %v765_v61  ;;  %v756_v6 = vmin.f32 %v2108_v62, 20.0 }
  0xfb   : > { %v1836_v7 = vpop.eup %1835  ;;  %v2114_v8 = vmul.f32 %v1830_v60, %v579_v1  ;;  %v578_v9 = vadd.f32 2.0, %v1834_v4  ;;  %1851 = vpow2.f32 %v763_v2  ;;  %v755_v10 = vmin.f32 %v2111_v3, 20.0  ;;  %v1777_v11 = vpop.f32.mrb[10].mxu1 }
  0xfc   : > { %v1838_v12 = vpop.eup %1837  ;;  %v2117_v13 = vmul.f32 %v1832_v0, %v575_v5  ;;  %v574_v16 = vadd.f32 2.0, %v1836_v7  ;;  %v769_v17 = vmul.f32 1.442695, %v756_v6  ;;  %v742_v20 = vpop.f32.mrb[11].mxu1  ;;  %v2135_v45 = vadd.f32 %v1777_v11, %v2087_v38 }
  0xfd   : > { %v1840_v21 = vpop.eup %1839  ;;  %v603_v22 = vadd.f32 2.0, %v2114_v8  ;;  %v2120_v23 = vmul.f32 %v1834_v4, %v578_v9  ;;  %v577_v24 = vadd.f32 2.0, %v1838_v12  ;;  %v767_v25 = vmul.f32 1.442695, %v755_v10 }
  0xfe   : > { %v1842_v26 = vpop.eup %1841  ;;  %v599_v27 = vadd.f32 2.0, %v2117_v13  ;;  %v2123_v30 = vmul.f32 %v1836_v7, %v574_v16  ;;  %v581_v31 = vadd.f32 2.0, %v1840_v21  ;;  %1853 = vpow2.f32 %v769_v17 }
  0xff   : > { %v1844_v32 = vpop.eup %1843  ;;  %1855 = vrcp.f32 %v603_v22  ;;  %v602_v33 = vadd.f32 2.0, %v2120_v23  ;;  %v2126_v36 = vmul.f32 %v1838_v12, %v577_v24  ;;  %v576_v37 = vadd.f32 2.0, %v1842_v26 }
 0x100   : > { %1857 = vrcp.f32 %v599_v27  ;;  %v598_v39 = vadd.f32 2.0, %v2123_v30  ;;  %v2129_v40 = vmul.f32 %v1840_v21, %v581_v31  ;;  %v580_v41 = vadd.f32 2.0, %v1844_v32  ;;  %v1846_v42 = vpop.eup %1845 }
 0x101   : > { %1859 = vrcp.f32 %v602_v33  ;;  %v601_v43 = vadd.f32 2.0, %v2126_v36  ;;  %v2132_v44 = vmul.f32 %v1842_v26, %v576_v37  ;;  %v1848_v47 = vpop.eup %1847  ;;  %v776_v51 = vadd.f32 2.0, %v1846_v42 }
 0x102   : > { %1861 = vrcp.f32 %v598_v39  ;;  %v605_v49 = vadd.f32 2.0, %v2129_v40  ;;  %v2138_v50 = vmul.f32 %v1844_v32, %v580_v41  ;;  %v775_v54 = vadd.f32 2.0, %v1848_v47 }
 0x103   : > { %1863 = vrcp.f32 %v601_v43  ;;  %v600_v53 = vadd.f32 2.0, %v2132_v44  ;;  %v758_v56 = vmin.f32 %v2135_v45, 20.0  ;;  %v2144_v59 = vmul.f32 %v1846_v42, %v776_v51 }
 0x104   : > { %v1850_v57 = vpop.eup %1849  ;;  %1865 = vrcp.f32 %v605_v49  ;;  %v604_v58 = vadd.f32 2.0, %v2138_v50  ;;  %v2147_v61 = vmul.f32 %v1848_v47, %v775_v54  ;;  %v2151_v4 = vadd.f32 %v2087_v38, %v742_v20 }
 0x105   : > { %v1852_v60 = vpop.eup %1851  ;;  %1867 = vrcp.f32 %v600_v53  ;;  %v778_v63 = vadd.f32 2.0, %v1850_v57  ;;  %v773_v0 = vmul.f32 1.442695, %v758_v56  ;;  %v800_v1 = vadd.f32 2.0, %v2144_v59 }
 0x106   : > { %1869 = vrcp.f32 %v604_v58  ;;  %v777_v2 = vadd.f32 2.0, %v1852_v60  ;;  %v799_v5 = vadd.f32 2.0, %v2147_v61  ;;  %v757_v10 = vmin.f32 %v2151_v4, 20.0 }
 0x107   : > { %v2155_v6 = vmul.f32 %v1850_v57, %v778_v63  ;;  %1871 = vpow2.f32 %v767_v25 }
 0x108   : > { %v1854_v7 = vpop.eup %1853  ;;  %1873 = vrcp.f32 %v800_v1  ;;  %v2158_v9 = vmul.f32 %v1852_v60, %v777_v2  ;;  %v771_v21 = vmul.f32 1.442695, %v757_v10 }
 0x109   : > { %v1856_v11 = vpop.eup %1855  ;;  %1875 = vrcp.f32 %v799_v5  ;;  %v802_v38 = vadd.f32 2.0, %v2155_v6  ;;  %v780_v12 = vadd.f32 2.0, %v1854_v7 }
 0x10a   : > { %v1858_v16 = vpop.eup %1857  ;;  %v617_v17 = vmul.f32 %v1856_v11, %v2114_v8  ;;  %v801_v20 = vadd.f32 2.0, %v2158_v9  ;;  %1877 = vpow2.f32 %v773_v0 }
 0x10b   : > { %v1860_v22 = vpop.eup %1859  ;;  %v609_v24 = vmul.f32 %v1858_v16, %v2117_v13  ;;  %1879 = vrcp.f32 %v802_v38  ;;  %v2168_v25 = vmul.f32 %v1854_v7, %v780_v12 }
 0x10c   : > { %v1862_v26 = vpop.eup %1861  ;;  %v627_v27 = vmul.f32 %v617_v17, %v2062_v14  ;;  %v615_v8 = vmul.f32 %v1860_v22, %v2120_v23  ;;  %1881 = vrcp.f32 %v801_v20 }
 0x10d   : > { %v1864_v31 = vpop.eup %1863  ;;  %v623_v32 = vmul.f32 %v609_v24, %v2064_v15  ;;  %v607_v13 = vmul.f32 %v1862_v26, %v2123_v30  ;;  %v804_v33 = vadd.f32 2.0, %v2168_v25  ;;  %1883 = vpow2.f32 %v771_v21 }
 0x10e   : > { %v1866_v37 = vpop.eup %1865  ;;  %v2179_v39 = vsel %vm595_vm2, %v2062_v14, %v627_v27  ;;  %v626_v23 = vmul.f32 %v615_v8, %v2066_v18  ;;  %v613_v41 = vmul.f32 %v1864_v31, %v2126_v36  ;;  %vm1088_vm2 = vcmask 1046534  }
 0x10f   : > { %v1868_v42 = vpop.eup %1867  ;;  %v2187_v30 = vsel %vm591_vm1, %v2064_v15, %v623_v32  ;;  %v622_v43 = vmul.f32 %v607_v13, %v2068_v19  ;;  %v621_v47 = vmul.f32 %v1866_v37, %v2129_v40  ;;  %1885 = vrcp.f32 %v804_v33 }
 0x110   : > { %v1870_v14 = vpop.eup %1869  ;;  %v2195_v36 = vsel %vm594_vm3, %v2066_v18, %v626_v23  ;;  %v625_v49 = vmul.f32 %v613_v41, %v2074_v28  ;;  %v611_v51 = vmul.f32 %v1868_v42, %v2132_v44  ;;  %v1112_v15 = vrot.slane %v2187_v30, 1 }
 0x111   : > { %v1872_v53 = vpop.eup %1871  ;;  %v2203_v40 = vsel %vm590_vm4, %v2068_v19, %v622_v43  ;;  %v629_v54 = vmul.f32 %v621_v47, %v2076_v29  ;;  %v619_v56 = vmul.f32 %v1870_v14, %v2138_v50  ;;  %vm794_vm1 = vcmp.gt.f32.partialorder %v2100_v52, 20.0 }
 0x112   : > { %v1117_v18 = vrot.slane %v2195_v36, 6  ;;  %v1874_v57 = vpop.eup %1873  ;;  %v2212_v44 = vsel %vm593_vm5, %v2074_v28, %v625_v49  ;;  %v624_v58 = vmul.f32 %v611_v51, %v2078_v34  ;;  %vm793_vm3 = vcmp.gt.f32.partialorder %v2103_v55, 20.0 }
 0x113   : > { %v779_v19 = vadd.f32 2.0, %v1872_v53  ;;  %vm1091_vm4 = vcmask 1047559   ;;  %v1111_v60 = vrot.slane %v2203_v40, 2  ;;  %v1876_v50 = vpop.eup %1875  ;;  %v2220_v63 = vsel %vm597_vm7, %v2076_v29, %v629_v54 }
 0x114   : > { %v628_v0 = vmul.f32 %v619_v56, %v2080_v35  ;;  %v810_v1 = vmul.f32 %v1874_v57, %v2144_v59  ;;  %v1115_v28 = vrot.slane %v2212_v44, 7  ;;  %v1878_v2 = vpop.eup %1877  ;;  %v2228_v5 = vsel %vm592_vm9, %v2078_v34, %v624_v58 }
 0x115   : > { %v808_v7 = vmul.f32 %v1876_v50, %v2147_v61  ;;  %v2231_v10 = vmul.f32 %v1872_v53, %v779_v19  ;;  %v1113_v11 = vsel %vm1073_vm6, %v1112_v15, %v1111_v60  ;;  %v1880_v29 = vpop.eup %1879  ;;  %vm796_vm5 = vcmp.gt.f32.partialorder %v2108_v62, 20.0 }
 0x116   : > { %v2237_v38 = vsel %vm596_vm11, %v2080_v35, %v628_v0  ;;  %v824_v59 = vmul.f32 %v810_v1, %v2092_v46  ;;  %v782_v12 = vadd.f32 2.0, %v1878_v2  ;;  %v1114_v34 = vsel %vm1076_vm8, %v2228_v5, %v1113_v11  ;;  %v1882_v16 = vpop.eup %1881 }
 0x117   : > { %v823_v61 = vmul.f32 %v808_v7, %v2095_v48  ;;  %v814_v17 = vmul.f32 %v1880_v29, %v2155_v6  ;;  %v803_v20 = vadd.f32 2.0, %v2231_v10  ;;  %v1116_v21 = vsel %vm1079_vm10, %v1115_v28, %v1114_v34  ;;  %v1884_v22 = vpop.eup %1883 }
 0x118   : > { %v2250_v35 = vsel %vm792_vm13, %v2092_v46, %v824_v59  ;;  %v812_v24 = vmul.f32 %v1882_v16, %v2158_v9  ;;  %v2253_v26 = vmul.f32 %v1878_v2, %v782_v12  ;;  %v1118_v27 = vsel %vm1082_vm12, %v1117_v18, %v1116_v21 }
 0x119   : > { %v2259_v6 = vsel %vm791_vm14, %v2095_v48, %v823_v61  ;;  %v826_v8 = vmul.f32 %v814_v17, %v2100_v52  ;;  %1887 = vrcp.f32 %v803_v20  ;;  %v781_v31 = vadd.f32 2.0, %v1884_v22  ;;  %v1886_v32 = vpop.eup %1885 }
 0x11a   : > { %v825_v13 = vmul.f32 %v812_v24, %v2103_v55  ;;  %v806_v46 = vadd.f32 2.0, %v2253_v26  ;;  %1780 = vmatprep.mubr.msk.f32.mxu0 %vm420_vm0, %v2259_v6  ;;  %v1119_v9 = vrot.slane %v2179_v39, 5  ;;  %v1121_v33 = vrot.slane %v2237_v38, 4 }
 0x11b   : > { %v2271_v48 = vsel %vm794_vm1, %v2100_v52, %v826_v8  ;;  %v818_v37 = vmul.f32 %v1886_v32, %v2168_v25  ;;  %v2274_v23 = vmul.f32 %v1884_v22, %v781_v31  ;;  %1781 = vmatmul.mubr.msk.f32.vlgmr.msra.gmra.mrb[4].mxu0 %vm420_vm0, %v2250_v35  ;;  %v1123_v41 = vrot.slane %v2220_v63, 3 }
 0x11c   : > { %v2282_v42 = vsel %vm793_vm3, %v2103_v55, %v825_v13  ;;  %1889 = vrcp.f32 %v806_v46  ;;  %v1120_v43 = vsel %vm1085_vm15, %v1119_v9, %v1118_v27  ;;  %v1094_v52 = vrot.slane %v2203_v40, 1 }
 0x11d   : > { %v828_v47 = vmul.f32 %v818_v37, %v2108_v62  ;;  %v805_v25 = vadd.f32 2.0, %v2274_v23  ;;  %v1122_v14 = vsel %vm1088_vm2, %v1121_v33, %v1120_v43  ;;  %1783 = vmatprep.mubr.msk.f32.mxu0 %vm420_vm0, %v2282_v42  ;;  %v1096_v49 = vrot.slane %v2228_v5, 7 }
 0x11e   : > { %v1124_v51 = vsel %vm1091_vm4, %v1123_v41, %v1122_v14  ;;  %v1095_v55 = vsel %vm1073_vm6, %v2187_v30, %v1094_v52  ;;  %v1098_v15 = vrot.slane %v2212_v44, 6  ;;  %v1100_v53 = vrot.slane %v2195_v36, 5 }
 0x11f   : > { %v2300_v54 = vsel %vm796_vm5, %v2108_v62, %v828_v47  ;;  %vm795_vm7 = vcmp.gt.f32.partialorder %v2111_v3, 20.0  ;;  %1891 = vrcp.f32 %v805_v25  ;;  %1125 = vrot.lane.b32.xlu1 %v1124_v51, %s1949_s27  ;;  %v1097_v56 = vsel %vm1076_vm8, %v1096_v49, %v1095_v55  ;;  %1784 = vmatmul.mubr.msk.f32.gmra.mrb[6].mxu0 %vm420_vm0, %v2271_v48 }
 0x120   : > { %v1102_v18 = vrot.slane %v2179_v39, 4  ;;  %v1099_v57 = vsel %vm1079_vm10, %v1098_v15, %v1097_v56  ;;  %v1104_v58 = vrot.slane %v2237_v38, 3  ;;  %v1106_v62 = vrot.slane %v2220_v63, 2 }
 0x121   : > { %v1145_v19 = vrot.slane %v2203_v40, 4  ;;  %v1101_v60 = vsel %vm1082_vm12, %v1100_v53, %v1099_v57  ;;  %v1146_v50 = vrot.slane %v2187_v30, 3  ;;  %v1148_v0 = vrot.slane %v2228_v5, 2 }
 0x122   : > { %v1150_v1 = vrot.slane %v2212_v44, 1  ;;  %vm798_vm9 = vcmp.gt.f32.partialorder %v2135_v45, 20.0  ;;  %v1103_v28 = vsel %vm1085_vm15, %v1102_v18, %v1101_v60  ;;  %v1153_v2 = vrot.slane %v2179_v39, 7 }
 0x123   : > { %v1155_v7 = vrot.slane %v2237_v38, 6  ;;  %v1157_v11 = vrot.slane %v2220_v63, 5  ;;  %v1888_v29 = vpop.eup %1887  ;;  %v1105_v59 = vsel %vm1088_vm2, %v1104_v58, %v1103_v28  ;;  %v1147_v12 = vsel %vm1073_vm6, %v1146_v50, %v1145_v19 }
 0x124   : > { %v1128_v34 = vrot.slane %v2203_v40, 3  ;;  %v1129_v16 = vrot.slane %v2187_v30, 2  ;;  %v816_v61 = vmul.f32 %v1888_v29, %v2231_v10  ;;  %v1107_v17 = vsel %vm1091_vm4, %v1106_v62, %v1105_v59 }
 0x125   : > { %v1149_v20 = vsel %vm1076_vm8, %v1148_v0, %v1147_v12  ;;  %v1131_v21 = vrot.slane %v2228_v5, 1  ;;  %1108 = vrot.lane.b32.xlu0 %v1107_v17, %s1950_s28  ;;  %v1134_v27 = vrot.slane %v2195_v36, 7  ;;  %v1136_v8 = vrot.slane %v2179_v39, 6 }
 0x126   : > { %v1151_v22 = vsel %vm1079_vm10, %v1150_v1, %v1149_v20  ;;  %v1130_v24 = vsel %vm1073_vm6, %v1129_v16, %v1128_v34  ;;  %v1890_v31 = vpop.eup %1889  ;;  %v827_v10 = vmul.f32 %v816_v61, %v2111_v3  ;;  %v1138_v46 = vrot.slane %v2237_v38, 5 }
 0x127   : > { %v1152_v32 = vsel %vm1082_vm12, %v2195_v36, %v1151_v22  ;;  %v1132_v13 = vsel %vm1076_vm8, %v1131_v21, %v1130_v24  ;;  %v822_v9 = vmul.f32 %v1890_v31, %v2253_v26  ;;  %v1140_v41 = vrot.slane %v2220_v63, 4 }
 0x128   : > { %v1154_v33 = vsel %vm1085_vm15, %v1153_v2, %v1152_v32  ;;  %v1133_v37 = vsel %vm1079_vm10, %v2212_v44, %v1132_v13  ;;  %v2347_v43 = vsel %vm795_vm7, %v2111_v3, %v827_v10  ;;  %v1179_v25 = vrot.slane %v2203_v40, 6 }
 0x129   : > { %v1156_v52 = vsel %vm1088_vm2, %v1155_v7, %v1154_v33  ;;  %v1135_v47 = vsel %vm1082_vm12, %v1134_v27, %v1133_v37  ;;  %v1892_v14 = vpop.eup %1891  ;;  %v830_v26 = vmul.f32 %v822_v9, %v2135_v45  ;;  %1786 = vmatprep.mubr.msk.f32.mxu0 %vm420_vm0, %v2347_v43  ;;  %v1180_v55 = vrot.slane %v2187_v30, 5 }
 0x12a   : > { %v1158_v49 = vsel %vm1091_vm4, %v1157_v11, %v1156_v52  ;;  %v1137_v51 = vsel %vm1085_vm15, %v1136_v8, %v1135_v47  ;;  %v820_v3 = vmul.f32 %v1892_v14, %v2274_v23  ;;  %1787 = vmatmul.mubr.msk.f32.gmra.mrb[8].mxu0 %vm420_vm0, %v2300_v54  ;;  %v1182_v53 = vrot.slane %v2228_v5, 4 }
 0x12b   : > { %1159 = vrot.lane.b32.xlu1 %v1158_v49, %s1951_s29  ;;  %v1139_v15 = vsel %vm1088_vm2, %v1138_v46, %v1137_v51  ;;  %v1184_v56 = vrot.slane %v2212_v44, 3  ;;  %v2368_v18 = vsel %vm798_vm9, %v2135_v45, %v830_v26  ;;  %vm797_vm11 = vcmp.gt.f32.partialorder %v2151_v4, 20.0 }
 0x12c   : > { %v1141_v23 = vsel %vm1091_vm4, %v1140_v41, %v1139_v15  ;;  %v1181_v57 = vsel %vm1073_vm6, %v1180_v55, %v1179_v25  ;;  %v829_v58 = vmul.f32 %v820_v3, %v2151_v4  ;;  %v1186_v19 = vrot.slane %v2195_v36, 2 }
 0x12d   : > { %1142 = vrot.lane.b32.xlu0 %v1141_v23, %s1952_s13  ;;  %v1183_v62 = vsel %vm1076_vm8, %v1182_v53, %v1181_v57  ;;  %v1188_v60 = vrot.slane %v2179_v39, 1  ;;  %v1162_v50 = vrot.slane %v2203_v40, 5  ;;  %v1163_v0 = vrot.slane %v2187_v30, 4 }
 0x12e   : > { %v1185_v45 = vsel %vm1079_vm10, %v1184_v56, %v1183_v62  ;;  %v1165_v1 = vrot.slane %v2228_v5, 3  ;;  %v2383_v28 = vsel %vm797_vm11, %v2151_v4, %v829_v58  ;;  %v1191_v7 = vrot.slane %v2220_v63, 7 }
 0x12f   : > { %v1187_v2 = vsel %vm1082_vm12, %v1186_v19, %v1185_v45  ;;  %v1167_v11 = vrot.slane %v2212_v44, 2  ;;  %1789 = vmatprep.mubr.msk.f32.mxu0 %vm420_vm0, %v2383_v28  ;;  %v1164_v59 = vsel %vm1073_vm6, %v1163_v0, %v1162_v50  ;;  %v1169_v12 = vrot.slane %v2195_v36, 1 }
 0x130   : > { %v1189_v29 = vsel %vm1085_vm15, %v1188_v60, %v1187_v2  ;;  %v1172_v34 = vrot.slane %v2237_v38, 7  ;;  %v1166_v16 = vsel %vm1076_vm8, %v1165_v1, %v1164_v59  ;;  %1790 = vmatmul.mubr.msk.f32.gmra.mrb[10].mxu0 %vm420_vm0, %v2368_v18  ;;  %v1277_v61 = vrot.slane %v2259_v6, 3 }
 0x131   : > { %v1190_v4 = vsel %vm1088_vm2, %v2237_v38, %v1189_v29  ;;  %v1278_v17 = vrot.slane %v2250_v35, 2  ;;  %v1168_v21 = vsel %vm1079_vm10, %v1167_v11, %v1166_v16  ;;  %v1280_v22 = vrot.slane %v2282_v42, 1 }
 0x132   : > { %v1192_v20 = vsel %vm1091_vm4, %v1191_v7, %v1190_v4  ;;  %v1283_v24 = vrot.slane %v2347_v43, 7  ;;  %v1170_v27 = vsel %vm1082_vm12, %v1169_v12, %v1168_v21  ;;  %v1174_v8 = vrot.slane %v2220_v63, 6 }
 0x133   : > { %1193 = vrot.lane.b32.xlu1 %v1192_v20, %s1953_s14  ;;  %v1279_v31 = vsel %vm1073_vm6, %v1278_v17, %v1277_v61  ;;  %v1285_v10 = vrot.slane %v2300_v54, 6  ;;  %v1171_v32 = vsel %vm1085_vm15, %v2179_v39, %v1170_v27  ;;  %v1287_v46 = vrot.slane %v2383_v28, 5 }
 0x134   : > { %v1281_v13 = vsel %vm1076_vm8, %v1280_v22, %v1279_v31  ;;  %v1196_v9 = vrot.slane %v2203_v40, 7  ;;  %v1173_v33 = vsel %vm1088_vm2, %v1172_v34, %v1171_v32  ;;  %v1197_v41 = vrot.slane %v2187_v30, 6 }
 0x135   : > { %v1282_v37 = vsel %vm1079_vm10, %v2271_v48, %v1281_v13  ;;  %v1199_v52 = vrot.slane %v2228_v5, 5  ;;  %v1175_v47 = vsel %vm1091_vm4, %v1174_v8, %v1173_v33  ;;  %v1289_v14 = vrot.slane %v2368_v18, 4 }
 0x136   : > { %v1284_v25 = vsel %vm1082_vm12, %v1283_v24, %v1282_v37  ;;  %v1201_v26 = vrot.slane %v2212_v44, 4  ;;  %1176 = vrot.lane.b32.xlu0 %v1175_v47, %s1954_s15  ;;  %v1198_v51 = vsel %vm1073_vm6, %v1197_v41, %v1196_v9  ;;  %v1203_v55 = vrot.slane %v2195_v36, 3 }
 0x137   : > { %v1286_v49 = vsel %vm1085_vm15, %v1285_v10, %v1284_v25  ;;  %v1205_v3 = vrot.slane %v2179_v39, 2  ;;  %v1200_v53 = vsel %vm1076_vm8, %v1199_v52, %v1198_v51  ;;  %v1311_v56 = vrot.slane %v2259_v6, 5 }
 0x138   : > { %v1288_v15 = vsel %vm1088_vm2, %v1287_v46, %v1286_v49  ;;  %v1312_v23 = vrot.slane %v2250_v35, 4  ;;  %v1202_v58 = vsel %vm1079_vm10, %v1201_v26, %v1200_v53  ;;  %v1207_v62 = vrot.slane %v2237_v38, 1 }
 0x139   : > { %v1290_v57 = vsel %vm1091_vm4, %v1289_v14, %v1288_v15  ;;  %v1314_v19 = vrot.slane %v2282_v42, 3  ;;  %v1204_v60 = vsel %vm1082_vm12, %v1203_v55, %v1202_v58  ;;  %v1316_v50 = vrot.slane %v2271_v48, 2 }
 0x13a   : > { %1291 = vrot.lane.b32.xlu1 %v1290_v57, %s1952_s13  ;;  %v1313_v45 = vsel %vm1073_vm6, %v1312_v23, %v1311_v56  ;;  %v1318_v0 = vrot.slane %v2347_v43, 1  ;;  %v1206_v1 = vsel %vm1085_vm15, %v1205_v3, %v1204_v60  ;;  %v1321_v7 = vrot.slane %v2383_v28, 7 }
 0x13b   : > { %v1315_v2 = vsel %vm1076_vm8, %v1314_v19, %v1313_v45  ;;  %v1328_v11 = vrot.slane %v2259_v6, 6  ;;  %v1208_v29 = vsel %vm1088_vm2, %v1207_v62, %v1206_v1  ;;  %v1329_v12 = vrot.slane %v2250_v35, 5 }
 0x13c   : > { %v1317_v59 = vsel %vm1079_vm10, %v1316_v50, %v1315_v2  ;;  %v1331_v34 = vrot.slane %v2282_v42, 4  ;;  %v1209_v4 = vsel %vm1091_vm4, %v2220_v63, %v1208_v29  ;;  %v1323_v61 = vrot.slane %v2368_v18, 6 }
 0x13d   : > { %v1319_v16 = vsel %vm1082_vm12, %v1318_v0, %v1317_v59  ;;  %v1335_v17 = vrot.slane %v2347_v43, 2  ;;  %1210 = vrot.lane.b32.xlu0 %v1209_v4, %s1955_s16  ;;  %v1330_v21 = vsel %vm1073_vm6, %v1329_v12, %v1328_v11  ;;  %v1333_v22 = vrot.slane %v2271_v48, 3 }
 0x13e   : > { %v1320_v20 = vsel %vm1085_vm15, %v2300_v54, %v1319_v16  ;;  %v1337_v24 = vrot.slane %v2300_v54, 1  ;;  %v1332_v8 = vsel %vm1076_vm8, %v1331_v34, %v1330_v21  ;;  %v1243_v31 = vrot.slane %v2259_v6, 1 }
 0x13f   : > { %v1322_v27 = vsel %vm1088_vm2, %v1321_v7, %v1320_v20  ;;  %v1245_v10 = vrot.slane %v2282_v42, 7  ;;  %v1334_v13 = vsel %vm1079_vm10, %v1333_v22, %v1332_v8  ;;  %v1340_v46 = vrot.slane %v2368_v18, 7 }
 0x140   : > { %v1324_v32 = vsel %vm1091_vm4, %v1323_v61, %v1322_v27  ;;  %v1249_v9 = vrot.slane %v2347_v43, 5  ;;  %v1336_v33 = vsel %vm1082_vm12, %v1335_v17, %v1334_v13  ;;  %v1244_v37 = vsel %vm1073_vm6, %v2250_v35, %v1243_v31 }
 0x141   : > { %1325 = vrot.lane.b32.xlu1 %v1324_v32, %s1954_s15  ;;  %v1247_v41 = vrot.slane %v2271_v48, 6  ;;  %v1251_v52 = vrot.slane %v2300_v54, 4  ;;  %v1338_v47 = vsel %vm1085_vm15, %v1337_v24, %v1336_v33  ;;  %v1246_v25 = vsel %vm1076_vm8, %v1245_v10, %v1244_v37 }
 0x142   : > { %v1253_v14 = vrot.slane %v2383_v28, 3  ;;  %v1260_v26 = vrot.slane %v2259_v6, 2  ;;  %v1339_v49 = vsel %vm1088_vm2, %v2383_v28, %v1338_v47  ;;  %v1261_v55 = vrot.slane %v2250_v35, 1 }
 0x143   : > { %v1248_v51 = vsel %vm1079_vm10, %v1247_v41, %v1246_v25  ;;  %v1264_v3 = vrot.slane %v2271_v48, 7  ;;  %v1341_v15 = vsel %vm1091_vm4, %v1340_v46, %v1339_v49  ;;  %v1255_v56 = vrot.slane %v2368_v18, 2 }
 0x144   : > { %v1250_v53 = vsel %vm1082_vm12, %v1249_v9, %v1248_v51  ;;  %v1266_v23 = vrot.slane %v2347_v43, 6  ;;  %1342 = vrot.lane.b32.xlu0 %v1341_v15, %s1953_s14  ;;  %v1262_v58 = vsel %vm1073_vm6, %v1261_v55, %v1260_v26  ;;  %v1268_v62 = vrot.slane %v2300_v54, 5  ;;  %s396_s14 = scalar_lea.vmem %s2819_s8, %s2573_s17 }
 0x145   : > { %v1252_v57 = vsel %vm1085_vm15, %v1251_v52, %v1250_v53  ;;  %v1270_v19 = vrot.slane %v2383_v28, 4  ;;  %v1263_v45 = vsel %vm1076_vm8, %v2282_v42, %v1262_v58  ;;  %v1294_v50 = vrot.slane %v2259_v6, 4 }
 0x146   : > { %v1254_v60 = vsel %vm1088_vm2, %v1253_v14, %v1252_v57  ;;  %v1295_v0 = vrot.slane %v2250_v35, 3  ;;  %v1265_v2 = vsel %vm1079_vm10, %v1264_v3, %v1263_v45  ;;  %v1272_v7 = vrot.slane %v2368_v18, 3 }
 0x147   : > { %v1256_v1 = vsel %vm1091_vm4, %v1255_v56, %v1254_v60  ;;  %v1297_v11 = vrot.slane %v2282_v42, 2  ;;  %v1267_v29 = vsel %vm1082_vm12, %v1266_v23, %v1265_v2  ;;  %v1299_v12 = vrot.slane %v2271_v48, 1 }
 0x148   : > { %v1296_v59 = vsel %vm1073_vm6, %v1295_v0, %v1294_v50  ;;  %v1302_v34 = vrot.slane %v2300_v54, 7  ;;  %1257 = vrot.lane.b32.xlu0 %v1256_v1, %s1950_s28  ;;  %v1269_v4 = vsel %vm1085_vm15, %v1268_v62, %v1267_v29  ;;  %v1304_v61 = vrot.slane %v2383_v28, 6 }
 0x149   : > { %v1298_v16 = vsel %vm1076_vm8, %v1297_v11, %v1296_v59  ;;  %v1072_v17 = vrot.slane %v2187_v30, 7  ;;  %v1271_v20 = vsel %vm1088_vm2, %v1270_v19, %v1269_v4  ;;  %v1075_v22 = vrot.slane %v2228_v5, 6 }
 0x14a   : > { %v1300_v21 = vsel %vm1079_vm10, %v1299_v12, %v1298_v16  ;;  %v1078_v24 = vrot.slane %v2212_v44, 5  ;;  %v1273_v27 = vsel %vm1091_vm4, %v1272_v7, %v1271_v20  ;;  %v1306_v10 = vrot.slane %v2368_v18, 5 }
 0x14b   : > { %v1301_v8 = vsel %vm1082_vm12, %v2347_v43, %v1300_v21  ;;  %v1074_v30 = vsel %vm1073_vm6, %v1072_v17, %v2203_v40  ;;  %v1081_v5 = vrot.slane %v2195_v36, 4  ;;  %v1084_v46 = vrot.slane %v2179_v39, 3 }
 0x14c   : > { %v1303_v31 = vsel %vm1085_vm15, %v1302_v34, %v1301_v8  ;;  %1274 = vrot.lane.b32.xlu0 %v1273_v27, %s1949_s27  ;;  %v1077_v44 = vsel %vm1076_vm8, %v1075_v22, %v1074_v30  ;;  %v1087_v33 = vrot.slane %v2237_v38, 2  ;;  %v1090_v40 = vrot.slane %v2220_v63, 1 }
 0x14d   : > { %v1305_v32 = vsel %vm1088_vm2, %v1304_v61, %v1303_v31  ;;  %v1080_v9 = vsel %vm1079_vm10, %v1078_v24, %v1077_v44  ;;  %v1228_v52 = vrot.slane %v2250_v35, 7  ;;  %v1230_v36 = vrot.slane %v2282_v42, 6  ;;  %v1711_v44 = vld [vmem:[%s2817_s6] ss:$0 sm:$0xff] }
 0x14e   : > { %v1307_v13 = vsel %vm1091_vm4, %v1306_v10, %v1305_v32  ;;  %v1083_v37 = vsel %vm1082_vm12, %v1081_v5, %v1080_v9  ;;  %v1234_v39 = vrot.slane %v2347_v43, 4  ;;  %v1232_v14 = vrot.slane %v2271_v48, 5 }
 0x14f   : > { %v1086_v41 = vsel %vm1085_vm15, %v1084_v46, %v1083_v37  ;;  %v1229_v38 = vsel %vm1073_vm6, %v1228_v52, %v2259_v6  ;;  %v1345_v63 = vrot.slane %v2259_v6, 7  ;;  %v1238_v49 = vrot.slane %v2383_v28, 2 }
 0x150   : > { %1308 = vrot.lane.b32.xlu0 %v1307_v13, %s1951_s29  ;;  %v1089_v47 = vsel %vm1088_vm2, %v1087_v33, %v1086_v41  ;;  %v1231_v26 = vsel %vm1076_vm8, %v1230_v36, %v1229_v38  ;;  %v1346_v51 = vrot.slane %v2250_v35, 6  ;;  %v1348_v55 = vrot.slane %v2282_v42, 5 }
 0x151   : > { %v1092_v25 = vsel %vm1091_vm4, %v1090_v40, %v1089_v47  ;;  %v1233_v3 = vsel %vm1079_vm10, %v1232_v14, %v1231_v26  ;;  %v1236_v15 = vrot.slane %v2300_v54, 3  ;;  %v1352_v53 = vrot.slane %v2347_v43, 3 }
 0x152   : > { %v1235_v56 = vsel %vm1082_vm12, %v1234_v39, %v1233_v3  ;;  %v1347_v23 = vsel %vm1073_vm6, %v1346_v51, %v1345_v63  ;;  %v1350_v6 = vrot.slane %v2271_v48, 4  ;;  %v1240_v58 = vrot.slane %v2368_v18, 1 }
 0x153   : > { %v1237_v57 = vsel %vm1085_vm15, %v1236_v15, %v1235_v56  ;;  %v1349_v35 = vsel %vm1076_vm8, %v1348_v55, %v1347_v23  ;;  %v1356_v42 = vrot.slane %v2383_v28, 1  ;;  %v1354_v43 = vrot.slane %v2300_v54, 2 }
 0x154   : > { %v1239_v62 = vsel %vm1088_vm2, %v1238_v49, %v1237_v57  ;;  %v1351_v19 = vsel %vm1079_vm10, %v1350_v6, %v1349_v35  ;;  %vm1214_vm13 = vcmask 130048   ;;  %vm1216_vm14 = vcmask 195584  }
 0x155   : > { %v1241_v60 = vsel %vm1091_vm4, %v1240_v58, %v1239_v62  ;;  %v1353_v45 = vsel %vm1082_vm12, %v1352_v53, %v1351_v19  ;;  %vm1218_vm1 = vcmask 261120   ;;  %vm1220_vm3 = vcmask 326656  }
 0x156   : > { %v1355_v48 = vsel %vm1085_vm15, %v1354_v43, %v1353_v45  ;;  %vm1222_vm5 = vcmask 392192   ;;  %vm1224_vm7 = vcmask 457728   ;;  %vm2821_vm9 = vcmask 523264  }
 0x157   : > { %v1357_v50 = vsel %vm1088_vm2, %v1356_v42, %v1355_v48 }
 0x158   : > { %v2566_v0 = vsel %vm1091_vm4, %v2368_v18, %v1357_v50 }
 0x191   : > { %v1126_v1 = vpop.permute.xlu1 %1125 }
 0x197   : > { %v1109_v28 = vpop.permute.xlu0 %1108 }
 0x198   : > { %v1213_v7 = vsel %vm420_vm0, %v1092_v25, %v1109_v28 }
 0x199   : > { %v1215_v54 = vsel %vm1214_vm13, %v1213_v7, %v1126_v1 }
 0x19d   : > { %v1160_v11 = vpop.permute.xlu1 %1159 }
 0x19f   : > { %v1143_v2 = vpop.permute.xlu0 %1142 }
 0x1a0   : > { %v1217_v29 = vsel %vm1216_vm14, %v1215_v54, %v1143_v2 }
 0x1a1   : > { %v1219_v12 = vsel %vm1218_vm1, %v1217_v29, %v1160_v11 }
 0x1a5   : > { %v1194_v34 = vpop.permute.xlu1 %1193 }
 0x1a8   : > { %v1177_v59 = vpop.permute.xlu0 %1176 }
 0x1a9   : > { %v1221_v18 = vsel %vm1220_vm3, %v1219_v12, %v1177_v59 }
 0x1aa   : > { %v1223_v16 = vsel %vm1222_vm5, %v1221_v18, %v1194_v34 }
 0x1ac   : > { %v1292_v21 = vpop.permute.xlu1 %1291 }
 0x1af   : > { %v1211_v4 = vpop.permute.xlu0 %1210 }
 0x1b0   : > { %v1225_v61 = vsel %vm1224_vm7, %v1223_v16, %v1211_v4 }
 0x1b1   : > { %1227 = vst.msk [vmem:[%s389_s20] sm:$0xff] %vm2821_vm9, %v1225_v61 }
 0x1b3   : > { %v1326_v10 = vpop.permute.xlu1 %1325 }
 0x1b6   : > { %v1343_v17 = vpop.permute.xlu0 %1342 }
 0x1ba   : > { %v1258_v20 = vpop.permute.xlu0 %1257 }
 0x1bb   : > { %v1362_v22 = vsel %vm420_vm0, %v1241_v60, %v1258_v20 }
 0x1be   : > { %v1275_v24 = vpop.permute.xlu0 %1274 }
 0x1bf   : > { %v1363_v27 = vsel %vm1214_vm13, %v1362_v22, %v1275_v24 }
 0x1c0   : > { %v1364_v8 = vsel %vm1216_vm14, %v1363_v27, %v1292_v21 }
 0x1c2   : > { %v1309_v31 = vpop.permute.xlu0 %1308 }
 0x1c3   : > { %v1365_v30 = vsel %vm1218_vm1, %v1364_v8, %v1309_v31 }
 0x1c4   : > { %v1366_v32 = vsel %vm1220_vm3, %v1365_v30, %v1326_v10 }
 0x1c5   : > { %v2589_v5 = vsel %vm1222_vm5, %v1366_v32, %v1343_v17 }
 0x1ee   : > { %v1782_v13 = vpop.f32.mrb[4].mxu0 }
 0x1ef   : > { %v2594_v46 = vadd.f32 %v1782_v13, %v1711_v44  ;;  %v937_v9 = vpop.f32.mrb[5].mxu0 }
 0x1f0   : > { %v2596_v33 = vadd.f32 %v1711_v44, %v937_v9 }
 0x1f1   : > { %v977_v37 = vmin.f32 %v2594_v46, 20.0  ;;  %vm1017_vm11 = vcmp.gt.f32.partialorder %v2594_v46, 20.0 }
 0x1f2   : > { %v976_v40 = vmin.f32 %v2596_v33, 20.0  ;;  %v1785_v41 = vpop.f32.mrb[6].mxu0  ;;  %vm1016_vm3 = vcmp.gt.f32.partialorder %v2596_v33, 20.0 }
 0x1f3   : > { %v986_v52 = vmul.f32 1.442695, %v977_v37  ;;  %v2600_v36 = vadd.f32 %v1785_v41, %v1711_v44  ;;  %v947_v47 = vpop.f32.mrb[7].mxu0 }
 0x1f4   : > { %v984_v39 = vmul.f32 1.442695, %v976_v40  ;;  %v2602_v25 = vadd.f32 %v1711_v44, %v947_v47 }
 0x1f5   : > { %1893 = vpow2.f32 %v986_v52  ;;  %v979_v38 = vmin.f32 %v2600_v36, 20.0  ;;  %vm1019_vm5 = vcmp.gt.f32.partialorder %v2600_v36, 20.0 }
 0x1f6   : > { %1895 = vpow2.f32 %v984_v39  ;;  %v978_v14 = vmin.f32 %v2602_v25, 20.0  ;;  %vm1018_vm9 = vcmp.gt.f32.partialorder %v2602_v25, 20.0 }
 0x1f7   : > { %v990_v63 = vmul.f32 1.442695, %v979_v38 }
 0x1f8   : > { %v988_v26 = vmul.f32 1.442695, %v978_v14 }
 0x1f9   : > { %1897 = vpow2.f32 %v990_v63 }
 0x1fa   : > { %1899 = vpow2.f32 %v988_v26 }
 0x1fd   : > { %v1788_v49 = vpop.f32.mrb[8].mxu0 }
 0x1fe   : > { %v2606_v51 = vadd.f32 %v1788_v49, %v1711_v44  ;;  %v957_v55 = vpop.f32.mrb[9].mxu0 }
 0x1ff   : > { %v1894_v3 = vpop.eup %1893  ;;  %v2608_v15 = vadd.f32 %v1711_v44, %v957_v55 }
 0x200   : > { %v1896_v53 = vpop.eup %1895  ;;  %v1001_v56 = vadd.f32 2.0, %v1894_v3  ;;  %v981_v23 = vmin.f32 %v2606_v51, 20.0 }
 0x201   : > { %v1000_v6 = vadd.f32 2.0, %v1896_v53  ;;  %v980_v57 = vmin.f32 %v2608_v15, 20.0 }
 0x202   : > { %v1009_v58 = vmul.f32 %v1894_v3, %v1001_v56  ;;  %v994_v35 = vmul.f32 1.442695, %v981_v23 }
 0x203   : > { %v1898_v42 = vpop.eup %1897  ;;  %v1008_v62 = vmul.f32 %v1896_v53, %v1000_v6  ;;  %v992_v19 = vmul.f32 1.442695, %v980_v57  ;;  %v1791_v43 = vpop.f32.mrb[10].mxu0 }
 0x204   : > { %v1900_v60 = vpop.eup %1899  ;;  %v1025_v45 = vadd.f32 2.0, %v1009_v58  ;;  %v1003_v48 = vadd.f32 2.0, %v1898_v42  ;;  %1901 = vpow2.f32 %v994_v35  ;;  %v2612_v50 = vadd.f32 %v1791_v43, %v1711_v44  ;;  %v967_v28 = vpop.f32.mrb[11].mxu0 }
 0x205   : > { %v1024_v1 = vadd.f32 2.0, %v1008_v62  ;;  %v1002_v2 = vadd.f32 2.0, %v1900_v60  ;;  %1903 = vpow2.f32 %v992_v19  ;;  %v2614_v7 = vadd.f32 %v1711_v44, %v967_v28 }
 0x206   : > { %1905 = vrcp.f32 %v1025_v45  ;;  %v1011_v54 = vmul.f32 %v1898_v42, %v1003_v48  ;;  %v983_v11 = vmin.f32 %v2612_v50, 20.0 }
 0x207   : > { %1907 = vrcp.f32 %v1024_v1  ;;  %v1010_v29 = vmul.f32 %v1900_v60, %v1002_v2  ;;  %v982_v59 = vmin.f32 %v2614_v7, 20.0 }
 0x208   : > { %v1027_v12 = vadd.f32 2.0, %v1011_v54  ;;  %v998_v18 = vmul.f32 1.442695, %v983_v11 }
 0x209   : > { %v1026_v34 = vadd.f32 2.0, %v1010_v29  ;;  %v996_v4 = vmul.f32 1.442695, %v982_v59 }
 0x20a   : > { %1909 = vrcp.f32 %v1027_v12 }
 0x20b   : > { %1911 = vrcp.f32 %v1026_v34 }
 0x20c   : > { %1913 = vpow2.f32 %v998_v18 }
 0x20d   : > { %1915 = vpow2.f32 %v996_v4 }
 0x20e   : > { %v1902_v16 = vpop.eup %1901 }
 0x20f   : > { %v1904_v61 = vpop.eup %1903  ;;  %v1005_v17 = vadd.f32 2.0, %v1902_v16 }
 0x210   : > { %v1906_v20 = vpop.eup %1905  ;;  %v1004_v21 = vadd.f32 2.0, %v1904_v61 }
 0x211   : > { %v1908_v22 = vpop.eup %1907  ;;  %v1035_v24 = vmul.f32 %v1906_v20, %v1009_v58  ;;  %v1013_v27 = vmul.f32 %v1902_v16, %v1005_v17 }
 0x212   : > { %v1033_v8 = vmul.f32 %v1908_v22, %v1008_v62  ;;  %v2618_v31 = vmul.f32 %v1904_v61, %v1004_v21 }
 0x213   : > { %v1049_v10 = vmul.f32 %v1035_v24, %v2594_v46  ;;  %v1029_v30 = vadd.f32 2.0, %v1013_v27 }
 0x214   : > { %v1910_v32 = vpop.eup %1909  ;;  %v1048_v44 = vmul.f32 %v1033_v8, %v2596_v33  ;;  %v1028_v13 = vadd.f32 2.0, %v2618_v31 }
 0x215   : > { %v1912_v9 = vpop.eup %1911  ;;  %v2627_v37 = vsel %vm1017_vm11, %v2594_v46, %v1049_v10  ;;  %v1039_v40 = vmul.f32 %v1910_v32, %v1011_v54  ;;  %1917 = vrcp.f32 %v1029_v30  ;;  %vm1021_vm11 = vcmp.gt.f32.partialorder %v2606_v51, 20.0 }
 0x216   : > { %v1914_v41 = vpop.eup %1913  ;;  %v2631_v52 = vsel %vm1016_vm3, %v2596_v33, %v1048_v44  ;;  %v1037_v47 = vmul.f32 %v1912_v9, %v1010_v29  ;;  %1919 = vrcp.f32 %v1028_v13  ;;  %v1479_v39 = vrot.slane %v2627_v37, 5 }
 0x217   : > { %v1916_v38 = vpop.eup %1915  ;;  %v1051_v14 = vmul.f32 %v1039_v40, %v2600_v36  ;;  %v1007_v63 = vadd.f32 2.0, %v1914_v41  ;;  %v1478_v26 = vrot.slane %v2631_v52, 6  ;;  %v1427_v46 = vrot.slane %v2631_v52, 3 }
 0x218   : > { %v1050_v49 = vmul.f32 %v1037_v47, %v2602_v25  ;;  %v1006_v55 = vadd.f32 2.0, %v1916_v38  ;;  %v1428_v3 = vrot.slane %v2627_v37, 2  ;;  %v1393_v33 = vrot.slane %v2631_v52, 1 }
 0x219   : > { %v2643_v53 = vsel %vm1019_vm5, %v2600_v36, %v1051_v14  ;;  %v2645_v56 = vmul.f32 %v1914_v41, %v1007_v63  ;;  %v1480_v23 = vsel %vm1073_vm6, %v1479_v39, %v1478_v26  ;;  %v1461_v6 = vrot.slane %v2631_v52, 5 }
 0x21a   : > { %v2652_v57 = vsel %vm1018_vm9, %v2602_v25, %v1050_v49  ;;  %v2654_v58 = vmul.f32 %v1916_v38, %v1006_v55  ;;  %v1483_v35 = vrot.slane %v2643_v53, 3  ;;  %v1429_v42 = vsel %vm1073_vm6, %v1428_v3, %v1427_v46 }
 0x21b   : > { %v1031_v36 = vadd.f32 2.0, %v2645_v56  ;;  %v1481_v62 = vrot.slane %v2652_v57, 4  ;;  %v1430_v19 = vrot.slane %v2652_v57, 1  ;;  %v1394_v43 = vsel %vm1073_vm6, %v2627_v37, %v1393_v33 }
 0x21c   : > { %vm1020_vm9 = vcmp.gt.f32.partialorder %v2608_v15, 20.0  ;;  %v1030_v25 = vadd.f32 2.0, %v2654_v58  ;;  %v1395_v60 = vrot.slane %v2652_v57, 7  ;;  %v1397_v45 = vrot.slane %v2643_v53, 6 }
 0x21d   : > { %v1462_v48 = vrot.slane %v2627_v37, 4  ;;  %1921 = vrcp.f32 %v1031_v36  ;;  %v1482_v28 = vsel %vm1076_vm8, %v1481_v62, %v1480_v23  ;;  %v1431_v1 = vsel %vm1076_vm8, %v1430_v19, %v1429_v42 }
 0x21e   : > { %v1464_v2 = vrot.slane %v2652_v57, 3  ;;  %1923 = vrcp.f32 %v1030_v25  ;;  %v1484_v54 = vsel %vm1079_vm10, %v1483_v35, %v1482_v28  ;;  %v1432_v11 = vsel %vm1079_vm10, %v2643_v53, %v1431_v1 }
 0x21f   : > { %v1396_v29 = vsel %vm1076_vm8, %v1395_v60, %v1394_v43  ;;  %v1918_v59 = vpop.eup %1917  ;;  %v1463_v18 = vsel %vm1073_vm6, %v1462_v48, %v1461_v6  ;;  %v1466_v34 = vrot.slane %v2643_v53, 2  ;;  %v1410_v4 = vrot.slane %v2631_v52, 2 }
 0x220   : > { %v1398_v12 = vsel %vm1079_vm10, %v1397_v45, %v1396_v29  ;;  %v1920_v16 = vpop.eup %1919  ;;  %v1043_v61 = vmul.f32 %v1918_v59, %v1013_v27  ;;  %v1465_v17 = vsel %vm1076_vm8, %v1464_v2, %v1463_v18  ;;  %v1411_v20 = vrot.slane %v2627_v37, 1 }
 0x221   : > { %v1414_v21 = vrot.slane %v2643_v53, 7  ;;  %v1041_v22 = vmul.f32 %v1920_v16, %v2618_v31  ;;  %v1467_v24 = vsel %vm1079_vm10, %v1466_v34, %v1465_v17  ;;  %v1495_v8 = vrot.slane %v2631_v52, 7 }
 0x222   : > { %v1496_v10 = vrot.slane %v2627_v37, 6  ;;  %v1053_v30 = vmul.f32 %v1043_v61, %v2606_v51  ;;  %v1412_v32 = vsel %vm1073_vm6, %v1411_v20, %v1410_v4  ;;  %v1498_v27 = vrot.slane %v2652_v57, 5 }
 0x223   : > { %v1500_v44 = vrot.slane %v2643_v53, 4  ;;  %v1052_v13 = vmul.f32 %v1041_v22, %v2608_v15  ;;  %vm1023_vm3 = vcmp.gt.f32.partialorder %v2612_v50, 20.0  ;;  %v1413_v31 = vsel %vm1076_vm8, %v2652_v57, %v1412_v32 }
 0x224   : > { %v1497_v9 = vsel %vm1073_vm6, %v1496_v10, %v1495_v8  ;;  %v1444_v40 = vrot.slane %v2631_v52, 4  ;;  %v2700_v41 = vsel %vm1021_vm11, %v2606_v51, %v1053_v30  ;;  %vm1022_vm5 = vcmp.gt.f32.partialorder %v2614_v7, 20.0 }
 0x225   : > { %v1415_v47 = vsel %vm1079_vm10, %v1414_v21, %v1413_v31  ;;  %v1499_v39 = vsel %vm1076_vm8, %v1498_v27, %v1497_v9  ;;  %v1445_v38 = vrot.slane %v2627_v37, 3  ;;  %v2709_v14 = vsel %vm1020_vm9, %v2608_v15, %v1052_v13 }
 0x226   : > { %v1487_v63 = vrot.slane %v2700_v41, 1  ;;  %v1435_v26 = vrot.slane %v2700_v41, 6  ;;  %v1401_v51 = vrot.slane %v2700_v41, 4  ;;  %v1485_v46 = vrot.slane %v2709_v14, 2 }
 0x227   : > { %v1433_v49 = vrot.slane %v2709_v14, 7  ;;  %v1399_v55 = vrot.slane %v2709_v14, 5  ;;  %v1468_v3 = vrot.slane %v2709_v14, 1  ;;  %v1922_v33 = vpop.eup %1921  ;;  %v1416_v23 = vrot.slane %v2709_v14, 6 }
 0x228   : > { %v1418_v15 = vrot.slane %v2700_v41, 5  ;;  %v1501_v6 = vsel %vm1079_vm10, %v1500_v44, %v1499_v39  ;;  %v1502_v35 = vrot.slane %v2709_v14, 3  ;;  %v1924_v42 = vpop.eup %1923  ;;  %v1047_v36 = vmul.f32 %v1922_v33, %v2645_v56 }
 0x229   : > { %v1486_v62 = vsel %vm1082_vm12, %v1485_v46, %v1484_v54  ;;  %v1434_v19 = vsel %vm1082_vm12, %v1433_v49, %v1432_v11  ;;  %v1400_v43 = vsel %vm1082_vm12, %v1399_v55, %v1398_v12  ;;  %v1045_v25 = vmul.f32 %v1924_v42, %v2654_v58 }
 0x22a   : > { %v1488_v60 = vsel %vm1085_vm15, %v1487_v63, %v1486_v62  ;;  %v1436_v45 = vsel %vm1085_vm15, %v1435_v26, %v1434_v19  ;;  %v1402_v48 = vsel %vm1085_vm15, %v1401_v51, %v1400_v43  ;;  %v1055_v28 = vmul.f32 %v1047_v36, %v2612_v50 }
 0x22b   : > { %v1469_v1 = vsel %vm1082_vm12, %v1468_v3, %v1467_v24  ;;  %v1417_v56 = vsel %vm1082_vm12, %v1416_v23, %v1415_v47  ;;  %v1503_v2 = vsel %vm1082_vm12, %v1502_v35, %v1501_v6  ;;  %v1054_v54 = vmul.f32 %v1045_v25, %v2614_v7 }
 0x22c   : > { %v1470_v11 = vsel %vm1085_vm15, %v2700_v41, %v1469_v1  ;;  %v1419_v58 = vsel %vm1085_vm15, %v1418_v15, %v1417_v56  ;;  %v1504_v29 = vrot.slane %v2700_v41, 2  ;;  %v1063_v59 = vsel %vm1023_vm3, %v2612_v50, %v1055_v28 }
 0x22d   : > { %v1446_v12 = vsel %vm1073_vm6, %v1445_v38, %v1444_v40  ;;  %v1447_v18 = vrot.slane %v2652_v57, 2  ;;  %v1449_v34 = vrot.slane %v2643_v53, 1  ;;  %v1062_v4 = vsel %vm1022_vm5, %v2614_v7, %v1054_v54 }
 0x22e   : > { %v1490_v16 = vrot.slane %v1063_v59, 7  ;;  %v1439_v61 = vrot.slane %v1063_v59, 4  ;;  %v1405_v17 = vrot.slane %v1063_v59, 2  ;;  %v1489_v20 = vsel %vm1088_vm2, %v1062_v4, %v1488_v60 }
 0x22f   : > { %v1437_v21 = vrot.slane %v1062_v4, 5  ;;  %v1403_v22 = vrot.slane %v1062_v4, 3  ;;  %v1471_v24 = vrot.slane %v1062_v4, 7  ;;  %v1473_v8 = vrot.slane %v1063_v59, 6 }
 0x230   : > { %v1491_v50 = vsel %vm1091_vm4, %v1490_v16, %v1489_v20  ;;  %v1420_v10 = vrot.slane %v1062_v4, 4  ;;  %v1422_v30 = vrot.slane %v1063_v59, 3  ;;  %v1505_v44 = vsel %vm1085_vm15, %v1504_v29, %v1503_v2 }
 0x231   : > { %1492 = vrot.lane.b32.xlu1 %v1491_v50, %s1952_s13  ;;  %v1438_v32 = vsel %vm1088_vm2, %v1437_v21, %v1436_v45  ;;  %v1404_v27 = vsel %vm1088_vm2, %v1403_v22, %v1402_v48  ;;  %v1472_v7 = vsel %vm1088_vm2, %v1471_v24, %v1470_v11  ;;  %v1506_v39 = vrot.slane %v1062_v4, 1 }
 0x232   : > { %v1440_v13 = vsel %vm1091_vm4, %v1439_v61, %v1438_v32  ;;  %v1406_v31 = vsel %vm1091_vm4, %v1405_v17, %v1404_v27  ;;  %v1474_v9 = vsel %vm1091_vm4, %v1473_v8, %v1472_v7  ;;  %v1421_v40 = vsel %vm1088_vm2, %v1420_v10, %v1419_v58 }
 0x233   : > { %1441 = vrot.lane.b32.xlu0 %v1440_v13, %s1956_s22  ;;  %v1423_v47 = vsel %vm1091_vm4, %v1422_v30, %v1421_v40  ;;  %v1448_v38 = vsel %vm1076_vm8, %v1447_v18, %v1446_v12  ;;  %v1452_v63 = vrot.slane %v2700_v41, 7  ;;  %v1454_v51 = vrot.slane %v1062_v4, 6 }
 0x234   : > { %v1450_v26 = vsel %vm1079_vm10, %v1449_v34, %v1448_v38  ;;  %v1456_v46 = vrot.slane %v1063_v59, 5  ;;  %v1378_v49 = vrot.slane %v2627_v37, 7  ;;  %v1507_v55 = vsel %vm1088_vm2, %v1506_v39, %v1505_v44 }
 0x235   : > { %1407 = vrot.lane.b32.xlu1 %v1406_v31, %s1957_s23  ;;  %v1451_v3 = vsel %vm1082_vm12, %v2709_v14, %v1450_v26  ;;  %v1380_v33 = vrot.slane %v2652_v57, 6  ;;  %v1382_v23 = vrot.slane %v2643_v53, 5  ;;  %v1508_v15 = vsel %vm1091_vm4, %v1063_v59, %v1507_v55 }
 0x236   : > { %v1453_v6 = vsel %vm1085_vm15, %v1452_v63, %v1451_v3  ;;  %v1379_v35 = vsel %vm1073_vm6, %v1378_v49, %v2631_v52  ;;  %v1384_v37 = vrot.slane %v2709_v14, 4  ;;  %v1388_v62 = vrot.slane %v1062_v4, 2 }
 0x237   : > { %1475 = vrot.lane.b32.xlu0 %v1474_v9, %s1958_s24  ;;  %v1455_v42 = vsel %vm1088_vm2, %v1454_v51, %v1453_v6  ;;  %v1381_v36 = vsel %vm1076_vm8, %v1380_v33, %v1379_v35  ;;  %v1386_v19 = vrot.slane %v2700_v41, 3  ;;  %v1390_v14 = vrot.slane %v1063_v59, 1 }
 0x238   : > { %v1457_v57 = vsel %vm1091_vm4, %v1456_v46, %v1455_v42  ;;  %v1383_v53 = vsel %vm1079_vm10, %v1382_v23, %v1381_v36  ;;  %vm1512_vm6 = vcmask 31744   ;;  %vm1515_vm8 = vcmask 97280  }
 0x239   : > { %1424 = vrot.lane.b32.xlu1 %v1423_v47, %s1950_s28  ;;  %v1385_v43 = vsel %vm1082_vm12, %v1384_v37, %v1383_v53  ;;  %vm1518_vm10 = vcmask 162816   ;;  %vm1521_vm12 = vcmask 228352   ;;  %s403_s28 = scalar_lea.vmem %s2820_s9, %s2573_s17 }
 0x23a   : > { %v1387_v52 = vsel %vm1085_vm15, %v1386_v19, %v1385_v43 }
 0x23b   : > { %1509 = vrot.lane.b32.xlu0 %v1508_v15, %s1959_s25  ;;  %v1389_v25 = vsel %vm1088_vm2, %v1388_v62, %v1387_v52 }
 0x23c   : > { %v1391_v60 = vsel %vm1091_vm4, %v1390_v14, %v1389_v25 }
 0x23d   : > { %1458 = vrot.lane.b32.xlu1 %v1457_v57, %s1949_s27 }
 0x241   : > { %1359 = vrot.lane.b32.xlu1 %v2566_v0, %s1955_s16 }
 0x2a3   : > { %v1493_v41 = vpop.permute.xlu1 %1492 }
 0x2a5   : > { %v1442_v45 = vpop.permute.xlu0 %1441 }
 0x2a7   : > { %v1408_v48 = vpop.permute.xlu1 %1407 }
 0x2a8   : > { %v1513_v28 = vsel %vm1512_vm6, %v1391_v60, %v1408_v48 }
 0x2a9   : > { %v1476_v56 = vpop.permute.xlu0 %1475 }
 0x2ab   : > { %v1425_v1 = vpop.permute.xlu1 %1424 }
 0x2ac   : > { %v1514_v2 = vsel %vm420_vm0, %v1513_v28, %v1425_v1  ;;  %vm2822_vm0 = vcmask 523264  }
 0x2ad   : > { %v1516_v11 = vsel %vm1515_vm8, %v1514_v2, %v1442_v45  ;;  %v1510_v29 = vpop.permute.xlu0 %1509 }
 0x2af   : > { %v1459_v54 = vpop.permute.xlu1 %1458 }
 0x2b0   : > { %v1517_v58 = vsel %vm1214_vm13, %v1516_v11, %v1459_v54 }
 0x2b1   : > { %v1519_v0 = vsel %vm1518_vm10, %v1517_v58, %v1476_v56 }
 0x2b2   : > { %v1520_v59 = vsel %vm1216_vm14, %v1519_v0, %v1493_v41 }
 0x2b3   : > { %v1522_v12 = vsel %vm1521_vm12, %v1520_v59, %v1510_v29  ;;  %v1360_v18 = vpop.permute.xlu1 %1359 }
 0x2b4   : > { %1523 = vst.msk [vmem:[%s403_s28] sm:$0xff] %vm1218_vm1, %v1522_v12  ;;  %v1368_v34 = vsel %vm1224_vm7, %v2589_v5, %v1360_v18 }
 0x2b5   : > { %1369 = vst.msk [vmem:[%s396_s14] sm:$0xff] %vm2822_vm0, %v1368_v34 }
 0x2b6 PF: > { %s20_s11 = sadd.s32 1, %s1947_s11   ;;  %s2823_s30 = smov %s1943_s10 }
 0x2b7   : > { %p17_p5 = scmp.ge.s32.totalorder %s20_s11, 4   ;;  %s2824_s10 = smov %s2826_s12 }
 0x2b9   :  { %19 = sbr.rel (!%p17_p5) target bundleno = 2 (0x2), region = 102 }

// kernel: stem_forward.8
= control target key start
LH: loop header
LB: loop body
LE: loop exit
PB: predicated region body
PF: predicated region fallthrough
CT: control target
= control target key end

     0   :  { %s1313_s12 = smov 0   ;;  %s1315_s13 = smov 0   ;;  %s1794_s0 = inlined_call_operand.vmem [shape: f32[2,1,10,10,4], index: 0, kind: input, shape index: {}]   ;;  %s1795_s1 = inlined_call_operand.vmem [shape: f32[36,8], index: 1, kind: input, shape index: {}]   ;;  %s1796_s2 = inlined_call_operand.vmem [shape: f32[1,8], index: 2, kind: input, shape index: {}]   ;;  %s1797_s3 = inlined_call_operand.vmem [shape: f32[2,8,64], index: 3, kind: output, shape index: {}]  }
   0x1   :  { %s1317_s14 = smov 0  }
   0x2 LB: > { %s25_s15 = sadd.s32 1, %s1276_s13  ;;  %p1078_p0 = scmp.ge.s32.totalorder %s1280_s14, 1  ;;  %s1280_s14 = sphi %s1317_s14, %s13_s14   ;;  %s1276_s13 = sphi %s1315_s13, %s1799_s13   ;;  %s1272_s12 = sphi %s1313_s12, %s1798_s12  }
   0x3   : > { %p27_p1 = scmp.ge.s32.totalorder %s25_s15, 2  ;;  %p151_p2 = scmp.lt.s32.totalorder %s1280_s14, 3 }
   0x5   : > { %s1801_s15 = smov (%p27_p1, %s25_s15), 0  ;;  %p152_p3 = pnand %p1078_p0, %p151_p2 }
   0x6   : > { %p177_p4 = scmp.lt.s32.totalorder (!%p152_p3), %s1272_s12, 1  ;;  %s1282_s20 = smov (!%p152_p3), 8   ;;  %v598_v17 = vld [vmem:[%s1795_s1] sm:$0xff] (!%p152_p3)  ;;  %v599_v18 = vld [vmem:[%s1795_s1 + $0x8] sm:$0xff] (!%p152_p3)  ;;  %v600_v21 = vld [vmem:[%s1795_s1 + $0x10] sm:$0xff] (!%p152_p3)  ;;  %vm635_vm0 = vcmask (!%p152_p3), 1043456  }
   0x7   : > { %155 = sbr.rel (%p152_p3) target bundleno = 648 (0x288), region = 32  ;;  %s1283_s21 = smov (!%p152_p3), 4   ;;  %v1176_v19 = vpack.c.bf16 (!%p152_p3), %v599_v18, %v598_v17  ;;  %v601_v22 = vld [vmem:[%s1795_s1 + $0x18] sm:$0xff] (!%p152_p3)  ;;  %v602_v24 = vld [vmem:[%s1795_s1 + $0x20] sm:$0xf] (!%p152_p3)  ;;  %vm526_vm1 = vcmask (!%p152_p3), 31744  }
   0x8   : > { %s1284_s22 = smov (!%p152_p3), 12   ;;  %s1285_s23 = smov (!%p152_p3), 16   ;;  %v1180_v23 = vpack.c.bf16 (!%p152_p3), %v601_v22, %v600_v21  ;;  %vm535_vm2 = vcmask (!%p152_p3), 64512   ;;  %vm544_vm3 = vcmask (!%p152_p3), 97280   ;;  %vm553_vm4 = vcmask (!%p152_p3), 130048  }
   0x9   : > { %s1286_s24 = smov (!%p152_p3), 20   ;;  %s1287_s25 = smov (!%p152_p3), 24   ;;  %1177 = vmatprep.subr.bf16.mxu0 (!%p152_p3), %v1176_v19  ;;  %1184 = vmatprep.subr.bf16.mxu1 (!%p152_p3), %v1176_v19  ;;  %vm562_vm5 = vcmask (!%p152_p3), 162816   ;;  %vm571_vm6 = vcmask (!%p152_p3), 195584   ;;  %vm580_vm7 = vcmask (!%p152_p3), 228352   ;;  %vm589_vm8 = vcmask (!%p152_p3), 261120  }
   0xa   : > { %s1288_s30 = smov (!%p152_p3), 28   ;;  %1179 = vmatpush3.bf16.msra.mxu0 (!%p152_p3), %v1176_v19  ;;  %1187 = vmatpush3.bf16.msra.mxu1 (!%p152_p3), %v1176_v19  ;;  %s1289_s10 = smov (!%p152_p3), 32   ;;  %vm610_vm9 = vcmask (!%p152_p3), 293888   ;;  %vm841_vm12 = vcmask (!%p152_p3), 1041409   ;;  %vm844_vm13 = vcmask (!%p152_p3), 1042434   ;;  %vm847_vm15 = vcmask (!%p152_p3), 1043459  }
   0xb   : > { %1181 = vmatprep.subr.bf16.mxu0 (!%p152_p3), %v1180_v23  ;;  %1185 = vmatprep.subr.bf16.mxu1 (!%p152_p3), %v1180_v23  ;;  %s1290_s17 = smov (!%p152_p3), 48   ;;  %s1291_s18 = smov (!%p152_p3), 40  }
   0xe   : > { %s1803_s12 = smov (!%p177_p4, %s1272_s12), 1  ;;  %1183 = vmatpush3.bf16.msra.mxu0 %v1180_v23  ;;  %1188 = vmatpush3.bf16.msra.mxu1 %v1180_v23 }
   0xf   : > { %s1190_s16 = smul.u32 160, %s1803_s12  ;;  %1162 = vmatprep.subr.msk.mxu0 %vm635_vm0, %v602_v24  ;;  %1186 = vmatprep.subr.msk.mxu1 %vm635_vm0, %v602_v24 }
  0x11   : > { %s1337_s19 = scalar_lea.vmem %s1794_s0, %s1190_s16 }
  0x12   : > { %v208_v0 = vld [vmem:[%s1337_s19 + $0x2] sm:$0xff]  ;;  %v209_v2 = vld [vmem:[%s1337_s19 + $0x12] sm:$0xff]  ;;  %1163 = vmatpush3.msk.msra.mxu0 %vm635_vm0, %v602_v24  ;;  %1189 = vmatpush3.msk.msra.mxu1 %vm635_vm0, %v602_v24 }
  0x13   : > { %v200_v1 = vld [vmem:[%s1337_s19 + $0x1] sm:$0xff]  ;;  %310 = vrot.lane.b32.xlu1 %v208_v0, %s1282_s20  ;;  %v201_v3 = vld [vmem:[%s1337_s19 + $0x11] sm:$0xff] }
  0x14   : > { %278 = vrot.lane.b32.xlu0 %v200_v1, %s1283_s21  ;;  %v1348_v4 = vld [vmem:[%s1337_s19 + $0x20] sm:$0xff]  ;;  %v1351_v5 = vld [vmem:[%s1337_s19 + $0x10] sm:$0xff] }
  0x15   : > { %v202_v6 = vld [vmem:[%s1337_s19 + $0x21] sm:$0xff]  ;;  %v203_v8 = vld [vmem:[%s1337_s19 + $0x31] sm:$0xff] }
  0x16   : > { %v1361_v7 = vld [vmem:[%s1337_s19 + $0x41] sm:$0xff]  ;;  %v1371_v10 = vld [vmem:[%s1337_s19 + $0x51] sm:$0xff] }
  0x17   : > { %312 = vrot.lane.b32.xlu1 %v209_v2, %s1282_s20  ;;  %v210_v9 = vld [vmem:[%s1337_s19 + $0x22] sm:$0xff]  ;;  %v211_v12 = vld [vmem:[%s1337_s19 + $0x32] sm:$0xff] }
  0x18   : > { %280 = vrot.lane.b32.xlu0 %v201_v3, %s1283_s21  ;;  %v1377_v11 = vld [vmem:[%s1337_s19 + $0x42] sm:$0xff]  ;;  %v1387_v13 = vld [vmem:[%s1337_s19 + $0x30] sm:$0xff] }
  0x19   : > { %v1390_v14 = vld [vmem:[%s1337_s19 + $0x52] sm:$0xff]  ;;  %v1404_v16 = vld [vmem:[%s1337_s19 + $0x40] sm:$0xff] }
  0x1a   : > { %v1397_v15 = vld [vmem:[%s1337_s19 + $0x50] sm:$0xff]  ;;  %v1416_v20 = vld [vmem:[%s1337_s19 + $0x60] sm:$0xff] }
  0x1b   : > { %344 = vrot.lane.b32.xlu1 %v1348_v4, %s1284_s22  ;;  %v206_v25 = vld [vmem:[%s1337_s19 + $0x61] sm:$0xff]  ;;  %v207_v26 = vld [vmem:[%s1337_s19 + $0x71] sm:$0xff] }
  0x1c   : > { %342 = vrot.lane.b32.xlu0 %v1351_v5, %s1284_s22  ;;  %v214_v27 = vld [vmem:[%s1337_s19 + $0x62] sm:$0xff]  ;;  %v215_v28 = vld [vmem:[%s1337_s19 + $0x72] sm:$0xff] }
  0x1d   : > { %v1457_v29 = vld [vmem:[%s1337_s19 + $0x70] sm:$0xff]  ;;  %v1088_v30 = vld [vmem:[%s1337_s19 + $0x80] sm:$0xff] }
  0x1e   : > { %v1096_v31 = vld [vmem:[%s1337_s19 + $0x81] sm:$0xff]  ;;  %v1112_v33 = vld [vmem:[%s1337_s19 + $0x90] sm:$0xff] }
  0x1f   : > { %282 = vrot.lane.b32.xlu1 %v202_v6, %s1283_s21  ;;  %v1104_v32 = vld [vmem:[%s1337_s19 + $0x82] sm:$0xff]  ;;  %v1120_v36 = vld [vmem:[%s1337_s19 + $0x91] sm:$0xff] }
  0x20   : > { %374 = vrot.lane.b32.xlu0 %v201_v3, %s1285_s23  ;;  %v1128_v39 = vld [vmem:[%s1337_s19 + $0x92] sm:$0xff] }
  0x23   : > { %376 = vrot.lane.b32.xlu1 %v202_v6, %s1285_s23 }
  0x24   : > { %286 = vrot.lane.b32.xlu0 %v1361_v7, %s1283_s21 }
  0x27   : > { %284 = vrot.lane.b32.xlu1 %v203_v8, %s1283_s21 }
  0x28   : > { %406 = vrot.lane.b32.xlu0 %v209_v2, %s1286_s24 }
  0x2b   : > { %314 = vrot.lane.b32.xlu1 %v210_v9, %s1282_s20 }
  0x2c   : > { %288 = vrot.lane.b32.xlu0 %v1371_v10, %s1283_s21 }
  0x2f   : > { %408 = vrot.lane.b32.xlu1 %v210_v9, %s1286_s24 }
  0x30   : > { %318 = vrot.lane.b32.xlu0 %v1377_v11, %s1282_s20 }
  0x33   : > { %316 = vrot.lane.b32.xlu1 %v211_v12, %s1282_s20 }
  0x34   : > { %438 = vrot.lane.b32.xlu0 %v1348_v4, %s1287_s25 }
  0x37   : > { %346 = vrot.lane.b32.xlu1 %v1387_v13, %s1284_s22 }
  0x38   : > { %320 = vrot.lane.b32.xlu0 %v1390_v14, %s1282_s20 }
  0x3b   : > { %440 = vrot.lane.b32.xlu1 %v1387_v13, %s1287_s25 }
  0x3c   : > { %350 = vrot.lane.b32.xlu0 %v1397_v15, %s1284_s22 }
  0x3f   : > { %348 = vrot.lane.b32.xlu1 %v1404_v16, %s1284_s22 }
  0x40   : > { %470 = vrot.lane.b32.xlu0 %v202_v6, %s1288_s30 }
  0x43   : > { %378 = vrot.lane.b32.xlu1 %v203_v8, %s1285_s23 }
  0x44   : > { %352 = vrot.lane.b32.xlu0 %v1416_v20, %s1284_s22 }
  0x47   : > { %472 = vrot.lane.b32.xlu1 %v203_v8, %s1288_s30 }
  0x48   : > { %382 = vrot.lane.b32.xlu0 %v1371_v10, %s1285_s23 }
  0x4b   : > { %290 = vrot.lane.b32.xlu1 %v206_v25, %s1283_s21 }
  0x4c   : > { %502 = vrot.lane.b32.xlu0 %v210_v9, %s1289_s10 }
  0x4f   : > { %384 = vrot.lane.b32.xlu1 %v206_v25, %s1285_s23 }
  0x50   : > { %380 = vrot.lane.b32.xlu0 %v1361_v7, %s1285_s23 }
  0x53   : > { %414 = vrot.lane.b32.xlu1 %v1390_v14, %s1286_s24 }
  0x54   : > { %410 = vrot.lane.b32.xlu0 %v211_v12, %s1286_s24 }
  0x57   : > { %292 = vrot.lane.b32.xlu1 %v207_v26, %s1283_s21 }
  0x58   : > { %504 = vrot.lane.b32.xlu0 %v211_v12, %s1289_s10 }
  0x5b   : > { %412 = vrot.lane.b32.xlu1 %v1377_v11, %s1286_s24 }
  0x5c   : > { %322 = vrot.lane.b32.xlu0 %v214_v27, %s1282_s20 }
  0x5f   : > { %442 = vrot.lane.b32.xlu1 %v1404_v16, %s1287_s25 }
  0x60   : > { %416 = vrot.lane.b32.xlu0 %v214_v27, %s1286_s24 }
  0x63   : > { %324 = vrot.lane.b32.xlu1 %v215_v28, %s1282_s20 }
  0x64   : > { %446 = vrot.lane.b32.xlu0 %v1416_v20, %s1287_s25 }
  0x67   : > { %444 = vrot.lane.b32.xlu1 %v1397_v15, %s1287_s25 }
  0x68   : > { %354 = vrot.lane.b32.xlu0 %v1457_v29, %s1284_s22 }
  0x6b   : > { %474 = vrot.lane.b32.xlu1 %v1361_v7, %s1288_s30 }
  0x6c   : > { %448 = vrot.lane.b32.xlu0 %v1457_v29, %s1287_s25 }
  0x6f   : > { %356 = vrot.lane.b32.xlu1 %v1088_v30, %s1284_s22 }
  0x70   : > { %478 = vrot.lane.b32.xlu0 %v206_v25, %s1288_s30 }
  0x73   : > { %476 = vrot.lane.b32.xlu1 %v1371_v10, %s1288_s30 }
  0x74   : > { %386 = vrot.lane.b32.xlu0 %v207_v26, %s1285_s23 }
  0x77   : > { %506 = vrot.lane.b32.xlu1 %v1377_v11, %s1289_s10 }
  0x78   : > { %480 = vrot.lane.b32.xlu0 %v207_v26, %s1288_s30 }
  0x7b   : > { %388 = vrot.lane.b32.xlu1 %v1096_v31, %s1285_s23 }
  0x7c   : > { %510 = vrot.lane.b32.xlu0 %v214_v27, %s1289_s10 }
  0x7f   : > { %508 = vrot.lane.b32.xlu1 %v1390_v14, %s1289_s10 }
  0x80   : > { %418 = vrot.lane.b32.xlu0 %v215_v28, %s1286_s24 }
  0x83   : > { %420 = vrot.lane.b32.xlu1 %v1104_v32, %s1286_s24 }
  0x84   : > { %512 = vrot.lane.b32.xlu0 %v215_v28, %s1289_s10 }
  0x85   : > { %v311_v34 = vpop.permute.xlu1 %310 }
  0x86   : > { %v279_v35 = vpop.permute.xlu0 %278 }
  0x87   : > { %452 = vrot.lane.b32.xlu1 %v1112_v33, %s1287_s25 }
  0x88   : > { %450 = vrot.lane.b32.xlu0 %v1088_v30, %s1287_s25 }
  0x89   : > { %v1489_v37 = vpop.permute.xlu1 %312 }
  0x8a   : > { %v281_v38 = vpop.permute.xlu0 %280 }
  0x8b   : > { %484 = vrot.lane.b32.xlu1 %v1120_v36, %s1288_s30  ;;  %v528_v21 = vsel %vm526_vm1, %v1351_v5, %v281_v38 }
  0x8c   : > { %482 = vrot.lane.b32.xlu0 %v1096_v31, %s1288_s30  ;;  %v537_v24 = vsel %vm535_vm2, %v528_v21, %v1489_v37 }
  0x8d   : > { %v345_v40 = vpop.permute.xlu1 %344 }
  0x8e   : > { %v343_v41 = vpop.permute.xlu0 %342  ;;  %v546_v25 = vsel %vm544_vm3, %v537_v24, %v345_v40 }
  0x8f   : > { %516 = vrot.lane.b32.xlu1 %v1128_v39, %s1289_s10 }
  0x90   : > { %514 = vrot.lane.b32.xlu0 %v1104_v32, %s1289_s10 }
  0x91   : > { %v283_v42 = vpop.permute.xlu1 %282 }
  0x92   : > { %v375_v43 = vpop.permute.xlu0 %374  ;;  %v529_v48 = vsel %vm526_vm1, %v1348_v4, %v283_v42  ;;  %v192_v4 = vld [vmem:[%s1337_s19] sm:$0xff]  ;;  %s1292_s19 = smov 56  }
  0x93   : > { %v527_v6 = vsel %vm526_vm1, %v192_v4, %v279_v35 }
  0x94   : > { %v536_v9 = vsel %vm535_vm2, %v527_v6, %v311_v34 }
  0x95   : > { %v377_v44 = vpop.permute.xlu1 %376  ;;  %v545_v10 = vsel %vm544_vm3, %v536_v9, %v343_v41 }
  0x96   : > { %v287_v45 = vpop.permute.xlu0 %286  ;;  %v555_v28 = vsel %vm553_vm4, %v546_v25, %v377_v44 }
  0x97   : > { %v531_v52 = vsel %vm526_vm1, %v1404_v16, %v287_v45 }
  0x99   : > { %v285_v46 = vpop.permute.xlu1 %284 }
  0x9a   : > { %v407_v47 = vpop.permute.xlu0 %406  ;;  %v530_v56 = vsel %vm526_vm1, %v1387_v13, %v285_v46  ;;  %v554_v13 = vsel %vm553_vm4, %v545_v10, %v375_v43 }
  0x9b   : > { %v563_v14 = vsel %vm562_vm5, %v554_v13, %v407_v47 }
  0x9d   : > { %v315_v49 = vpop.permute.xlu1 %314 }
  0x9e   : > { %v289_v50 = vpop.permute.xlu0 %288  ;;  %v1499_v51 = vsel %vm535_vm2, %v529_v48, %v315_v49 }
  0x9f   : > { %v532_v60 = vsel %vm526_vm1, %v1397_v15, %v289_v50 }
  0xa1   : > { %v409_v53 = vpop.permute.xlu1 %408 }
  0xa2   : > { %v319_v54 = vpop.permute.xlu0 %318  ;;  %v564_v30 = vsel %vm562_vm5, %v555_v28, %v409_v53 }
  0xa3   : > { %v1504_v55 = vsel %vm535_vm2, %v531_v52, %v319_v54 }
  0xa5   : > { %v317_v57 = vpop.permute.xlu1 %316 }
  0xa6   : > { %v439_v58 = vpop.permute.xlu0 %438  ;;  %v1509_v59 = vsel %vm535_vm2, %v530_v56, %v317_v57 }
  0xa7   : > { %v572_v15 = vsel %vm571_vm6, %v563_v14, %v439_v58 }
  0xa9   : > { %v347_v61 = vpop.permute.xlu1 %346 }
  0xaa   : > { %v321_v62 = vpop.permute.xlu0 %320  ;;  %v547_v47 = vsel %vm544_vm3, %v1499_v51, %v347_v61 }
  0xab   : > { %v1514_v63 = vsel %vm535_vm2, %v532_v60, %v321_v62 }
  0xad   : > { %v441_v0 = vpop.permute.xlu1 %440 }
  0xae   : > { %v351_v1 = vpop.permute.xlu0 %350  ;;  %v573_v31 = vsel %vm571_vm6, %v564_v30, %v441_v0 }
  0xaf   : > { %v549_v54 = vsel %vm544_vm3, %v1504_v55, %v351_v1 }
  0xb1   : > { %v1516_v2 = vpop.permute.xlu1 %348 }
  0xb2   : > { %v471_v3 = vpop.permute.xlu0 %470  ;;  %v548_v0 = vsel %vm544_vm3, %v1509_v59, %v1516_v2 }
  0xb3   : > { %v581_v16 = vsel %vm580_vm7, %v572_v15, %v471_v3 }
  0xb5   : > { %v379_v7 = vpop.permute.xlu1 %378 }
  0xb6   : > { %v1520_v8 = vpop.permute.xlu0 %352  ;;  %v556_v50 = vsel %vm553_vm4, %v547_v47, %v379_v7 }
  0xb7   : > { %v550_v10 = vsel %vm544_vm3, %v1514_v63, %v1520_v8 }
  0xb9   : > { %v473_v11 = vpop.permute.xlu1 %472 }
  0xba   : > { %v383_v12 = vpop.permute.xlu0 %382  ;;  %v582_v32 = vsel %vm580_vm7, %v573_v31, %v473_v11 }
  0xbb   : > { %v558_v60 = vsel %vm553_vm4, %v549_v54, %v383_v12 }
  0xbd   : > { %v1528_v17 = vpop.permute.xlu1 %290 }
  0xbe   : > { %v503_v18 = vpop.permute.xlu0 %502 }
  0xbf   : > { %v590_v19 = vsel %vm589_vm8, %v581_v16, %v503_v18 }
  0xc0   : > { %1164 = vmatprep.mubr.msk.f32.mxu0 %vm610_vm9, %v590_v19 }
  0xc1   : > { %v385_v22 = vpop.permute.xlu1 %384 }
  0xc2   : > { %v381_v23 = vpop.permute.xlu0 %380  ;;  %v559_v12 = vsel %vm553_vm4, %v550_v10, %v385_v22  ;;  %v533_v22 = vsel %vm526_vm1, %v1416_v20, %v1528_v17 }
  0xc3   : > { %v557_v4 = vsel %vm553_vm4, %v548_v0, %v381_v23 }
  0xc5   : > { %v415_v26 = vpop.permute.xlu1 %414 }
  0xc6   : > { %v411_v27 = vpop.permute.xlu0 %410  ;;  %v567_v51 = vsel %vm562_vm5, %v558_v60, %v415_v26 }
  0xc7   : > { %v565_v52 = vsel %vm562_vm5, %v556_v50, %v411_v27 }
  0xc9   : > { %v293_v33 = vpop.permute.xlu1 %292 }
  0xca   : > { %v505_v34 = vpop.permute.xlu0 %504  ;;  %v534_v23 = vsel %vm526_vm1, %v1457_v29, %v293_v33 }
  0xcb   : > { %v591_v5 = vsel %vm589_vm8, %v582_v32, %v505_v34 }
  0xcc   : > { %1165 = vmatmul.mubr.msk.f32.vlgmr.msra.gmra.mrb[0].mxu0 %vm610_vm9, %v591_v5 }
  0xcd   : > { %v413_v35 = vpop.permute.xlu1 %412 }
  0xce   : > { %v323_v36 = vpop.permute.xlu0 %322  ;;  %v566_v7 = vsel %vm562_vm5, %v557_v4, %v413_v35 }
  0xcf   : > { %v542_v24 = vsel %vm535_vm2, %v533_v22, %v323_v36 }
  0xd1   : > { %v443_v37 = vpop.permute.xlu1 %442 }
  0xd2   : > { %v417_v38 = vpop.permute.xlu0 %416  ;;  %v574_v53 = vsel %vm571_vm6, %v565_v52, %v443_v37 }
  0xd3   : > { %v568_v14 = vsel %vm562_vm5, %v559_v12, %v417_v38 }
  0xd5   : > { %v325_v39 = vpop.permute.xlu1 %324 }
  0xd6   : > { %v447_v40 = vpop.permute.xlu0 %446  ;;  %v543_v25 = vsel %vm535_vm2, %v534_v23, %v325_v39  ;;  %v1601_v39 = vld [vmem:[%s1796_s2] ss:$0 sm:$0xff] }
  0xd7   : > { %v576_v61 = vsel %vm571_vm6, %v567_v51, %v447_v40 }
  0xd9   : > { %v445_v41 = vpop.permute.xlu1 %444 }
  0xda   : > { %v355_v42 = vpop.permute.xlu0 %354  ;;  %v575_v9 = vsel %vm571_vm6, %v566_v7, %v445_v41 }
  0xdb   : > { %v551_v26 = vsel %vm544_vm3, %v542_v24, %v355_v42 }
  0xdd   : > { %v475_v43 = vpop.permute.xlu1 %474 }
  0xde   : > { %v449_v44 = vpop.permute.xlu0 %448  ;;  %v583_v56 = vsel %vm580_vm7, %v574_v53, %v475_v43 }
  0xdf   : > { %v577_v15 = vsel %vm571_vm6, %v568_v14, %v449_v44 }
  0xe1   : > { %v357_v45 = vpop.permute.xlu1 %356 }
  0xe2   : > { %v479_v46 = vpop.permute.xlu0 %478  ;;  %v552_v27 = vsel %vm544_vm3, %v543_v25, %v357_v45  ;;  %vm850_vm3 = vcmask 1044484  }
  0xe3   : > { %v585_v55 = vsel %vm580_vm7, %v576_v61, %v479_v46 }
  0xe5   : > { %v477_v48 = vpop.permute.xlu1 %476 }
  0xe6   : > { %v387_v49 = vpop.permute.xlu0 %386  ;;  %v584_v59 = vsel %vm580_vm7, %v575_v9, %v477_v48 }
  0xe7   : > { %v560_v31 = vsel %vm553_vm4, %v551_v26, %v387_v49 }
  0xe9   : > { %v507_v57 = vpop.permute.xlu1 %506 }
  0xea   : > { %v481_v58 = vpop.permute.xlu0 %480  ;;  %v592_v62 = vsel %vm589_vm8, %v583_v56, %v507_v57 }
  0xeb   : > { %1167 = vmatprep.mubr.msk.f32.mxu0 %vm610_vm9, %v592_v62  ;;  %v586_v16 = vsel %vm580_vm7, %v577_v15, %v481_v58 }
  0xed   : > { %v389_v1 = vpop.permute.xlu1 %388 }
  0xee   : > { %v511_v3 = vpop.permute.xlu0 %510  ;;  %v561_v32 = vsel %vm553_vm4, %v552_v27, %v389_v1 }
  0xef   : > { %v594_v6 = vsel %vm589_vm8, %v585_v55, %v511_v3 }
  0xf0   : > { %1170 = vmatprep.mubr.msk.f32.mxu1 %vm610_vm9, %v594_v6 }
  0xf1   : > { %v509_v2 = vpop.permute.xlu1 %508 }
  0xf2   : > { %v419_v11 = vpop.permute.xlu0 %418  ;;  %v593_v13 = vsel %vm589_vm8, %v584_v59, %v509_v2 }
  0xf3   : > { %1168 = vmatmul.mubr.msk.f32.gmra.mrb[2].mxu0 %vm610_vm9, %v593_v13  ;;  %v569_v34 = vsel %vm562_vm5, %v560_v31, %v419_v11 }
  0xf5   : > { %v421_v18 = vpop.permute.xlu1 %420 }
  0xf6   : > { %v513_v19 = vpop.permute.xlu0 %512  ;;  %v570_v20 = vsel %vm562_vm5, %v561_v32, %v421_v18 }
  0xf7   : > { %v595_v63 = vsel %vm589_vm8, %v586_v16, %v513_v19 }
  0xf8   : > { %1171 = vmatmul.mubr.msk.f32.vlgmr.msra.gmra.mrb[0].mxu1 %vm610_vm9, %v595_v63 }
  0xf9   : > { %v453_v8 = vpop.permute.xlu1 %452 }
  0xfa   : > { %v451_v21 = vpop.permute.xlu0 %450  ;;  %v579_v29 = vsel %vm571_vm6, %v570_v20, %v453_v8 }
  0xfb   : > { %v578_v17 = vsel %vm571_vm6, %v569_v34, %v451_v21 }
  0xfd   : > { %v485_v28 = vpop.permute.xlu1 %484 }
  0xfe   : > { %v483_v30 = vpop.permute.xlu0 %482  ;;  %v588_v33 = vsel %vm580_vm7, %v579_v29, %v485_v28 }
  0xff   : > { %v587_v5 = vsel %vm580_vm7, %v578_v17, %v483_v30  ;;  %vm853_vm7 = vcmask 1045509  }
 0x101   : > { %v517_v35 = vpop.permute.xlu1 %516 }
 0x102   : > { %v515_v36 = vpop.permute.xlu0 %514  ;;  %v597_v37 = vsel %vm589_vm8, %v588_v33, %v517_v35 }
 0x103   : > { %v596_v38 = vsel %vm589_vm8, %v587_v5, %v515_v36 }
 0x104   : > { %1173 = vmatprep.mubr.msk.f32.mxu1 %vm610_vm9, %v596_v38 }
 0x105   : > { %1174 = vmatmul.mubr.msk.f32.gmra.mrb[2].mxu1 %vm610_vm9, %v597_v37 }
 0x19f   : > { %v1166_v40 = vpop.f32.mrb[0].mxu0 }
 0x1a0   : > { %v711_v41 = vadd.f32 %v1166_v40, %v1601_v39  ;;  %v705_v42 = vpop.f32.mrb[1].mxu0 }
 0x1a1   : > { %v706_v43 = vadd.f32 %v1601_v39, %v705_v42 }
 0x1a2   : > { %v745_v44 = vmin.f32 %v711_v41, 20.0  ;;  %vm785_vm10 = vcmp.gt.f32.partialorder %v711_v41, 20.0 }
 0x1a3   : > { %v744_v45 = vmin.f32 %v706_v43, 20.0  ;;  %vm784_vm11 = vcmp.gt.f32.partialorder %v706_v43, 20.0 }
 0x1a4   : > { %v754_v46 = vmul.f32 1.442695, %v745_v44 }
 0x1a5   : > { %v752_v47 = vmul.f32 1.442695, %v744_v45 }
 0x1a6   : > { %1226 = vpow2.f32 %v754_v46 }
 0x1a7   : > { %1228 = vpow2.f32 %v752_v47 }
 0x1b0   : > { %v1227_v48 = vpop.eup %1226 }
 0x1b1   : > { %v1229_v49 = vpop.eup %1228  ;;  %v769_v50 = vadd.f32 2.0, %v1227_v48 }
 0x1b2   : > { %v768_v52 = vadd.f32 2.0, %v1229_v49 }
 0x1b3   : > { %v777_v53 = vmul.f32 %v1227_v48, %v769_v50 }
 0x1b4   : > { %v776_v54 = vmul.f32 %v1229_v49, %v768_v52 }
 0x1b5   : > { %v793_v56 = vadd.f32 2.0, %v777_v53 }
 0x1b6   : > { %v792_v57 = vadd.f32 2.0, %v776_v54 }
 0x1b7   : > { %1230 = vrcp.f32 %v793_v56 }
 0x1b8   : > { %1232 = vrcp.f32 %v792_v57 }
 0x1c1   : > { %v1231_v58 = vpop.eup %1230 }
 0x1c2   : > { %v1233_v60 = vpop.eup %1232  ;;  %v803_v62 = vmul.f32 %v1231_v58, %v777_v53 }
 0x1c3   : > { %v801_v51 = vmul.f32 %v1233_v60, %v776_v54 }
 0x1c4   : > { %v817_v61 = vmul.f32 %v803_v62, %v711_v41 }
 0x1c5   : > { %v816_v0 = vmul.f32 %v801_v51, %v706_v43 }
 0x1c6   : > { %v825_v55 = vsel %vm785_vm10, %v711_v41, %v817_v61  ;;  %v1169_v3 = vpop.f32.mrb[2].mxu0  ;;  %vm856_vm10 = vcmask 1046534  }
 0x1c7   : > { %v824_v1 = vsel %vm784_vm11, %v706_v43, %v816_v0  ;;  %v880_v4 = vrot.slane %v825_v55, 1  ;;  %v914_v6 = vrot.slane %v825_v55, 3  ;;  %v897_v7 = vrot.slane %v825_v55, 2  ;;  %v715_v10 = vpop.f32.mrb[3].mxu0 }
 0x1c8   : > { %v1606_v9 = vadd.f32 %v1169_v3, %v1601_v39  ;;  %v879_v59 = vrot.slane %v824_v1, 2  ;;  %v862_v2 = vrot.slane %v824_v1, 1  ;;  %v913_v11 = vrot.slane %v824_v1, 4 }
 0x1c9   : > { %v1609_v12 = vadd.f32 %v1601_v39, %v715_v10  ;;  %v896_v13 = vrot.slane %v824_v1, 3  ;;  %v947_v14 = vrot.slane %v824_v1, 6  ;;  %v948_v15 = vrot.slane %v825_v55, 5 }
 0x1ca   : > { %v747_v16 = vmin.f32 %v1606_v9, 20.0  ;;  %v1613_v18 = vsel %vm841_vm12, %v880_v4, %v879_v59  ;;  %v1616_v19 = vsel %vm841_vm12, %v825_v55, %v862_v2  ;;  %v1620_v21 = vsel %vm841_vm12, %v914_v6, %v913_v11 }
 0x1cb   : > { %v746_v63 = vmin.f32 %v1609_v12, 20.0  ;;  %v1172_v8 = vpop.f32.mrb[0].mxu1  ;;  %v1623_v22 = vsel %vm841_vm12, %v897_v7, %v896_v13  ;;  %v1629_v26 = vsel %vm841_vm12, %v948_v15, %v947_v14  ;;  %v930_v27 = vrot.slane %v824_v1, 5 }
 0x1cc   : > { %v758_v23 = vmul.f32 1.442695, %v747_v16  ;;  %v1626_v24 = vadd.f32 %v1172_v8, %v1601_v39  ;;  %v725_v25 = vpop.f32.mrb[1].mxu1  ;;  %v931_v31 = vrot.slane %v825_v55, 4  ;;  %v964_v32 = vrot.slane %v824_v1, 7 }
 0x1cd   : > { %v756_v28 = vmul.f32 1.442695, %v746_v63  ;;  %v1632_v30 = vadd.f32 %v1601_v39, %v725_v25  ;;  %v965_v20 = vrot.slane %v825_v55, 6  ;;  %v840_v35 = vrot.slane %v825_v55, 7 }
 0x1ce   : > { %1234 = vpow2.f32 %v758_v23  ;;  %v749_v34 = vmin.f32 %v1626_v24, 20.0  ;;  %v1637_v17 = vsel %vm841_vm12, %v931_v31, %v930_v27  ;;  %vm787_vm14 = vcmp.gt.f32.partialorder %v1606_v9, 20.0 }
 0x1cf   : > { %1236 = vpow2.f32 %v756_v28  ;;  %v748_v29 = vmin.f32 %v1632_v30, 20.0  ;;  %v1640_v5 = vsel %vm841_vm12, %v965_v20, %v964_v32  ;;  %v1643_v37 = vsel %vm841_vm12, %v840_v35, %v824_v1 }
 0x1d0   : > { %v762_v33 = vmul.f32 1.442695, %v749_v34  ;;  %vm786_vm0 = vcmp.gt.f32.partialorder %v1609_v12, 20.0  ;;  %vm789_vm1 = vcmp.gt.f32.partialorder %v1626_v24, 20.0  ;;  %vm788_vm5 = vcmp.gt.f32.partialorder %v1632_v30, 20.0 }
 0x1d1   : > { %v760_v36 = vmul.f32 1.442695, %v748_v29  ;;  %vm859_vm11 = vcmask 1047559  }
 0x1d2   : > { %1238 = vpow2.f32 %v762_v33 }
 0x1d3   : > { %1240 = vpow2.f32 %v760_v36 }
 0x1d8   : > { %v1235_v38 = vpop.eup %1234  ;;  %v1175_v40 = vpop.f32.mrb[2].mxu1 }
 0x1d9   : > { %v1237_v41 = vpop.eup %1236  ;;  %v771_v42 = vadd.f32 2.0, %v1235_v38  ;;  %v1646_v43 = vadd.f32 %v1175_v40, %v1601_v39  ;;  %v735_v44 = vpop.f32.mrb[3].mxu1 }
 0x1da   : > { %v770_v45 = vadd.f32 2.0, %v1237_v41  ;;  %v1649_v46 = vadd.f32 %v1601_v39, %v735_v44 }
 0x1db   : > { %v779_v47 = vmul.f32 %v1235_v38, %v771_v42  ;;  %v751_v48 = vmin.f32 %v1646_v43, 20.0  ;;  %vm791_vm9 = vcmp.gt.f32.partialorder %v1646_v43, 20.0 }
 0x1dc   : > { %v1239_v49 = vpop.eup %1238  ;;  %v778_v50 = vmul.f32 %v1237_v41, %v770_v45  ;;  %v750_v52 = vmin.f32 %v1649_v46, 20.0  ;;  %vm790_vm12 = vcmp.gt.f32.partialorder %v1649_v46, 20.0 }
 0x1dd   : > { %v1241_v53 = vpop.eup %1240  ;;  %v795_v54 = vadd.f32 2.0, %v779_v47  ;;  %v773_v56 = vadd.f32 2.0, %v1239_v49  ;;  %v766_v57 = vmul.f32 1.442695, %v751_v48 }
 0x1de   : > { %v794_v58 = vadd.f32 2.0, %v778_v50  ;;  %v772_v60 = vadd.f32 2.0, %v1241_v53  ;;  %v764_v62 = vmul.f32 1.442695, %v750_v52 }
 0x1df   : > { %1242 = vrcp.f32 %v795_v54  ;;  %v781_v51 = vmul.f32 %v1239_v49, %v773_v56 }
 0x1e0   : > { %1244 = vrcp.f32 %v794_v58  ;;  %v780_v61 = vmul.f32 %v1241_v53, %v772_v60 }
 0x1e1   : > { %v797_v39 = vadd.f32 2.0, %v781_v51  ;;  %1246 = vpow2.f32 %v766_v57 }
 0x1e2   : > { %v796_v0 = vadd.f32 2.0, %v780_v61  ;;  %1248 = vpow2.f32 %v764_v62 }
 0x1e3   : > { %1250 = vrcp.f32 %v797_v39 }
 0x1e4   : > { %1252 = vrcp.f32 %v796_v0 }
 0x1e9   : > { %v1243_v55 = vpop.eup %1242 }
 0x1ea   : > { %v1245_v1 = vpop.eup %1244  ;;  %v807_v3 = vmul.f32 %v1243_v55, %v779_v47 }
 0x1eb   : > { %v1247_v4 = vpop.eup %1246  ;;  %v805_v6 = vmul.f32 %v1245_v1, %v778_v50 }
 0x1ec   : > { %v1249_v7 = vpop.eup %1248  ;;  %v819_v10 = vmul.f32 %v807_v3, %v1606_v9  ;;  %v775_v59 = vadd.f32 2.0, %v1247_v4 }
 0x1ed   : > { %v1251_v2 = vpop.eup %1250  ;;  %v818_v11 = vmul.f32 %v805_v6, %v1609_v12  ;;  %v774_v13 = vadd.f32 2.0, %v1249_v7 }
 0x1ee   : > { %v1253_v14 = vpop.eup %1252  ;;  %v1659_v15 = vsel %vm787_vm14, %v1606_v9, %v819_v10  ;;  %v811_v16 = vmul.f32 %v1251_v2, %v781_v51  ;;  %v783_v63 = vmul.f32 %v1247_v4, %v775_v59  ;;  %vm987_vm14 = vcmask 392192  }
 0x1ef   : > { %v1663_v8 = vsel %vm786_vm0, %v1609_v12, %v818_v11  ;;  %v809_v23 = vmul.f32 %v1253_v14, %v780_v61  ;;  %v782_v25 = vmul.f32 %v1249_v7, %v774_v13  ;;  %v883_v27 = vrot.slane %v1659_v15, 7 }
 0x1f0   : > { %v821_v28 = vmul.f32 %v811_v16, %v1626_v24  ;;  %v799_v31 = vadd.f32 2.0, %v783_v63  ;;  %v882_v9 = vsel %vm844_vm13, %v1663_v8, %v1613_v18  ;;  %v864_v32 = vrot.slane %v1663_v8, 7 }
 0x1f1   : > { %v820_v34 = vmul.f32 %v809_v23, %v1632_v30  ;;  %v798_v20 = vadd.f32 2.0, %v782_v25  ;;  %v884_v29 = vsel %vm847_vm15, %v883_v27, %v882_v9  ;;  %v866_v12 = vrot.slane %v1659_v15, 6 }
 0x1f2   : > { %v1677_v33 = vsel %vm789_vm1, %v1626_v24, %v821_v28  ;;  %1254 = vrcp.f32 %v799_v31  ;;  %v865_v35 = vsel %vm844_vm13, %v864_v32, %v1616_v19  ;;  %v916_v18 = vrot.slane %v1663_v8, 2 }
 0x1f3   : > { %v1685_v36 = vsel %vm788_vm5, %v1632_v30, %v820_v34  ;;  %1256 = vrcp.f32 %v798_v20  ;;  %v887_v38 = vrot.slane %v1677_v33, 5  ;;  %v867_v40 = vsel %vm847_vm15, %v866_v12, %v865_v35 }
 0x1f4   : > { %v885_v41 = vrot.slane %v1685_v36, 6  ;;  %v868_v24 = vrot.slane %v1685_v36, 5  ;;  %v870_v42 = vrot.slane %v1677_v33, 4  ;;  %v917_v19 = vsel %vm844_vm13, %v916_v18, %v1620_v21 }
 0x1f5   : > { %v918_v44 = vrot.slane %v1659_v15, 1  ;;  %v921_v45 = vrot.slane %v1677_v33, 7  ;;  %v899_v30 = vrot.slane %v1663_v8, 1  ;;  %v902_v47 = vrot.slane %v1685_v36, 7 }
 0x1f6   : > { %v886_v48 = vsel %vm850_vm3, %v885_v41, %v884_v29  ;;  %v869_v49 = vsel %vm850_vm3, %v868_v24, %v867_v40  ;;  %v904_v50 = vrot.slane %v1677_v33, 6  ;;  %v950_v52 = vrot.slane %v1663_v8, 4 }
 0x1f7   : > { %v888_v53 = vsel %vm853_vm7, %v887_v38, %v886_v48  ;;  %v871_v21 = vsel %vm853_vm7, %v870_v42, %v869_v49  ;;  %v919_v54 = vsel %vm847_vm15, %v918_v44, %v917_v19  ;;  %v900_v56 = vsel %vm844_vm13, %v899_v30, %v1623_v22 }
 0x1f8   : > { %v920_v57 = vsel %vm850_vm3, %v1685_v36, %v919_v54  ;;  %v901_v58 = vsel %vm847_vm15, %v1659_v15, %v900_v56  ;;  %v951_v60 = vsel %vm844_vm13, %v950_v52, %v1629_v26  ;;  %v952_v62 = vrot.slane %v1659_v15, 3 }
 0x1f9   : > { %v922_v51 = vsel %vm853_vm7, %v921_v45, %v920_v57  ;;  %v903_v61 = vsel %vm850_vm3, %v902_v47, %v901_v58  ;;  %v954_v22 = vrot.slane %v1685_v36, 2  ;;  %v956_v55 = vrot.slane %v1677_v33, 1 }
 0x1fa   : > { %v905_v39 = vsel %vm853_vm7, %v904_v50, %v903_v61  ;;  %v953_v0 = vsel %vm847_vm15, %v952_v62, %v951_v60  ;;  %v933_v1 = vrot.slane %v1663_v8, 3  ;;  %v935_v3 = vrot.slane %v1659_v15, 2 }
 0x1fb   : > { %v955_v26 = vsel %vm850_vm3, %v954_v22, %v953_v0  ;;  %v937_v4 = vrot.slane %v1685_v36, 1  ;;  %v967_v6 = vrot.slane %v1663_v8, 5  ;;  %v969_v2 = vrot.slane %v1659_v15, 4 }
 0x1fc   : > { %v1255_v7 = vpop.eup %1254  ;;  %v957_v10 = vsel %vm853_vm7, %v956_v55, %v955_v26  ;;  %v934_v59 = vsel %vm844_vm13, %v933_v1, %v1637_v17  ;;  %v971_v11 = vrot.slane %v1685_v36, 3  ;;  %v843_v27 = vrot.slane %v1663_v8, 6 }
 0x1fd   : > { %v1257_v13 = vpop.eup %1256  ;;  %v815_v14 = vmul.f32 %v1255_v7, %v783_v63  ;;  %v936_v16 = vsel %vm847_vm15, %v935_v3, %v934_v59  ;;  %v968_v23 = vsel %vm844_vm13, %v967_v6, %v1640_v5  ;;  %v973_v17 = vrot.slane %v1677_v33, 2 }
 0x1fe   : > { %v813_v28 = vmul.f32 %v1257_v13, %v782_v25  ;;  %v938_v31 = vsel %vm850_vm3, %v937_v4, %v936_v16  ;;  %v970_v9 = vsel %vm847_vm15, %v969_v2, %v968_v23  ;;  %v846_v20 = vrot.slane %v1659_v15, 5 }
 0x1ff   : > { %v823_v32 = vmul.f32 %v815_v14, %v1646_v43  ;;  %v939_v34 = vsel %vm853_vm7, %v1677_v33, %v938_v31  ;;  %v972_v63 = vsel %vm850_vm3, %v971_v11, %v970_v9  ;;  %v845_v25 = vsel %vm844_vm13, %v843_v27, %v1643_v37 }
 0x200   : > { %v822_v5 = vmul.f32 %v813_v28, %v1649_v46  ;;  %v974_v8 = vsel %vm853_vm7, %v973_v17, %v972_v63  ;;  %v849_v12 = vrot.slane %v1685_v36, 4  ;;  %v852_v35 = vrot.slane %v1677_v33, 3 }
 0x201   : > { %v831_v29 = vsel %vm791_vm9, %v1646_v43, %v823_v32  ;;  %v848_v18 = vsel %vm847_vm15, %v846_v20, %v845_v25  ;;  %vm985_vm13 = vcmask 326656   ;;  %vm989_vm15 = vcmask 457728  }
 0x202   : > { %v830_v15 = vsel %vm790_vm12, %v1649_v46, %v822_v5  ;;  %v891_v38 = vrot.slane %v831_v29, 3  ;;  %v874_v40 = vrot.slane %v831_v29, 2  ;;  %v925_v41 = vrot.slane %v831_v29, 5 }
 0x203   : > { %v889_v24 = vrot.slane %v830_v15, 4  ;;  %v872_v42 = vrot.slane %v830_v15, 3  ;;  %v923_v19 = vrot.slane %v830_v15, 6  ;;  %v906_v44 = vrot.slane %v830_v15, 5 }
 0x204   : > { %v908_v37 = vrot.slane %v831_v29, 4  ;;  %v958_v45 = vsel %vm856_vm10, %v830_v15, %v957_v10  ;;  %v959_v30 = vrot.slane %v831_v29, 7  ;;  %v940_v43 = vrot.slane %v830_v15, 7 }
 0x205   : > { %v890_v36 = vsel %vm856_vm10, %v889_v24, %v888_v53  ;;  %v873_v33 = vsel %vm856_vm10, %v872_v42, %v871_v21  ;;  %v924_v47 = vsel %vm856_vm10, %v923_v19, %v922_v51  ;;  %v907_v46 = vsel %vm856_vm10, %v906_v44, %v905_v39 }
 0x206   : > { %v892_v48 = vsel %vm859_vm11, %v891_v38, %v890_v36  ;;  %v875_v49 = vsel %vm859_vm11, %v874_v40, %v873_v33  ;;  %v926_v50 = vsel %vm859_vm11, %v925_v41, %v924_v47  ;;  %v909_v52 = vsel %vm859_vm11, %v908_v37, %v907_v46 }
 0x207   : > { %893 = vrot.lane.b32.xlu1 %v892_v48, %s1285_s23  ;;  %876 = vrot.lane.b32.xlu0 %v875_v49, %s1282_s20  ;;  %v960_v53 = vsel %vm859_vm11, %v959_v30, %v958_v45  ;;  %v941_v21 = vsel %vm856_vm10, %v940_v43, %v939_v34  ;;  %v942_v54 = vrot.slane %v831_v29, 6  ;;  %v975_v56 = vrot.slane %v830_v15, 1  ;;  %s1080_s20 = sshll.u32 %s1803_s12, 3 }
 0x208   : > { %v855_v57 = vrot.slane %v830_v15, 2  ;;  %v851_v58 = vsel %vm850_vm3, %v849_v12, %v848_v18  ;;  %v858_v51 = vrot.slane %v831_v29, 1  ;;  %s188_s23 = scalar_lea.vmem %s1797_s3, %s1080_s20 }
 0x209   : > { %v943_v60 = vsel %vm859_vm11, %v942_v54, %v941_v21  ;;  %v976_v62 = vsel %vm856_vm10, %v975_v56, %v974_v8  ;;  %v854_v61 = vsel %vm853_vm7, %v852_v35, %v851_v58 }
 0x20a   : > { %v977_v22 = vsel %vm859_vm11, %v831_v29, %v976_v62  ;;  %v857_v39 = vsel %vm856_vm10, %v855_v57, %v854_v61 }
 0x20b   : > { %927 = vrot.lane.b32.xlu1 %v926_v50, %s1289_s10  ;;  %910 = vrot.lane.b32.xlu0 %v909_v52, %s1287_s25  ;;  %v860_v0 = vsel %vm859_vm11, %v858_v51, %v857_v39 }
 0x20f   : > { %961 = vrot.lane.b32.xlu1 %v960_v53, %s1290_s17  ;;  %944 = vrot.lane.b32.xlu0 %v943_v60, %s1291_s18 }
 0x213   : > { %978 = vrot.lane.b32.xlu0 %v977_v22, %s1292_s19 }
 0x279   : > { %v894_v55 = vpop.permute.xlu1 %893  ;;  %v877_v1 = vpop.permute.xlu0 %876 }
 0x27a   : > { %v981_v26 = vsel %vm535_vm2, %v860_v0, %v877_v1  ;;  %vm991_vm2 = vcmask 523264  }
 0x27b   : > { %v982_v6 = vsel %vm553_vm4, %v981_v26, %v894_v55 }
 0x27d   : > { %v928_v3 = vpop.permute.xlu1 %927  ;;  %v911_v4 = vpop.permute.xlu0 %910 }
 0x27e   : > { %v983_v7 = vsel %vm571_vm6, %v982_v6, %v911_v4 }
 0x27f   : > { %v984_v59 = vsel %vm589_vm8, %v983_v7, %v928_v3 }
 0x281   : > { %v945_v10 = vpop.permute.xlu0 %944  ;;  %v962_v2 = vpop.permute.xlu1 %961 }
 0x282   : > { %v986_v11 = vsel %vm985_vm13, %v984_v59, %v945_v10 }
 0x283   : > { %v988_v14 = vsel %vm987_vm14, %v986_v11, %v962_v2 }
 0x285   : > { %v979_v13 = vpop.permute.xlu0 %978 }
 0x286   : > { %v990_v16 = vsel %vm989_vm15, %v988_v14, %v979_v13 }
 0x287   : > { %992 = vst.msk [vmem:[%s188_s23] sm:$0xff] %vm991_vm2, %v990_v16 }
 0x288 PF: > { %s13_s14 = sadd.s32 1, %s1280_s14   ;;  %s1798_s12 = smov %s1276_s13 }
 0x289   : > { %p10_p5 = scmp.ge.s32.totalorder %s13_s14, 4   ;;  %s1799_s13 = smov %s1801_s15 }
 0x28b   :  { %12 = sbr.rel (!%p10_p5) target bundleno = 2 (0x2), region = 65 }

// kernel: stem_forward.9
= control target key start
LH: loop header
LB: loop body
LE: loop exit
PB: predicated region body
PF: predicated region fallthrough
CT: control target
= control target key end

     0   :  { %s1603_s27 = smov 0   ;;  %s1605_s28 = smov 0   ;;  %s1939_s0 = inlined_call_operand.vmem [shape: f32[2,8,8,8], index: 0, kind: input, shape index: {}]   ;;  %s1940_s1 = inlined_call_operand.vmem [shape: f32[2,8,8,8], index: 1, kind: input, shape index: {}]   ;;  %s1941_s2 = inlined_call_operand.vmem [shape: f32[2,8,8,8], index: 2, kind: input, shape index: {}]   ;;  %s1942_s3 = inlined_call_operand.vmem [shape: f32[8,8], index: 3, kind: input, shape index: {}]   ;;  %s1943_s4 = inlined_call_operand.vmem [shape: f32[1,8], index: 4, kind: input, shape index: {}]   ;;  %s1944_s5 = inlined_call_operand.vmem [shape: f32[8,8], index: 5, kind: input, shape index: {}]   ;;  %s1945_s6 = inlined_call_operand.vmem [shape: f32[8,8], index: 6, kind: input, shape index: {}]   ;;  %s1946_s7 = inlined_call_operand.vmem [shape: f32[1,8], index: 7, kind: input, shape index: {}]   ;;  %s1947_s8 = inlined_call_operand.vmem [shape: f32[2,8,64], index: 8, kind: output, shape index: {}]  }
   0x1   :  { %s1607_s29 = smov 0  }
   0x2 LB: > { %s30_s30 = sadd.s32 1, %s1545_s28  ;;  %p1314_p0 = scmp.ge.s32.totalorder %s1549_s29, 1  ;;  %s1549_s29 = sphi %s1607_s29, %s18_s29   ;;  %s1545_s28 = sphi %s1605_s28, %s1949_s28   ;;  %s1541_s27 = sphi %s1603_s27, %s1948_s27  }
   0x3   : > { %p32_p1 = scmp.ge.s32.totalorder %s30_s30, 2  ;;  %p317_p2 = scmp.lt.s32.totalorder %s1549_s29, 3 }
   0x5   : > { %s1951_s30 = smov (%p32_p1, %s30_s30), 0  ;;  %p318_p3 = pnand %p1314_p0, %p317_p2 }
   0x6   : > { %v444_v0 = vld [vmem:[%s1942_s3] sm:$0xff] (!%p318_p3)  ;;  %p376_p4 = scmp.lt.s32.totalorder (!%p318_p3), %s1541_s27, 1  ;;  %vm452_vm0 = vcmask (!%p318_p3), 64512   ;;  %vm1042_vm10 = vcmask (!%p318_p3), 1041409   ;;  %vm1045_vm14 = vcmask (!%p318_p3), 1042434   ;;  %vm1051_vm15 = vcmask (!%p318_p3), 1044484  }
   0x7   : > { %321 = sbr.rel (%p318_p3) target bundleno = 694 (0x2b6), region = 52  ;;  %1380 = vmatprep.subr.mxu0 (!%p318_p3), %v444_v0  ;;  %v671_v25 = vld [vmem:[%s1945_s6] sm:$0xff] (!%p318_p3)  ;;  %s1552_s12 = smov (!%p318_p3), 8  }
   0x8   : > { %1381 = vmatpush3.msra.mxu0 (!%p318_p3), %v444_v0  ;;  %1422 = vmatprep.subr.mxu1 (!%p318_p3), %v671_v25  ;;  %v1651_v26 = vld [vmem:[%s1944_s5] sm:$0xff] (!%p318_p3)  ;;  %s1553_s13 = smov (!%p318_p3), 32   ;;  %s1555_s15 = smov (!%p318_p3), 48  }
   0x9   : > { %1394 = vmatprep.subr.mxu0 (!%p318_p3), %v671_v25  ;;  %1423 = vmatpush3.msra.mxu1 (!%p318_p3), %v671_v25  ;;  %v1322_v27 = vld [vmem:[%s1943_s4] ss:$0 sm:$0xff] (!%p318_p3)  ;;  %s1556_s16 = smov (!%p318_p3), 40  }
   0xa   : > { %1408 = vmatprep.subr.mxu1 (!%p318_p3), %v1651_v26 }
   0xe   : > { %s1953_s27 = smov (!%p376_p4, %s1541_s27), 1 }
   0xf   : > { %s1627_s11 = sshll.u32 %s1953_s27, 6  ;;  %s1321_s18 = sshll.u32 %s1953_s27, 3 }
  0x10   : > { %s393_s14 = scalar_lea.vmem %s1940_s1, %s1627_s11  ;;  %s403_s17 = scalar_lea.vmem %s1941_s2, %s1627_s11 }
  0x11   : > { %v420_v1 = vld [vmem:[%s393_s14] sm:$0xff]  ;;  %v421_v3 = vld [vmem:[%s393_s14 + $0x8] sm:$0xff]  ;;  %v422_v6 = vld [vmem:[%s393_s14 + $0x10] sm:$0xff]  ;;  %s383_s26 = scalar_lea.vmem %s1939_s0, %s1627_s11  ;;  %s1551_s11 = smov 24  }
  0x12   : > { %v428_v2 = vld [vmem:[%s403_s17] sm:$0xff]  ;;  %v429_v5 = vld [vmem:[%s403_s17 + $0x8] sm:$0xff]  ;;  %v430_v7 = vld [vmem:[%s403_s17 + $0x10] sm:$0xff]  ;;  %s411_s21 = scalar_lea.vmem %s1947_s8, %s1321_s18 }
  0x13   : > { %v436_v4 = vadd.f32 %v428_v2, %v420_v1  ;;  %v437_v8 = vadd.f32 %v429_v5, %v421_v3  ;;  %v438_v9 = vadd.f32 %v430_v7, %v422_v6  ;;  %v423_v10 = vld [vmem:[%s393_s14 + $0x18] sm:$0xff]  ;;  %v424_v12 = vld [vmem:[%s393_s14 + $0x20] sm:$0xff]  ;;  %v425_v16 = vld [vmem:[%s393_s14 + $0x28] sm:$0xff] }
  0x14   : > { %v431_v11 = vld [vmem:[%s403_s17 + $0x18] sm:$0xff]  ;;  %v432_v13 = vld [vmem:[%s403_s17 + $0x20] sm:$0xff]  ;;  %v433_v17 = vld [vmem:[%s403_s17 + $0x28] sm:$0xff] }
  0x15   : > { %1382 = vmatprep.mubr.msk.f32.mxu0 %vm452_vm0, %v436_v4  ;;  %v439_v14 = vadd.f32 %v431_v11, %v423_v10  ;;  %v440_v15 = vadd.f32 %v432_v13, %v424_v12  ;;  %v426_v18 = vld [vmem:[%s393_s14 + $0x30] sm:$0xff]  ;;  %v441_v20 = vadd.f32 %v433_v17, %v425_v16  ;;  %v427_v22 = vld [vmem:[%s393_s14 + $0x38] sm:$0xff]  ;;  %s1554_s14 = smov 16  }
  0x16   : > { %1383 = vmatmul.mubr.msk.f32.vlgmr.msra.gmra.mrb[0].mxu0 %vm452_vm0, %v437_v8  ;;  %v434_v19 = vld [vmem:[%s403_s17 + $0x30] sm:$0xff]  ;;  %v435_v23 = vld [vmem:[%s403_s17 + $0x38] sm:$0xff]  ;;  %s1557_s17 = smov 56  }
  0x17   : > { %1385 = vmatprep.mubr.msk.f32.mxu0 %vm452_vm0, %v438_v9  ;;  %v442_v21 = vadd.f32 %v434_v19, %v426_v18  ;;  %v443_v24 = vadd.f32 %v435_v23, %v427_v22  ;;  %1395 = vmatpush3.msra.mxu0 %v671_v25 }
  0x1a   : > { %1386 = vmatmul.mubr.msk.f32.gmra.mrb[2].mxu0 %vm452_vm0, %v439_v14 }
  0x1b   : > { %1388 = vmatprep.mubr.msk.f32.mxu0 %vm452_vm0, %v440_v15 }
  0x1e   : > { %1389 = vmatmul.mubr.msk.f32.gmra.mrb[4].mxu0 %vm452_vm0, %v441_v20 }
  0x1f   : > { %1391 = vmatprep.mubr.msk.f32.mxu0 %vm452_vm0, %v442_v21 }
  0x22   : > { %1392 = vmatmul.mubr.msk.f32.gmra.mrb[6].mxu0 %vm452_vm0, %v443_v24 }
  0xe9   : > { %v1384_v28 = vpop.f32.mrb[0].mxu0 }
  0xea   : > { %v1657_v29 = vadd.f32 %v1384_v28, %v1322_v27  ;;  %v543_v30 = vpop.f32.mrb[1].mxu0 }
  0xeb   : > { %v1659_v31 = vadd.f32 %v1322_v27, %v543_v30 }
  0xec   : > { %v583_v32 = vmin.f32 %v1657_v29, 20.0  ;;  %vm623_vm2 = vcmp.gt.f32.partialorder %v1657_v29, 20.0 }
  0xed   : > { %v582_v33 = vmin.f32 %v1659_v31, 20.0  ;;  %v1387_v34 = vpop.f32.mrb[2].mxu0  ;;  %vm622_vm1 = vcmp.gt.f32.partialorder %v1659_v31, 20.0 }
  0xee   : > { %v592_v35 = vmul.f32 1.442695, %v583_v32  ;;  %v1663_v36 = vadd.f32 %v1387_v34, %v1322_v27  ;;  %v553_v37 = vpop.f32.mrb[3].mxu0 }
  0xef   : > { %v590_v38 = vmul.f32 1.442695, %v582_v33  ;;  %v1665_v39 = vadd.f32 %v1322_v27, %v553_v37 }
  0xf0   : > { %1463 = vpow2.f32 %v592_v35  ;;  %v585_v40 = vmin.f32 %v1663_v36, 20.0  ;;  %vm625_vm4 = vcmp.gt.f32.partialorder %v1663_v36, 20.0 }
  0xf1   : > { %1465 = vpow2.f32 %v590_v38  ;;  %v584_v41 = vmin.f32 %v1665_v39, 20.0  ;;  %v1390_v42 = vpop.f32.mrb[4].mxu0  ;;  %vm624_vm3 = vcmp.gt.f32.partialorder %v1665_v39, 20.0 }
  0xf2   : > { %v596_v43 = vmul.f32 1.442695, %v585_v40  ;;  %v1669_v44 = vadd.f32 %v1390_v42, %v1322_v27  ;;  %v563_v45 = vpop.f32.mrb[5].mxu0 }
  0xf3   : > { %v594_v46 = vmul.f32 1.442695, %v584_v41  ;;  %v1671_v47 = vadd.f32 %v1322_v27, %v563_v45 }
  0xf4   : > { %1467 = vpow2.f32 %v596_v43  ;;  %v587_v48 = vmin.f32 %v1669_v44, 20.0  ;;  %vm627_vm6 = vcmp.gt.f32.partialorder %v1669_v44, 20.0 }
  0xf5   : > { %1469 = vpow2.f32 %v594_v46  ;;  %v586_v49 = vmin.f32 %v1671_v47, 20.0  ;;  %v1393_v50 = vpop.f32.mrb[6].mxu0  ;;  %vm626_vm5 = vcmp.gt.f32.partialorder %v1671_v47, 20.0 }
  0xf6   : > { %v600_v51 = vmul.f32 1.442695, %v587_v48  ;;  %v1675_v52 = vadd.f32 %v1393_v50, %v1322_v27  ;;  %v573_v53 = vpop.f32.mrb[7].mxu0 }
  0xf7   : > { %v598_v54 = vmul.f32 1.442695, %v586_v49  ;;  %v1677_v55 = vadd.f32 %v1322_v27, %v573_v53 }
  0xf8   : > { %1471 = vpow2.f32 %v600_v51  ;;  %v589_v56 = vmin.f32 %v1675_v52, 20.0  ;;  %vm629_vm8 = vcmp.gt.f32.partialorder %v1675_v52, 20.0 }
  0xf9   : > { %1473 = vpow2.f32 %v598_v54  ;;  %v588_v57 = vmin.f32 %v1677_v55, 20.0  ;;  %vm628_vm7 = vcmp.gt.f32.partialorder %v1677_v55, 20.0 }
  0xfa   : > { %v1464_v58 = vpop.eup %1463  ;;  %v604_v59 = vmul.f32 1.442695, %v589_v56 }
  0xfb   : > { %v1466_v60 = vpop.eup %1465  ;;  %v607_v61 = vadd.f32 2.0, %v1464_v58  ;;  %v602_v62 = vmul.f32 1.442695, %v588_v57 }
  0xfc   : > { %1475 = vpow2.f32 %v604_v59  ;;  %v606_v63 = vadd.f32 2.0, %v1466_v60 }
  0xfd   : > { %v615_v0 = vmul.f32 %v1464_v58, %v607_v61  ;;  %1477 = vpow2.f32 %v602_v62 }
  0xfe   : > { %v1468_v1 = vpop.eup %1467  ;;  %v614_v2 = vmul.f32 %v1466_v60, %v606_v63  ;;  %v412_v63 = vld [vmem:[%s383_s26] sm:$0xff] }
  0xff   : > { %v1470_v3 = vpop.eup %1469  ;;  %v631_v4 = vadd.f32 2.0, %v615_v0  ;;  %v609_v5 = vadd.f32 2.0, %v1468_v1 }
 0x100   : > { %v630_v6 = vadd.f32 2.0, %v614_v2  ;;  %v608_v7 = vadd.f32 2.0, %v1470_v3 }
 0x101   : > { %1479 = vrcp.f32 %v631_v4  ;;  %v617_v8 = vmul.f32 %v1468_v1, %v609_v5  ;;  %v414_v1 = vld [vmem:[%s383_s26 + $0x10] sm:$0xff] }
 0x102   : > { %v1472_v9 = vpop.eup %1471  ;;  %1481 = vrcp.f32 %v630_v6  ;;  %v616_v10 = vmul.f32 %v1470_v3, %v608_v7  ;;  %v418_v3 = vld [vmem:[%s383_s26 + $0x30] sm:$0xff] }
 0x103   : > { %v1474_v11 = vpop.eup %1473  ;;  %v633_v12 = vadd.f32 2.0, %v617_v8  ;;  %v611_v13 = vadd.f32 2.0, %v1472_v9 }
 0x104   : > { %v632_v14 = vadd.f32 2.0, %v616_v10  ;;  %v610_v15 = vadd.f32 2.0, %v1474_v11 }
 0x105   : > { %1483 = vrcp.f32 %v633_v12  ;;  %v619_v16 = vmul.f32 %v1472_v9, %v611_v13  ;;  %v1347_v9 = vld [vmem:[%s1946_s7] ss:$0 sm:$0xff] }
 0x106   : > { %v1476_v17 = vpop.eup %1475  ;;  %1485 = vrcp.f32 %v632_v14  ;;  %v618_v18 = vmul.f32 %v1474_v11, %v610_v15 }
 0x107   : > { %v1478_v19 = vpop.eup %1477  ;;  %v635_v20 = vadd.f32 2.0, %v619_v16  ;;  %v613_v21 = vadd.f32 2.0, %v1476_v17 }
 0x108   : > { %v634_v22 = vadd.f32 2.0, %v618_v18  ;;  %v612_v23 = vadd.f32 2.0, %v1478_v19 }
 0x109   : > { %1487 = vrcp.f32 %v635_v20  ;;  %v621_v24 = vmul.f32 %v1476_v17, %v613_v21 }
 0x10a   : > { %1489 = vrcp.f32 %v634_v22  ;;  %v620_v25 = vmul.f32 %v1478_v19, %v612_v23 }
 0x10b   : > { %v1480_v27 = vpop.eup %1479  ;;  %v637_v28 = vadd.f32 2.0, %v621_v24 }
 0x10c   : > { %v1482_v30 = vpop.eup %1481  ;;  %v641_v32 = vmul.f32 %v1480_v27, %v615_v0  ;;  %v636_v33 = vadd.f32 2.0, %v620_v25  ;;  %v413_v0 = vld [vmem:[%s383_s26 + $0x8] sm:$0xff] }
 0x10d   : > { %v639_v34 = vmul.f32 %v1482_v30, %v614_v2  ;;  %1491 = vrcp.f32 %v637_v28  ;;  %v416_v2 = vld [vmem:[%s383_s26 + $0x20] sm:$0xff] }
 0x10e   : > { %v655_v35 = vmul.f32 %v641_v32, %v1657_v29  ;;  %1493 = vrcp.f32 %v636_v33 }
 0x10f   : > { %v1484_v37 = vpop.eup %1483  ;;  %v654_v38 = vmul.f32 %v639_v34, %v1659_v31 }
 0x110   : > { %v1486_v40 = vpop.eup %1485  ;;  %v645_v41 = vmul.f32 %v1484_v37, %v617_v8  ;;  %v663_v45 = vsel %vm623_vm2, %v1657_v29, %v655_v35 }
 0x111   : > { %v662_v42 = vsel %vm622_vm1, %v1659_v31, %v654_v38  ;;  %v643_v43 = vmul.f32 %v1486_v40, %v616_v10 }
 0x112   : > { %1396 = vmatprep.mubr.msk.f32.mxu0 %vm452_vm0, %v662_v42  ;;  %v657_v46 = vmul.f32 %v645_v41, %v1663_v36 }
 0x113   : > { %v1488_v48 = vpop.eup %1487  ;;  %1397 = vmatmul.mubr.msk.f32.vlgmr.msra.gmra.mrb[8].mxu0 %vm452_vm0, %v663_v45  ;;  %v656_v49 = vmul.f32 %v643_v43, %v1665_v39 }
 0x114   : > { %v1490_v50 = vpop.eup %1489  ;;  %v649_v51 = vmul.f32 %v1488_v48, %v619_v16  ;;  %v665_v29 = vsel %vm625_vm4, %v1663_v36, %v657_v46  ;;  %vm1054_vm4 = vcmask 1045509  }
 0x115   : > { %v664_v53 = vsel %vm624_vm3, %v1665_v39, %v656_v49  ;;  %v647_v31 = vmul.f32 %v1490_v50, %v618_v18  ;;  %vm1048_vm3 = vcmask 1043459  }
 0x116   : > { %1399 = vmatprep.mubr.msk.f32.mxu0 %vm452_vm0, %v664_v53  ;;  %v659_v54 = vmul.f32 %v649_v51, %v1669_v44 }
 0x117   : > { %v1492_v56 = vpop.eup %1491  ;;  %1400 = vmatmul.mubr.msk.f32.gmra.mrb[10].mxu0 %vm452_vm0, %v665_v29  ;;  %v658_v57 = vmul.f32 %v647_v31, %v1671_v47 }
 0x118   : > { %v1494_v58 = vpop.eup %1493  ;;  %v653_v59 = vmul.f32 %v1492_v56, %v621_v24  ;;  %v667_v36 = vsel %vm627_vm6, %v1669_v44, %v659_v54 }
 0x119   : > { %v666_v39 = vsel %vm626_vm5, %v1671_v47, %v658_v57  ;;  %v651_v60 = vmul.f32 %v1494_v58, %v620_v25 }
 0x11a   : > { %1402 = vmatprep.mubr.msk.f32.mxu1 %vm452_vm0, %v666_v39  ;;  %v661_v61 = vmul.f32 %v653_v59, %v1675_v52 }
 0x11b   : > { %1403 = vmatmul.mubr.msk.f32.vlgmr.msra.gmra.mrb[0].mxu1 %vm452_vm0, %v667_v36  ;;  %v660_v62 = vmul.f32 %v651_v60, %v1677_v55 }
 0x11c   : > { %1409 = vmatpush3.msra.mxu1 %v1651_v26  ;;  %v669_v44 = vsel %vm629_vm8, %v1675_v52, %v661_v61  ;;  %v415_v26 = vld [vmem:[%s383_s26 + $0x18] sm:$0xff]  ;;  %vm1060_vm8 = vcmask 1047559  }
 0x11d   : > { %v668_v47 = vsel %vm628_vm7, %v1677_v55, %v660_v62  ;;  %v417_v55 = vld [vmem:[%s383_s26 + $0x28] sm:$0xff]  ;;  %v419_v52 = vld [vmem:[%s383_s26 + $0x38] sm:$0xff]  ;;  %vm1057_vm7 = vcmask 1046534  }
 0x11e   : > { %1405 = vmatprep.mubr.msk.f32.mxu1 %vm452_vm0, %v668_v47 }
 0x11f   : > { %1406 = vmatmul.mubr.msk.f32.gmra.mrb[2].mxu1 %vm452_vm0, %v669_v44 }
 0x120   : > { %1410 = vmatprep.mubr.msk.f32.mxu1 %vm452_vm0, %v412_v63 }
 0x123   : > { %1411 = vmatmul.mubr.msk.f32.vlgmr.msra.gmra.mrb[4].mxu1 %vm452_vm0, %v413_v0 }
 0x124   : > { %1413 = vmatprep.mubr.msk.f32.mxu1 %vm452_vm0, %v414_v1 }
 0x127   : > { %1414 = vmatmul.mubr.msk.f32.gmra.mrb[6].mxu1 %vm452_vm0, %v415_v26 }
 0x128   : > { %1416 = vmatprep.mubr.msk.f32.mxu1 %vm452_vm0, %v416_v2 }
 0x12b   : > { %1417 = vmatmul.mubr.msk.f32.gmra.mrb[0].mxu1 %vm452_vm0, %v417_v55 }
 0x12c   : > { %1419 = vmatprep.mubr.msk.f32.mxu1 %vm452_vm0, %v418_v3 }
 0x12f   : > { %1420 = vmatmul.mubr.msk.f32.gmra.mrb[2].mxu1 %vm452_vm0, %v419_v52 }
 0x1e6   : > { %v1398_v4 = vpop.f32.mrb[8].mxu0 }
 0x1e7   : > { %v762_v5 = vpop.f32.mrb[9].mxu0 }
 0x1ea   : > { %v1401_v6 = vpop.f32.mrb[10].mxu0 }
 0x1eb   : > { %v772_v7 = vpop.f32.mrb[11].mxu0 }
 0x1f6   : > { %v1412_v8 = vpop.f32.mrb[4].mxu1 }
 0x1f7   : > { %v897_v10 = vadd.f32 %v1412_v8, %v1398_v4  ;;  %v891_v11 = vpop.f32.mrb[5].mxu1 }
 0x1f8   : > { %v892_v12 = vadd.f32 %v891_v11, %v762_v5 }
 0x1f9   : > { %v1729_v13 = vadd.f32 %v1347_v9, %v897_v10 }
 0x1fa   : > { %v1731_v14 = vadd.f32 %v1347_v9, %v892_v12  ;;  %v1415_v15 = vpop.f32.mrb[6].mxu1 }
 0x1fb   : > { %v946_v16 = vmin.f32 %v1729_v13, 20.0  ;;  %v907_v17 = vadd.f32 %v1415_v15, %v1401_v6  ;;  %v901_v18 = vpop.f32.mrb[7].mxu1  ;;  %vm986_vm9 = vcmp.gt.f32.partialorder %v1729_v13, 20.0 }
 0x1fc   : > { %v945_v19 = vmin.f32 %v1731_v14, 20.0  ;;  %v902_v20 = vadd.f32 %v901_v18, %v772_v7  ;;  %vm985_vm11 = vcmp.gt.f32.partialorder %v1731_v14, 20.0 }
 0x1fd   : > { %v955_v21 = vmul.f32 1.442695, %v946_v16  ;;  %v1735_v22 = vadd.f32 %v1347_v9, %v907_v17 }
 0x1fe   : > { %v953_v23 = vmul.f32 1.442695, %v945_v19  ;;  %v1737_v24 = vadd.f32 %v1347_v9, %v902_v20  ;;  %v1418_v25 = vpop.f32.mrb[0].mxu1 }
 0x1ff   : > { %1495 = vpow2.f32 %v955_v21  ;;  %v948_v27 = vmin.f32 %v1735_v22, 20.0  ;;  %v1740_v28 = vadd.f32 %v1418_v25, %v1347_v9  ;;  %v911_v30 = vpop.f32.mrb[1].mxu1  ;;  %vm988_vm12 = vcmp.gt.f32.partialorder %v1735_v22, 20.0 }
 0x200   : > { %1497 = vpow2.f32 %v953_v23  ;;  %v947_v32 = vmin.f32 %v1737_v24, 20.0  ;;  %v1743_v33 = vadd.f32 %v1347_v9, %v911_v30  ;;  %vm987_vm13 = vcmp.gt.f32.partialorder %v1737_v24, 20.0 }
 0x201   : > { %v959_v34 = vmul.f32 1.442695, %v948_v27  ;;  %v950_v35 = vmin.f32 %v1740_v28, 20.0  ;;  %vm990_vm1 = vcmp.gt.f32.partialorder %v1740_v28, 20.0 }
 0x202   : > { %v957_v37 = vmul.f32 1.442695, %v947_v32  ;;  %v949_v38 = vmin.f32 %v1743_v33, 20.0  ;;  %v1421_v40 = vpop.f32.mrb[2].mxu1  ;;  %vm989_vm2 = vcmp.gt.f32.partialorder %v1743_v33, 20.0 }
 0x203   : > { %1499 = vpow2.f32 %v959_v34  ;;  %v963_v41 = vmul.f32 1.442695, %v950_v35  ;;  %v1747_v42 = vadd.f32 %v1421_v40, %v1347_v9  ;;  %v921_v43 = vpop.f32.mrb[3].mxu1 }
 0x204   : > { %1501 = vpow2.f32 %v957_v37  ;;  %v961_v45 = vmul.f32 1.442695, %v949_v38  ;;  %v1749_v46 = vadd.f32 %v1347_v9, %v921_v43 }
 0x205   : > { %1503 = vpow2.f32 %v963_v41  ;;  %v952_v48 = vmin.f32 %v1747_v42, 20.0  ;;  %vm992_vm5 = vcmp.gt.f32.partialorder %v1747_v42, 20.0 }
 0x206   : > { %1505 = vpow2.f32 %v961_v45  ;;  %v951_v49 = vmin.f32 %v1749_v46, 20.0  ;;  %vm991_vm6 = vcmp.gt.f32.partialorder %v1749_v46, 20.0 }
 0x207   : > { %v967_v50 = vmul.f32 1.442695, %v952_v48 }
 0x208   : > { %v965_v51 = vmul.f32 1.442695, %v951_v49 }
 0x209   : > { %v1496_v53 = vpop.eup %1495  ;;  %1507 = vpow2.f32 %v967_v50 }
 0x20a   : > { %v1498_v31 = vpop.eup %1497  ;;  %v970_v29 = vadd.f32 2.0, %v1496_v53  ;;  %1509 = vpow2.f32 %v965_v51 }
 0x20b   : > { %v969_v54 = vadd.f32 2.0, %v1498_v31 }
 0x20c   : > { %v978_v56 = vmul.f32 %v1496_v53, %v970_v29 }
 0x20d   : > { %v1500_v57 = vpop.eup %1499  ;;  %v977_v58 = vmul.f32 %v1498_v31, %v969_v54 }
 0x20e   : > { %v1502_v59 = vpop.eup %1501  ;;  %v994_v39 = vadd.f32 2.0, %v978_v56  ;;  %v972_v60 = vadd.f32 2.0, %v1500_v57 }
 0x20f   : > { %v1504_v36 = vpop.eup %1503  ;;  %v993_v61 = vadd.f32 2.0, %v977_v58  ;;  %v971_v62 = vadd.f32 2.0, %v1502_v59 }
 0x210   : > { %v1506_v47 = vpop.eup %1505  ;;  %1511 = vrcp.f32 %v994_v39  ;;  %v980_v63 = vmul.f32 %v1500_v57, %v972_v60  ;;  %v974_v44 = vadd.f32 2.0, %v1504_v36 }
 0x211   : > { %1513 = vrcp.f32 %v993_v61  ;;  %v979_v0 = vmul.f32 %v1502_v59, %v971_v62  ;;  %v973_v1 = vadd.f32 2.0, %v1506_v47 }
 0x212   : > { %v996_v26 = vadd.f32 2.0, %v980_v63  ;;  %v982_v2 = vmul.f32 %v1504_v36, %v974_v44 }
 0x213   : > { %v1508_v55 = vpop.eup %1507  ;;  %v995_v3 = vadd.f32 2.0, %v979_v0  ;;  %v981_v52 = vmul.f32 %v1506_v47, %v973_v1 }
 0x214   : > { %v1510_v4 = vpop.eup %1509  ;;  %1515 = vrcp.f32 %v996_v26  ;;  %v998_v5 = vadd.f32 2.0, %v982_v2  ;;  %v976_v6 = vadd.f32 2.0, %v1508_v55 }
 0x215   : > { %1517 = vrcp.f32 %v995_v3  ;;  %v997_v7 = vadd.f32 2.0, %v981_v52  ;;  %v975_v8 = vadd.f32 2.0, %v1510_v4 }
 0x216   : > { %1519 = vrcp.f32 %v998_v5  ;;  %v984_v9 = vmul.f32 %v1508_v55, %v976_v6 }
 0x217   : > { %1521 = vrcp.f32 %v997_v7  ;;  %v983_v10 = vmul.f32 %v1510_v4, %v975_v8 }
 0x218   : > { %v1000_v11 = vadd.f32 2.0, %v984_v9 }
 0x219   : > { %v999_v12 = vadd.f32 2.0, %v983_v10 }
 0x21a   : > { %v1512_v15 = vpop.eup %1511  ;;  %1523 = vrcp.f32 %v1000_v11 }
 0x21b   : > { %v1514_v16 = vpop.eup %1513  ;;  %v1004_v17 = vmul.f32 %v1512_v15, %v978_v56  ;;  %1525 = vrcp.f32 %v999_v12 }
 0x21c   : > { %v1002_v18 = vmul.f32 %v1514_v16, %v977_v58 }
 0x21d   : > { %v1018_v19 = vmul.f32 %v1004_v17, %v1729_v13 }
 0x21e   : > { %v1516_v20 = vpop.eup %1515  ;;  %v1017_v21 = vmul.f32 %v1002_v18, %v1731_v14 }
 0x21f   : > { %v1518_v23 = vpop.eup %1517  ;;  %v1760_v25 = vsel %vm986_vm9, %v1729_v13, %v1018_v19  ;;  %v1008_v27 = vmul.f32 %v1516_v20, %v980_v63  ;;  %vm1183_vm9 = vcmask 130048  }
 0x220   : > { %v1520_v30 = vpop.eup %1519  ;;  %v1765_v32 = vsel %vm985_vm11, %v1731_v14, %v1017_v21  ;;  %v1006_v34 = vmul.f32 %v1518_v23, %v979_v0  ;;  %v1098_v35 = vrot.slane %v1760_v25, 2  ;;  %v1115_v37 = vrot.slane %v1760_v25, 3 }
 0x221   : > { %v1522_v13 = vpop.eup %1521  ;;  %v1020_v38 = vmul.f32 %v1008_v27, %v1735_v22  ;;  %v1012_v40 = vmul.f32 %v1520_v30, %v982_v2  ;;  %v1097_v41 = vrot.slane %v1765_v32, 3  ;;  %v1063_v43 = vrot.slane %v1765_v32, 1 }
 0x222   : > { %v1019_v45 = vmul.f32 %v1006_v34, %v1737_v24  ;;  %v1010_v48 = vmul.f32 %v1522_v13, %v981_v52  ;;  %v1114_v14 = vrot.slane %v1765_v32, 4  ;;  %v1081_v19 = vrot.slane %v1760_v25, 1 }
 0x223   : > { %v1779_v49 = vsel %vm988_vm12, %v1735_v22, %v1020_v38  ;;  %v1022_v50 = vmul.f32 %v1012_v40, %v1740_v28  ;;  %v1099_v51 = vsel %vm1042_vm10, %v1098_v35, %v1097_v41  ;;  %v1064_v53 = vsel %vm1042_vm10, %v1760_v25, %v1063_v43 }
 0x224   : > { %v1524_v31 = vpop.eup %1523  ;;  %v1788_v29 = vsel %vm987_vm13, %v1737_v24, %v1019_v45  ;;  %v1021_v54 = vmul.f32 %v1010_v48, %v1743_v33  ;;  %v1116_v56 = vsel %vm1042_vm10, %v1115_v37, %v1114_v14  ;;  %v1080_v22 = vrot.slane %v1765_v32, 2 }
 0x225   : > { %v1526_v57 = vpop.eup %1525  ;;  %v1796_v58 = vsel %vm990_vm1, %v1740_v28, %v1022_v50  ;;  %v1016_v59 = vmul.f32 %v1524_v31, %v984_v9  ;;  %v1100_v39 = vrot.slane %v1788_v29, 1  ;;  %v1065_v24 = vrot.slane %v1788_v29, 7 }
 0x226   : > { %v1803_v60 = vsel %vm989_vm2, %v1743_v33, %v1021_v54  ;;  %v1014_v36 = vmul.f32 %v1526_v57, %v983_v10  ;;  %v1105_v61 = vrot.slane %v1796_v58, 6  ;;  %v1067_v62 = vrot.slane %v1779_v49, 6 }
 0x227   : > { %v1024_v47 = vmul.f32 %v1016_v59, %v1747_v42  ;;  %v1101_v28 = vsel %vm1045_vm14, %v1100_v39, %v1099_v51  ;;  %v1103_v63 = vrot.slane %v1803_v60, 7  ;;  %v1066_v44 = vsel %vm1045_vm14, %v1065_v24, %v1064_v53 }
 0x228   : > { %v1023_v0 = vmul.f32 %v1014_v36, %v1749_v46  ;;  %v1102_v1 = vsel %vm1048_vm3, %v1779_v49, %v1101_v28  ;;  %v1068_v33 = vsel %vm1048_vm3, %v1067_v62, %v1066_v44  ;;  %v1069_v26 = vrot.slane %v1803_v60, 5 }
 0x229   : > { %v1819_v2 = vsel %vm992_vm5, %v1747_v42, %v1024_v47  ;;  %v1104_v55 = vsel %vm1051_vm15, %v1103_v63, %v1102_v1  ;;  %v1071_v3 = vrot.slane %v1796_v58, 4  ;;  %v1117_v52 = vrot.slane %v1788_v29, 2 }
 0x22a   : > { %v1827_v4 = vsel %vm991_vm6, %v1749_v46, %v1023_v0  ;;  %v1106_v5 = vsel %vm1054_vm4, %v1105_v61, %v1104_v55  ;;  %v1070_v6 = vsel %vm1051_vm15, %v1069_v26, %v1068_v33  ;;  %v1119_v7 = vrot.slane %v1779_v49, 1 }
 0x22b   : > { %v1107_v42 = vrot.slane %v1827_v4, 5  ;;  %v1109_v8 = vrot.slane %v1819_v2, 4  ;;  %v1072_v9 = vsel %vm1054_vm4, %v1071_v3, %v1070_v6  ;;  %v1073_v10 = vrot.slane %v1827_v4, 3 }
 0x22c   : > { %v1075_v11 = vrot.slane %v1819_v2, 2  ;;  %v1118_v12 = vsel %vm1045_vm14, %v1117_v52, %v1116_v56  ;;  %v1122_v46 = vrot.slane %v1796_v58, 7  ;;  %v1124_v15 = vrot.slane %v1827_v4, 6 }
 0x22d   : > { %v1108_v16 = vsel %vm1057_vm7, %v1107_v42, %v1106_v5  ;;  %v1074_v17 = vsel %vm1057_vm7, %v1073_v10, %v1072_v9  ;;  %v1120_v18 = vsel %vm1048_vm3, %v1119_v7, %v1118_v12  ;;  %v1084_v27 = vrot.slane %v1779_v49, 7 }
 0x22e   : > { %v1110_v20 = vsel %vm1060_vm8, %v1109_v8, %v1108_v16  ;;  %v1076_v21 = vsel %vm1060_vm8, %v1075_v11, %v1074_v17  ;;  %v1121_v23 = vsel %vm1051_vm15, %v1803_v60, %v1120_v18  ;;  %v1126_v34 = vrot.slane %v1819_v2, 5 }
 0x22f   : > { %1111 = vrot.lane.b32.xlu1 %v1110_v20, %s1551_s11  ;;  %1077 = vrot.lane.b32.xlu0 %v1076_v21, %s1552_s12  ;;  %v1123_v30 = vsel %vm1054_vm4, %v1122_v46, %v1121_v23  ;;  %v1082_v35 = vsel %vm1042_vm10, %v1081_v19, %v1080_v22  ;;  %v1086_v37 = vrot.slane %v1803_v60, 6  ;;  %v1088_v40 = vrot.slane %v1796_v58, 5 }
 0x230   : > { %v1125_v13 = vsel %vm1057_vm7, %v1124_v15, %v1123_v30  ;;  %v1083_v38 = vsel %vm1045_vm14, %v1788_v29, %v1082_v35  ;;  %v1090_v41 = vrot.slane %v1827_v4, 4  ;;  %v1148_v48 = vrot.slane %v1765_v32, 6 }
 0x231   : > { %v1127_v43 = vsel %vm1060_vm8, %v1126_v34, %v1125_v13  ;;  %v1085_v45 = vsel %vm1048_vm3, %v1084_v27, %v1083_v38  ;;  %v1149_v14 = vrot.slane %v1760_v25, 5  ;;  %v1092_v51 = vrot.slane %v1819_v2, 3 }
 0x232   : > { %v1087_v50 = vsel %vm1051_vm15, %v1086_v37, %v1085_v45  ;;  %v1151_v53 = vrot.slane %v1788_v29, 4  ;;  %v1155_v31 = vrot.slane %v1803_v60, 2  ;;  %v1153_v22 = vrot.slane %v1779_v49, 3 }
 0x233   : > { %1128 = vrot.lane.b32.xlu1 %v1127_v43, %s1553_s13  ;;  %v1089_v54 = vsel %vm1054_vm4, %v1088_v40, %v1087_v50  ;;  %v1150_v56 = vsel %vm1042_vm10, %v1149_v14, %v1148_v48  ;;  %v1157_v57 = vrot.slane %v1796_v58, 1  ;;  %v1131_v24 = vrot.slane %v1765_v32, 5 }
 0x234   : > { %v1091_v59 = vsel %vm1057_vm7, %v1090_v41, %v1089_v54  ;;  %v1152_v39 = vsel %vm1045_vm14, %v1151_v53, %v1150_v56  ;;  %v1132_v36 = vrot.slane %v1760_v25, 4  ;;  %v1160_v47 = vrot.slane %v1819_v2, 7 }
 0x235   : > { %v1093_v61 = vsel %vm1060_vm8, %v1092_v51, %v1091_v59  ;;  %v1154_v62 = vsel %vm1048_vm3, %v1153_v22, %v1152_v39  ;;  %v1134_v28 = vrot.slane %v1788_v29, 3  ;;  %v1136_v0 = vrot.slane %v1779_v49, 2 }
 0x236   : > { %1094 = vrot.lane.b32.xlu0 %v1093_v61, %s1554_s14  ;;  %v1156_v63 = vsel %vm1051_vm15, %v1155_v31, %v1154_v62  ;;  %v1133_v44 = vsel %vm1042_vm10, %v1132_v36, %v1131_v24  ;;  %v1138_v1 = vrot.slane %v1803_v60, 1  ;;  %v1141_v55 = vrot.slane %v1827_v4, 7 }
 0x237   : > { %v1158_v33 = vsel %vm1054_vm4, %v1157_v57, %v1156_v63  ;;  %v1135_v26 = vsel %vm1045_vm14, %v1134_v28, %v1133_v44  ;;  %v1165_v3 = vrot.slane %v1765_v32, 7  ;;  %v1166_v6 = vrot.slane %v1760_v25, 6 }
 0x238   : > { %v1159_v52 = vsel %vm1057_vm7, %v1827_v4, %v1158_v33  ;;  %v1137_v5 = vsel %vm1048_vm3, %v1136_v0, %v1135_v26  ;;  %v1168_v7 = vrot.slane %v1788_v29, 5  ;;  %v1143_v9 = vrot.slane %v1819_v2, 6 }
 0x239   : > { %v1161_v42 = vsel %vm1060_vm8, %v1160_v47, %v1159_v52  ;;  %v1139_v8 = vsel %vm1051_vm15, %v1138_v1, %v1137_v5  ;;  %v1172_v10 = vrot.slane %v1803_v60, 3  ;;  %v1167_v12 = vsel %vm1042_vm10, %v1166_v6, %v1165_v3 }
 0x23a   : > { %1162 = vrot.lane.b32.xlu1 %v1161_v42, %s1555_s15  ;;  %v1140_v11 = vsel %vm1054_vm4, %v1796_v58, %v1139_v8  ;;  %v1170_v46 = vrot.slane %v1779_v49, 4  ;;  %v1176_v15 = vrot.slane %v1827_v4, 1  ;;  %v1169_v17 = vsel %vm1045_vm14, %v1168_v7, %v1167_v12 }
 0x23b   : > { %v1142_v16 = vsel %vm1057_vm7, %v1141_v55, %v1140_v11  ;;  %v1041_v18 = vrot.slane %v1760_v25, 7  ;;  %v1044_v19 = vrot.slane %v1788_v29, 6  ;;  %v1174_v23 = vrot.slane %v1796_v58, 2 }
 0x23c   : > { %v1144_v20 = vsel %vm1060_vm8, %v1143_v9, %v1142_v16  ;;  %v1171_v21 = vsel %vm1048_vm3, %v1170_v46, %v1169_v17  ;;  %v1050_v30 = vrot.slane %v1803_v60, 4  ;;  %v1047_v35 = vrot.slane %v1779_v49, 5 }
 0x23d   : > { %1145 = vrot.lane.b32.xlu0 %v1144_v20, %s1556_s16  ;;  %v1173_v27 = vsel %vm1051_vm15, %v1172_v10, %v1171_v21  ;;  %v1043_v25 = vsel %vm1042_vm10, %v1041_v18, %v1765_v32  ;;  %v1056_v37 = vrot.slane %v1827_v4, 2  ;;  %v1053_v40 = vrot.slane %v1796_v58, 3 }
 0x23e   : > { %v1175_v34 = vsel %vm1054_vm4, %v1174_v23, %v1173_v27  ;;  %v1046_v13 = vsel %vm1045_vm14, %v1044_v19, %v1043_v25  ;;  %v1059_v41 = vrot.slane %v1819_v2, 1  ;;  %vm1185_vm10 = vcmask 195584  }
 0x23f   : > { %v1177_v29 = vsel %vm1057_vm7, %v1176_v15, %v1175_v34  ;;  %v1049_v60 = vsel %vm1048_vm3, %v1047_v35, %v1046_v13  ;;  %vm1187_vm11 = vcmask 261120   ;;  %vm1189_vm12 = vcmask 326656  }
 0x240   : > { %v1178_v38 = vsel %vm1060_vm8, %v1819_v2, %v1177_v29  ;;  %v1052_v49 = vsel %vm1051_vm15, %v1050_v30, %v1049_v60  ;;  %vm1191_vm13 = vcmask 392192   ;;  %vm1193_vm14 = vcmask 457728  }
 0x241   : > { %1179 = vrot.lane.b32.xlu0 %v1178_v38, %s1557_s17  ;;  %v1055_v32 = vsel %vm1054_vm4, %v1053_v40, %v1052_v49  ;;  %vm1195_vm15 = vcmask 523264  }
 0x242   : > { %v1058_v4 = vsel %vm1057_vm7, %v1056_v37, %v1055_v32 }
 0x243   : > { %v1061_v43 = vsel %vm1060_vm8, %v1059_v41, %v1058_v4 }
 0x2a1   : > { %v1078_v45 = vpop.permute.xlu0 %1077  ;;  %v1112_v48 = vpop.permute.xlu1 %1111 }
 0x2a2   : > { %v1182_v58 = vsel %vm452_vm0, %v1061_v43, %v1078_v45 }
 0x2a5   : > { %v1129_v51 = vpop.permute.xlu1 %1128 }
 0x2a8   : > { %v1095_v14 = vpop.permute.xlu0 %1094 }
 0x2a9   : > { %v1184_v50 = vsel %vm1183_vm9, %v1182_v58, %v1095_v14 }
 0x2aa   : > { %v1186_v53 = vsel %vm1185_vm10, %v1184_v50, %v1112_v48 }
 0x2ab   : > { %v1188_v2 = vsel %vm1187_vm11, %v1186_v53, %v1129_v51 }
 0x2ac   : > { %v1163_v54 = vpop.permute.xlu1 %1162 }
 0x2af   : > { %v1146_v31 = vpop.permute.xlu0 %1145 }
 0x2b0   : > { %v1190_v56 = vsel %vm1189_vm12, %v1188_v2, %v1146_v31 }
 0x2b1   : > { %v1192_v57 = vsel %vm1191_vm13, %v1190_v56, %v1163_v54 }
 0x2b3   : > { %v1180_v22 = vpop.permute.xlu0 %1179 }
 0x2b4   : > { %v1194_v59 = vsel %vm1193_vm14, %v1192_v57, %v1180_v22 }
 0x2b5   : > { %1196 = vst.msk [vmem:[%s411_s21] sm:$0xff] %vm1195_vm15, %v1194_v59 }
 0x2b6 PF: > { %s18_s29 = sadd.s32 1, %s1549_s29   ;;  %s1948_s27 = smov %s1545_s28 }
 0x2b7   : > { %p15_p5 = scmp.ge.s32.totalorder %s18_s29, 4   ;;  %s1949_s28 = smov %s1951_s30 }
 0x2b9   :  { %17 = sbr.rel (!%p15_p5) target bundleno = 2 (0x2), region = 88 }

</bundles_post_ra>
